<compile_context>
chip_gen: v7x
topology: tpu7x:2x2x1
jax: 0.10.0
libtpu: 0.0.40
codegen_flags: <defaults>
</compile_context>

<pallas_src>
import functools

import jax
import jax.numpy as jnp
from jax.experimental import pallas as pl
from jax.experimental.pallas import tpu as pltpu

IN_FEATURES = 196608   # from Linear(196608, 10)
OUT_FEATURES = 10
KFOLD = 4              # fold factor: (10, K) -> (40, K/4), 8-sublane aligned, zero pad waste


def _linear_kernel(x_ref, w_ref, o_ref, acc_ref):
    """Partial folded matmul over one K-half, reduced along grid axis 1.

    x_ref:   (KFOLD*B, TK)          K-slice of folded input  (contraction on lanes)
    w_ref:   (KFOLD*N, TK)          K-slice of folded weight (contraction on lanes)
    o_ref:   (1, KFOLD*B, KFOLD*N)  partial cross-product output for this K-half
    acc_ref: (KFOLD*B, KFOLD*N)     f32 VMEM accumulator
    """
    k = pl.program_id(1)

    @pl.when(k == 0)
    def _():
        acc_ref[...] = jnp.zeros_like(acc_ref)

    # Contraction on the lane axis of both operands (same pattern as x @ W.T).
    acc_ref[...] += jnp.einsum(
        "bk,nk->bn", x_ref[...], w_ref[...],
        preferred_element_type=jnp.float32,
    )

    @pl.when(k == pl.num_programs(1) - 1)
    def _():
        o_ref[...] = acc_ref[...][None].astype(o_ref.dtype)


@functools.partial(jax.jit, static_argnames=("tk",))
def damon_forward(x, w, b, *, tk=24576):
    """x: (B, 196608) f32, w: (10, 196608) f32 (PyTorch layout), b: (10,) f32."""
    B, K = x.shape
    N, Kw = w.shape
    assert K == Kw == IN_FEATURES and N == OUT_FEATURES
    assert K % KFOLD == 0

    kf = K // KFOLD                       # 49152 columns after folding
    # Row-major reshapes == bitcasts: no data movement, no padding rows.
    #   x4[KFOLD*b + j, :] = x[b, j*kf:(j+1)*kf]
    #   w4[KFOLD*n + j, :] = w[n, j*kf:(j+1)*kf]
    x4 = x.reshape(B * KFOLD, kf)
    w4 = w.reshape(N * KFOLD, kf)

    half = kf // 2                        # columns per K-half (megacore split)
    assert half % tk == 0 and tk % 128 == 0, "tk must divide K/(2*KFOLD) and be lane-aligned"
    k_blocks = half // tk                 # inner reduction steps per K-half

    Bp = B * KFOLD                        # 8  for batch=2
    Np = N * KFOLD                        # 40

    partials = pl.pallas_call(
        _linear_kernel,
        out_shape=jax.ShapeDtypeStruct((2, Bp, Np), jnp.float32),
        grid_spec=pltpu.PrefetchScalarGridSpec(
            num_scalar_prefetch=0,
            grid=(2, k_blocks),  # (K-half [parallel across TCs on v7x], K-blocks)
            in_specs=[
                # folded x K-slice: full (4B) row dim, tk lanes per step (lane-dense DMA)
                pl.BlockSpec((Bp, tk), lambda c, k: (0, c * k_blocks + k)),
                # folded weight K-slice: (40, tk) block, K on lanes (lane-dense DMA)
                pl.BlockSpec((Np, tk), lambda c, k: (0, c * k_blocks + k)),
            ],
            out_specs=pl.BlockSpec((1, Bp, Np), lambda c, k: (c, 0, 0)),
            scratch_shapes=[pltpu.VMEM((Bp, Np), jnp.float32)],
        ),
        compiler_params=pltpu.CompilerParams(
            # leading K-half split is independent (2 TCs on v7x); inner K is a reduction
            dimension_semantics=("parallel", "arbitrary"),
        ),
    )(x4, w4)

    # Tiny epilogue on a (4B, 40) array: combine the two K-half partials, take the
    # matching-fold diagonal sum (out[b, n] = sum_j cross[4b+j, 4n+j]), add bias.
    cross = partials[0] + partials[1]                    # (4B, 4N)
    cross = cross.reshape(B, KFOLD, N, KFOLD)            # [b, j, n, i]
    out = jnp.diagonal(cross, axis1=1, axis2=3).sum(-1)  # (B, N)
    return out + b


def init_params(key):
    """Deterministic init matching PyTorch Linear's shapes: W (10, 196608), b (10,)."""
    kw, kb = jax.random.split(key)
    bound = 1.0 / (IN_FEATURES ** 0.5)  # PyTorch default: U(-1/sqrt(K), 1/sqrt(K))
    w = jax.random.uniform(
        kw, (OUT_FEATURES, IN_FEATURES), jnp.float32, minval=-bound, maxval=bound
    )
    b = jax.random.uniform(
        kb, (OUT_FEATURES,), jnp.float32, minval=-bound, maxval=bound
    )
    return w, b


if __name__ == "__main__":
    key = jax.random.PRNGKey(0)
    k_x, k_p = jax.random.split(key)

    batch = 2  # small batch; feature dim is fixed at 196608 by the module
    x = jax.random.normal(k_x, (batch, IN_FEATURES), jnp.float32)
    w, b = init_params(k_p)

    out = damon_forward(x, w, b)
    out = jax.block_until_ready(out)

    # correctness check against plain-JAX reference of the PyTorch semantics
    ref = x @ w.T + b
    assert out.shape == (batch, OUT_FEATURES)
    assert jnp.allclose(out, ref, rtol=5e-4, atol=5e-4), float(jnp.max(jnp.abs(out - ref)))

    print("KERNEL_OK")
</pallas_src>

<mosaic_0001>
module attributes {stable_mosaic.version = 11 : i64} {
  func.func @_linear_kernel(%arg0: i32, %arg1: i32, %arg2: memref<8x24576xf32, #tpu.memory_space<vmem>>, %arg3: memref<40x24576xf32, #tpu.memory_space<vmem>>, %arg4: memref<1x8x40xf32, #tpu.memory_space<vmem>>, %arg5: memref<8x40xf32, #tpu.memory_space<vmem>>) attributes {dimension_semantics = [#tpu.dimension_semantics<parallel>, #tpu.dimension_semantics<arbitrary>], iteration_bounds = array<i64: 2, 1>, scalar_prefetch = 0 : i64, scratch_operands = 1 : i64, tpu.core_type = #tpu.core_type<tc>, window_params = [{transform_indices = @transform_0, window_bounds = array<i64: 8, 24576>}, {transform_indices = @transform_1, window_bounds = array<i64: 40, 24576>}, {transform_indices = @transform_2, window_bounds = array<i64: 1, 8, 40>}]} {
    %c0_i32 = arith.constant 0 : i32
    %0 = arith.cmpi eq, %arg1, %c0_i32 : i32
    %1 = arith.extui %0 : i1 to i32
    %c0_i32_0 = arith.constant 0 : i32
    %2 = arith.cmpi ne, %1, %c0_i32_0 : i32
    scf.if %2 {
      %cst_10 = arith.constant 0.000000e+00 : f32
      %12 = vector.broadcast %cst_10 : f32 to vector<8x40xf32>
      %c0_11 = arith.constant 0 : index
      %c0_12 = arith.constant 0 : index
      %13 = vector.load %arg5[%c0_11, %c0_12] : memref<8x40xf32, #tpu.memory_space<vmem>>, vector<8x40xf32>
      tpu.vector_store %arg5[%c0_11, %c0_12], %12 {strides = array<i32>} : memref<8x40xf32, #tpu.memory_space<vmem>>, vector<8x40xf32>,
    } else {
    }
    %c0 = arith.constant 0 : index
    %c0_1 = arith.constant 0 : index
    %3 = vector.load %arg5[%c0, %c0_1] : memref<8x40xf32, #tpu.memory_space<vmem>>, vector<8x40xf32>
    %c0_2 = arith.constant 0 : index
    %c0_3 = arith.constant 0 : index
    %4 = vector.load %arg2[%c0_2, %c0_3] : memref<8x24576xf32, #tpu.memory_space<vmem>>, vector<8x24576xf32>
    %c0_4 = arith.constant 0 : index
    %c0_5 = arith.constant 0 : index
    %5 = vector.load %arg3[%c0_4, %c0_5] : memref<40x24576xf32, #tpu.memory_space<vmem>>, vector<40x24576xf32>
    "tpu.trace_start"() <{level = 10 : i32, message = "bk,nk->bn"}> : () -> ()
    %cst = arith.constant dense<0.000000e+00> : vector<8x40xf32>
    %6 = tpu.matmul %4, %5, %cst {dimension_numbers = #tpu.dot_dimension_numbers<[1], [1], [0], [0], [0, 0, 1, 0], [], []>} : vector<8x24576xf32>, vector<40x24576xf32>, vector<8x40xf32> -> vector<8x40xf32>
    "tpu.trace_stop"() : () -> ()
    %7 = arith.addf %3, %6 : vector<8x40xf32>
    %c0_6 = arith.constant 0 : index
    %c0_7 = arith.constant 0 : index
    %8 = vector.load %arg5[%c0_6, %c0_7] : memref<8x40xf32, #tpu.memory_space<vmem>>, vector<8x40xf32>
    tpu.vector_store %arg5[%c0_6, %c0_7], %7 {strides = array<i32>} : memref<8x40xf32, #tpu.memory_space<vmem>>, vector<8x40xf32>,
    %c0_i32_8 = arith.constant 0 : i32
    %9 = arith.cmpi eq, %arg1, %c0_i32_8 : i32
    %10 = arith.extui %9 : i1 to i32
    %c0_i32_9 = arith.constant 0 : i32
    %11 = arith.cmpi ne, %10, %c0_i32_9 : i32
    scf.if %11 {
      %c0_10 = arith.constant 0 : index
      %c0_11 = arith.constant 0 : index
      %12 = vector.load %arg5[%c0_10, %c0_11] : memref<8x40xf32, #tpu.memory_space<vmem>>, vector<8x40xf32>
      %13 = vector.shape_cast %12 : vector<8x40xf32> to vector<1x8x40xf32>
      %c0_12 = arith.constant 0 : index
      %c0_13 = arith.constant 0 : index
      %c0_14 = arith.constant 0 : index
      %14 = vector.load %arg4[%c0_12, %c0_13, %c0_14] : memref<1x8x40xf32, #tpu.memory_space<vmem>>, vector<1x8x40xf32>
      tpu.vector_store %arg4[%c0_12, %c0_13, %c0_14], %13 {strides = array<i32>} : memref<1x8x40xf32, #tpu.memory_space<vmem>>, vector<1x8x40xf32>,
    } else {
    }
    return
  }
  func.func @transform_0(%arg0: i32, %arg1: i32) -> (i32, i32) {
    %c1_i32 = arith.constant 1 : i32
    %0 = arith.muli %arg0, %c1_i32 : i32
    %1 = arith.addi %0, %arg1 : i32
    %c0_i32 = arith.constant 0 : i32
    %c0_i32_0 = arith.constant 0 : i32
    return %c0_i32, %1 : i32, i32
  }
  func.func @transform_1(%arg0: i32, %arg1: i32) -> (i32, i32) {
    %c1_i32 = arith.constant 1 : i32
    %0 = arith.muli %arg0, %c1_i32 : i32
    %1 = arith.addi %0, %arg1 : i32
    %c0_i32 = arith.constant 0 : i32
    %c0_i32_0 = arith.constant 0 : i32
    return %c0_i32, %1 : i32, i32
  }
  func.func @transform_2(%arg0: i32, %arg1: i32) -> (i32, i32, i32) {
    %c0_i32 = arith.constant 0 : i32
    %c0_i32_0 = arith.constant 0 : i32
    %c0_i32_1 = arith.constant 0 : i32
    return %arg0, %c0_i32, %c0_i32_0 : i32, i32, i32
  }
}

</mosaic_0001>

<bundles_post_ra>
// kernel: damon_forward.1
= control target key start
LH: loop header
LB: loop body
LE: loop exit
PB: predicated region body
PF: predicated region fallthrough
CT: control target
= control target key end

     0   :  { %s10971_s9 = smov 0   ;;  %s10973_s10 = smov 0   ;;  %s14124_s0 = inlined_call_operand.vmem [shape: f32[8,49152], index: 0, kind: input, shape index: {}]   ;;  %s14125_s1 = inlined_call_operand.vmem [shape: f32[40,49152], index: 1, kind: input, shape index: {}]   ;;  %s14126_s2 = inlined_call_operand.vmem [shape: f32[2,8,40], index: 2, kind: output, shape index: {}]  }
   0x1   :  { %s10975_s11 = smov 0   ;;  %s10977_s12 = smov 0  }
   0x2   :  { %s10979_s13 = smov 0  }
   0x3 LB: > { %s24_s14 = sadd.s32 1, %s10949_s12  ;;  %p68_p1 = scmp.ne.s32.totalorder %s10941_s10, %s10937_s9  ;;  %s10953_s13 = sphi %s10979_s13, %s12_s13   ;;  %s10949_s12 = sphi %s10977_s12, %s14130_s12   ;;  %s10945_s11 = sphi %s10975_s11, %s14129_s11   ;;  %s10941_s10 = sphi %s10973_s10, %s14128_s10   ;;  %s10937_s9 = sphi %s10971_s9, %s14127_s9  }
   0x4   : > { %p26_p0 = scmp.ge.s32.totalorder %s24_s14, 2  ;;  %p69_p2 = scmp.eq.s32.totalorder %s10953_s13, 0 }
   0x5   : > { %s61_s16 = sadd.s32 1, %s10941_s10  ;;  %p10096_p5 = scmp.ge.s32.totalorder %s10953_s13, 2 }
   0x6   : > { %s14132_s14 = smov (%p26_p0, %s24_s14), 0  ;;  %p70_p3 = por %p69_p2, %p68_p1 }
   0x7   : > { %s58_s15 = ssub.s32 %s10949_s12, %s14132_s14  ;;  %120 = sbr.rel (%p10096_p5) target bundleno = 499 (0x1f3), region = 16 }
   0x8   : > { %p59_p4 = scmp.eq.s32.totalorder %s58_s15, 0 }
   0xa   : > { %s11006_s17 = scalar_select %p59_p4, %s10941_s10, %s61_s16  }
   0xe   : > { %134 = sbr.rel (!%p70_p3) target bundleno = 499 (0x1f3), region = 24  ;;  %s136_s18 = sand.u32 (%p70_p3), 1, %s10941_s10  }
   0xf   : > { %s10103_s19 = smul.u32 (%p70_p3), 1536, %s10949_s12 }
  0x10   : > { %s10872_s20 = smul.u32 (%p70_p3), 7680, %s136_s18 }
  0x11   : > { %s11014_s23 = scalar_lea.vmem (%p70_p3), %s14125_s1, %s10103_s19 }
  0x12   : > { %v155_v0 = vld [vmem:[%s11014_s23] sm:$0xff] (%p70_p3)  ;;  %v157_v1 = vld [vmem:[%s11014_s23 + $0x8] sm:$0xff] (%p70_p3)  ;;  %v159_v2 = vld [vmem:[%s11014_s23 + $0x10] sm:$0xff] (%p70_p3)  ;;  %s11019_s24 = scalar_lea.vmem (%p70_p3), [#allocation3], %s10872_s20 }
  0x13   : > { %156 = vst [vmem:[%s11019_s24] sm:$0xff] (%p70_p3), %v155_v0  ;;  %158 = vst [vmem:[%s11019_s24 + $0x8] sm:$0xff] (%p70_p3), %v157_v1  ;;  %v161_v3 = vld [vmem:[%s11014_s23 + $0x18] sm:$0xff] (%p70_p3)  ;;  %v163_v4 = vld [vmem:[%s11014_s23 + $0x20] sm:$0xff] (%p70_p3) }
  0x14   : > { %160 = vst [vmem:[%s11019_s24 + $0x10] sm:$0xff] (%p70_p3), %v159_v2  ;;  %v165_v5 = vld [vmem:[%s11014_s23 + $0x28] sm:$0xff] (%p70_p3)  ;;  %162 = vst [vmem:[%s11019_s24 + $0x18] sm:$0xff] (%p70_p3), %v161_v3  ;;  %v167_v6 = vld [vmem:[%s11014_s23 + $0x30] sm:$0xff] (%p70_p3) }
  0x15   : > { %164 = vst [vmem:[%s11019_s24 + $0x20] sm:$0xff] %v163_v4  ;;  %166 = vst [vmem:[%s11019_s24 + $0x28] sm:$0xff] %v165_v5  ;;  %v169_v7 = vld [vmem:[%s11014_s23 + $0x38] sm:$0xff]  ;;  %v171_v8 = vld [vmem:[%s11014_s23 + $0x40] sm:$0xff] }
  0x16   : > { %168 = vst [vmem:[%s11019_s24 + $0x30] sm:$0xff] %v167_v6  ;;  %170 = vst [vmem:[%s11019_s24 + $0x38] sm:$0xff] %v169_v7  ;;  %v173_v9 = vld [vmem:[%s11014_s23 + $0x48] sm:$0xff]  ;;  %v175_v10 = vld [vmem:[%s11014_s23 + $0x50] sm:$0xff] }
  0x17   : > { %172 = vst [vmem:[%s11019_s24 + $0x40] sm:$0xff] %v171_v8  ;;  %v177_v11 = vld [vmem:[%s11014_s23 + $0x58] sm:$0xff]  ;;  %174 = vst [vmem:[%s11019_s24 + $0x48] sm:$0xff] %v173_v9  ;;  %v179_v12 = vld [vmem:[%s11014_s23 + $0x60] sm:$0xff] }
  0x18   : > { %176 = vst [vmem:[%s11019_s24 + $0x50] sm:$0xff] %v175_v10  ;;  %178 = vst [vmem:[%s11019_s24 + $0x58] sm:$0xff] %v177_v11  ;;  %v181_v13 = vld [vmem:[%s11014_s23 + $0x68] sm:$0xff]  ;;  %v183_v14 = vld [vmem:[%s11014_s23 + $0x70] sm:$0xff] }
  0x19   : > { %180 = vst [vmem:[%s11019_s24 + $0x60] sm:$0xff] %v179_v12  ;;  %182 = vst [vmem:[%s11019_s24 + $0x68] sm:$0xff] %v181_v13  ;;  %v185_v15 = vld [vmem:[%s11014_s23 + $0x78] sm:$0xff]  ;;  %v187_v16 = vld [vmem:[%s11014_s23 + $0x80] sm:$0xff] }
  0x1a   : > { %184 = vst [vmem:[%s11019_s24 + $0x70] sm:$0xff] %v183_v14  ;;  %v189_v17 = vld [vmem:[%s11014_s23 + $0x88] sm:$0xff]  ;;  %186 = vst [vmem:[%s11019_s24 + $0x78] sm:$0xff] %v185_v15  ;;  %v191_v18 = vld [vmem:[%s11014_s23 + $0x90] sm:$0xff] }
  0x1b   : > { %188 = vst [vmem:[%s11019_s24 + $0x80] sm:$0xff] %v187_v16  ;;  %190 = vst [vmem:[%s11019_s24 + $0x88] sm:$0xff] %v189_v17  ;;  %v193_v19 = vld [vmem:[%s11014_s23 + $0x98] sm:$0xff]  ;;  %v195_v20 = vld [vmem:[%s11014_s23 + $0xa0] sm:$0xff] }
  0x1c   : > { %192 = vst [vmem:[%s11019_s24 + $0x90] sm:$0xff] %v191_v18  ;;  %194 = vst [vmem:[%s11019_s24 + $0x98] sm:$0xff] %v193_v19  ;;  %v197_v21 = vld [vmem:[%s11014_s23 + $0xa8] sm:$0xff]  ;;  %v199_v22 = vld [vmem:[%s11014_s23 + $0xb0] sm:$0xff] }
  0x1d   : > { %196 = vst [vmem:[%s11019_s24 + $0xa0] sm:$0xff] %v195_v20  ;;  %v201_v23 = vld [vmem:[%s11014_s23 + $0xb8] sm:$0xff]  ;;  %198 = vst [vmem:[%s11019_s24 + $0xa8] sm:$0xff] %v197_v21  ;;  %v203_v24 = vld [vmem:[%s11014_s23 + $0xc0] sm:$0xff] }
  0x1e   : > { %200 = vst [vmem:[%s11019_s24 + $0xb0] sm:$0xff] %v199_v22  ;;  %202 = vst [vmem:[%s11019_s24 + $0xb8] sm:$0xff] %v201_v23  ;;  %v205_v25 = vld [vmem:[%s11014_s23 + $0xc8] sm:$0xff]  ;;  %v207_v26 = vld [vmem:[%s11014_s23 + $0xd0] sm:$0xff] }
  0x1f   : > { %204 = vst [vmem:[%s11019_s24 + $0xc0] sm:$0xff] %v203_v24  ;;  %206 = vst [vmem:[%s11019_s24 + $0xc8] sm:$0xff] %v205_v25  ;;  %v209_v27 = vld [vmem:[%s11014_s23 + $0xd8] sm:$0xff]  ;;  %v211_v28 = vld [vmem:[%s11014_s23 + $0xe0] sm:$0xff] }
  0x20   : > { %208 = vst [vmem:[%s11019_s24 + $0xd0] sm:$0xff] %v207_v26  ;;  %v213_v29 = vld [vmem:[%s11014_s23 + $0xe8] sm:$0xff]  ;;  %210 = vst [vmem:[%s11019_s24 + $0xd8] sm:$0xff] %v209_v27  ;;  %v215_v30 = vld [vmem:[%s11014_s23 + $0xf0] sm:$0xff] }
  0x21   : > { %212 = vst [vmem:[%s11019_s24 + $0xe0] sm:$0xff] %v211_v28  ;;  %214 = vst [vmem:[%s11019_s24 + $0xe8] sm:$0xff] %v213_v29  ;;  %v217_v31 = vld [vmem:[%s11014_s23 + $0xf8] sm:$0xff]  ;;  %v219_v32 = vld [vmem:[%s11014_s23 + $0x100] sm:$0xff] }
  0x22   : > { %216 = vst [vmem:[%s11019_s24 + $0xf0] sm:$0xff] %v215_v30  ;;  %218 = vst [vmem:[%s11019_s24 + $0xf8] sm:$0xff] %v217_v31  ;;  %v221_v33 = vld [vmem:[%s11014_s23 + $0x108] sm:$0xff]  ;;  %v223_v34 = vld [vmem:[%s11014_s23 + $0x110] sm:$0xff] }
  0x23   : > { %220 = vst [vmem:[%s11019_s24 + $0x100] sm:$0xff] %v219_v32  ;;  %v225_v35 = vld [vmem:[%s11014_s23 + $0x118] sm:$0xff]  ;;  %222 = vst [vmem:[%s11019_s24 + $0x108] sm:$0xff] %v221_v33  ;;  %v227_v36 = vld [vmem:[%s11014_s23 + $0x120] sm:$0xff] }
  0x24   : > { %224 = vst [vmem:[%s11019_s24 + $0x110] sm:$0xff] %v223_v34  ;;  %226 = vst [vmem:[%s11019_s24 + $0x118] sm:$0xff] %v225_v35  ;;  %v229_v37 = vld [vmem:[%s11014_s23 + $0x128] sm:$0xff]  ;;  %v231_v38 = vld [vmem:[%s11014_s23 + $0x130] sm:$0xff] }
  0x25   : > { %228 = vst [vmem:[%s11019_s24 + $0x120] sm:$0xff] %v227_v36  ;;  %230 = vst [vmem:[%s11019_s24 + $0x128] sm:$0xff] %v229_v37  ;;  %v233_v39 = vld [vmem:[%s11014_s23 + $0x138] sm:$0xff]  ;;  %v235_v40 = vld [vmem:[%s11014_s23 + $0x140] sm:$0xff] }
  0x26   : > { %232 = vst [vmem:[%s11019_s24 + $0x130] sm:$0xff] %v231_v38  ;;  %v237_v41 = vld [vmem:[%s11014_s23 + $0x148] sm:$0xff]  ;;  %234 = vst [vmem:[%s11019_s24 + $0x138] sm:$0xff] %v233_v39  ;;  %v239_v42 = vld [vmem:[%s11014_s23 + $0x150] sm:$0xff] }
  0x27   : > { %236 = vst [vmem:[%s11019_s24 + $0x140] sm:$0xff] %v235_v40  ;;  %238 = vst [vmem:[%s11019_s24 + $0x148] sm:$0xff] %v237_v41  ;;  %v241_v43 = vld [vmem:[%s11014_s23 + $0x158] sm:$0xff]  ;;  %v243_v44 = vld [vmem:[%s11014_s23 + $0x160] sm:$0xff] }
  0x28   : > { %240 = vst [vmem:[%s11019_s24 + $0x150] sm:$0xff] %v239_v42  ;;  %242 = vst [vmem:[%s11019_s24 + $0x158] sm:$0xff] %v241_v43  ;;  %v245_v45 = vld [vmem:[%s11014_s23 + $0x168] sm:$0xff]  ;;  %v247_v46 = vld [vmem:[%s11014_s23 + $0x170] sm:$0xff] }
  0x29   : > { %244 = vst [vmem:[%s11019_s24 + $0x160] sm:$0xff] %v243_v44  ;;  %v249_v47 = vld [vmem:[%s11014_s23 + $0x178] sm:$0xff]  ;;  %246 = vst [vmem:[%s11019_s24 + $0x168] sm:$0xff] %v245_v45  ;;  %v251_v48 = vld [vmem:[%s11014_s23 + $0x180] sm:$0xff] }
  0x2a   : > { %248 = vst [vmem:[%s11019_s24 + $0x170] sm:$0xff] %v247_v46  ;;  %250 = vst [vmem:[%s11019_s24 + $0x178] sm:$0xff] %v249_v47  ;;  %v253_v49 = vld [vmem:[%s11014_s23 + $0x188] sm:$0xff]  ;;  %v255_v50 = vld [vmem:[%s11014_s23 + $0x190] sm:$0xff] }
  0x2b   : > { %252 = vst [vmem:[%s11019_s24 + $0x180] sm:$0xff] %v251_v48  ;;  %254 = vst [vmem:[%s11019_s24 + $0x188] sm:$0xff] %v253_v49  ;;  %v257_v51 = vld [vmem:[%s11014_s23 + $0x198] sm:$0xff]  ;;  %v259_v52 = vld [vmem:[%s11014_s23 + $0x1a0] sm:$0xff] }
  0x2c   : > { %256 = vst [vmem:[%s11019_s24 + $0x190] sm:$0xff] %v255_v50  ;;  %v261_v53 = vld [vmem:[%s11014_s23 + $0x1a8] sm:$0xff]  ;;  %258 = vst [vmem:[%s11019_s24 + $0x198] sm:$0xff] %v257_v51  ;;  %v263_v54 = vld [vmem:[%s11014_s23 + $0x1b0] sm:$0xff] }
  0x2d   : > { %260 = vst [vmem:[%s11019_s24 + $0x1a0] sm:$0xff] %v259_v52  ;;  %262 = vst [vmem:[%s11019_s24 + $0x1a8] sm:$0xff] %v261_v53  ;;  %v265_v55 = vld [vmem:[%s11014_s23 + $0x1b8] sm:$0xff]  ;;  %v267_v56 = vld [vmem:[%s11014_s23 + $0x1c0] sm:$0xff] }
  0x2e   : > { %264 = vst [vmem:[%s11019_s24 + $0x1b0] sm:$0xff] %v263_v54  ;;  %266 = vst [vmem:[%s11019_s24 + $0x1b8] sm:$0xff] %v265_v55  ;;  %v269_v57 = vld [vmem:[%s11014_s23 + $0x1c8] sm:$0xff]  ;;  %v271_v58 = vld [vmem:[%s11014_s23 + $0x1d0] sm:$0xff] }
  0x2f   : > { %268 = vst [vmem:[%s11019_s24 + $0x1c0] sm:$0xff] %v267_v56  ;;  %v273_v59 = vld [vmem:[%s11014_s23 + $0x1d8] sm:$0xff]  ;;  %270 = vst [vmem:[%s11019_s24 + $0x1c8] sm:$0xff] %v269_v57  ;;  %v275_v60 = vld [vmem:[%s11014_s23 + $0x1e0] sm:$0xff] }
  0x30   : > { %272 = vst [vmem:[%s11019_s24 + $0x1d0] sm:$0xff] %v271_v58  ;;  %274 = vst [vmem:[%s11019_s24 + $0x1d8] sm:$0xff] %v273_v59  ;;  %v277_v61 = vld [vmem:[%s11014_s23 + $0x1e8] sm:$0xff]  ;;  %v279_v62 = vld [vmem:[%s11014_s23 + $0x1f0] sm:$0xff] }
  0x31   : > { %276 = vst [vmem:[%s11019_s24 + $0x1e0] sm:$0xff] %v275_v60  ;;  %278 = vst [vmem:[%s11019_s24 + $0x1e8] sm:$0xff] %v277_v61  ;;  %v281_v63 = vld [vmem:[%s11014_s23 + $0x1f8] sm:$0xff]  ;;  %v283_v0 = vld [vmem:[%s11014_s23 + $0x200] sm:$0xff] }
  0x32   : > { %280 = vst [vmem:[%s11019_s24 + $0x1f0] sm:$0xff] %v279_v62  ;;  %v285_v1 = vld [vmem:[%s11014_s23 + $0x208] sm:$0xff]  ;;  %282 = vst [vmem:[%s11019_s24 + $0x1f8] sm:$0xff] %v281_v63  ;;  %v287_v2 = vld [vmem:[%s11014_s23 + $0x210] sm:$0xff] }
  0x33   : > { %284 = vst [vmem:[%s11019_s24 + $0x200] sm:$0xff] %v283_v0  ;;  %286 = vst [vmem:[%s11019_s24 + $0x208] sm:$0xff] %v285_v1  ;;  %v289_v3 = vld [vmem:[%s11014_s23 + $0x218] sm:$0xff]  ;;  %v291_v4 = vld [vmem:[%s11014_s23 + $0x220] sm:$0xff] }
  0x34   : > { %288 = vst [vmem:[%s11019_s24 + $0x210] sm:$0xff] %v287_v2  ;;  %290 = vst [vmem:[%s11019_s24 + $0x218] sm:$0xff] %v289_v3  ;;  %v293_v5 = vld [vmem:[%s11014_s23 + $0x228] sm:$0xff]  ;;  %v295_v6 = vld [vmem:[%s11014_s23 + $0x230] sm:$0xff] }
  0x35   : > { %292 = vst [vmem:[%s11019_s24 + $0x220] sm:$0xff] %v291_v4  ;;  %v297_v7 = vld [vmem:[%s11014_s23 + $0x238] sm:$0xff]  ;;  %294 = vst [vmem:[%s11019_s24 + $0x228] sm:$0xff] %v293_v5  ;;  %v299_v8 = vld [vmem:[%s11014_s23 + $0x240] sm:$0xff] }
  0x36   : > { %296 = vst [vmem:[%s11019_s24 + $0x230] sm:$0xff] %v295_v6  ;;  %298 = vst [vmem:[%s11019_s24 + $0x238] sm:$0xff] %v297_v7  ;;  %v301_v9 = vld [vmem:[%s11014_s23 + $0x248] sm:$0xff]  ;;  %v303_v10 = vld [vmem:[%s11014_s23 + $0x250] sm:$0xff] }
  0x37   : > { %300 = vst [vmem:[%s11019_s24 + $0x240] sm:$0xff] %v299_v8  ;;  %302 = vst [vmem:[%s11019_s24 + $0x248] sm:$0xff] %v301_v9  ;;  %v305_v11 = vld [vmem:[%s11014_s23 + $0x258] sm:$0xff]  ;;  %v307_v12 = vld [vmem:[%s11014_s23 + $0x260] sm:$0xff] }
  0x38   : > { %304 = vst [vmem:[%s11019_s24 + $0x250] sm:$0xff] %v303_v10  ;;  %v309_v13 = vld [vmem:[%s11014_s23 + $0x268] sm:$0xff]  ;;  %306 = vst [vmem:[%s11019_s24 + $0x258] sm:$0xff] %v305_v11  ;;  %v311_v14 = vld [vmem:[%s11014_s23 + $0x270] sm:$0xff] }
  0x39   : > { %308 = vst [vmem:[%s11019_s24 + $0x260] sm:$0xff] %v307_v12  ;;  %310 = vst [vmem:[%s11019_s24 + $0x268] sm:$0xff] %v309_v13  ;;  %v313_v15 = vld [vmem:[%s11014_s23 + $0x278] sm:$0xff]  ;;  %v315_v16 = vld [vmem:[%s11014_s23 + $0x280] sm:$0xff] }
  0x3a   : > { %312 = vst [vmem:[%s11019_s24 + $0x270] sm:$0xff] %v311_v14  ;;  %314 = vst [vmem:[%s11019_s24 + $0x278] sm:$0xff] %v313_v15  ;;  %v317_v17 = vld [vmem:[%s11014_s23 + $0x288] sm:$0xff]  ;;  %v319_v18 = vld [vmem:[%s11014_s23 + $0x290] sm:$0xff] }
  0x3b   : > { %316 = vst [vmem:[%s11019_s24 + $0x280] sm:$0xff] %v315_v16  ;;  %v321_v19 = vld [vmem:[%s11014_s23 + $0x298] sm:$0xff]  ;;  %318 = vst [vmem:[%s11019_s24 + $0x288] sm:$0xff] %v317_v17  ;;  %v323_v20 = vld [vmem:[%s11014_s23 + $0x2a0] sm:$0xff] }
  0x3c   : > { %320 = vst [vmem:[%s11019_s24 + $0x290] sm:$0xff] %v319_v18  ;;  %322 = vst [vmem:[%s11019_s24 + $0x298] sm:$0xff] %v321_v19  ;;  %v325_v21 = vld [vmem:[%s11014_s23 + $0x2a8] sm:$0xff]  ;;  %v327_v22 = vld [vmem:[%s11014_s23 + $0x2b0] sm:$0xff] }
  0x3d   : > { %324 = vst [vmem:[%s11019_s24 + $0x2a0] sm:$0xff] %v323_v20  ;;  %326 = vst [vmem:[%s11019_s24 + $0x2a8] sm:$0xff] %v325_v21  ;;  %v329_v23 = vld [vmem:[%s11014_s23 + $0x2b8] sm:$0xff]  ;;  %v331_v24 = vld [vmem:[%s11014_s23 + $0x2c0] sm:$0xff] }
  0x3e   : > { %328 = vst [vmem:[%s11019_s24 + $0x2b0] sm:$0xff] %v327_v22  ;;  %v333_v25 = vld [vmem:[%s11014_s23 + $0x2c8] sm:$0xff]  ;;  %330 = vst [vmem:[%s11019_s24 + $0x2b8] sm:$0xff] %v329_v23  ;;  %v335_v26 = vld [vmem:[%s11014_s23 + $0x2d0] sm:$0xff] }
  0x3f   : > { %332 = vst [vmem:[%s11019_s24 + $0x2c0] sm:$0xff] %v331_v24  ;;  %334 = vst [vmem:[%s11019_s24 + $0x2c8] sm:$0xff] %v333_v25  ;;  %v337_v27 = vld [vmem:[%s11014_s23 + $0x2d8] sm:$0xff]  ;;  %v339_v28 = vld [vmem:[%s11014_s23 + $0x2e0] sm:$0xff] }
  0x40   : > { %336 = vst [vmem:[%s11019_s24 + $0x2d0] sm:$0xff] %v335_v26  ;;  %338 = vst [vmem:[%s11019_s24 + $0x2d8] sm:$0xff] %v337_v27  ;;  %v341_v29 = vld [vmem:[%s11014_s23 + $0x2e8] sm:$0xff]  ;;  %v343_v30 = vld [vmem:[%s11014_s23 + $0x2f0] sm:$0xff] }
  0x41   : > { %340 = vst [vmem:[%s11019_s24 + $0x2e0] sm:$0xff] %v339_v28  ;;  %v345_v31 = vld [vmem:[%s11014_s23 + $0x2f8] sm:$0xff]  ;;  %342 = vst [vmem:[%s11019_s24 + $0x2e8] sm:$0xff] %v341_v29  ;;  %v347_v32 = vld [vmem:[%s11014_s23 + $0x300] sm:$0xff] }
  0x42   : > { %344 = vst [vmem:[%s11019_s24 + $0x2f0] sm:$0xff] %v343_v30  ;;  %346 = vst [vmem:[%s11019_s24 + $0x2f8] sm:$0xff] %v345_v31  ;;  %v349_v33 = vld [vmem:[%s11014_s23 + $0x308] sm:$0xff]  ;;  %v351_v34 = vld [vmem:[%s11014_s23 + $0x310] sm:$0xff] }
  0x43   : > { %348 = vst [vmem:[%s11019_s24 + $0x300] sm:$0xff] %v347_v32  ;;  %350 = vst [vmem:[%s11019_s24 + $0x308] sm:$0xff] %v349_v33  ;;  %v353_v35 = vld [vmem:[%s11014_s23 + $0x318] sm:$0xff]  ;;  %v355_v36 = vld [vmem:[%s11014_s23 + $0x320] sm:$0xff] }
  0x44   : > { %352 = vst [vmem:[%s11019_s24 + $0x310] sm:$0xff] %v351_v34  ;;  %v357_v37 = vld [vmem:[%s11014_s23 + $0x328] sm:$0xff]  ;;  %354 = vst [vmem:[%s11019_s24 + $0x318] sm:$0xff] %v353_v35  ;;  %v359_v38 = vld [vmem:[%s11014_s23 + $0x330] sm:$0xff] }
  0x45   : > { %356 = vst [vmem:[%s11019_s24 + $0x320] sm:$0xff] %v355_v36  ;;  %358 = vst [vmem:[%s11019_s24 + $0x328] sm:$0xff] %v357_v37  ;;  %v361_v39 = vld [vmem:[%s11014_s23 + $0x338] sm:$0xff]  ;;  %v363_v40 = vld [vmem:[%s11014_s23 + $0x340] sm:$0xff] }
  0x46   : > { %360 = vst [vmem:[%s11019_s24 + $0x330] sm:$0xff] %v359_v38  ;;  %362 = vst [vmem:[%s11019_s24 + $0x338] sm:$0xff] %v361_v39  ;;  %v365_v41 = vld [vmem:[%s11014_s23 + $0x348] sm:$0xff]  ;;  %v367_v42 = vld [vmem:[%s11014_s23 + $0x350] sm:$0xff] }
  0x47   : > { %364 = vst [vmem:[%s11019_s24 + $0x340] sm:$0xff] %v363_v40  ;;  %v369_v43 = vld [vmem:[%s11014_s23 + $0x358] sm:$0xff]  ;;  %366 = vst [vmem:[%s11019_s24 + $0x348] sm:$0xff] %v365_v41  ;;  %v371_v44 = vld [vmem:[%s11014_s23 + $0x360] sm:$0xff] }
  0x48   : > { %368 = vst [vmem:[%s11019_s24 + $0x350] sm:$0xff] %v367_v42  ;;  %370 = vst [vmem:[%s11019_s24 + $0x358] sm:$0xff] %v369_v43  ;;  %v373_v45 = vld [vmem:[%s11014_s23 + $0x368] sm:$0xff]  ;;  %v375_v46 = vld [vmem:[%s11014_s23 + $0x370] sm:$0xff] }
  0x49   : > { %372 = vst [vmem:[%s11019_s24 + $0x360] sm:$0xff] %v371_v44  ;;  %374 = vst [vmem:[%s11019_s24 + $0x368] sm:$0xff] %v373_v45  ;;  %v377_v47 = vld [vmem:[%s11014_s23 + $0x378] sm:$0xff]  ;;  %v379_v48 = vld [vmem:[%s11014_s23 + $0x380] sm:$0xff] }
  0x4a   : > { %376 = vst [vmem:[%s11019_s24 + $0x370] sm:$0xff] %v375_v46  ;;  %v381_v49 = vld [vmem:[%s11014_s23 + $0x388] sm:$0xff]  ;;  %378 = vst [vmem:[%s11019_s24 + $0x378] sm:$0xff] %v377_v47  ;;  %v383_v50 = vld [vmem:[%s11014_s23 + $0x390] sm:$0xff] }
  0x4b   : > { %380 = vst [vmem:[%s11019_s24 + $0x380] sm:$0xff] %v379_v48  ;;  %382 = vst [vmem:[%s11019_s24 + $0x388] sm:$0xff] %v381_v49  ;;  %v385_v51 = vld [vmem:[%s11014_s23 + $0x398] sm:$0xff]  ;;  %v387_v52 = vld [vmem:[%s11014_s23 + $0x3a0] sm:$0xff] }
  0x4c   : > { %384 = vst [vmem:[%s11019_s24 + $0x390] sm:$0xff] %v383_v50  ;;  %386 = vst [vmem:[%s11019_s24 + $0x398] sm:$0xff] %v385_v51  ;;  %v389_v53 = vld [vmem:[%s11014_s23 + $0x3a8] sm:$0xff]  ;;  %v391_v54 = vld [vmem:[%s11014_s23 + $0x3b0] sm:$0xff] }
  0x4d   : > { %388 = vst [vmem:[%s11019_s24 + $0x3a0] sm:$0xff] %v387_v52  ;;  %v393_v55 = vld [vmem:[%s11014_s23 + $0x3b8] sm:$0xff]  ;;  %390 = vst [vmem:[%s11019_s24 + $0x3a8] sm:$0xff] %v389_v53  ;;  %v395_v56 = vld [vmem:[%s11014_s23 + $0x3c0] sm:$0xff] }
  0x4e   : > { %392 = vst [vmem:[%s11019_s24 + $0x3b0] sm:$0xff] %v391_v54  ;;  %394 = vst [vmem:[%s11019_s24 + $0x3b8] sm:$0xff] %v393_v55  ;;  %v397_v57 = vld [vmem:[%s11014_s23 + $0x3c8] sm:$0xff]  ;;  %v399_v58 = vld [vmem:[%s11014_s23 + $0x3d0] sm:$0xff] }
  0x4f   : > { %396 = vst [vmem:[%s11019_s24 + $0x3c0] sm:$0xff] %v395_v56  ;;  %398 = vst [vmem:[%s11019_s24 + $0x3c8] sm:$0xff] %v397_v57  ;;  %v401_v59 = vld [vmem:[%s11014_s23 + $0x3d8] sm:$0xff]  ;;  %v403_v60 = vld [vmem:[%s11014_s23 + $0x3e0] sm:$0xff] }
  0x50   : > { %400 = vst [vmem:[%s11019_s24 + $0x3d0] sm:$0xff] %v399_v58  ;;  %v405_v61 = vld [vmem:[%s11014_s23 + $0x3e8] sm:$0xff]  ;;  %402 = vst [vmem:[%s11019_s24 + $0x3d8] sm:$0xff] %v401_v59  ;;  %v407_v62 = vld [vmem:[%s11014_s23 + $0x3f0] sm:$0xff] }
  0x51   : > { %404 = vst [vmem:[%s11019_s24 + $0x3e0] sm:$0xff] %v403_v60  ;;  %406 = vst [vmem:[%s11019_s24 + $0x3e8] sm:$0xff] %v405_v61  ;;  %v409_v63 = vld [vmem:[%s11014_s23 + $0x3f8] sm:$0xff]  ;;  %v411_v0 = vld [vmem:[%s11014_s23 + $0x400] sm:$0xff] }
  0x52   : > { %408 = vst [vmem:[%s11019_s24 + $0x3f0] sm:$0xff] %v407_v62  ;;  %410 = vst [vmem:[%s11019_s24 + $0x3f8] sm:$0xff] %v409_v63  ;;  %v413_v1 = vld [vmem:[%s11014_s23 + $0x408] sm:$0xff]  ;;  %v415_v2 = vld [vmem:[%s11014_s23 + $0x410] sm:$0xff] }
  0x53   : > { %412 = vst [vmem:[%s11019_s24 + $0x400] sm:$0xff] %v411_v0  ;;  %v417_v3 = vld [vmem:[%s11014_s23 + $0x418] sm:$0xff]  ;;  %414 = vst [vmem:[%s11019_s24 + $0x408] sm:$0xff] %v413_v1  ;;  %v419_v4 = vld [vmem:[%s11014_s23 + $0x420] sm:$0xff] }
  0x54   : > { %416 = vst [vmem:[%s11019_s24 + $0x410] sm:$0xff] %v415_v2  ;;  %418 = vst [vmem:[%s11019_s24 + $0x418] sm:$0xff] %v417_v3  ;;  %v421_v5 = vld [vmem:[%s11014_s23 + $0x428] sm:$0xff]  ;;  %v423_v6 = vld [vmem:[%s11014_s23 + $0x430] sm:$0xff] }
  0x55   : > { %420 = vst [vmem:[%s11019_s24 + $0x420] sm:$0xff] %v419_v4  ;;  %422 = vst [vmem:[%s11019_s24 + $0x428] sm:$0xff] %v421_v5  ;;  %v425_v7 = vld [vmem:[%s11014_s23 + $0x438] sm:$0xff]  ;;  %v427_v8 = vld [vmem:[%s11014_s23 + $0x440] sm:$0xff] }
  0x56   : > { %424 = vst [vmem:[%s11019_s24 + $0x430] sm:$0xff] %v423_v6  ;;  %v429_v9 = vld [vmem:[%s11014_s23 + $0x448] sm:$0xff]  ;;  %426 = vst [vmem:[%s11019_s24 + $0x438] sm:$0xff] %v425_v7  ;;  %v431_v10 = vld [vmem:[%s11014_s23 + $0x450] sm:$0xff] }
  0x57   : > { %428 = vst [vmem:[%s11019_s24 + $0x440] sm:$0xff] %v427_v8  ;;  %430 = vst [vmem:[%s11019_s24 + $0x448] sm:$0xff] %v429_v9  ;;  %v433_v11 = vld [vmem:[%s11014_s23 + $0x458] sm:$0xff]  ;;  %v435_v12 = vld [vmem:[%s11014_s23 + $0x460] sm:$0xff] }
  0x58   : > { %432 = vst [vmem:[%s11019_s24 + $0x450] sm:$0xff] %v431_v10  ;;  %434 = vst [vmem:[%s11019_s24 + $0x458] sm:$0xff] %v433_v11  ;;  %v437_v13 = vld [vmem:[%s11014_s23 + $0x468] sm:$0xff]  ;;  %v439_v14 = vld [vmem:[%s11014_s23 + $0x470] sm:$0xff] }
  0x59   : > { %436 = vst [vmem:[%s11019_s24 + $0x460] sm:$0xff] %v435_v12  ;;  %v441_v15 = vld [vmem:[%s11014_s23 + $0x478] sm:$0xff]  ;;  %438 = vst [vmem:[%s11019_s24 + $0x468] sm:$0xff] %v437_v13  ;;  %v443_v16 = vld [vmem:[%s11014_s23 + $0x480] sm:$0xff] }
  0x5a   : > { %440 = vst [vmem:[%s11019_s24 + $0x470] sm:$0xff] %v439_v14  ;;  %442 = vst [vmem:[%s11019_s24 + $0x478] sm:$0xff] %v441_v15  ;;  %v445_v17 = vld [vmem:[%s11014_s23 + $0x488] sm:$0xff]  ;;  %v447_v18 = vld [vmem:[%s11014_s23 + $0x490] sm:$0xff] }
  0x5b   : > { %444 = vst [vmem:[%s11019_s24 + $0x480] sm:$0xff] %v443_v16  ;;  %446 = vst [vmem:[%s11019_s24 + $0x488] sm:$0xff] %v445_v17  ;;  %v449_v19 = vld [vmem:[%s11014_s23 + $0x498] sm:$0xff]  ;;  %v451_v20 = vld [vmem:[%s11014_s23 + $0x4a0] sm:$0xff] }
  0x5c   : > { %448 = vst [vmem:[%s11019_s24 + $0x490] sm:$0xff] %v447_v18  ;;  %v453_v21 = vld [vmem:[%s11014_s23 + $0x4a8] sm:$0xff]  ;;  %450 = vst [vmem:[%s11019_s24 + $0x498] sm:$0xff] %v449_v19  ;;  %v455_v22 = vld [vmem:[%s11014_s23 + $0x4b0] sm:$0xff] }
  0x5d   : > { %452 = vst [vmem:[%s11019_s24 + $0x4a0] sm:$0xff] %v451_v20  ;;  %454 = vst [vmem:[%s11019_s24 + $0x4a8] sm:$0xff] %v453_v21  ;;  %v457_v23 = vld [vmem:[%s11014_s23 + $0x4b8] sm:$0xff]  ;;  %v459_v24 = vld [vmem:[%s11014_s23 + $0x4c0] sm:$0xff] }
  0x5e   : > { %456 = vst [vmem:[%s11019_s24 + $0x4b0] sm:$0xff] %v455_v22  ;;  %458 = vst [vmem:[%s11019_s24 + $0x4b8] sm:$0xff] %v457_v23  ;;  %v461_v25 = vld [vmem:[%s11014_s23 + $0x4c8] sm:$0xff]  ;;  %v463_v26 = vld [vmem:[%s11014_s23 + $0x4d0] sm:$0xff] }
  0x5f   : > { %460 = vst [vmem:[%s11019_s24 + $0x4c0] sm:$0xff] %v459_v24  ;;  %v465_v27 = vld [vmem:[%s11014_s23 + $0x4d8] sm:$0xff]  ;;  %462 = vst [vmem:[%s11019_s24 + $0x4c8] sm:$0xff] %v461_v25  ;;  %v467_v28 = vld [vmem:[%s11014_s23 + $0x4e0] sm:$0xff] }
  0x60   : > { %464 = vst [vmem:[%s11019_s24 + $0x4d0] sm:$0xff] %v463_v26  ;;  %466 = vst [vmem:[%s11019_s24 + $0x4d8] sm:$0xff] %v465_v27  ;;  %v469_v29 = vld [vmem:[%s11014_s23 + $0x4e8] sm:$0xff]  ;;  %v471_v30 = vld [vmem:[%s11014_s23 + $0x4f0] sm:$0xff] }
  0x61   : > { %468 = vst [vmem:[%s11019_s24 + $0x4e0] sm:$0xff] %v467_v28  ;;  %470 = vst [vmem:[%s11019_s24 + $0x4e8] sm:$0xff] %v469_v29  ;;  %v473_v31 = vld [vmem:[%s11014_s23 + $0x4f8] sm:$0xff]  ;;  %v475_v32 = vld [vmem:[%s11014_s23 + $0x500] sm:$0xff] }
  0x62   : > { %472 = vst [vmem:[%s11019_s24 + $0x4f0] sm:$0xff] %v471_v30  ;;  %v477_v33 = vld [vmem:[%s11014_s23 + $0x508] sm:$0xff]  ;;  %474 = vst [vmem:[%s11019_s24 + $0x4f8] sm:$0xff] %v473_v31  ;;  %v479_v34 = vld [vmem:[%s11014_s23 + $0x510] sm:$0xff] }
  0x63   : > { %476 = vst [vmem:[%s11019_s24 + $0x500] sm:$0xff] %v475_v32  ;;  %478 = vst [vmem:[%s11019_s24 + $0x508] sm:$0xff] %v477_v33  ;;  %v481_v35 = vld [vmem:[%s11014_s23 + $0x518] sm:$0xff]  ;;  %v483_v36 = vld [vmem:[%s11014_s23 + $0x520] sm:$0xff] }
  0x64   : > { %480 = vst [vmem:[%s11019_s24 + $0x510] sm:$0xff] %v479_v34  ;;  %482 = vst [vmem:[%s11019_s24 + $0x518] sm:$0xff] %v481_v35  ;;  %v485_v37 = vld [vmem:[%s11014_s23 + $0x528] sm:$0xff]  ;;  %v487_v38 = vld [vmem:[%s11014_s23 + $0x530] sm:$0xff] }
  0x65   : > { %484 = vst [vmem:[%s11019_s24 + $0x520] sm:$0xff] %v483_v36  ;;  %v489_v39 = vld [vmem:[%s11014_s23 + $0x538] sm:$0xff]  ;;  %486 = vst [vmem:[%s11019_s24 + $0x528] sm:$0xff] %v485_v37  ;;  %v491_v40 = vld [vmem:[%s11014_s23 + $0x540] sm:$0xff] }
  0x66   : > { %488 = vst [vmem:[%s11019_s24 + $0x530] sm:$0xff] %v487_v38  ;;  %490 = vst [vmem:[%s11019_s24 + $0x538] sm:$0xff] %v489_v39  ;;  %v493_v41 = vld [vmem:[%s11014_s23 + $0x548] sm:$0xff]  ;;  %v495_v42 = vld [vmem:[%s11014_s23 + $0x550] sm:$0xff] }
  0x67   : > { %492 = vst [vmem:[%s11019_s24 + $0x540] sm:$0xff] %v491_v40  ;;  %494 = vst [vmem:[%s11019_s24 + $0x548] sm:$0xff] %v493_v41  ;;  %v497_v43 = vld [vmem:[%s11014_s23 + $0x558] sm:$0xff]  ;;  %v499_v44 = vld [vmem:[%s11014_s23 + $0x560] sm:$0xff] }
  0x68   : > { %496 = vst [vmem:[%s11019_s24 + $0x550] sm:$0xff] %v495_v42  ;;  %v501_v45 = vld [vmem:[%s11014_s23 + $0x568] sm:$0xff]  ;;  %498 = vst [vmem:[%s11019_s24 + $0x558] sm:$0xff] %v497_v43  ;;  %v503_v46 = vld [vmem:[%s11014_s23 + $0x570] sm:$0xff] }
  0x69   : > { %500 = vst [vmem:[%s11019_s24 + $0x560] sm:$0xff] %v499_v44  ;;  %502 = vst [vmem:[%s11019_s24 + $0x568] sm:$0xff] %v501_v45  ;;  %v505_v47 = vld [vmem:[%s11014_s23 + $0x578] sm:$0xff]  ;;  %v507_v48 = vld [vmem:[%s11014_s23 + $0x580] sm:$0xff] }
  0x6a   : > { %504 = vst [vmem:[%s11019_s24 + $0x570] sm:$0xff] %v503_v46  ;;  %506 = vst [vmem:[%s11019_s24 + $0x578] sm:$0xff] %v505_v47  ;;  %v509_v49 = vld [vmem:[%s11014_s23 + $0x588] sm:$0xff]  ;;  %v511_v50 = vld [vmem:[%s11014_s23 + $0x590] sm:$0xff] }
  0x6b   : > { %508 = vst [vmem:[%s11019_s24 + $0x580] sm:$0xff] %v507_v48  ;;  %v513_v51 = vld [vmem:[%s11014_s23 + $0x598] sm:$0xff]  ;;  %510 = vst [vmem:[%s11019_s24 + $0x588] sm:$0xff] %v509_v49  ;;  %v515_v52 = vld [vmem:[%s11014_s23 + $0x5a0] sm:$0xff] }
  0x6c   : > { %512 = vst [vmem:[%s11019_s24 + $0x590] sm:$0xff] %v511_v50  ;;  %514 = vst [vmem:[%s11019_s24 + $0x598] sm:$0xff] %v513_v51  ;;  %v517_v53 = vld [vmem:[%s11014_s23 + $0x5a8] sm:$0xff]  ;;  %v519_v54 = vld [vmem:[%s11014_s23 + $0x5b0] sm:$0xff] }
  0x6d   : > { %516 = vst [vmem:[%s11019_s24 + $0x5a0] sm:$0xff] %v515_v52  ;;  %518 = vst [vmem:[%s11019_s24 + $0x5a8] sm:$0xff] %v517_v53  ;;  %v521_v55 = vld [vmem:[%s11014_s23 + $0x5b8] sm:$0xff]  ;;  %v523_v56 = vld [vmem:[%s11014_s23 + $0x5c0] sm:$0xff] }
  0x6e   : > { %520 = vst [vmem:[%s11019_s24 + $0x5b0] sm:$0xff] %v519_v54  ;;  %v525_v57 = vld [vmem:[%s11014_s23 + $0x5c8] sm:$0xff]  ;;  %522 = vst [vmem:[%s11019_s24 + $0x5b8] sm:$0xff] %v521_v55  ;;  %v527_v58 = vld [vmem:[%s11014_s23 + $0x5d0] sm:$0xff] }
  0x6f   : > { %524 = vst [vmem:[%s11019_s24 + $0x5c0] sm:$0xff] %v523_v56  ;;  %526 = vst [vmem:[%s11019_s24 + $0x5c8] sm:$0xff] %v525_v57  ;;  %v529_v59 = vld [vmem:[%s11014_s23 + $0x5d8] sm:$0xff]  ;;  %v531_v60 = vld [vmem:[%s11014_s23 + $0x5e0] sm:$0xff] }
  0x70   : > { %528 = vst [vmem:[%s11019_s24 + $0x5d0] sm:$0xff] %v527_v58  ;;  %530 = vst [vmem:[%s11019_s24 + $0x5d8] sm:$0xff] %v529_v59  ;;  %v533_v61 = vld [vmem:[%s11014_s23 + $0x5e8] sm:$0xff]  ;;  %v535_v62 = vld [vmem:[%s11014_s23 + $0x5f0] sm:$0xff] }
  0x71   : > { %532 = vst [vmem:[%s11019_s24 + $0x5e0] sm:$0xff] %v531_v60  ;;  %v537_v63 = vld [vmem:[%s11014_s23 + $0x5f8] sm:$0xff]  ;;  %534 = vst [vmem:[%s11019_s24 + $0x5e8] sm:$0xff] %v533_v61  ;;  %v539_v0 = vld [vmem:[%s11014_s23 + $0xc00] sm:$0xff] }
  0x72   : > { %536 = vst [vmem:[%s11019_s24 + $0x5f0] sm:$0xff] %v535_v62  ;;  %538 = vst [vmem:[%s11019_s24 + $0x5f8] sm:$0xff] %v537_v63  ;;  %v541_v1 = vld [vmem:[%s11014_s23 + $0xc08] sm:$0xff]  ;;  %v543_v2 = vld [vmem:[%s11014_s23 + $0xc10] sm:$0xff] }
  0x73   : > { %540 = vst [vmem:[%s11019_s24 + $0x600] sm:$0xff] %v539_v0  ;;  %542 = vst [vmem:[%s11019_s24 + $0x608] sm:$0xff] %v541_v1  ;;  %v545_v3 = vld [vmem:[%s11014_s23 + $0xc18] sm:$0xff]  ;;  %v547_v4 = vld [vmem:[%s11014_s23 + $0xc20] sm:$0xff] }
  0x74   : > { %544 = vst [vmem:[%s11019_s24 + $0x610] sm:$0xff] %v543_v2  ;;  %v549_v5 = vld [vmem:[%s11014_s23 + $0xc28] sm:$0xff]  ;;  %546 = vst [vmem:[%s11019_s24 + $0x618] sm:$0xff] %v545_v3  ;;  %v551_v6 = vld [vmem:[%s11014_s23 + $0xc30] sm:$0xff] }
  0x75   : > { %548 = vst [vmem:[%s11019_s24 + $0x620] sm:$0xff] %v547_v4  ;;  %550 = vst [vmem:[%s11019_s24 + $0x628] sm:$0xff] %v549_v5  ;;  %v553_v7 = vld [vmem:[%s11014_s23 + $0xc38] sm:$0xff]  ;;  %v555_v8 = vld [vmem:[%s11014_s23 + $0xc40] sm:$0xff] }
  0x76   : > { %552 = vst [vmem:[%s11019_s24 + $0x630] sm:$0xff] %v551_v6  ;;  %554 = vst [vmem:[%s11019_s24 + $0x638] sm:$0xff] %v553_v7  ;;  %v557_v9 = vld [vmem:[%s11014_s23 + $0xc48] sm:$0xff]  ;;  %v559_v10 = vld [vmem:[%s11014_s23 + $0xc50] sm:$0xff] }
  0x77   : > { %556 = vst [vmem:[%s11019_s24 + $0x640] sm:$0xff] %v555_v8  ;;  %v561_v11 = vld [vmem:[%s11014_s23 + $0xc58] sm:$0xff]  ;;  %558 = vst [vmem:[%s11019_s24 + $0x648] sm:$0xff] %v557_v9  ;;  %v563_v12 = vld [vmem:[%s11014_s23 + $0xc60] sm:$0xff] }
  0x78   : > { %560 = vst [vmem:[%s11019_s24 + $0x650] sm:$0xff] %v559_v10  ;;  %562 = vst [vmem:[%s11019_s24 + $0x658] sm:$0xff] %v561_v11  ;;  %v565_v13 = vld [vmem:[%s11014_s23 + $0xc68] sm:$0xff]  ;;  %v567_v14 = vld [vmem:[%s11014_s23 + $0xc70] sm:$0xff] }
  0x79   : > { %564 = vst [vmem:[%s11019_s24 + $0x660] sm:$0xff] %v563_v12  ;;  %566 = vst [vmem:[%s11019_s24 + $0x668] sm:$0xff] %v565_v13  ;;  %v569_v15 = vld [vmem:[%s11014_s23 + $0xc78] sm:$0xff]  ;;  %v571_v16 = vld [vmem:[%s11014_s23 + $0xc80] sm:$0xff] }
  0x7a   : > { %568 = vst [vmem:[%s11019_s24 + $0x670] sm:$0xff] %v567_v14  ;;  %v573_v17 = vld [vmem:[%s11014_s23 + $0xc88] sm:$0xff]  ;;  %570 = vst [vmem:[%s11019_s24 + $0x678] sm:$0xff] %v569_v15  ;;  %v575_v18 = vld [vmem:[%s11014_s23 + $0xc90] sm:$0xff] }
  0x7b   : > { %572 = vst [vmem:[%s11019_s24 + $0x680] sm:$0xff] %v571_v16  ;;  %574 = vst [vmem:[%s11019_s24 + $0x688] sm:$0xff] %v573_v17  ;;  %v577_v19 = vld [vmem:[%s11014_s23 + $0xc98] sm:$0xff]  ;;  %v579_v20 = vld [vmem:[%s11014_s23 + $0xca0] sm:$0xff] }
  0x7c   : > { %576 = vst [vmem:[%s11019_s24 + $0x690] sm:$0xff] %v575_v18  ;;  %578 = vst [vmem:[%s11019_s24 + $0x698] sm:$0xff] %v577_v19  ;;  %v581_v21 = vld [vmem:[%s11014_s23 + $0xca8] sm:$0xff]  ;;  %v583_v22 = vld [vmem:[%s11014_s23 + $0xcb0] sm:$0xff] }
  0x7d   : > { %580 = vst [vmem:[%s11019_s24 + $0x6a0] sm:$0xff] %v579_v20  ;;  %v585_v23 = vld [vmem:[%s11014_s23 + $0xcb8] sm:$0xff]  ;;  %582 = vst [vmem:[%s11019_s24 + $0x6a8] sm:$0xff] %v581_v21  ;;  %v587_v24 = vld [vmem:[%s11014_s23 + $0xcc0] sm:$0xff] }
  0x7e   : > { %584 = vst [vmem:[%s11019_s24 + $0x6b0] sm:$0xff] %v583_v22  ;;  %586 = vst [vmem:[%s11019_s24 + $0x6b8] sm:$0xff] %v585_v23  ;;  %v589_v25 = vld [vmem:[%s11014_s23 + $0xcc8] sm:$0xff]  ;;  %v591_v26 = vld [vmem:[%s11014_s23 + $0xcd0] sm:$0xff] }
  0x7f   : > { %588 = vst [vmem:[%s11019_s24 + $0x6c0] sm:$0xff] %v587_v24  ;;  %590 = vst [vmem:[%s11019_s24 + $0x6c8] sm:$0xff] %v589_v25  ;;  %v593_v27 = vld [vmem:[%s11014_s23 + $0xcd8] sm:$0xff]  ;;  %v595_v28 = vld [vmem:[%s11014_s23 + $0xce0] sm:$0xff] }
  0x80   : > { %592 = vst [vmem:[%s11019_s24 + $0x6d0] sm:$0xff] %v591_v26  ;;  %v597_v29 = vld [vmem:[%s11014_s23 + $0xce8] sm:$0xff]  ;;  %594 = vst [vmem:[%s11019_s24 + $0x6d8] sm:$0xff] %v593_v27  ;;  %v599_v30 = vld [vmem:[%s11014_s23 + $0xcf0] sm:$0xff] }
  0x81   : > { %596 = vst [vmem:[%s11019_s24 + $0x6e0] sm:$0xff] %v595_v28  ;;  %598 = vst [vmem:[%s11019_s24 + $0x6e8] sm:$0xff] %v597_v29  ;;  %v601_v31 = vld [vmem:[%s11014_s23 + $0xcf8] sm:$0xff]  ;;  %v603_v32 = vld [vmem:[%s11014_s23 + $0xd00] sm:$0xff] }
  0x82   : > { %600 = vst [vmem:[%s11019_s24 + $0x6f0] sm:$0xff] %v599_v30  ;;  %602 = vst [vmem:[%s11019_s24 + $0x6f8] sm:$0xff] %v601_v31  ;;  %v605_v33 = vld [vmem:[%s11014_s23 + $0xd08] sm:$0xff]  ;;  %v607_v34 = vld [vmem:[%s11014_s23 + $0xd10] sm:$0xff] }
  0x83   : > { %604 = vst [vmem:[%s11019_s24 + $0x700] sm:$0xff] %v603_v32  ;;  %v609_v35 = vld [vmem:[%s11014_s23 + $0xd18] sm:$0xff]  ;;  %606 = vst [vmem:[%s11019_s24 + $0x708] sm:$0xff] %v605_v33  ;;  %v611_v36 = vld [vmem:[%s11014_s23 + $0xd20] sm:$0xff] }
  0x84   : > { %608 = vst [vmem:[%s11019_s24 + $0x710] sm:$0xff] %v607_v34  ;;  %610 = vst [vmem:[%s11019_s24 + $0x718] sm:$0xff] %v609_v35  ;;  %v613_v37 = vld [vmem:[%s11014_s23 + $0xd28] sm:$0xff]  ;;  %v615_v38 = vld [vmem:[%s11014_s23 + $0xd30] sm:$0xff] }
  0x85   : > { %612 = vst [vmem:[%s11019_s24 + $0x720] sm:$0xff] %v611_v36  ;;  %614 = vst [vmem:[%s11019_s24 + $0x728] sm:$0xff] %v613_v37  ;;  %v617_v39 = vld [vmem:[%s11014_s23 + $0xd38] sm:$0xff]  ;;  %v619_v40 = vld [vmem:[%s11014_s23 + $0xd40] sm:$0xff] }
  0x86   : > { %616 = vst [vmem:[%s11019_s24 + $0x730] sm:$0xff] %v615_v38  ;;  %v621_v41 = vld [vmem:[%s11014_s23 + $0xd48] sm:$0xff]  ;;  %618 = vst [vmem:[%s11019_s24 + $0x738] sm:$0xff] %v617_v39  ;;  %v623_v42 = vld [vmem:[%s11014_s23 + $0xd50] sm:$0xff] }
  0x87   : > { %620 = vst [vmem:[%s11019_s24 + $0x740] sm:$0xff] %v619_v40  ;;  %622 = vst [vmem:[%s11019_s24 + $0x748] sm:$0xff] %v621_v41  ;;  %v625_v43 = vld [vmem:[%s11014_s23 + $0xd58] sm:$0xff]  ;;  %v627_v44 = vld [vmem:[%s11014_s23 + $0xd60] sm:$0xff] }
  0x88   : > { %624 = vst [vmem:[%s11019_s24 + $0x750] sm:$0xff] %v623_v42  ;;  %626 = vst [vmem:[%s11019_s24 + $0x758] sm:$0xff] %v625_v43  ;;  %v629_v45 = vld [vmem:[%s11014_s23 + $0xd68] sm:$0xff]  ;;  %v631_v46 = vld [vmem:[%s11014_s23 + $0xd70] sm:$0xff] }
  0x89   : > { %628 = vst [vmem:[%s11019_s24 + $0x760] sm:$0xff] %v627_v44  ;;  %v633_v47 = vld [vmem:[%s11014_s23 + $0xd78] sm:$0xff]  ;;  %630 = vst [vmem:[%s11019_s24 + $0x768] sm:$0xff] %v629_v45  ;;  %v635_v48 = vld [vmem:[%s11014_s23 + $0xd80] sm:$0xff] }
  0x8a   : > { %632 = vst [vmem:[%s11019_s24 + $0x770] sm:$0xff] %v631_v46  ;;  %634 = vst [vmem:[%s11019_s24 + $0x778] sm:$0xff] %v633_v47  ;;  %v637_v49 = vld [vmem:[%s11014_s23 + $0xd88] sm:$0xff]  ;;  %v639_v50 = vld [vmem:[%s11014_s23 + $0xd90] sm:$0xff] }
  0x8b   : > { %636 = vst [vmem:[%s11019_s24 + $0x780] sm:$0xff] %v635_v48  ;;  %638 = vst [vmem:[%s11019_s24 + $0x788] sm:$0xff] %v637_v49  ;;  %v641_v51 = vld [vmem:[%s11014_s23 + $0xd98] sm:$0xff]  ;;  %v643_v52 = vld [vmem:[%s11014_s23 + $0xda0] sm:$0xff] }
  0x8c   : > { %640 = vst [vmem:[%s11019_s24 + $0x790] sm:$0xff] %v639_v50  ;;  %v645_v53 = vld [vmem:[%s11014_s23 + $0xda8] sm:$0xff]  ;;  %642 = vst [vmem:[%s11019_s24 + $0x798] sm:$0xff] %v641_v51  ;;  %v647_v54 = vld [vmem:[%s11014_s23 + $0xdb0] sm:$0xff] }
  0x8d   : > { %644 = vst [vmem:[%s11019_s24 + $0x7a0] sm:$0xff] %v643_v52  ;;  %646 = vst [vmem:[%s11019_s24 + $0x7a8] sm:$0xff] %v645_v53  ;;  %v649_v55 = vld [vmem:[%s11014_s23 + $0xdb8] sm:$0xff]  ;;  %v651_v56 = vld [vmem:[%s11014_s23 + $0xdc0] sm:$0xff] }
  0x8e   : > { %648 = vst [vmem:[%s11019_s24 + $0x7b0] sm:$0xff] %v647_v54  ;;  %650 = vst [vmem:[%s11019_s24 + $0x7b8] sm:$0xff] %v649_v55  ;;  %v653_v57 = vld [vmem:[%s11014_s23 + $0xdc8] sm:$0xff]  ;;  %v655_v58 = vld [vmem:[%s11014_s23 + $0xdd0] sm:$0xff] }
  0x8f   : > { %652 = vst [vmem:[%s11019_s24 + $0x7c0] sm:$0xff] %v651_v56  ;;  %v657_v59 = vld [vmem:[%s11014_s23 + $0xdd8] sm:$0xff]  ;;  %654 = vst [vmem:[%s11019_s24 + $0x7c8] sm:$0xff] %v653_v57  ;;  %v659_v60 = vld [vmem:[%s11014_s23 + $0xde0] sm:$0xff] }
  0x90   : > { %656 = vst [vmem:[%s11019_s24 + $0x7d0] sm:$0xff] %v655_v58  ;;  %658 = vst [vmem:[%s11019_s24 + $0x7d8] sm:$0xff] %v657_v59  ;;  %v661_v61 = vld [vmem:[%s11014_s23 + $0xde8] sm:$0xff]  ;;  %v663_v62 = vld [vmem:[%s11014_s23 + $0xdf0] sm:$0xff] }
  0x91   : > { %660 = vst [vmem:[%s11019_s24 + $0x7e0] sm:$0xff] %v659_v60  ;;  %662 = vst [vmem:[%s11019_s24 + $0x7e8] sm:$0xff] %v661_v61  ;;  %v665_v63 = vld [vmem:[%s11014_s23 + $0xdf8] sm:$0xff]  ;;  %v667_v0 = vld [vmem:[%s11014_s23 + $0xe00] sm:$0xff] }
  0x92   : > { %664 = vst [vmem:[%s11019_s24 + $0x7f0] sm:$0xff] %v663_v62  ;;  %v669_v1 = vld [vmem:[%s11014_s23 + $0xe08] sm:$0xff]  ;;  %666 = vst [vmem:[%s11019_s24 + $0x7f8] sm:$0xff] %v665_v63  ;;  %v671_v2 = vld [vmem:[%s11014_s23 + $0xe10] sm:$0xff] }
  0x93   : > { %668 = vst [vmem:[%s11019_s24 + $0x800] sm:$0xff] %v667_v0  ;;  %670 = vst [vmem:[%s11019_s24 + $0x808] sm:$0xff] %v669_v1  ;;  %v673_v3 = vld [vmem:[%s11014_s23 + $0xe18] sm:$0xff]  ;;  %v675_v4 = vld [vmem:[%s11014_s23 + $0xe20] sm:$0xff] }
  0x94   : > { %672 = vst [vmem:[%s11019_s24 + $0x810] sm:$0xff] %v671_v2  ;;  %674 = vst [vmem:[%s11019_s24 + $0x818] sm:$0xff] %v673_v3  ;;  %v677_v5 = vld [vmem:[%s11014_s23 + $0xe28] sm:$0xff]  ;;  %v679_v6 = vld [vmem:[%s11014_s23 + $0xe30] sm:$0xff] }
  0x95   : > { %676 = vst [vmem:[%s11019_s24 + $0x820] sm:$0xff] %v675_v4  ;;  %v681_v7 = vld [vmem:[%s11014_s23 + $0xe38] sm:$0xff]  ;;  %678 = vst [vmem:[%s11019_s24 + $0x828] sm:$0xff] %v677_v5  ;;  %v683_v8 = vld [vmem:[%s11014_s23 + $0xe40] sm:$0xff] }
  0x96   : > { %680 = vst [vmem:[%s11019_s24 + $0x830] sm:$0xff] %v679_v6  ;;  %682 = vst [vmem:[%s11019_s24 + $0x838] sm:$0xff] %v681_v7  ;;  %v685_v9 = vld [vmem:[%s11014_s23 + $0xe48] sm:$0xff]  ;;  %v687_v10 = vld [vmem:[%s11014_s23 + $0xe50] sm:$0xff] }
  0x97   : > { %684 = vst [vmem:[%s11019_s24 + $0x840] sm:$0xff] %v683_v8  ;;  %686 = vst [vmem:[%s11019_s24 + $0x848] sm:$0xff] %v685_v9  ;;  %v689_v11 = vld [vmem:[%s11014_s23 + $0xe58] sm:$0xff]  ;;  %v691_v12 = vld [vmem:[%s11014_s23 + $0xe60] sm:$0xff] }
  0x98   : > { %688 = vst [vmem:[%s11019_s24 + $0x850] sm:$0xff] %v687_v10  ;;  %v693_v13 = vld [vmem:[%s11014_s23 + $0xe68] sm:$0xff]  ;;  %690 = vst [vmem:[%s11019_s24 + $0x858] sm:$0xff] %v689_v11  ;;  %v695_v14 = vld [vmem:[%s11014_s23 + $0xe70] sm:$0xff] }
  0x99   : > { %692 = vst [vmem:[%s11019_s24 + $0x860] sm:$0xff] %v691_v12  ;;  %694 = vst [vmem:[%s11019_s24 + $0x868] sm:$0xff] %v693_v13  ;;  %v697_v15 = vld [vmem:[%s11014_s23 + $0xe78] sm:$0xff]  ;;  %v699_v16 = vld [vmem:[%s11014_s23 + $0xe80] sm:$0xff] }
  0x9a   : > { %696 = vst [vmem:[%s11019_s24 + $0x870] sm:$0xff] %v695_v14  ;;  %698 = vst [vmem:[%s11019_s24 + $0x878] sm:$0xff] %v697_v15  ;;  %v701_v17 = vld [vmem:[%s11014_s23 + $0xe88] sm:$0xff]  ;;  %v703_v18 = vld [vmem:[%s11014_s23 + $0xe90] sm:$0xff] }
  0x9b   : > { %700 = vst [vmem:[%s11019_s24 + $0x880] sm:$0xff] %v699_v16  ;;  %v705_v19 = vld [vmem:[%s11014_s23 + $0xe98] sm:$0xff]  ;;  %702 = vst [vmem:[%s11019_s24 + $0x888] sm:$0xff] %v701_v17  ;;  %v707_v20 = vld [vmem:[%s11014_s23 + $0xea0] sm:$0xff] }
  0x9c   : > { %704 = vst [vmem:[%s11019_s24 + $0x890] sm:$0xff] %v703_v18  ;;  %706 = vst [vmem:[%s11019_s24 + $0x898] sm:$0xff] %v705_v19  ;;  %v709_v21 = vld [vmem:[%s11014_s23 + $0xea8] sm:$0xff]  ;;  %v711_v22 = vld [vmem:[%s11014_s23 + $0xeb0] sm:$0xff] }
  0x9d   : > { %708 = vst [vmem:[%s11019_s24 + $0x8a0] sm:$0xff] %v707_v20  ;;  %710 = vst [vmem:[%s11019_s24 + $0x8a8] sm:$0xff] %v709_v21  ;;  %v713_v23 = vld [vmem:[%s11014_s23 + $0xeb8] sm:$0xff]  ;;  %v715_v24 = vld [vmem:[%s11014_s23 + $0xec0] sm:$0xff] }
  0x9e   : > { %712 = vst [vmem:[%s11019_s24 + $0x8b0] sm:$0xff] %v711_v22  ;;  %v717_v25 = vld [vmem:[%s11014_s23 + $0xec8] sm:$0xff]  ;;  %714 = vst [vmem:[%s11019_s24 + $0x8b8] sm:$0xff] %v713_v23  ;;  %v719_v26 = vld [vmem:[%s11014_s23 + $0xed0] sm:$0xff] }
  0x9f   : > { %716 = vst [vmem:[%s11019_s24 + $0x8c0] sm:$0xff] %v715_v24  ;;  %718 = vst [vmem:[%s11019_s24 + $0x8c8] sm:$0xff] %v717_v25  ;;  %v721_v27 = vld [vmem:[%s11014_s23 + $0xed8] sm:$0xff]  ;;  %v723_v28 = vld [vmem:[%s11014_s23 + $0xee0] sm:$0xff] }
  0xa0   : > { %720 = vst [vmem:[%s11019_s24 + $0x8d0] sm:$0xff] %v719_v26  ;;  %722 = vst [vmem:[%s11019_s24 + $0x8d8] sm:$0xff] %v721_v27  ;;  %v725_v29 = vld [vmem:[%s11014_s23 + $0xee8] sm:$0xff]  ;;  %v727_v30 = vld [vmem:[%s11014_s23 + $0xef0] sm:$0xff] }
  0xa1   : > { %724 = vst [vmem:[%s11019_s24 + $0x8e0] sm:$0xff] %v723_v28  ;;  %v729_v31 = vld [vmem:[%s11014_s23 + $0xef8] sm:$0xff]  ;;  %726 = vst [vmem:[%s11019_s24 + $0x8e8] sm:$0xff] %v725_v29  ;;  %v731_v32 = vld [vmem:[%s11014_s23 + $0xf00] sm:$0xff] }
  0xa2   : > { %728 = vst [vmem:[%s11019_s24 + $0x8f0] sm:$0xff] %v727_v30  ;;  %730 = vst [vmem:[%s11019_s24 + $0x8f8] sm:$0xff] %v729_v31  ;;  %v733_v33 = vld [vmem:[%s11014_s23 + $0xf08] sm:$0xff]  ;;  %v735_v34 = vld [vmem:[%s11014_s23 + $0xf10] sm:$0xff] }
  0xa3   : > { %732 = vst [vmem:[%s11019_s24 + $0x900] sm:$0xff] %v731_v32  ;;  %734 = vst [vmem:[%s11019_s24 + $0x908] sm:$0xff] %v733_v33  ;;  %v737_v35 = vld [vmem:[%s11014_s23 + $0xf18] sm:$0xff]  ;;  %v739_v36 = vld [vmem:[%s11014_s23 + $0xf20] sm:$0xff] }
  0xa4   : > { %736 = vst [vmem:[%s11019_s24 + $0x910] sm:$0xff] %v735_v34  ;;  %v741_v37 = vld [vmem:[%s11014_s23 + $0xf28] sm:$0xff]  ;;  %738 = vst [vmem:[%s11019_s24 + $0x918] sm:$0xff] %v737_v35  ;;  %v743_v38 = vld [vmem:[%s11014_s23 + $0xf30] sm:$0xff] }
  0xa5   : > { %740 = vst [vmem:[%s11019_s24 + $0x920] sm:$0xff] %v739_v36  ;;  %742 = vst [vmem:[%s11019_s24 + $0x928] sm:$0xff] %v741_v37  ;;  %v745_v39 = vld [vmem:[%s11014_s23 + $0xf38] sm:$0xff]  ;;  %v747_v40 = vld [vmem:[%s11014_s23 + $0xf40] sm:$0xff] }
  0xa6   : > { %744 = vst [vmem:[%s11019_s24 + $0x930] sm:$0xff] %v743_v38  ;;  %746 = vst [vmem:[%s11019_s24 + $0x938] sm:$0xff] %v745_v39  ;;  %v749_v41 = vld [vmem:[%s11014_s23 + $0xf48] sm:$0xff]  ;;  %v751_v42 = vld [vmem:[%s11014_s23 + $0xf50] sm:$0xff] }
  0xa7   : > { %748 = vst [vmem:[%s11019_s24 + $0x940] sm:$0xff] %v747_v40  ;;  %v753_v43 = vld [vmem:[%s11014_s23 + $0xf58] sm:$0xff]  ;;  %750 = vst [vmem:[%s11019_s24 + $0x948] sm:$0xff] %v749_v41  ;;  %v755_v44 = vld [vmem:[%s11014_s23 + $0xf60] sm:$0xff] }
  0xa8   : > { %752 = vst [vmem:[%s11019_s24 + $0x950] sm:$0xff] %v751_v42  ;;  %754 = vst [vmem:[%s11019_s24 + $0x958] sm:$0xff] %v753_v43  ;;  %v757_v45 = vld [vmem:[%s11014_s23 + $0xf68] sm:$0xff]  ;;  %v759_v46 = vld [vmem:[%s11014_s23 + $0xf70] sm:$0xff] }
  0xa9   : > { %756 = vst [vmem:[%s11019_s24 + $0x960] sm:$0xff] %v755_v44  ;;  %758 = vst [vmem:[%s11019_s24 + $0x968] sm:$0xff] %v757_v45  ;;  %v761_v47 = vld [vmem:[%s11014_s23 + $0xf78] sm:$0xff]  ;;  %v763_v48 = vld [vmem:[%s11014_s23 + $0xf80] sm:$0xff] }
  0xaa   : > { %760 = vst [vmem:[%s11019_s24 + $0x970] sm:$0xff] %v759_v46  ;;  %v765_v49 = vld [vmem:[%s11014_s23 + $0xf88] sm:$0xff]  ;;  %762 = vst [vmem:[%s11019_s24 + $0x978] sm:$0xff] %v761_v47  ;;  %v767_v50 = vld [vmem:[%s11014_s23 + $0xf90] sm:$0xff] }
  0xab   : > { %764 = vst [vmem:[%s11019_s24 + $0x980] sm:$0xff] %v763_v48  ;;  %766 = vst [vmem:[%s11019_s24 + $0x988] sm:$0xff] %v765_v49  ;;  %v769_v51 = vld [vmem:[%s11014_s23 + $0xf98] sm:$0xff]  ;;  %v771_v52 = vld [vmem:[%s11014_s23 + $0xfa0] sm:$0xff] }
  0xac   : > { %768 = vst [vmem:[%s11019_s24 + $0x990] sm:$0xff] %v767_v50  ;;  %770 = vst [vmem:[%s11019_s24 + $0x998] sm:$0xff] %v769_v51  ;;  %v773_v53 = vld [vmem:[%s11014_s23 + $0xfa8] sm:$0xff]  ;;  %v775_v54 = vld [vmem:[%s11014_s23 + $0xfb0] sm:$0xff] }
  0xad   : > { %772 = vst [vmem:[%s11019_s24 + $0x9a0] sm:$0xff] %v771_v52  ;;  %v777_v55 = vld [vmem:[%s11014_s23 + $0xfb8] sm:$0xff]  ;;  %774 = vst [vmem:[%s11019_s24 + $0x9a8] sm:$0xff] %v773_v53  ;;  %v779_v56 = vld [vmem:[%s11014_s23 + $0xfc0] sm:$0xff] }
  0xae   : > { %776 = vst [vmem:[%s11019_s24 + $0x9b0] sm:$0xff] %v775_v54  ;;  %778 = vst [vmem:[%s11019_s24 + $0x9b8] sm:$0xff] %v777_v55  ;;  %v781_v57 = vld [vmem:[%s11014_s23 + $0xfc8] sm:$0xff]  ;;  %v783_v58 = vld [vmem:[%s11014_s23 + $0xfd0] sm:$0xff] }
  0xaf   : > { %780 = vst [vmem:[%s11019_s24 + $0x9c0] sm:$0xff] %v779_v56  ;;  %782 = vst [vmem:[%s11019_s24 + $0x9c8] sm:$0xff] %v781_v57  ;;  %v785_v59 = vld [vmem:[%s11014_s23 + $0xfd8] sm:$0xff]  ;;  %v787_v60 = vld [vmem:[%s11014_s23 + $0xfe0] sm:$0xff] }
  0xb0   : > { %784 = vst [vmem:[%s11019_s24 + $0x9d0] sm:$0xff] %v783_v58  ;;  %v789_v61 = vld [vmem:[%s11014_s23 + $0xfe8] sm:$0xff]  ;;  %786 = vst [vmem:[%s11019_s24 + $0x9d8] sm:$0xff] %v785_v59  ;;  %v791_v62 = vld [vmem:[%s11014_s23 + $0xff0] sm:$0xff] }
  0xb1   : > { %788 = vst [vmem:[%s11019_s24 + $0x9e0] sm:$0xff] %v787_v60  ;;  %790 = vst [vmem:[%s11019_s24 + $0x9e8] sm:$0xff] %v789_v61  ;;  %v793_v63 = vld [vmem:[%s11014_s23 + $0xff8] sm:$0xff]  ;;  %v795_v0 = vld [vmem:[%s11014_s23 + $0x1000] sm:$0xff] }
  0xb2   : > { %792 = vst [vmem:[%s11019_s24 + $0x9f0] sm:$0xff] %v791_v62  ;;  %794 = vst [vmem:[%s11019_s24 + $0x9f8] sm:$0xff] %v793_v63  ;;  %v797_v1 = vld [vmem:[%s11014_s23 + $0x1008] sm:$0xff]  ;;  %v799_v2 = vld [vmem:[%s11014_s23 + $0x1010] sm:$0xff] }
  0xb3   : > { %796 = vst [vmem:[%s11019_s24 + $0xa00] sm:$0xff] %v795_v0  ;;  %v801_v3 = vld [vmem:[%s11014_s23 + $0x1018] sm:$0xff]  ;;  %798 = vst [vmem:[%s11019_s24 + $0xa08] sm:$0xff] %v797_v1  ;;  %v803_v4 = vld [vmem:[%s11014_s23 + $0x1020] sm:$0xff] }
  0xb4   : > { %800 = vst [vmem:[%s11019_s24 + $0xa10] sm:$0xff] %v799_v2  ;;  %802 = vst [vmem:[%s11019_s24 + $0xa18] sm:$0xff] %v801_v3  ;;  %v805_v5 = vld [vmem:[%s11014_s23 + $0x1028] sm:$0xff]  ;;  %v807_v6 = vld [vmem:[%s11014_s23 + $0x1030] sm:$0xff] }
  0xb5   : > { %804 = vst [vmem:[%s11019_s24 + $0xa20] sm:$0xff] %v803_v4  ;;  %806 = vst [vmem:[%s11019_s24 + $0xa28] sm:$0xff] %v805_v5  ;;  %v809_v7 = vld [vmem:[%s11014_s23 + $0x1038] sm:$0xff]  ;;  %v811_v8 = vld [vmem:[%s11014_s23 + $0x1040] sm:$0xff] }
  0xb6   : > { %808 = vst [vmem:[%s11019_s24 + $0xa30] sm:$0xff] %v807_v6  ;;  %v813_v9 = vld [vmem:[%s11014_s23 + $0x1048] sm:$0xff]  ;;  %810 = vst [vmem:[%s11019_s24 + $0xa38] sm:$0xff] %v809_v7  ;;  %v815_v10 = vld [vmem:[%s11014_s23 + $0x1050] sm:$0xff] }
  0xb7   : > { %812 = vst [vmem:[%s11019_s24 + $0xa40] sm:$0xff] %v811_v8  ;;  %814 = vst [vmem:[%s11019_s24 + $0xa48] sm:$0xff] %v813_v9  ;;  %v817_v11 = vld [vmem:[%s11014_s23 + $0x1058] sm:$0xff]  ;;  %v819_v12 = vld [vmem:[%s11014_s23 + $0x1060] sm:$0xff] }
  0xb8   : > { %816 = vst [vmem:[%s11019_s24 + $0xa50] sm:$0xff] %v815_v10  ;;  %818 = vst [vmem:[%s11019_s24 + $0xa58] sm:$0xff] %v817_v11  ;;  %v821_v13 = vld [vmem:[%s11014_s23 + $0x1068] sm:$0xff]  ;;  %v823_v14 = vld [vmem:[%s11014_s23 + $0x1070] sm:$0xff] }
  0xb9   : > { %820 = vst [vmem:[%s11019_s24 + $0xa60] sm:$0xff] %v819_v12  ;;  %v825_v15 = vld [vmem:[%s11014_s23 + $0x1078] sm:$0xff]  ;;  %822 = vst [vmem:[%s11019_s24 + $0xa68] sm:$0xff] %v821_v13  ;;  %v827_v16 = vld [vmem:[%s11014_s23 + $0x1080] sm:$0xff] }
  0xba   : > { %824 = vst [vmem:[%s11019_s24 + $0xa70] sm:$0xff] %v823_v14  ;;  %826 = vst [vmem:[%s11019_s24 + $0xa78] sm:$0xff] %v825_v15  ;;  %v829_v17 = vld [vmem:[%s11014_s23 + $0x1088] sm:$0xff]  ;;  %v831_v18 = vld [vmem:[%s11014_s23 + $0x1090] sm:$0xff] }
  0xbb   : > { %828 = vst [vmem:[%s11019_s24 + $0xa80] sm:$0xff] %v827_v16  ;;  %830 = vst [vmem:[%s11019_s24 + $0xa88] sm:$0xff] %v829_v17  ;;  %v833_v19 = vld [vmem:[%s11014_s23 + $0x1098] sm:$0xff]  ;;  %v835_v20 = vld [vmem:[%s11014_s23 + $0x10a0] sm:$0xff] }
  0xbc   : > { %832 = vst [vmem:[%s11019_s24 + $0xa90] sm:$0xff] %v831_v18  ;;  %v837_v21 = vld [vmem:[%s11014_s23 + $0x10a8] sm:$0xff]  ;;  %834 = vst [vmem:[%s11019_s24 + $0xa98] sm:$0xff] %v833_v19  ;;  %v839_v22 = vld [vmem:[%s11014_s23 + $0x10b0] sm:$0xff] }
  0xbd   : > { %836 = vst [vmem:[%s11019_s24 + $0xaa0] sm:$0xff] %v835_v20  ;;  %838 = vst [vmem:[%s11019_s24 + $0xaa8] sm:$0xff] %v837_v21  ;;  %v841_v23 = vld [vmem:[%s11014_s23 + $0x10b8] sm:$0xff]  ;;  %v843_v24 = vld [vmem:[%s11014_s23 + $0x10c0] sm:$0xff] }
  0xbe   : > { %840 = vst [vmem:[%s11019_s24 + $0xab0] sm:$0xff] %v839_v22  ;;  %842 = vst [vmem:[%s11019_s24 + $0xab8] sm:$0xff] %v841_v23  ;;  %v845_v25 = vld [vmem:[%s11014_s23 + $0x10c8] sm:$0xff]  ;;  %v847_v26 = vld [vmem:[%s11014_s23 + $0x10d0] sm:$0xff] }
  0xbf   : > { %844 = vst [vmem:[%s11019_s24 + $0xac0] sm:$0xff] %v843_v24  ;;  %v849_v27 = vld [vmem:[%s11014_s23 + $0x10d8] sm:$0xff]  ;;  %846 = vst [vmem:[%s11019_s24 + $0xac8] sm:$0xff] %v845_v25  ;;  %v851_v28 = vld [vmem:[%s11014_s23 + $0x10e0] sm:$0xff] }
  0xc0   : > { %848 = vst [vmem:[%s11019_s24 + $0xad0] sm:$0xff] %v847_v26  ;;  %850 = vst [vmem:[%s11019_s24 + $0xad8] sm:$0xff] %v849_v27  ;;  %v853_v29 = vld [vmem:[%s11014_s23 + $0x10e8] sm:$0xff]  ;;  %v855_v30 = vld [vmem:[%s11014_s23 + $0x10f0] sm:$0xff] }
  0xc1   : > { %852 = vst [vmem:[%s11019_s24 + $0xae0] sm:$0xff] %v851_v28  ;;  %854 = vst [vmem:[%s11019_s24 + $0xae8] sm:$0xff] %v853_v29  ;;  %v857_v31 = vld [vmem:[%s11014_s23 + $0x10f8] sm:$0xff]  ;;  %v859_v32 = vld [vmem:[%s11014_s23 + $0x1100] sm:$0xff] }
  0xc2   : > { %856 = vst [vmem:[%s11019_s24 + $0xaf0] sm:$0xff] %v855_v30  ;;  %v861_v33 = vld [vmem:[%s11014_s23 + $0x1108] sm:$0xff]  ;;  %858 = vst [vmem:[%s11019_s24 + $0xaf8] sm:$0xff] %v857_v31  ;;  %v863_v34 = vld [vmem:[%s11014_s23 + $0x1110] sm:$0xff] }
  0xc3   : > { %860 = vst [vmem:[%s11019_s24 + $0xb00] sm:$0xff] %v859_v32  ;;  %862 = vst [vmem:[%s11019_s24 + $0xb08] sm:$0xff] %v861_v33  ;;  %v865_v35 = vld [vmem:[%s11014_s23 + $0x1118] sm:$0xff]  ;;  %v867_v36 = vld [vmem:[%s11014_s23 + $0x1120] sm:$0xff] }
  0xc4   : > { %864 = vst [vmem:[%s11019_s24 + $0xb10] sm:$0xff] %v863_v34  ;;  %866 = vst [vmem:[%s11019_s24 + $0xb18] sm:$0xff] %v865_v35  ;;  %v869_v37 = vld [vmem:[%s11014_s23 + $0x1128] sm:$0xff]  ;;  %v871_v38 = vld [vmem:[%s11014_s23 + $0x1130] sm:$0xff] }
  0xc5   : > { %868 = vst [vmem:[%s11019_s24 + $0xb20] sm:$0xff] %v867_v36  ;;  %v873_v39 = vld [vmem:[%s11014_s23 + $0x1138] sm:$0xff]  ;;  %870 = vst [vmem:[%s11019_s24 + $0xb28] sm:$0xff] %v869_v37  ;;  %v875_v40 = vld [vmem:[%s11014_s23 + $0x1140] sm:$0xff] }
  0xc6   : > { %872 = vst [vmem:[%s11019_s24 + $0xb30] sm:$0xff] %v871_v38  ;;  %874 = vst [vmem:[%s11019_s24 + $0xb38] sm:$0xff] %v873_v39  ;;  %v877_v41 = vld [vmem:[%s11014_s23 + $0x1148] sm:$0xff]  ;;  %v879_v42 = vld [vmem:[%s11014_s23 + $0x1150] sm:$0xff] }
  0xc7   : > { %876 = vst [vmem:[%s11019_s24 + $0xb40] sm:$0xff] %v875_v40  ;;  %878 = vst [vmem:[%s11019_s24 + $0xb48] sm:$0xff] %v877_v41  ;;  %v881_v43 = vld [vmem:[%s11014_s23 + $0x1158] sm:$0xff]  ;;  %v883_v44 = vld [vmem:[%s11014_s23 + $0x1160] sm:$0xff] }
  0xc8   : > { %880 = vst [vmem:[%s11019_s24 + $0xb50] sm:$0xff] %v879_v42  ;;  %v885_v45 = vld [vmem:[%s11014_s23 + $0x1168] sm:$0xff]  ;;  %882 = vst [vmem:[%s11019_s24 + $0xb58] sm:$0xff] %v881_v43  ;;  %v887_v46 = vld [vmem:[%s11014_s23 + $0x1170] sm:$0xff] }
  0xc9   : > { %884 = vst [vmem:[%s11019_s24 + $0xb60] sm:$0xff] %v883_v44  ;;  %886 = vst [vmem:[%s11019_s24 + $0xb68] sm:$0xff] %v885_v45  ;;  %v889_v47 = vld [vmem:[%s11014_s23 + $0x1178] sm:$0xff]  ;;  %v891_v48 = vld [vmem:[%s11014_s23 + $0x1180] sm:$0xff] }
  0xca   : > { %888 = vst [vmem:[%s11019_s24 + $0xb70] sm:$0xff] %v887_v46  ;;  %890 = vst [vmem:[%s11019_s24 + $0xb78] sm:$0xff] %v889_v47  ;;  %v893_v49 = vld [vmem:[%s11014_s23 + $0x1188] sm:$0xff]  ;;  %v895_v50 = vld [vmem:[%s11014_s23 + $0x1190] sm:$0xff] }
  0xcb   : > { %892 = vst [vmem:[%s11019_s24 + $0xb80] sm:$0xff] %v891_v48  ;;  %v897_v51 = vld [vmem:[%s11014_s23 + $0x1198] sm:$0xff]  ;;  %894 = vst [vmem:[%s11019_s24 + $0xb88] sm:$0xff] %v893_v49  ;;  %v899_v52 = vld [vmem:[%s11014_s23 + $0x11a0] sm:$0xff] }
  0xcc   : > { %896 = vst [vmem:[%s11019_s24 + $0xb90] sm:$0xff] %v895_v50  ;;  %898 = vst [vmem:[%s11019_s24 + $0xb98] sm:$0xff] %v897_v51  ;;  %v901_v53 = vld [vmem:[%s11014_s23 + $0x11a8] sm:$0xff]  ;;  %v903_v54 = vld [vmem:[%s11014_s23 + $0x11b0] sm:$0xff] }
  0xcd   : > { %900 = vst [vmem:[%s11019_s24 + $0xba0] sm:$0xff] %v899_v52  ;;  %902 = vst [vmem:[%s11019_s24 + $0xba8] sm:$0xff] %v901_v53  ;;  %v905_v55 = vld [vmem:[%s11014_s23 + $0x11b8] sm:$0xff]  ;;  %v907_v56 = vld [vmem:[%s11014_s23 + $0x11c0] sm:$0xff] }
  0xce   : > { %904 = vst [vmem:[%s11019_s24 + $0xbb0] sm:$0xff] %v903_v54  ;;  %v909_v57 = vld [vmem:[%s11014_s23 + $0x11c8] sm:$0xff]  ;;  %906 = vst [vmem:[%s11019_s24 + $0xbb8] sm:$0xff] %v905_v55  ;;  %v911_v58 = vld [vmem:[%s11014_s23 + $0x11d0] sm:$0xff] }
  0xcf   : > { %908 = vst [vmem:[%s11019_s24 + $0xbc0] sm:$0xff] %v907_v56  ;;  %910 = vst [vmem:[%s11019_s24 + $0xbc8] sm:$0xff] %v909_v57  ;;  %v913_v59 = vld [vmem:[%s11014_s23 + $0x11d8] sm:$0xff]  ;;  %v915_v60 = vld [vmem:[%s11014_s23 + $0x11e0] sm:$0xff] }
  0xd0   : > { %912 = vst [vmem:[%s11019_s24 + $0xbd0] sm:$0xff] %v911_v58  ;;  %914 = vst [vmem:[%s11019_s24 + $0xbd8] sm:$0xff] %v913_v59  ;;  %v917_v61 = vld [vmem:[%s11014_s23 + $0x11e8] sm:$0xff]  ;;  %v919_v62 = vld [vmem:[%s11014_s23 + $0x11f0] sm:$0xff] }
  0xd1   : > { %916 = vst [vmem:[%s11019_s24 + $0xbe0] sm:$0xff] %v915_v60  ;;  %v921_v63 = vld [vmem:[%s11014_s23 + $0x11f8] sm:$0xff]  ;;  %918 = vst [vmem:[%s11019_s24 + $0xbe8] sm:$0xff] %v917_v61  ;;  %v923_v0 = vld [vmem:[%s11014_s23 + $0x1800] sm:$0xff] }
  0xd2   : > { %920 = vst [vmem:[%s11019_s24 + $0xbf0] sm:$0xff] %v919_v62  ;;  %922 = vst [vmem:[%s11019_s24 + $0xbf8] sm:$0xff] %v921_v63  ;;  %v925_v1 = vld [vmem:[%s11014_s23 + $0x1808] sm:$0xff]  ;;  %v927_v2 = vld [vmem:[%s11014_s23 + $0x1810] sm:$0xff] }
  0xd3   : > { %924 = vst [vmem:[%s11019_s24 + $0xc00] sm:$0xff] %v923_v0  ;;  %926 = vst [vmem:[%s11019_s24 + $0xc08] sm:$0xff] %v925_v1  ;;  %v929_v3 = vld [vmem:[%s11014_s23 + $0x1818] sm:$0xff]  ;;  %v931_v4 = vld [vmem:[%s11014_s23 + $0x1820] sm:$0xff] }
  0xd4   : > { %928 = vst [vmem:[%s11019_s24 + $0xc10] sm:$0xff] %v927_v2  ;;  %v933_v5 = vld [vmem:[%s11014_s23 + $0x1828] sm:$0xff]  ;;  %930 = vst [vmem:[%s11019_s24 + $0xc18] sm:$0xff] %v929_v3  ;;  %v935_v6 = vld [vmem:[%s11014_s23 + $0x1830] sm:$0xff] }
  0xd5   : > { %932 = vst [vmem:[%s11019_s24 + $0xc20] sm:$0xff] %v931_v4  ;;  %934 = vst [vmem:[%s11019_s24 + $0xc28] sm:$0xff] %v933_v5  ;;  %v937_v7 = vld [vmem:[%s11014_s23 + $0x1838] sm:$0xff]  ;;  %v939_v8 = vld [vmem:[%s11014_s23 + $0x1840] sm:$0xff] }
  0xd6   : > { %936 = vst [vmem:[%s11019_s24 + $0xc30] sm:$0xff] %v935_v6  ;;  %938 = vst [vmem:[%s11019_s24 + $0xc38] sm:$0xff] %v937_v7  ;;  %v941_v9 = vld [vmem:[%s11014_s23 + $0x1848] sm:$0xff]  ;;  %v943_v10 = vld [vmem:[%s11014_s23 + $0x1850] sm:$0xff] }
  0xd7   : > { %940 = vst [vmem:[%s11019_s24 + $0xc40] sm:$0xff] %v939_v8  ;;  %v945_v11 = vld [vmem:[%s11014_s23 + $0x1858] sm:$0xff]  ;;  %942 = vst [vmem:[%s11019_s24 + $0xc48] sm:$0xff] %v941_v9  ;;  %v947_v12 = vld [vmem:[%s11014_s23 + $0x1860] sm:$0xff] }
  0xd8   : > { %944 = vst [vmem:[%s11019_s24 + $0xc50] sm:$0xff] %v943_v10  ;;  %946 = vst [vmem:[%s11019_s24 + $0xc58] sm:$0xff] %v945_v11  ;;  %v949_v13 = vld [vmem:[%s11014_s23 + $0x1868] sm:$0xff]  ;;  %v951_v14 = vld [vmem:[%s11014_s23 + $0x1870] sm:$0xff] }
  0xd9   : > { %948 = vst [vmem:[%s11019_s24 + $0xc60] sm:$0xff] %v947_v12  ;;  %950 = vst [vmem:[%s11019_s24 + $0xc68] sm:$0xff] %v949_v13  ;;  %v953_v15 = vld [vmem:[%s11014_s23 + $0x1878] sm:$0xff]  ;;  %v955_v16 = vld [vmem:[%s11014_s23 + $0x1880] sm:$0xff] }
  0xda   : > { %952 = vst [vmem:[%s11019_s24 + $0xc70] sm:$0xff] %v951_v14  ;;  %v957_v17 = vld [vmem:[%s11014_s23 + $0x1888] sm:$0xff]  ;;  %954 = vst [vmem:[%s11019_s24 + $0xc78] sm:$0xff] %v953_v15  ;;  %v959_v18 = vld [vmem:[%s11014_s23 + $0x1890] sm:$0xff] }
  0xdb   : > { %956 = vst [vmem:[%s11019_s24 + $0xc80] sm:$0xff] %v955_v16  ;;  %958 = vst [vmem:[%s11019_s24 + $0xc88] sm:$0xff] %v957_v17  ;;  %v961_v19 = vld [vmem:[%s11014_s23 + $0x1898] sm:$0xff]  ;;  %v963_v20 = vld [vmem:[%s11014_s23 + $0x18a0] sm:$0xff] }
  0xdc   : > { %960 = vst [vmem:[%s11019_s24 + $0xc90] sm:$0xff] %v959_v18  ;;  %962 = vst [vmem:[%s11019_s24 + $0xc98] sm:$0xff] %v961_v19  ;;  %v965_v21 = vld [vmem:[%s11014_s23 + $0x18a8] sm:$0xff]  ;;  %v967_v22 = vld [vmem:[%s11014_s23 + $0x18b0] sm:$0xff] }
  0xdd   : > { %964 = vst [vmem:[%s11019_s24 + $0xca0] sm:$0xff] %v963_v20  ;;  %v969_v23 = vld [vmem:[%s11014_s23 + $0x18b8] sm:$0xff]  ;;  %966 = vst [vmem:[%s11019_s24 + $0xca8] sm:$0xff] %v965_v21  ;;  %v971_v24 = vld [vmem:[%s11014_s23 + $0x18c0] sm:$0xff] }
  0xde   : > { %968 = vst [vmem:[%s11019_s24 + $0xcb0] sm:$0xff] %v967_v22  ;;  %970 = vst [vmem:[%s11019_s24 + $0xcb8] sm:$0xff] %v969_v23  ;;  %v973_v25 = vld [vmem:[%s11014_s23 + $0x18c8] sm:$0xff]  ;;  %v975_v26 = vld [vmem:[%s11014_s23 + $0x18d0] sm:$0xff] }
  0xdf   : > { %972 = vst [vmem:[%s11019_s24 + $0xcc0] sm:$0xff] %v971_v24  ;;  %974 = vst [vmem:[%s11019_s24 + $0xcc8] sm:$0xff] %v973_v25  ;;  %v977_v27 = vld [vmem:[%s11014_s23 + $0x18d8] sm:$0xff]  ;;  %v979_v28 = vld [vmem:[%s11014_s23 + $0x18e0] sm:$0xff] }
  0xe0   : > { %976 = vst [vmem:[%s11019_s24 + $0xcd0] sm:$0xff] %v975_v26  ;;  %v981_v29 = vld [vmem:[%s11014_s23 + $0x18e8] sm:$0xff]  ;;  %978 = vst [vmem:[%s11019_s24 + $0xcd8] sm:$0xff] %v977_v27  ;;  %v983_v30 = vld [vmem:[%s11014_s23 + $0x18f0] sm:$0xff] }
  0xe1   : > { %980 = vst [vmem:[%s11019_s24 + $0xce0] sm:$0xff] %v979_v28  ;;  %982 = vst [vmem:[%s11019_s24 + $0xce8] sm:$0xff] %v981_v29  ;;  %v985_v31 = vld [vmem:[%s11014_s23 + $0x18f8] sm:$0xff]  ;;  %v987_v32 = vld [vmem:[%s11014_s23 + $0x1900] sm:$0xff] }
  0xe2   : > { %984 = vst [vmem:[%s11019_s24 + $0xcf0] sm:$0xff] %v983_v30  ;;  %986 = vst [vmem:[%s11019_s24 + $0xcf8] sm:$0xff] %v985_v31  ;;  %v989_v33 = vld [vmem:[%s11014_s23 + $0x1908] sm:$0xff]  ;;  %v991_v34 = vld [vmem:[%s11014_s23 + $0x1910] sm:$0xff] }
  0xe3   : > { %988 = vst [vmem:[%s11019_s24 + $0xd00] sm:$0xff] %v987_v32  ;;  %v993_v35 = vld [vmem:[%s11014_s23 + $0x1918] sm:$0xff]  ;;  %990 = vst [vmem:[%s11019_s24 + $0xd08] sm:$0xff] %v989_v33  ;;  %v995_v36 = vld [vmem:[%s11014_s23 + $0x1920] sm:$0xff] }
  0xe4   : > { %992 = vst [vmem:[%s11019_s24 + $0xd10] sm:$0xff] %v991_v34  ;;  %994 = vst [vmem:[%s11019_s24 + $0xd18] sm:$0xff] %v993_v35  ;;  %v997_v37 = vld [vmem:[%s11014_s23 + $0x1928] sm:$0xff]  ;;  %v999_v38 = vld [vmem:[%s11014_s23 + $0x1930] sm:$0xff] }
  0xe5   : > { %996 = vst [vmem:[%s11019_s24 + $0xd20] sm:$0xff] %v995_v36  ;;  %998 = vst [vmem:[%s11019_s24 + $0xd28] sm:$0xff] %v997_v37  ;;  %v1001_v39 = vld [vmem:[%s11014_s23 + $0x1938] sm:$0xff]  ;;  %v1003_v40 = vld [vmem:[%s11014_s23 + $0x1940] sm:$0xff] }
  0xe6   : > { %1000 = vst [vmem:[%s11019_s24 + $0xd30] sm:$0xff] %v999_v38  ;;  %v1005_v41 = vld [vmem:[%s11014_s23 + $0x1948] sm:$0xff]  ;;  %1002 = vst [vmem:[%s11019_s24 + $0xd38] sm:$0xff] %v1001_v39  ;;  %v1007_v42 = vld [vmem:[%s11014_s23 + $0x1950] sm:$0xff] }
  0xe7   : > { %1004 = vst [vmem:[%s11019_s24 + $0xd40] sm:$0xff] %v1003_v40  ;;  %1006 = vst [vmem:[%s11019_s24 + $0xd48] sm:$0xff] %v1005_v41  ;;  %v1009_v43 = vld [vmem:[%s11014_s23 + $0x1958] sm:$0xff]  ;;  %v1011_v44 = vld [vmem:[%s11014_s23 + $0x1960] sm:$0xff] }
  0xe8   : > { %1008 = vst [vmem:[%s11019_s24 + $0xd50] sm:$0xff] %v1007_v42  ;;  %1010 = vst [vmem:[%s11019_s24 + $0xd58] sm:$0xff] %v1009_v43  ;;  %v1013_v45 = vld [vmem:[%s11014_s23 + $0x1968] sm:$0xff]  ;;  %v1015_v46 = vld [vmem:[%s11014_s23 + $0x1970] sm:$0xff] }
  0xe9   : > { %1012 = vst [vmem:[%s11019_s24 + $0xd60] sm:$0xff] %v1011_v44  ;;  %v1017_v47 = vld [vmem:[%s11014_s23 + $0x1978] sm:$0xff]  ;;  %1014 = vst [vmem:[%s11019_s24 + $0xd68] sm:$0xff] %v1013_v45  ;;  %v1019_v48 = vld [vmem:[%s11014_s23 + $0x1980] sm:$0xff] }
  0xea   : > { %1016 = vst [vmem:[%s11019_s24 + $0xd70] sm:$0xff] %v1015_v46  ;;  %1018 = vst [vmem:[%s11019_s24 + $0xd78] sm:$0xff] %v1017_v47  ;;  %v1021_v49 = vld [vmem:[%s11014_s23 + $0x1988] sm:$0xff]  ;;  %v1023_v50 = vld [vmem:[%s11014_s23 + $0x1990] sm:$0xff] }
  0xeb   : > { %1020 = vst [vmem:[%s11019_s24 + $0xd80] sm:$0xff] %v1019_v48  ;;  %1022 = vst [vmem:[%s11019_s24 + $0xd88] sm:$0xff] %v1021_v49  ;;  %v1025_v51 = vld [vmem:[%s11014_s23 + $0x1998] sm:$0xff]  ;;  %v1027_v52 = vld [vmem:[%s11014_s23 + $0x19a0] sm:$0xff] }
  0xec   : > { %1024 = vst [vmem:[%s11019_s24 + $0xd90] sm:$0xff] %v1023_v50  ;;  %v1029_v53 = vld [vmem:[%s11014_s23 + $0x19a8] sm:$0xff]  ;;  %1026 = vst [vmem:[%s11019_s24 + $0xd98] sm:$0xff] %v1025_v51  ;;  %v1031_v54 = vld [vmem:[%s11014_s23 + $0x19b0] sm:$0xff] }
  0xed   : > { %1028 = vst [vmem:[%s11019_s24 + $0xda0] sm:$0xff] %v1027_v52  ;;  %1030 = vst [vmem:[%s11019_s24 + $0xda8] sm:$0xff] %v1029_v53  ;;  %v1033_v55 = vld [vmem:[%s11014_s23 + $0x19b8] sm:$0xff]  ;;  %v1035_v56 = vld [vmem:[%s11014_s23 + $0x19c0] sm:$0xff] }
  0xee   : > { %1032 = vst [vmem:[%s11019_s24 + $0xdb0] sm:$0xff] %v1031_v54  ;;  %1034 = vst [vmem:[%s11019_s24 + $0xdb8] sm:$0xff] %v1033_v55  ;;  %v1037_v57 = vld [vmem:[%s11014_s23 + $0x19c8] sm:$0xff]  ;;  %v1039_v58 = vld [vmem:[%s11014_s23 + $0x19d0] sm:$0xff] }
  0xef   : > { %1036 = vst [vmem:[%s11019_s24 + $0xdc0] sm:$0xff] %v1035_v56  ;;  %v1041_v59 = vld [vmem:[%s11014_s23 + $0x19d8] sm:$0xff]  ;;  %1038 = vst [vmem:[%s11019_s24 + $0xdc8] sm:$0xff] %v1037_v57  ;;  %v1043_v60 = vld [vmem:[%s11014_s23 + $0x19e0] sm:$0xff] }
  0xf0   : > { %1040 = vst [vmem:[%s11019_s24 + $0xdd0] sm:$0xff] %v1039_v58  ;;  %1042 = vst [vmem:[%s11019_s24 + $0xdd8] sm:$0xff] %v1041_v59  ;;  %v1045_v61 = vld [vmem:[%s11014_s23 + $0x19e8] sm:$0xff]  ;;  %v1047_v62 = vld [vmem:[%s11014_s23 + $0x19f0] sm:$0xff] }
  0xf1   : > { %1044 = vst [vmem:[%s11019_s24 + $0xde0] sm:$0xff] %v1043_v60  ;;  %1046 = vst [vmem:[%s11019_s24 + $0xde8] sm:$0xff] %v1045_v61  ;;  %v1049_v63 = vld [vmem:[%s11014_s23 + $0x19f8] sm:$0xff]  ;;  %v1051_v0 = vld [vmem:[%s11014_s23 + $0x1a00] sm:$0xff] }
  0xf2   : > { %1048 = vst [vmem:[%s11019_s24 + $0xdf0] sm:$0xff] %v1047_v62  ;;  %v1053_v1 = vld [vmem:[%s11014_s23 + $0x1a08] sm:$0xff]  ;;  %1050 = vst [vmem:[%s11019_s24 + $0xdf8] sm:$0xff] %v1049_v63  ;;  %v1055_v2 = vld [vmem:[%s11014_s23 + $0x1a10] sm:$0xff] }
  0xf3   : > { %1052 = vst [vmem:[%s11019_s24 + $0xe00] sm:$0xff] %v1051_v0  ;;  %1054 = vst [vmem:[%s11019_s24 + $0xe08] sm:$0xff] %v1053_v1  ;;  %v1057_v3 = vld [vmem:[%s11014_s23 + $0x1a18] sm:$0xff]  ;;  %v1059_v4 = vld [vmem:[%s11014_s23 + $0x1a20] sm:$0xff] }
  0xf4   : > { %1056 = vst [vmem:[%s11019_s24 + $0xe10] sm:$0xff] %v1055_v2  ;;  %1058 = vst [vmem:[%s11019_s24 + $0xe18] sm:$0xff] %v1057_v3  ;;  %v1061_v5 = vld [vmem:[%s11014_s23 + $0x1a28] sm:$0xff]  ;;  %v1063_v6 = vld [vmem:[%s11014_s23 + $0x1a30] sm:$0xff] }
  0xf5   : > { %1060 = vst [vmem:[%s11019_s24 + $0xe20] sm:$0xff] %v1059_v4  ;;  %v1065_v7 = vld [vmem:[%s11014_s23 + $0x1a38] sm:$0xff]  ;;  %1062 = vst [vmem:[%s11019_s24 + $0xe28] sm:$0xff] %v1061_v5  ;;  %v1067_v8 = vld [vmem:[%s11014_s23 + $0x1a40] sm:$0xff] }
  0xf6   : > { %1064 = vst [vmem:[%s11019_s24 + $0xe30] sm:$0xff] %v1063_v6  ;;  %1066 = vst [vmem:[%s11019_s24 + $0xe38] sm:$0xff] %v1065_v7  ;;  %v1069_v9 = vld [vmem:[%s11014_s23 + $0x1a48] sm:$0xff]  ;;  %v1071_v10 = vld [vmem:[%s11014_s23 + $0x1a50] sm:$0xff] }
  0xf7   : > { %1068 = vst [vmem:[%s11019_s24 + $0xe40] sm:$0xff] %v1067_v8  ;;  %1070 = vst [vmem:[%s11019_s24 + $0xe48] sm:$0xff] %v1069_v9  ;;  %v1073_v11 = vld [vmem:[%s11014_s23 + $0x1a58] sm:$0xff]  ;;  %v1075_v12 = vld [vmem:[%s11014_s23 + $0x1a60] sm:$0xff] }
  0xf8   : > { %1072 = vst [vmem:[%s11019_s24 + $0xe50] sm:$0xff] %v1071_v10  ;;  %v1077_v13 = vld [vmem:[%s11014_s23 + $0x1a68] sm:$0xff]  ;;  %1074 = vst [vmem:[%s11019_s24 + $0xe58] sm:$0xff] %v1073_v11  ;;  %v1079_v14 = vld [vmem:[%s11014_s23 + $0x1a70] sm:$0xff] }
  0xf9   : > { %1076 = vst [vmem:[%s11019_s24 + $0xe60] sm:$0xff] %v1075_v12  ;;  %1078 = vst [vmem:[%s11019_s24 + $0xe68] sm:$0xff] %v1077_v13  ;;  %v1081_v15 = vld [vmem:[%s11014_s23 + $0x1a78] sm:$0xff]  ;;  %v1083_v16 = vld [vmem:[%s11014_s23 + $0x1a80] sm:$0xff] }
  0xfa   : > { %1080 = vst [vmem:[%s11019_s24 + $0xe70] sm:$0xff] %v1079_v14  ;;  %1082 = vst [vmem:[%s11019_s24 + $0xe78] sm:$0xff] %v1081_v15  ;;  %v1085_v17 = vld [vmem:[%s11014_s23 + $0x1a88] sm:$0xff]  ;;  %v1087_v18 = vld [vmem:[%s11014_s23 + $0x1a90] sm:$0xff] }
  0xfb   : > { %1084 = vst [vmem:[%s11019_s24 + $0xe80] sm:$0xff] %v1083_v16  ;;  %v1089_v19 = vld [vmem:[%s11014_s23 + $0x1a98] sm:$0xff]  ;;  %1086 = vst [vmem:[%s11019_s24 + $0xe88] sm:$0xff] %v1085_v17  ;;  %v1091_v20 = vld [vmem:[%s11014_s23 + $0x1aa0] sm:$0xff] }
  0xfc   : > { %1088 = vst [vmem:[%s11019_s24 + $0xe90] sm:$0xff] %v1087_v18  ;;  %1090 = vst [vmem:[%s11019_s24 + $0xe98] sm:$0xff] %v1089_v19  ;;  %v1093_v21 = vld [vmem:[%s11014_s23 + $0x1aa8] sm:$0xff]  ;;  %v1095_v22 = vld [vmem:[%s11014_s23 + $0x1ab0] sm:$0xff] }
  0xfd   : > { %1092 = vst [vmem:[%s11019_s24 + $0xea0] sm:$0xff] %v1091_v20  ;;  %1094 = vst [vmem:[%s11019_s24 + $0xea8] sm:$0xff] %v1093_v21  ;;  %v1097_v23 = vld [vmem:[%s11014_s23 + $0x1ab8] sm:$0xff]  ;;  %v1099_v24 = vld [vmem:[%s11014_s23 + $0x1ac0] sm:$0xff] }
  0xfe   : > { %1096 = vst [vmem:[%s11019_s24 + $0xeb0] sm:$0xff] %v1095_v22  ;;  %v1101_v25 = vld [vmem:[%s11014_s23 + $0x1ac8] sm:$0xff]  ;;  %1098 = vst [vmem:[%s11019_s24 + $0xeb8] sm:$0xff] %v1097_v23  ;;  %v1103_v26 = vld [vmem:[%s11014_s23 + $0x1ad0] sm:$0xff] }
  0xff   : > { %1100 = vst [vmem:[%s11019_s24 + $0xec0] sm:$0xff] %v1099_v24  ;;  %1102 = vst [vmem:[%s11019_s24 + $0xec8] sm:$0xff] %v1101_v25  ;;  %v1105_v27 = vld [vmem:[%s11014_s23 + $0x1ad8] sm:$0xff]  ;;  %v1107_v28 = vld [vmem:[%s11014_s23 + $0x1ae0] sm:$0xff] }
 0x100   : > { %1104 = vst [vmem:[%s11019_s24 + $0xed0] sm:$0xff] %v1103_v26  ;;  %1106 = vst [vmem:[%s11019_s24 + $0xed8] sm:$0xff] %v1105_v27  ;;  %v1109_v29 = vld [vmem:[%s11014_s23 + $0x1ae8] sm:$0xff]  ;;  %v1111_v30 = vld [vmem:[%s11014_s23 + $0x1af0] sm:$0xff] }
 0x101   : > { %1108 = vst [vmem:[%s11019_s24 + $0xee0] sm:$0xff] %v1107_v28  ;;  %v1113_v31 = vld [vmem:[%s11014_s23 + $0x1af8] sm:$0xff]  ;;  %1110 = vst [vmem:[%s11019_s24 + $0xee8] sm:$0xff] %v1109_v29  ;;  %v1115_v32 = vld [vmem:[%s11014_s23 + $0x1b00] sm:$0xff] }
 0x102   : > { %1112 = vst [vmem:[%s11019_s24 + $0xef0] sm:$0xff] %v1111_v30  ;;  %1114 = vst [vmem:[%s11019_s24 + $0xef8] sm:$0xff] %v1113_v31  ;;  %v1117_v33 = vld [vmem:[%s11014_s23 + $0x1b08] sm:$0xff]  ;;  %v1119_v34 = vld [vmem:[%s11014_s23 + $0x1b10] sm:$0xff] }
 0x103   : > { %1116 = vst [vmem:[%s11019_s24 + $0xf00] sm:$0xff] %v1115_v32  ;;  %1118 = vst [vmem:[%s11019_s24 + $0xf08] sm:$0xff] %v1117_v33  ;;  %v1121_v35 = vld [vmem:[%s11014_s23 + $0x1b18] sm:$0xff]  ;;  %v1123_v36 = vld [vmem:[%s11014_s23 + $0x1b20] sm:$0xff] }
 0x104   : > { %1120 = vst [vmem:[%s11019_s24 + $0xf10] sm:$0xff] %v1119_v34  ;;  %v1125_v37 = vld [vmem:[%s11014_s23 + $0x1b28] sm:$0xff]  ;;  %1122 = vst [vmem:[%s11019_s24 + $0xf18] sm:$0xff] %v1121_v35  ;;  %v1127_v38 = vld [vmem:[%s11014_s23 + $0x1b30] sm:$0xff] }
 0x105   : > { %1124 = vst [vmem:[%s11019_s24 + $0xf20] sm:$0xff] %v1123_v36  ;;  %1126 = vst [vmem:[%s11019_s24 + $0xf28] sm:$0xff] %v1125_v37  ;;  %v1129_v39 = vld [vmem:[%s11014_s23 + $0x1b38] sm:$0xff]  ;;  %v1131_v40 = vld [vmem:[%s11014_s23 + $0x1b40] sm:$0xff] }
 0x106   : > { %1128 = vst [vmem:[%s11019_s24 + $0xf30] sm:$0xff] %v1127_v38  ;;  %1130 = vst [vmem:[%s11019_s24 + $0xf38] sm:$0xff] %v1129_v39  ;;  %v1133_v41 = vld [vmem:[%s11014_s23 + $0x1b48] sm:$0xff]  ;;  %v1135_v42 = vld [vmem:[%s11014_s23 + $0x1b50] sm:$0xff] }
 0x107   : > { %1132 = vst [vmem:[%s11019_s24 + $0xf40] sm:$0xff] %v1131_v40  ;;  %v1137_v43 = vld [vmem:[%s11014_s23 + $0x1b58] sm:$0xff]  ;;  %1134 = vst [vmem:[%s11019_s24 + $0xf48] sm:$0xff] %v1133_v41  ;;  %v1139_v44 = vld [vmem:[%s11014_s23 + $0x1b60] sm:$0xff] }
 0x108   : > { %1136 = vst [vmem:[%s11019_s24 + $0xf50] sm:$0xff] %v1135_v42  ;;  %1138 = vst [vmem:[%s11019_s24 + $0xf58] sm:$0xff] %v1137_v43  ;;  %v1141_v45 = vld [vmem:[%s11014_s23 + $0x1b68] sm:$0xff]  ;;  %v1143_v46 = vld [vmem:[%s11014_s23 + $0x1b70] sm:$0xff] }
 0x109   : > { %1140 = vst [vmem:[%s11019_s24 + $0xf60] sm:$0xff] %v1139_v44  ;;  %1142 = vst [vmem:[%s11019_s24 + $0xf68] sm:$0xff] %v1141_v45  ;;  %v1145_v47 = vld [vmem:[%s11014_s23 + $0x1b78] sm:$0xff]  ;;  %v1147_v48 = vld [vmem:[%s11014_s23 + $0x1b80] sm:$0xff] }
 0x10a   : > { %1144 = vst [vmem:[%s11019_s24 + $0xf70] sm:$0xff] %v1143_v46  ;;  %v1149_v49 = vld [vmem:[%s11014_s23 + $0x1b88] sm:$0xff]  ;;  %1146 = vst [vmem:[%s11019_s24 + $0xf78] sm:$0xff] %v1145_v47  ;;  %v1151_v50 = vld [vmem:[%s11014_s23 + $0x1b90] sm:$0xff] }
 0x10b   : > { %1148 = vst [vmem:[%s11019_s24 + $0xf80] sm:$0xff] %v1147_v48  ;;  %1150 = vst [vmem:[%s11019_s24 + $0xf88] sm:$0xff] %v1149_v49  ;;  %v1153_v51 = vld [vmem:[%s11014_s23 + $0x1b98] sm:$0xff]  ;;  %v1155_v52 = vld [vmem:[%s11014_s23 + $0x1ba0] sm:$0xff] }
 0x10c   : > { %1152 = vst [vmem:[%s11019_s24 + $0xf90] sm:$0xff] %v1151_v50  ;;  %1154 = vst [vmem:[%s11019_s24 + $0xf98] sm:$0xff] %v1153_v51  ;;  %v1157_v53 = vld [vmem:[%s11014_s23 + $0x1ba8] sm:$0xff]  ;;  %v1159_v54 = vld [vmem:[%s11014_s23 + $0x1bb0] sm:$0xff] }
 0x10d   : > { %1156 = vst [vmem:[%s11019_s24 + $0xfa0] sm:$0xff] %v1155_v52  ;;  %v1161_v55 = vld [vmem:[%s11014_s23 + $0x1bb8] sm:$0xff]  ;;  %1158 = vst [vmem:[%s11019_s24 + $0xfa8] sm:$0xff] %v1157_v53  ;;  %v1163_v56 = vld [vmem:[%s11014_s23 + $0x1bc0] sm:$0xff] }
 0x10e   : > { %1160 = vst [vmem:[%s11019_s24 + $0xfb0] sm:$0xff] %v1159_v54  ;;  %1162 = vst [vmem:[%s11019_s24 + $0xfb8] sm:$0xff] %v1161_v55  ;;  %v1165_v57 = vld [vmem:[%s11014_s23 + $0x1bc8] sm:$0xff]  ;;  %v1167_v58 = vld [vmem:[%s11014_s23 + $0x1bd0] sm:$0xff] }
 0x10f   : > { %1164 = vst [vmem:[%s11019_s24 + $0xfc0] sm:$0xff] %v1163_v56  ;;  %1166 = vst [vmem:[%s11019_s24 + $0xfc8] sm:$0xff] %v1165_v57  ;;  %v1169_v59 = vld [vmem:[%s11014_s23 + $0x1bd8] sm:$0xff]  ;;  %v1171_v60 = vld [vmem:[%s11014_s23 + $0x1be0] sm:$0xff] }
 0x110   : > { %1168 = vst [vmem:[%s11019_s24 + $0xfd0] sm:$0xff] %v1167_v58  ;;  %v1173_v61 = vld [vmem:[%s11014_s23 + $0x1be8] sm:$0xff]  ;;  %1170 = vst [vmem:[%s11019_s24 + $0xfd8] sm:$0xff] %v1169_v59  ;;  %v1175_v62 = vld [vmem:[%s11014_s23 + $0x1bf0] sm:$0xff] }
 0x111   : > { %1172 = vst [vmem:[%s11019_s24 + $0xfe0] sm:$0xff] %v1171_v60  ;;  %1174 = vst [vmem:[%s11019_s24 + $0xfe8] sm:$0xff] %v1173_v61  ;;  %v1177_v63 = vld [vmem:[%s11014_s23 + $0x1bf8] sm:$0xff]  ;;  %v1179_v0 = vld [vmem:[%s11014_s23 + $0x1c00] sm:$0xff] }
 0x112   : > { %1176 = vst [vmem:[%s11019_s24 + $0xff0] sm:$0xff] %v1175_v62  ;;  %1178 = vst [vmem:[%s11019_s24 + $0xff8] sm:$0xff] %v1177_v63  ;;  %v1181_v1 = vld [vmem:[%s11014_s23 + $0x1c08] sm:$0xff]  ;;  %v1183_v2 = vld [vmem:[%s11014_s23 + $0x1c10] sm:$0xff] }
 0x113   : > { %1180 = vst [vmem:[%s11019_s24 + $0x1000] sm:$0xff] %v1179_v0  ;;  %v1185_v3 = vld [vmem:[%s11014_s23 + $0x1c18] sm:$0xff]  ;;  %1182 = vst [vmem:[%s11019_s24 + $0x1008] sm:$0xff] %v1181_v1  ;;  %v1187_v4 = vld [vmem:[%s11014_s23 + $0x1c20] sm:$0xff] }
 0x114   : > { %1184 = vst [vmem:[%s11019_s24 + $0x1010] sm:$0xff] %v1183_v2  ;;  %1186 = vst [vmem:[%s11019_s24 + $0x1018] sm:$0xff] %v1185_v3  ;;  %v1189_v5 = vld [vmem:[%s11014_s23 + $0x1c28] sm:$0xff]  ;;  %v1191_v6 = vld [vmem:[%s11014_s23 + $0x1c30] sm:$0xff] }
 0x115   : > { %1188 = vst [vmem:[%s11019_s24 + $0x1020] sm:$0xff] %v1187_v4  ;;  %1190 = vst [vmem:[%s11019_s24 + $0x1028] sm:$0xff] %v1189_v5  ;;  %v1193_v7 = vld [vmem:[%s11014_s23 + $0x1c38] sm:$0xff]  ;;  %v1195_v8 = vld [vmem:[%s11014_s23 + $0x1c40] sm:$0xff] }
 0x116   : > { %1192 = vst [vmem:[%s11019_s24 + $0x1030] sm:$0xff] %v1191_v6  ;;  %v1197_v9 = vld [vmem:[%s11014_s23 + $0x1c48] sm:$0xff]  ;;  %1194 = vst [vmem:[%s11019_s24 + $0x1038] sm:$0xff] %v1193_v7  ;;  %v1199_v10 = vld [vmem:[%s11014_s23 + $0x1c50] sm:$0xff] }
 0x117   : > { %1196 = vst [vmem:[%s11019_s24 + $0x1040] sm:$0xff] %v1195_v8  ;;  %1198 = vst [vmem:[%s11019_s24 + $0x1048] sm:$0xff] %v1197_v9  ;;  %v1201_v11 = vld [vmem:[%s11014_s23 + $0x1c58] sm:$0xff]  ;;  %v1203_v12 = vld [vmem:[%s11014_s23 + $0x1c60] sm:$0xff] }
 0x118   : > { %1200 = vst [vmem:[%s11019_s24 + $0x1050] sm:$0xff] %v1199_v10  ;;  %1202 = vst [vmem:[%s11019_s24 + $0x1058] sm:$0xff] %v1201_v11  ;;  %v1205_v13 = vld [vmem:[%s11014_s23 + $0x1c68] sm:$0xff]  ;;  %v1207_v14 = vld [vmem:[%s11014_s23 + $0x1c70] sm:$0xff] }
 0x119   : > { %1204 = vst [vmem:[%s11019_s24 + $0x1060] sm:$0xff] %v1203_v12  ;;  %v1209_v15 = vld [vmem:[%s11014_s23 + $0x1c78] sm:$0xff]  ;;  %1206 = vst [vmem:[%s11019_s24 + $0x1068] sm:$0xff] %v1205_v13  ;;  %v1211_v16 = vld [vmem:[%s11014_s23 + $0x1c80] sm:$0xff] }
 0x11a   : > { %1208 = vst [vmem:[%s11019_s24 + $0x1070] sm:$0xff] %v1207_v14  ;;  %1210 = vst [vmem:[%s11019_s24 + $0x1078] sm:$0xff] %v1209_v15  ;;  %v1213_v17 = vld [vmem:[%s11014_s23 + $0x1c88] sm:$0xff]  ;;  %v1215_v18 = vld [vmem:[%s11014_s23 + $0x1c90] sm:$0xff] }
 0x11b   : > { %1212 = vst [vmem:[%s11019_s24 + $0x1080] sm:$0xff] %v1211_v16  ;;  %1214 = vst [vmem:[%s11019_s24 + $0x1088] sm:$0xff] %v1213_v17  ;;  %v1217_v19 = vld [vmem:[%s11014_s23 + $0x1c98] sm:$0xff]  ;;  %v1219_v20 = vld [vmem:[%s11014_s23 + $0x1ca0] sm:$0xff] }
 0x11c   : > { %1216 = vst [vmem:[%s11019_s24 + $0x1090] sm:$0xff] %v1215_v18  ;;  %v1221_v21 = vld [vmem:[%s11014_s23 + $0x1ca8] sm:$0xff]  ;;  %1218 = vst [vmem:[%s11019_s24 + $0x1098] sm:$0xff] %v1217_v19  ;;  %v1223_v22 = vld [vmem:[%s11014_s23 + $0x1cb0] sm:$0xff] }
 0x11d   : > { %1220 = vst [vmem:[%s11019_s24 + $0x10a0] sm:$0xff] %v1219_v20  ;;  %1222 = vst [vmem:[%s11019_s24 + $0x10a8] sm:$0xff] %v1221_v21  ;;  %v1225_v23 = vld [vmem:[%s11014_s23 + $0x1cb8] sm:$0xff]  ;;  %v1227_v24 = vld [vmem:[%s11014_s23 + $0x1cc0] sm:$0xff] }
 0x11e   : > { %1224 = vst [vmem:[%s11019_s24 + $0x10b0] sm:$0xff] %v1223_v22  ;;  %1226 = vst [vmem:[%s11019_s24 + $0x10b8] sm:$0xff] %v1225_v23  ;;  %v1229_v25 = vld [vmem:[%s11014_s23 + $0x1cc8] sm:$0xff]  ;;  %v1231_v26 = vld [vmem:[%s11014_s23 + $0x1cd0] sm:$0xff] }
 0x11f   : > { %1228 = vst [vmem:[%s11019_s24 + $0x10c0] sm:$0xff] %v1227_v24  ;;  %v1233_v27 = vld [vmem:[%s11014_s23 + $0x1cd8] sm:$0xff]  ;;  %1230 = vst [vmem:[%s11019_s24 + $0x10c8] sm:$0xff] %v1229_v25  ;;  %v1235_v28 = vld [vmem:[%s11014_s23 + $0x1ce0] sm:$0xff] }
 0x120   : > { %1232 = vst [vmem:[%s11019_s24 + $0x10d0] sm:$0xff] %v1231_v26  ;;  %1234 = vst [vmem:[%s11019_s24 + $0x10d8] sm:$0xff] %v1233_v27  ;;  %v1237_v29 = vld [vmem:[%s11014_s23 + $0x1ce8] sm:$0xff]  ;;  %v1239_v30 = vld [vmem:[%s11014_s23 + $0x1cf0] sm:$0xff] }
 0x121   : > { %1236 = vst [vmem:[%s11019_s24 + $0x10e0] sm:$0xff] %v1235_v28  ;;  %1238 = vst [vmem:[%s11019_s24 + $0x10e8] sm:$0xff] %v1237_v29  ;;  %v1241_v31 = vld [vmem:[%s11014_s23 + $0x1cf8] sm:$0xff]  ;;  %v1243_v32 = vld [vmem:[%s11014_s23 + $0x1d00] sm:$0xff] }
 0x122   : > { %1240 = vst [vmem:[%s11019_s24 + $0x10f0] sm:$0xff] %v1239_v30  ;;  %v1245_v33 = vld [vmem:[%s11014_s23 + $0x1d08] sm:$0xff]  ;;  %1242 = vst [vmem:[%s11019_s24 + $0x10f8] sm:$0xff] %v1241_v31  ;;  %v1247_v34 = vld [vmem:[%s11014_s23 + $0x1d10] sm:$0xff] }
 0x123   : > { %1244 = vst [vmem:[%s11019_s24 + $0x1100] sm:$0xff] %v1243_v32  ;;  %1246 = vst [vmem:[%s11019_s24 + $0x1108] sm:$0xff] %v1245_v33  ;;  %v1249_v35 = vld [vmem:[%s11014_s23 + $0x1d18] sm:$0xff]  ;;  %v1251_v36 = vld [vmem:[%s11014_s23 + $0x1d20] sm:$0xff] }
 0x124   : > { %1248 = vst [vmem:[%s11019_s24 + $0x1110] sm:$0xff] %v1247_v34  ;;  %1250 = vst [vmem:[%s11019_s24 + $0x1118] sm:$0xff] %v1249_v35  ;;  %v1253_v37 = vld [vmem:[%s11014_s23 + $0x1d28] sm:$0xff]  ;;  %v1255_v38 = vld [vmem:[%s11014_s23 + $0x1d30] sm:$0xff] }
 0x125   : > { %1252 = vst [vmem:[%s11019_s24 + $0x1120] sm:$0xff] %v1251_v36  ;;  %v1257_v39 = vld [vmem:[%s11014_s23 + $0x1d38] sm:$0xff]  ;;  %1254 = vst [vmem:[%s11019_s24 + $0x1128] sm:$0xff] %v1253_v37  ;;  %v1259_v40 = vld [vmem:[%s11014_s23 + $0x1d40] sm:$0xff] }
 0x126   : > { %1256 = vst [vmem:[%s11019_s24 + $0x1130] sm:$0xff] %v1255_v38  ;;  %1258 = vst [vmem:[%s11019_s24 + $0x1138] sm:$0xff] %v1257_v39  ;;  %v1261_v41 = vld [vmem:[%s11014_s23 + $0x1d48] sm:$0xff]  ;;  %v1263_v42 = vld [vmem:[%s11014_s23 + $0x1d50] sm:$0xff] }
 0x127   : > { %1260 = vst [vmem:[%s11019_s24 + $0x1140] sm:$0xff] %v1259_v40  ;;  %1262 = vst [vmem:[%s11019_s24 + $0x1148] sm:$0xff] %v1261_v41  ;;  %v1265_v43 = vld [vmem:[%s11014_s23 + $0x1d58] sm:$0xff]  ;;  %v1267_v44 = vld [vmem:[%s11014_s23 + $0x1d60] sm:$0xff] }
 0x128   : > { %1264 = vst [vmem:[%s11019_s24 + $0x1150] sm:$0xff] %v1263_v42  ;;  %v1269_v45 = vld [vmem:[%s11014_s23 + $0x1d68] sm:$0xff]  ;;  %1266 = vst [vmem:[%s11019_s24 + $0x1158] sm:$0xff] %v1265_v43  ;;  %v1271_v46 = vld [vmem:[%s11014_s23 + $0x1d70] sm:$0xff] }
 0x129   : > { %1268 = vst [vmem:[%s11019_s24 + $0x1160] sm:$0xff] %v1267_v44  ;;  %1270 = vst [vmem:[%s11019_s24 + $0x1168] sm:$0xff] %v1269_v45  ;;  %v1273_v47 = vld [vmem:[%s11014_s23 + $0x1d78] sm:$0xff]  ;;  %v1275_v48 = vld [vmem:[%s11014_s23 + $0x1d80] sm:$0xff] }
 0x12a   : > { %1272 = vst [vmem:[%s11019_s24 + $0x1170] sm:$0xff] %v1271_v46  ;;  %1274 = vst [vmem:[%s11019_s24 + $0x1178] sm:$0xff] %v1273_v47  ;;  %v1277_v49 = vld [vmem:[%s11014_s23 + $0x1d88] sm:$0xff]  ;;  %v1279_v50 = vld [vmem:[%s11014_s23 + $0x1d90] sm:$0xff] }
 0x12b   : > { %1276 = vst [vmem:[%s11019_s24 + $0x1180] sm:$0xff] %v1275_v48  ;;  %v1281_v51 = vld [vmem:[%s11014_s23 + $0x1d98] sm:$0xff]  ;;  %1278 = vst [vmem:[%s11019_s24 + $0x1188] sm:$0xff] %v1277_v49  ;;  %v1283_v52 = vld [vmem:[%s11014_s23 + $0x1da0] sm:$0xff] }
 0x12c   : > { %1280 = vst [vmem:[%s11019_s24 + $0x1190] sm:$0xff] %v1279_v50  ;;  %1282 = vst [vmem:[%s11019_s24 + $0x1198] sm:$0xff] %v1281_v51  ;;  %v1285_v53 = vld [vmem:[%s11014_s23 + $0x1da8] sm:$0xff]  ;;  %v1287_v54 = vld [vmem:[%s11014_s23 + $0x1db0] sm:$0xff] }
 0x12d   : > { %1284 = vst [vmem:[%s11019_s24 + $0x11a0] sm:$0xff] %v1283_v52  ;;  %1286 = vst [vmem:[%s11019_s24 + $0x11a8] sm:$0xff] %v1285_v53  ;;  %v1289_v55 = vld [vmem:[%s11014_s23 + $0x1db8] sm:$0xff]  ;;  %v1291_v56 = vld [vmem:[%s11014_s23 + $0x1dc0] sm:$0xff] }
 0x12e   : > { %1288 = vst [vmem:[%s11019_s24 + $0x11b0] sm:$0xff] %v1287_v54  ;;  %v1293_v57 = vld [vmem:[%s11014_s23 + $0x1dc8] sm:$0xff]  ;;  %1290 = vst [vmem:[%s11019_s24 + $0x11b8] sm:$0xff] %v1289_v55  ;;  %v1295_v58 = vld [vmem:[%s11014_s23 + $0x1dd0] sm:$0xff] }
 0x12f   : > { %1292 = vst [vmem:[%s11019_s24 + $0x11c0] sm:$0xff] %v1291_v56  ;;  %1294 = vst [vmem:[%s11019_s24 + $0x11c8] sm:$0xff] %v1293_v57  ;;  %v1297_v59 = vld [vmem:[%s11014_s23 + $0x1dd8] sm:$0xff]  ;;  %v1299_v60 = vld [vmem:[%s11014_s23 + $0x1de0] sm:$0xff] }
 0x130   : > { %1296 = vst [vmem:[%s11019_s24 + $0x11d0] sm:$0xff] %v1295_v58  ;;  %1298 = vst [vmem:[%s11019_s24 + $0x11d8] sm:$0xff] %v1297_v59  ;;  %v1301_v61 = vld [vmem:[%s11014_s23 + $0x1de8] sm:$0xff]  ;;  %v1303_v62 = vld [vmem:[%s11014_s23 + $0x1df0] sm:$0xff] }
 0x131   : > { %1300 = vst [vmem:[%s11019_s24 + $0x11e0] sm:$0xff] %v1299_v60  ;;  %v1305_v63 = vld [vmem:[%s11014_s23 + $0x1df8] sm:$0xff]  ;;  %1302 = vst [vmem:[%s11019_s24 + $0x11e8] sm:$0xff] %v1301_v61  ;;  %v1307_v0 = vld [vmem:[%s11014_s23 + $0x2400] sm:$0xff] }
 0x132   : > { %1304 = vst [vmem:[%s11019_s24 + $0x11f0] sm:$0xff] %v1303_v62  ;;  %1306 = vst [vmem:[%s11019_s24 + $0x11f8] sm:$0xff] %v1305_v63  ;;  %v1309_v1 = vld [vmem:[%s11014_s23 + $0x2408] sm:$0xff]  ;;  %v1311_v2 = vld [vmem:[%s11014_s23 + $0x2410] sm:$0xff] }
 0x133   : > { %1308 = vst [vmem:[%s11019_s24 + $0x1200] sm:$0xff] %v1307_v0  ;;  %1310 = vst [vmem:[%s11019_s24 + $0x1208] sm:$0xff] %v1309_v1  ;;  %v1313_v3 = vld [vmem:[%s11014_s23 + $0x2418] sm:$0xff]  ;;  %v1315_v4 = vld [vmem:[%s11014_s23 + $0x2420] sm:$0xff] }
 0x134   : > { %1312 = vst [vmem:[%s11019_s24 + $0x1210] sm:$0xff] %v1311_v2  ;;  %v1317_v5 = vld [vmem:[%s11014_s23 + $0x2428] sm:$0xff]  ;;  %1314 = vst [vmem:[%s11019_s24 + $0x1218] sm:$0xff] %v1313_v3  ;;  %v1319_v6 = vld [vmem:[%s11014_s23 + $0x2430] sm:$0xff] }
 0x135   : > { %1316 = vst [vmem:[%s11019_s24 + $0x1220] sm:$0xff] %v1315_v4  ;;  %1318 = vst [vmem:[%s11019_s24 + $0x1228] sm:$0xff] %v1317_v5  ;;  %v1321_v7 = vld [vmem:[%s11014_s23 + $0x2438] sm:$0xff]  ;;  %v1323_v8 = vld [vmem:[%s11014_s23 + $0x2440] sm:$0xff] }
 0x136   : > { %1320 = vst [vmem:[%s11019_s24 + $0x1230] sm:$0xff] %v1319_v6  ;;  %1322 = vst [vmem:[%s11019_s24 + $0x1238] sm:$0xff] %v1321_v7  ;;  %v1325_v9 = vld [vmem:[%s11014_s23 + $0x2448] sm:$0xff]  ;;  %v1327_v10 = vld [vmem:[%s11014_s23 + $0x2450] sm:$0xff] }
 0x137   : > { %1324 = vst [vmem:[%s11019_s24 + $0x1240] sm:$0xff] %v1323_v8  ;;  %v1329_v11 = vld [vmem:[%s11014_s23 + $0x2458] sm:$0xff]  ;;  %1326 = vst [vmem:[%s11019_s24 + $0x1248] sm:$0xff] %v1325_v9  ;;  %v1331_v12 = vld [vmem:[%s11014_s23 + $0x2460] sm:$0xff] }
 0x138   : > { %1328 = vst [vmem:[%s11019_s24 + $0x1250] sm:$0xff] %v1327_v10  ;;  %1330 = vst [vmem:[%s11019_s24 + $0x1258] sm:$0xff] %v1329_v11  ;;  %v1333_v13 = vld [vmem:[%s11014_s23 + $0x2468] sm:$0xff]  ;;  %v1335_v14 = vld [vmem:[%s11014_s23 + $0x2470] sm:$0xff] }
 0x139   : > { %1332 = vst [vmem:[%s11019_s24 + $0x1260] sm:$0xff] %v1331_v12  ;;  %1334 = vst [vmem:[%s11019_s24 + $0x1268] sm:$0xff] %v1333_v13  ;;  %v1337_v15 = vld [vmem:[%s11014_s23 + $0x2478] sm:$0xff]  ;;  %v1339_v16 = vld [vmem:[%s11014_s23 + $0x2480] sm:$0xff] }
 0x13a   : > { %1336 = vst [vmem:[%s11019_s24 + $0x1270] sm:$0xff] %v1335_v14  ;;  %v1341_v17 = vld [vmem:[%s11014_s23 + $0x2488] sm:$0xff]  ;;  %1338 = vst [vmem:[%s11019_s24 + $0x1278] sm:$0xff] %v1337_v15  ;;  %v1343_v18 = vld [vmem:[%s11014_s23 + $0x2490] sm:$0xff] }
 0x13b   : > { %1340 = vst [vmem:[%s11019_s24 + $0x1280] sm:$0xff] %v1339_v16  ;;  %1342 = vst [vmem:[%s11019_s24 + $0x1288] sm:$0xff] %v1341_v17  ;;  %v1345_v19 = vld [vmem:[%s11014_s23 + $0x2498] sm:$0xff]  ;;  %v1347_v20 = vld [vmem:[%s11014_s23 + $0x24a0] sm:$0xff] }
 0x13c   : > { %1344 = vst [vmem:[%s11019_s24 + $0x1290] sm:$0xff] %v1343_v18  ;;  %1346 = vst [vmem:[%s11019_s24 + $0x1298] sm:$0xff] %v1345_v19  ;;  %v1349_v21 = vld [vmem:[%s11014_s23 + $0x24a8] sm:$0xff]  ;;  %v1351_v22 = vld [vmem:[%s11014_s23 + $0x24b0] sm:$0xff] }
 0x13d   : > { %1348 = vst [vmem:[%s11019_s24 + $0x12a0] sm:$0xff] %v1347_v20  ;;  %v1353_v23 = vld [vmem:[%s11014_s23 + $0x24b8] sm:$0xff]  ;;  %1350 = vst [vmem:[%s11019_s24 + $0x12a8] sm:$0xff] %v1349_v21  ;;  %v1355_v24 = vld [vmem:[%s11014_s23 + $0x24c0] sm:$0xff] }
 0x13e   : > { %1352 = vst [vmem:[%s11019_s24 + $0x12b0] sm:$0xff] %v1351_v22  ;;  %1354 = vst [vmem:[%s11019_s24 + $0x12b8] sm:$0xff] %v1353_v23  ;;  %v1357_v25 = vld [vmem:[%s11014_s23 + $0x24c8] sm:$0xff]  ;;  %v1359_v26 = vld [vmem:[%s11014_s23 + $0x24d0] sm:$0xff] }
 0x13f   : > { %1356 = vst [vmem:[%s11019_s24 + $0x12c0] sm:$0xff] %v1355_v24  ;;  %1358 = vst [vmem:[%s11019_s24 + $0x12c8] sm:$0xff] %v1357_v25  ;;  %v1361_v27 = vld [vmem:[%s11014_s23 + $0x24d8] sm:$0xff]  ;;  %v1363_v28 = vld [vmem:[%s11014_s23 + $0x24e0] sm:$0xff] }
 0x140   : > { %1360 = vst [vmem:[%s11019_s24 + $0x12d0] sm:$0xff] %v1359_v26  ;;  %v1365_v29 = vld [vmem:[%s11014_s23 + $0x24e8] sm:$0xff]  ;;  %1362 = vst [vmem:[%s11019_s24 + $0x12d8] sm:$0xff] %v1361_v27  ;;  %v1367_v30 = vld [vmem:[%s11014_s23 + $0x24f0] sm:$0xff] }
 0x141   : > { %1364 = vst [vmem:[%s11019_s24 + $0x12e0] sm:$0xff] %v1363_v28  ;;  %1366 = vst [vmem:[%s11019_s24 + $0x12e8] sm:$0xff] %v1365_v29  ;;  %v1369_v31 = vld [vmem:[%s11014_s23 + $0x24f8] sm:$0xff]  ;;  %v1371_v32 = vld [vmem:[%s11014_s23 + $0x2500] sm:$0xff] }
 0x142   : > { %1368 = vst [vmem:[%s11019_s24 + $0x12f0] sm:$0xff] %v1367_v30  ;;  %1370 = vst [vmem:[%s11019_s24 + $0x12f8] sm:$0xff] %v1369_v31  ;;  %v1373_v33 = vld [vmem:[%s11014_s23 + $0x2508] sm:$0xff]  ;;  %v1375_v34 = vld [vmem:[%s11014_s23 + $0x2510] sm:$0xff] }
 0x143   : > { %1372 = vst [vmem:[%s11019_s24 + $0x1300] sm:$0xff] %v1371_v32  ;;  %v1377_v35 = vld [vmem:[%s11014_s23 + $0x2518] sm:$0xff]  ;;  %1374 = vst [vmem:[%s11019_s24 + $0x1308] sm:$0xff] %v1373_v33  ;;  %v1379_v36 = vld [vmem:[%s11014_s23 + $0x2520] sm:$0xff] }
 0x144   : > { %1376 = vst [vmem:[%s11019_s24 + $0x1310] sm:$0xff] %v1375_v34  ;;  %1378 = vst [vmem:[%s11019_s24 + $0x1318] sm:$0xff] %v1377_v35  ;;  %v1381_v37 = vld [vmem:[%s11014_s23 + $0x2528] sm:$0xff]  ;;  %v1383_v38 = vld [vmem:[%s11014_s23 + $0x2530] sm:$0xff] }
 0x145   : > { %1380 = vst [vmem:[%s11019_s24 + $0x1320] sm:$0xff] %v1379_v36  ;;  %1382 = vst [vmem:[%s11019_s24 + $0x1328] sm:$0xff] %v1381_v37  ;;  %v1385_v39 = vld [vmem:[%s11014_s23 + $0x2538] sm:$0xff]  ;;  %v1387_v40 = vld [vmem:[%s11014_s23 + $0x2540] sm:$0xff] }
 0x146   : > { %1384 = vst [vmem:[%s11019_s24 + $0x1330] sm:$0xff] %v1383_v38  ;;  %v1389_v41 = vld [vmem:[%s11014_s23 + $0x2548] sm:$0xff]  ;;  %1386 = vst [vmem:[%s11019_s24 + $0x1338] sm:$0xff] %v1385_v39  ;;  %v1391_v42 = vld [vmem:[%s11014_s23 + $0x2550] sm:$0xff] }
 0x147   : > { %1388 = vst [vmem:[%s11019_s24 + $0x1340] sm:$0xff] %v1387_v40  ;;  %1390 = vst [vmem:[%s11019_s24 + $0x1348] sm:$0xff] %v1389_v41  ;;  %v1393_v43 = vld [vmem:[%s11014_s23 + $0x2558] sm:$0xff]  ;;  %v1395_v44 = vld [vmem:[%s11014_s23 + $0x2560] sm:$0xff] }
 0x148   : > { %1392 = vst [vmem:[%s11019_s24 + $0x1350] sm:$0xff] %v1391_v42  ;;  %1394 = vst [vmem:[%s11019_s24 + $0x1358] sm:$0xff] %v1393_v43  ;;  %v1397_v45 = vld [vmem:[%s11014_s23 + $0x2568] sm:$0xff]  ;;  %v1399_v46 = vld [vmem:[%s11014_s23 + $0x2570] sm:$0xff] }
 0x149   : > { %1396 = vst [vmem:[%s11019_s24 + $0x1360] sm:$0xff] %v1395_v44  ;;  %v1401_v47 = vld [vmem:[%s11014_s23 + $0x2578] sm:$0xff]  ;;  %1398 = vst [vmem:[%s11019_s24 + $0x1368] sm:$0xff] %v1397_v45  ;;  %v1403_v48 = vld [vmem:[%s11014_s23 + $0x2580] sm:$0xff] }
 0x14a   : > { %1400 = vst [vmem:[%s11019_s24 + $0x1370] sm:$0xff] %v1399_v46  ;;  %1402 = vst [vmem:[%s11019_s24 + $0x1378] sm:$0xff] %v1401_v47  ;;  %v1405_v49 = vld [vmem:[%s11014_s23 + $0x2588] sm:$0xff]  ;;  %v1407_v50 = vld [vmem:[%s11014_s23 + $0x2590] sm:$0xff] }
 0x14b   : > { %1404 = vst [vmem:[%s11019_s24 + $0x1380] sm:$0xff] %v1403_v48  ;;  %1406 = vst [vmem:[%s11019_s24 + $0x1388] sm:$0xff] %v1405_v49  ;;  %v1409_v51 = vld [vmem:[%s11014_s23 + $0x2598] sm:$0xff]  ;;  %v1411_v52 = vld [vmem:[%s11014_s23 + $0x25a0] sm:$0xff] }
 0x14c   : > { %1408 = vst [vmem:[%s11019_s24 + $0x1390] sm:$0xff] %v1407_v50  ;;  %v1413_v53 = vld [vmem:[%s11014_s23 + $0x25a8] sm:$0xff]  ;;  %1410 = vst [vmem:[%s11019_s24 + $0x1398] sm:$0xff] %v1409_v51  ;;  %v1415_v54 = vld [vmem:[%s11014_s23 + $0x25b0] sm:$0xff] }
 0x14d   : > { %1412 = vst [vmem:[%s11019_s24 + $0x13a0] sm:$0xff] %v1411_v52  ;;  %1414 = vst [vmem:[%s11019_s24 + $0x13a8] sm:$0xff] %v1413_v53  ;;  %v1417_v55 = vld [vmem:[%s11014_s23 + $0x25b8] sm:$0xff]  ;;  %v1419_v56 = vld [vmem:[%s11014_s23 + $0x25c0] sm:$0xff] }
 0x14e   : > { %1416 = vst [vmem:[%s11019_s24 + $0x13b0] sm:$0xff] %v1415_v54  ;;  %1418 = vst [vmem:[%s11019_s24 + $0x13b8] sm:$0xff] %v1417_v55  ;;  %v1421_v57 = vld [vmem:[%s11014_s23 + $0x25c8] sm:$0xff]  ;;  %v1423_v58 = vld [vmem:[%s11014_s23 + $0x25d0] sm:$0xff] }
 0x14f   : > { %1420 = vst [vmem:[%s11019_s24 + $0x13c0] sm:$0xff] %v1419_v56  ;;  %v1425_v59 = vld [vmem:[%s11014_s23 + $0x25d8] sm:$0xff]  ;;  %1422 = vst [vmem:[%s11019_s24 + $0x13c8] sm:$0xff] %v1421_v57  ;;  %v1427_v60 = vld [vmem:[%s11014_s23 + $0x25e0] sm:$0xff] }
 0x150   : > { %1424 = vst [vmem:[%s11019_s24 + $0x13d0] sm:$0xff] %v1423_v58  ;;  %1426 = vst [vmem:[%s11019_s24 + $0x13d8] sm:$0xff] %v1425_v59  ;;  %v1429_v61 = vld [vmem:[%s11014_s23 + $0x25e8] sm:$0xff]  ;;  %v1431_v62 = vld [vmem:[%s11014_s23 + $0x25f0] sm:$0xff] }
 0x151   : > { %1428 = vst [vmem:[%s11019_s24 + $0x13e0] sm:$0xff] %v1427_v60  ;;  %1430 = vst [vmem:[%s11019_s24 + $0x13e8] sm:$0xff] %v1429_v61  ;;  %v1433_v63 = vld [vmem:[%s11014_s23 + $0x25f8] sm:$0xff]  ;;  %v1435_v0 = vld [vmem:[%s11014_s23 + $0x2600] sm:$0xff] }
 0x152   : > { %1432 = vst [vmem:[%s11019_s24 + $0x13f0] sm:$0xff] %v1431_v62  ;;  %v1437_v1 = vld [vmem:[%s11014_s23 + $0x2608] sm:$0xff]  ;;  %1434 = vst [vmem:[%s11019_s24 + $0x13f8] sm:$0xff] %v1433_v63  ;;  %v1439_v2 = vld [vmem:[%s11014_s23 + $0x2610] sm:$0xff] }
 0x153   : > { %1436 = vst [vmem:[%s11019_s24 + $0x1400] sm:$0xff] %v1435_v0  ;;  %1438 = vst [vmem:[%s11019_s24 + $0x1408] sm:$0xff] %v1437_v1  ;;  %v1441_v3 = vld [vmem:[%s11014_s23 + $0x2618] sm:$0xff]  ;;  %v1443_v4 = vld [vmem:[%s11014_s23 + $0x2620] sm:$0xff] }
 0x154   : > { %1440 = vst [vmem:[%s11019_s24 + $0x1410] sm:$0xff] %v1439_v2  ;;  %1442 = vst [vmem:[%s11019_s24 + $0x1418] sm:$0xff] %v1441_v3  ;;  %v1445_v5 = vld [vmem:[%s11014_s23 + $0x2628] sm:$0xff]  ;;  %v1447_v6 = vld [vmem:[%s11014_s23 + $0x2630] sm:$0xff] }
 0x155   : > { %1444 = vst [vmem:[%s11019_s24 + $0x1420] sm:$0xff] %v1443_v4  ;;  %v1449_v7 = vld [vmem:[%s11014_s23 + $0x2638] sm:$0xff]  ;;  %1446 = vst [vmem:[%s11019_s24 + $0x1428] sm:$0xff] %v1445_v5  ;;  %v1451_v8 = vld [vmem:[%s11014_s23 + $0x2640] sm:$0xff] }
 0x156   : > { %1448 = vst [vmem:[%s11019_s24 + $0x1430] sm:$0xff] %v1447_v6  ;;  %1450 = vst [vmem:[%s11019_s24 + $0x1438] sm:$0xff] %v1449_v7  ;;  %v1453_v9 = vld [vmem:[%s11014_s23 + $0x2648] sm:$0xff]  ;;  %v1455_v10 = vld [vmem:[%s11014_s23 + $0x2650] sm:$0xff] }
 0x157   : > { %1452 = vst [vmem:[%s11019_s24 + $0x1440] sm:$0xff] %v1451_v8  ;;  %1454 = vst [vmem:[%s11019_s24 + $0x1448] sm:$0xff] %v1453_v9  ;;  %v1457_v11 = vld [vmem:[%s11014_s23 + $0x2658] sm:$0xff]  ;;  %v1459_v12 = vld [vmem:[%s11014_s23 + $0x2660] sm:$0xff] }
 0x158   : > { %1456 = vst [vmem:[%s11019_s24 + $0x1450] sm:$0xff] %v1455_v10  ;;  %v1461_v13 = vld [vmem:[%s11014_s23 + $0x2668] sm:$0xff]  ;;  %1458 = vst [vmem:[%s11019_s24 + $0x1458] sm:$0xff] %v1457_v11  ;;  %v1463_v14 = vld [vmem:[%s11014_s23 + $0x2670] sm:$0xff] }
 0x159   : > { %1460 = vst [vmem:[%s11019_s24 + $0x1460] sm:$0xff] %v1459_v12  ;;  %1462 = vst [vmem:[%s11019_s24 + $0x1468] sm:$0xff] %v1461_v13  ;;  %v1465_v15 = vld [vmem:[%s11014_s23 + $0x2678] sm:$0xff]  ;;  %v1467_v16 = vld [vmem:[%s11014_s23 + $0x2680] sm:$0xff] }
 0x15a   : > { %1464 = vst [vmem:[%s11019_s24 + $0x1470] sm:$0xff] %v1463_v14  ;;  %1466 = vst [vmem:[%s11019_s24 + $0x1478] sm:$0xff] %v1465_v15  ;;  %v1469_v17 = vld [vmem:[%s11014_s23 + $0x2688] sm:$0xff]  ;;  %v1471_v18 = vld [vmem:[%s11014_s23 + $0x2690] sm:$0xff] }
 0x15b   : > { %1468 = vst [vmem:[%s11019_s24 + $0x1480] sm:$0xff] %v1467_v16  ;;  %v1473_v19 = vld [vmem:[%s11014_s23 + $0x2698] sm:$0xff]  ;;  %1470 = vst [vmem:[%s11019_s24 + $0x1488] sm:$0xff] %v1469_v17  ;;  %v1475_v20 = vld [vmem:[%s11014_s23 + $0x26a0] sm:$0xff] }
 0x15c   : > { %1472 = vst [vmem:[%s11019_s24 + $0x1490] sm:$0xff] %v1471_v18  ;;  %1474 = vst [vmem:[%s11019_s24 + $0x1498] sm:$0xff] %v1473_v19  ;;  %v1477_v21 = vld [vmem:[%s11014_s23 + $0x26a8] sm:$0xff]  ;;  %v1479_v22 = vld [vmem:[%s11014_s23 + $0x26b0] sm:$0xff] }
 0x15d   : > { %1476 = vst [vmem:[%s11019_s24 + $0x14a0] sm:$0xff] %v1475_v20  ;;  %1478 = vst [vmem:[%s11019_s24 + $0x14a8] sm:$0xff] %v1477_v21  ;;  %v1481_v23 = vld [vmem:[%s11014_s23 + $0x26b8] sm:$0xff]  ;;  %v1483_v24 = vld [vmem:[%s11014_s23 + $0x26c0] sm:$0xff] }
 0x15e   : > { %1480 = vst [vmem:[%s11019_s24 + $0x14b0] sm:$0xff] %v1479_v22  ;;  %v1485_v25 = vld [vmem:[%s11014_s23 + $0x26c8] sm:$0xff]  ;;  %1482 = vst [vmem:[%s11019_s24 + $0x14b8] sm:$0xff] %v1481_v23  ;;  %v1487_v26 = vld [vmem:[%s11014_s23 + $0x26d0] sm:$0xff] }
 0x15f   : > { %1484 = vst [vmem:[%s11019_s24 + $0x14c0] sm:$0xff] %v1483_v24  ;;  %1486 = vst [vmem:[%s11019_s24 + $0x14c8] sm:$0xff] %v1485_v25  ;;  %v1489_v27 = vld [vmem:[%s11014_s23 + $0x26d8] sm:$0xff]  ;;  %v1491_v28 = vld [vmem:[%s11014_s23 + $0x26e0] sm:$0xff] }
 0x160   : > { %1488 = vst [vmem:[%s11019_s24 + $0x14d0] sm:$0xff] %v1487_v26  ;;  %1490 = vst [vmem:[%s11019_s24 + $0x14d8] sm:$0xff] %v1489_v27  ;;  %v1493_v29 = vld [vmem:[%s11014_s23 + $0x26e8] sm:$0xff]  ;;  %v1495_v30 = vld [vmem:[%s11014_s23 + $0x26f0] sm:$0xff] }
 0x161   : > { %1492 = vst [vmem:[%s11019_s24 + $0x14e0] sm:$0xff] %v1491_v28  ;;  %v1497_v31 = vld [vmem:[%s11014_s23 + $0x26f8] sm:$0xff]  ;;  %1494 = vst [vmem:[%s11019_s24 + $0x14e8] sm:$0xff] %v1493_v29  ;;  %v1499_v32 = vld [vmem:[%s11014_s23 + $0x2700] sm:$0xff] }
 0x162   : > { %1496 = vst [vmem:[%s11019_s24 + $0x14f0] sm:$0xff] %v1495_v30  ;;  %1498 = vst [vmem:[%s11019_s24 + $0x14f8] sm:$0xff] %v1497_v31  ;;  %v1501_v33 = vld [vmem:[%s11014_s23 + $0x2708] sm:$0xff]  ;;  %v1503_v34 = vld [vmem:[%s11014_s23 + $0x2710] sm:$0xff] }
 0x163   : > { %1500 = vst [vmem:[%s11019_s24 + $0x1500] sm:$0xff] %v1499_v32  ;;  %1502 = vst [vmem:[%s11019_s24 + $0x1508] sm:$0xff] %v1501_v33  ;;  %v1505_v35 = vld [vmem:[%s11014_s23 + $0x2718] sm:$0xff]  ;;  %v1507_v36 = vld [vmem:[%s11014_s23 + $0x2720] sm:$0xff] }
 0x164   : > { %1504 = vst [vmem:[%s11019_s24 + $0x1510] sm:$0xff] %v1503_v34  ;;  %v1509_v37 = vld [vmem:[%s11014_s23 + $0x2728] sm:$0xff]  ;;  %1506 = vst [vmem:[%s11019_s24 + $0x1518] sm:$0xff] %v1505_v35  ;;  %v1511_v38 = vld [vmem:[%s11014_s23 + $0x2730] sm:$0xff] }
 0x165   : > { %1508 = vst [vmem:[%s11019_s24 + $0x1520] sm:$0xff] %v1507_v36  ;;  %1510 = vst [vmem:[%s11019_s24 + $0x1528] sm:$0xff] %v1509_v37  ;;  %v1513_v39 = vld [vmem:[%s11014_s23 + $0x2738] sm:$0xff]  ;;  %v1515_v40 = vld [vmem:[%s11014_s23 + $0x2740] sm:$0xff] }
 0x166   : > { %1512 = vst [vmem:[%s11019_s24 + $0x1530] sm:$0xff] %v1511_v38  ;;  %1514 = vst [vmem:[%s11019_s24 + $0x1538] sm:$0xff] %v1513_v39  ;;  %v1517_v41 = vld [vmem:[%s11014_s23 + $0x2748] sm:$0xff]  ;;  %v1519_v42 = vld [vmem:[%s11014_s23 + $0x2750] sm:$0xff] }
 0x167   : > { %1516 = vst [vmem:[%s11019_s24 + $0x1540] sm:$0xff] %v1515_v40  ;;  %v1521_v43 = vld [vmem:[%s11014_s23 + $0x2758] sm:$0xff]  ;;  %1518 = vst [vmem:[%s11019_s24 + $0x1548] sm:$0xff] %v1517_v41  ;;  %v1523_v44 = vld [vmem:[%s11014_s23 + $0x2760] sm:$0xff] }
 0x168   : > { %1520 = vst [vmem:[%s11019_s24 + $0x1550] sm:$0xff] %v1519_v42  ;;  %1522 = vst [vmem:[%s11019_s24 + $0x1558] sm:$0xff] %v1521_v43  ;;  %v1525_v45 = vld [vmem:[%s11014_s23 + $0x2768] sm:$0xff]  ;;  %v1527_v46 = vld [vmem:[%s11014_s23 + $0x2770] sm:$0xff] }
 0x169   : > { %1524 = vst [vmem:[%s11019_s24 + $0x1560] sm:$0xff] %v1523_v44  ;;  %1526 = vst [vmem:[%s11019_s24 + $0x1568] sm:$0xff] %v1525_v45  ;;  %v1529_v47 = vld [vmem:[%s11014_s23 + $0x2778] sm:$0xff]  ;;  %v1531_v48 = vld [vmem:[%s11014_s23 + $0x2780] sm:$0xff] }
 0x16a   : > { %1528 = vst [vmem:[%s11019_s24 + $0x1570] sm:$0xff] %v1527_v46  ;;  %v1533_v49 = vld [vmem:[%s11014_s23 + $0x2788] sm:$0xff]  ;;  %1530 = vst [vmem:[%s11019_s24 + $0x1578] sm:$0xff] %v1529_v47  ;;  %v1535_v50 = vld [vmem:[%s11014_s23 + $0x2790] sm:$0xff] }
 0x16b   : > { %1532 = vst [vmem:[%s11019_s24 + $0x1580] sm:$0xff] %v1531_v48  ;;  %1534 = vst [vmem:[%s11019_s24 + $0x1588] sm:$0xff] %v1533_v49  ;;  %v1537_v51 = vld [vmem:[%s11014_s23 + $0x2798] sm:$0xff]  ;;  %v1539_v52 = vld [vmem:[%s11014_s23 + $0x27a0] sm:$0xff] }
 0x16c   : > { %1536 = vst [vmem:[%s11019_s24 + $0x1590] sm:$0xff] %v1535_v50  ;;  %1538 = vst [vmem:[%s11019_s24 + $0x1598] sm:$0xff] %v1537_v51  ;;  %v1541_v53 = vld [vmem:[%s11014_s23 + $0x27a8] sm:$0xff]  ;;  %v1543_v54 = vld [vmem:[%s11014_s23 + $0x27b0] sm:$0xff] }
 0x16d   : > { %1540 = vst [vmem:[%s11019_s24 + $0x15a0] sm:$0xff] %v1539_v52  ;;  %v1545_v55 = vld [vmem:[%s11014_s23 + $0x27b8] sm:$0xff]  ;;  %1542 = vst [vmem:[%s11019_s24 + $0x15a8] sm:$0xff] %v1541_v53  ;;  %v1547_v56 = vld [vmem:[%s11014_s23 + $0x27c0] sm:$0xff] }
 0x16e   : > { %1544 = vst [vmem:[%s11019_s24 + $0x15b0] sm:$0xff] %v1543_v54  ;;  %1546 = vst [vmem:[%s11019_s24 + $0x15b8] sm:$0xff] %v1545_v55  ;;  %v1549_v57 = vld [vmem:[%s11014_s23 + $0x27c8] sm:$0xff]  ;;  %v1551_v58 = vld [vmem:[%s11014_s23 + $0x27d0] sm:$0xff] }
 0x16f   : > { %1548 = vst [vmem:[%s11019_s24 + $0x15c0] sm:$0xff] %v1547_v56  ;;  %1550 = vst [vmem:[%s11019_s24 + $0x15c8] sm:$0xff] %v1549_v57  ;;  %v1553_v59 = vld [vmem:[%s11014_s23 + $0x27d8] sm:$0xff]  ;;  %v1555_v60 = vld [vmem:[%s11014_s23 + $0x27e0] sm:$0xff] }
 0x170   : > { %1552 = vst [vmem:[%s11019_s24 + $0x15d0] sm:$0xff] %v1551_v58  ;;  %v1557_v61 = vld [vmem:[%s11014_s23 + $0x27e8] sm:$0xff]  ;;  %1554 = vst [vmem:[%s11019_s24 + $0x15d8] sm:$0xff] %v1553_v59  ;;  %v1559_v62 = vld [vmem:[%s11014_s23 + $0x27f0] sm:$0xff] }
 0x171   : > { %1556 = vst [vmem:[%s11019_s24 + $0x15e0] sm:$0xff] %v1555_v60  ;;  %1558 = vst [vmem:[%s11019_s24 + $0x15e8] sm:$0xff] %v1557_v61  ;;  %v1561_v63 = vld [vmem:[%s11014_s23 + $0x27f8] sm:$0xff]  ;;  %v1563_v0 = vld [vmem:[%s11014_s23 + $0x2800] sm:$0xff] }
 0x172   : > { %1560 = vst [vmem:[%s11019_s24 + $0x15f0] sm:$0xff] %v1559_v62  ;;  %1562 = vst [vmem:[%s11019_s24 + $0x15f8] sm:$0xff] %v1561_v63  ;;  %v1565_v1 = vld [vmem:[%s11014_s23 + $0x2808] sm:$0xff]  ;;  %v1567_v2 = vld [vmem:[%s11014_s23 + $0x2810] sm:$0xff] }
 0x173   : > { %1564 = vst [vmem:[%s11019_s24 + $0x1600] sm:$0xff] %v1563_v0  ;;  %v1569_v3 = vld [vmem:[%s11014_s23 + $0x2818] sm:$0xff]  ;;  %1566 = vst [vmem:[%s11019_s24 + $0x1608] sm:$0xff] %v1565_v1  ;;  %v1571_v4 = vld [vmem:[%s11014_s23 + $0x2820] sm:$0xff] }
 0x174   : > { %1568 = vst [vmem:[%s11019_s24 + $0x1610] sm:$0xff] %v1567_v2  ;;  %1570 = vst [vmem:[%s11019_s24 + $0x1618] sm:$0xff] %v1569_v3  ;;  %v1573_v5 = vld [vmem:[%s11014_s23 + $0x2828] sm:$0xff]  ;;  %v1575_v6 = vld [vmem:[%s11014_s23 + $0x2830] sm:$0xff] }
 0x175   : > { %1572 = vst [vmem:[%s11019_s24 + $0x1620] sm:$0xff] %v1571_v4  ;;  %1574 = vst [vmem:[%s11019_s24 + $0x1628] sm:$0xff] %v1573_v5  ;;  %v1577_v7 = vld [vmem:[%s11014_s23 + $0x2838] sm:$0xff]  ;;  %v1579_v8 = vld [vmem:[%s11014_s23 + $0x2840] sm:$0xff] }
 0x176   : > { %1576 = vst [vmem:[%s11019_s24 + $0x1630] sm:$0xff] %v1575_v6  ;;  %v1581_v9 = vld [vmem:[%s11014_s23 + $0x2848] sm:$0xff]  ;;  %1578 = vst [vmem:[%s11019_s24 + $0x1638] sm:$0xff] %v1577_v7  ;;  %v1583_v10 = vld [vmem:[%s11014_s23 + $0x2850] sm:$0xff] }
 0x177   : > { %1580 = vst [vmem:[%s11019_s24 + $0x1640] sm:$0xff] %v1579_v8  ;;  %1582 = vst [vmem:[%s11019_s24 + $0x1648] sm:$0xff] %v1581_v9  ;;  %v1585_v11 = vld [vmem:[%s11014_s23 + $0x2858] sm:$0xff]  ;;  %v1587_v12 = vld [vmem:[%s11014_s23 + $0x2860] sm:$0xff] }
 0x178   : > { %1584 = vst [vmem:[%s11019_s24 + $0x1650] sm:$0xff] %v1583_v10  ;;  %1586 = vst [vmem:[%s11019_s24 + $0x1658] sm:$0xff] %v1585_v11  ;;  %v1589_v13 = vld [vmem:[%s11014_s23 + $0x2868] sm:$0xff]  ;;  %v1591_v14 = vld [vmem:[%s11014_s23 + $0x2870] sm:$0xff] }
 0x179   : > { %1588 = vst [vmem:[%s11019_s24 + $0x1660] sm:$0xff] %v1587_v12  ;;  %v1593_v15 = vld [vmem:[%s11014_s23 + $0x2878] sm:$0xff]  ;;  %1590 = vst [vmem:[%s11019_s24 + $0x1668] sm:$0xff] %v1589_v13  ;;  %v1595_v16 = vld [vmem:[%s11014_s23 + $0x2880] sm:$0xff] }
 0x17a   : > { %1592 = vst [vmem:[%s11019_s24 + $0x1670] sm:$0xff] %v1591_v14  ;;  %1594 = vst [vmem:[%s11019_s24 + $0x1678] sm:$0xff] %v1593_v15  ;;  %v1597_v17 = vld [vmem:[%s11014_s23 + $0x2888] sm:$0xff]  ;;  %v1599_v18 = vld [vmem:[%s11014_s23 + $0x2890] sm:$0xff] }
 0x17b   : > { %1596 = vst [vmem:[%s11019_s24 + $0x1680] sm:$0xff] %v1595_v16  ;;  %1598 = vst [vmem:[%s11019_s24 + $0x1688] sm:$0xff] %v1597_v17  ;;  %v1601_v19 = vld [vmem:[%s11014_s23 + $0x2898] sm:$0xff]  ;;  %v1603_v20 = vld [vmem:[%s11014_s23 + $0x28a0] sm:$0xff] }
 0x17c   : > { %1600 = vst [vmem:[%s11019_s24 + $0x1690] sm:$0xff] %v1599_v18  ;;  %v1605_v21 = vld [vmem:[%s11014_s23 + $0x28a8] sm:$0xff]  ;;  %1602 = vst [vmem:[%s11019_s24 + $0x1698] sm:$0xff] %v1601_v19  ;;  %v1607_v22 = vld [vmem:[%s11014_s23 + $0x28b0] sm:$0xff] }
 0x17d   : > { %1604 = vst [vmem:[%s11019_s24 + $0x16a0] sm:$0xff] %v1603_v20  ;;  %1606 = vst [vmem:[%s11019_s24 + $0x16a8] sm:$0xff] %v1605_v21  ;;  %v1609_v23 = vld [vmem:[%s11014_s23 + $0x28b8] sm:$0xff]  ;;  %v1611_v24 = vld [vmem:[%s11014_s23 + $0x28c0] sm:$0xff] }
 0x17e   : > { %1608 = vst [vmem:[%s11019_s24 + $0x16b0] sm:$0xff] %v1607_v22  ;;  %1610 = vst [vmem:[%s11019_s24 + $0x16b8] sm:$0xff] %v1609_v23  ;;  %v1613_v25 = vld [vmem:[%s11014_s23 + $0x28c8] sm:$0xff]  ;;  %v1615_v26 = vld [vmem:[%s11014_s23 + $0x28d0] sm:$0xff] }
 0x17f   : > { %1612 = vst [vmem:[%s11019_s24 + $0x16c0] sm:$0xff] %v1611_v24  ;;  %v1617_v27 = vld [vmem:[%s11014_s23 + $0x28d8] sm:$0xff]  ;;  %1614 = vst [vmem:[%s11019_s24 + $0x16c8] sm:$0xff] %v1613_v25  ;;  %v1619_v28 = vld [vmem:[%s11014_s23 + $0x28e0] sm:$0xff] }
 0x180   : > { %1616 = vst [vmem:[%s11019_s24 + $0x16d0] sm:$0xff] %v1615_v26  ;;  %1618 = vst [vmem:[%s11019_s24 + $0x16d8] sm:$0xff] %v1617_v27  ;;  %v1621_v29 = vld [vmem:[%s11014_s23 + $0x28e8] sm:$0xff]  ;;  %v1623_v30 = vld [vmem:[%s11014_s23 + $0x28f0] sm:$0xff] }
 0x181   : > { %1620 = vst [vmem:[%s11019_s24 + $0x16e0] sm:$0xff] %v1619_v28  ;;  %1622 = vst [vmem:[%s11019_s24 + $0x16e8] sm:$0xff] %v1621_v29  ;;  %v1625_v31 = vld [vmem:[%s11014_s23 + $0x28f8] sm:$0xff]  ;;  %v1627_v32 = vld [vmem:[%s11014_s23 + $0x2900] sm:$0xff] }
 0x182   : > { %1624 = vst [vmem:[%s11019_s24 + $0x16f0] sm:$0xff] %v1623_v30  ;;  %v1629_v33 = vld [vmem:[%s11014_s23 + $0x2908] sm:$0xff]  ;;  %1626 = vst [vmem:[%s11019_s24 + $0x16f8] sm:$0xff] %v1625_v31  ;;  %v1631_v34 = vld [vmem:[%s11014_s23 + $0x2910] sm:$0xff] }
 0x183   : > { %1628 = vst [vmem:[%s11019_s24 + $0x1700] sm:$0xff] %v1627_v32  ;;  %1630 = vst [vmem:[%s11019_s24 + $0x1708] sm:$0xff] %v1629_v33  ;;  %v1633_v35 = vld [vmem:[%s11014_s23 + $0x2918] sm:$0xff]  ;;  %v1635_v36 = vld [vmem:[%s11014_s23 + $0x2920] sm:$0xff] }
 0x184   : > { %1632 = vst [vmem:[%s11019_s24 + $0x1710] sm:$0xff] %v1631_v34  ;;  %1634 = vst [vmem:[%s11019_s24 + $0x1718] sm:$0xff] %v1633_v35  ;;  %v1637_v37 = vld [vmem:[%s11014_s23 + $0x2928] sm:$0xff]  ;;  %v1639_v38 = vld [vmem:[%s11014_s23 + $0x2930] sm:$0xff] }
 0x185   : > { %1636 = vst [vmem:[%s11019_s24 + $0x1720] sm:$0xff] %v1635_v36  ;;  %v1641_v39 = vld [vmem:[%s11014_s23 + $0x2938] sm:$0xff]  ;;  %1638 = vst [vmem:[%s11019_s24 + $0x1728] sm:$0xff] %v1637_v37  ;;  %v1643_v40 = vld [vmem:[%s11014_s23 + $0x2940] sm:$0xff] }
 0x186   : > { %1640 = vst [vmem:[%s11019_s24 + $0x1730] sm:$0xff] %v1639_v38  ;;  %1642 = vst [vmem:[%s11019_s24 + $0x1738] sm:$0xff] %v1641_v39  ;;  %v1645_v41 = vld [vmem:[%s11014_s23 + $0x2948] sm:$0xff]  ;;  %v1647_v42 = vld [vmem:[%s11014_s23 + $0x2950] sm:$0xff] }
 0x187   : > { %1644 = vst [vmem:[%s11019_s24 + $0x1740] sm:$0xff] %v1643_v40  ;;  %1646 = vst [vmem:[%s11019_s24 + $0x1748] sm:$0xff] %v1645_v41  ;;  %v1649_v43 = vld [vmem:[%s11014_s23 + $0x2958] sm:$0xff]  ;;  %v1651_v44 = vld [vmem:[%s11014_s23 + $0x2960] sm:$0xff] }
 0x188   : > { %1648 = vst [vmem:[%s11019_s24 + $0x1750] sm:$0xff] %v1647_v42  ;;  %v1653_v45 = vld [vmem:[%s11014_s23 + $0x2968] sm:$0xff]  ;;  %1650 = vst [vmem:[%s11019_s24 + $0x1758] sm:$0xff] %v1649_v43  ;;  %v1655_v46 = vld [vmem:[%s11014_s23 + $0x2970] sm:$0xff] }
 0x189   : > { %1652 = vst [vmem:[%s11019_s24 + $0x1760] sm:$0xff] %v1651_v44  ;;  %1654 = vst [vmem:[%s11019_s24 + $0x1768] sm:$0xff] %v1653_v45  ;;  %v1657_v47 = vld [vmem:[%s11014_s23 + $0x2978] sm:$0xff]  ;;  %v1659_v48 = vld [vmem:[%s11014_s23 + $0x2980] sm:$0xff] }
 0x18a   : > { %1656 = vst [vmem:[%s11019_s24 + $0x1770] sm:$0xff] %v1655_v46  ;;  %1658 = vst [vmem:[%s11019_s24 + $0x1778] sm:$0xff] %v1657_v47  ;;  %v1661_v49 = vld [vmem:[%s11014_s23 + $0x2988] sm:$0xff]  ;;  %v1663_v50 = vld [vmem:[%s11014_s23 + $0x2990] sm:$0xff] }
 0x18b   : > { %1660 = vst [vmem:[%s11019_s24 + $0x1780] sm:$0xff] %v1659_v48  ;;  %v1665_v51 = vld [vmem:[%s11014_s23 + $0x2998] sm:$0xff]  ;;  %1662 = vst [vmem:[%s11019_s24 + $0x1788] sm:$0xff] %v1661_v49  ;;  %v1667_v52 = vld [vmem:[%s11014_s23 + $0x29a0] sm:$0xff] }
 0x18c   : > { %1664 = vst [vmem:[%s11019_s24 + $0x1790] sm:$0xff] %v1663_v50  ;;  %1666 = vst [vmem:[%s11019_s24 + $0x1798] sm:$0xff] %v1665_v51  ;;  %v1669_v53 = vld [vmem:[%s11014_s23 + $0x29a8] sm:$0xff]  ;;  %v1671_v54 = vld [vmem:[%s11014_s23 + $0x29b0] sm:$0xff] }
 0x18d   : > { %1668 = vst [vmem:[%s11019_s24 + $0x17a0] sm:$0xff] %v1667_v52  ;;  %1670 = vst [vmem:[%s11019_s24 + $0x17a8] sm:$0xff] %v1669_v53  ;;  %v1673_v55 = vld [vmem:[%s11014_s23 + $0x29b8] sm:$0xff]  ;;  %v1675_v56 = vld [vmem:[%s11014_s23 + $0x29c0] sm:$0xff] }
 0x18e   : > { %1672 = vst [vmem:[%s11019_s24 + $0x17b0] sm:$0xff] %v1671_v54  ;;  %v1677_v57 = vld [vmem:[%s11014_s23 + $0x29c8] sm:$0xff]  ;;  %1674 = vst [vmem:[%s11019_s24 + $0x17b8] sm:$0xff] %v1673_v55  ;;  %v1679_v58 = vld [vmem:[%s11014_s23 + $0x29d0] sm:$0xff] }
 0x18f   : > { %1676 = vst [vmem:[%s11019_s24 + $0x17c0] sm:$0xff] %v1675_v56  ;;  %1678 = vst [vmem:[%s11019_s24 + $0x17c8] sm:$0xff] %v1677_v57  ;;  %v1681_v59 = vld [vmem:[%s11014_s23 + $0x29d8] sm:$0xff]  ;;  %v1683_v60 = vld [vmem:[%s11014_s23 + $0x29e0] sm:$0xff] }
 0x190   : > { %1680 = vst [vmem:[%s11019_s24 + $0x17d0] sm:$0xff] %v1679_v58  ;;  %1682 = vst [vmem:[%s11019_s24 + $0x17d8] sm:$0xff] %v1681_v59  ;;  %v1685_v61 = vld [vmem:[%s11014_s23 + $0x29e8] sm:$0xff]  ;;  %v1687_v62 = vld [vmem:[%s11014_s23 + $0x29f0] sm:$0xff] }
 0x191   : > { %1684 = vst [vmem:[%s11019_s24 + $0x17e0] sm:$0xff] %v1683_v60  ;;  %v1689_v63 = vld [vmem:[%s11014_s23 + $0x29f8] sm:$0xff]  ;;  %1686 = vst [vmem:[%s11019_s24 + $0x17e8] sm:$0xff] %v1685_v61  ;;  %v1691_v0 = vld [vmem:[%s11014_s23 + $0x3000] sm:$0xff] }
 0x192   : > { %1688 = vst [vmem:[%s11019_s24 + $0x17f0] sm:$0xff] %v1687_v62  ;;  %1690 = vst [vmem:[%s11019_s24 + $0x17f8] sm:$0xff] %v1689_v63  ;;  %v1693_v1 = vld [vmem:[%s11014_s23 + $0x3008] sm:$0xff]  ;;  %v1695_v2 = vld [vmem:[%s11014_s23 + $0x3010] sm:$0xff] }
 0x193   : > { %1692 = vst [vmem:[%s11019_s24 + $0x1800] sm:$0xff] %v1691_v0  ;;  %1694 = vst [vmem:[%s11019_s24 + $0x1808] sm:$0xff] %v1693_v1  ;;  %v1697_v3 = vld [vmem:[%s11014_s23 + $0x3018] sm:$0xff]  ;;  %v1699_v4 = vld [vmem:[%s11014_s23 + $0x3020] sm:$0xff] }
 0x194   : > { %1696 = vst [vmem:[%s11019_s24 + $0x1810] sm:$0xff] %v1695_v2  ;;  %v1701_v5 = vld [vmem:[%s11014_s23 + $0x3028] sm:$0xff]  ;;  %1698 = vst [vmem:[%s11019_s24 + $0x1818] sm:$0xff] %v1697_v3  ;;  %v1703_v6 = vld [vmem:[%s11014_s23 + $0x3030] sm:$0xff] }
 0x195   : > { %1700 = vst [vmem:[%s11019_s24 + $0x1820] sm:$0xff] %v1699_v4  ;;  %1702 = vst [vmem:[%s11019_s24 + $0x1828] sm:$0xff] %v1701_v5  ;;  %v1705_v7 = vld [vmem:[%s11014_s23 + $0x3038] sm:$0xff]  ;;  %v1707_v8 = vld [vmem:[%s11014_s23 + $0x3040] sm:$0xff] }
 0x196   : > { %1704 = vst [vmem:[%s11019_s24 + $0x1830] sm:$0xff] %v1703_v6  ;;  %1706 = vst [vmem:[%s11019_s24 + $0x1838] sm:$0xff] %v1705_v7  ;;  %v1709_v9 = vld [vmem:[%s11014_s23 + $0x3048] sm:$0xff]  ;;  %v1711_v10 = vld [vmem:[%s11014_s23 + $0x3050] sm:$0xff] }
 0x197   : > { %1708 = vst [vmem:[%s11019_s24 + $0x1840] sm:$0xff] %v1707_v8  ;;  %v1713_v11 = vld [vmem:[%s11014_s23 + $0x3058] sm:$0xff]  ;;  %1710 = vst [vmem:[%s11019_s24 + $0x1848] sm:$0xff] %v1709_v9  ;;  %v1715_v12 = vld [vmem:[%s11014_s23 + $0x3060] sm:$0xff] }
 0x198   : > { %1712 = vst [vmem:[%s11019_s24 + $0x1850] sm:$0xff] %v1711_v10  ;;  %1714 = vst [vmem:[%s11019_s24 + $0x1858] sm:$0xff] %v1713_v11  ;;  %v1717_v13 = vld [vmem:[%s11014_s23 + $0x3068] sm:$0xff]  ;;  %v1719_v14 = vld [vmem:[%s11014_s23 + $0x3070] sm:$0xff] }
 0x199   : > { %1716 = vst [vmem:[%s11019_s24 + $0x1860] sm:$0xff] %v1715_v12  ;;  %1718 = vst [vmem:[%s11019_s24 + $0x1868] sm:$0xff] %v1717_v13  ;;  %v1721_v15 = vld [vmem:[%s11014_s23 + $0x3078] sm:$0xff]  ;;  %v1723_v16 = vld [vmem:[%s11014_s23 + $0x3080] sm:$0xff] }
 0x19a   : > { %1720 = vst [vmem:[%s11019_s24 + $0x1870] sm:$0xff] %v1719_v14  ;;  %v1725_v17 = vld [vmem:[%s11014_s23 + $0x3088] sm:$0xff]  ;;  %1722 = vst [vmem:[%s11019_s24 + $0x1878] sm:$0xff] %v1721_v15  ;;  %v1727_v18 = vld [vmem:[%s11014_s23 + $0x3090] sm:$0xff] }
 0x19b   : > { %1724 = vst [vmem:[%s11019_s24 + $0x1880] sm:$0xff] %v1723_v16  ;;  %1726 = vst [vmem:[%s11019_s24 + $0x1888] sm:$0xff] %v1725_v17  ;;  %v1729_v19 = vld [vmem:[%s11014_s23 + $0x3098] sm:$0xff]  ;;  %v1731_v20 = vld [vmem:[%s11014_s23 + $0x30a0] sm:$0xff] }
 0x19c   : > { %1728 = vst [vmem:[%s11019_s24 + $0x1890] sm:$0xff] %v1727_v18  ;;  %1730 = vst [vmem:[%s11019_s24 + $0x1898] sm:$0xff] %v1729_v19  ;;  %v1733_v21 = vld [vmem:[%s11014_s23 + $0x30a8] sm:$0xff]  ;;  %v1735_v22 = vld [vmem:[%s11014_s23 + $0x30b0] sm:$0xff] }
 0x19d   : > { %1732 = vst [vmem:[%s11019_s24 + $0x18a0] sm:$0xff] %v1731_v20  ;;  %v1737_v23 = vld [vmem:[%s11014_s23 + $0x30b8] sm:$0xff]  ;;  %1734 = vst [vmem:[%s11019_s24 + $0x18a8] sm:$0xff] %v1733_v21  ;;  %v1739_v24 = vld [vmem:[%s11014_s23 + $0x30c0] sm:$0xff] }
 0x19e   : > { %1736 = vst [vmem:[%s11019_s24 + $0x18b0] sm:$0xff] %v1735_v22  ;;  %1738 = vst [vmem:[%s11019_s24 + $0x18b8] sm:$0xff] %v1737_v23  ;;  %v1741_v25 = vld [vmem:[%s11014_s23 + $0x30c8] sm:$0xff]  ;;  %v1743_v26 = vld [vmem:[%s11014_s23 + $0x30d0] sm:$0xff] }
 0x19f   : > { %1740 = vst [vmem:[%s11019_s24 + $0x18c0] sm:$0xff] %v1739_v24  ;;  %1742 = vst [vmem:[%s11019_s24 + $0x18c8] sm:$0xff] %v1741_v25  ;;  %v1745_v27 = vld [vmem:[%s11014_s23 + $0x30d8] sm:$0xff]  ;;  %v1747_v28 = vld [vmem:[%s11014_s23 + $0x30e0] sm:$0xff] }
 0x1a0   : > { %1744 = vst [vmem:[%s11019_s24 + $0x18d0] sm:$0xff] %v1743_v26  ;;  %v1749_v29 = vld [vmem:[%s11014_s23 + $0x30e8] sm:$0xff]  ;;  %1746 = vst [vmem:[%s11019_s24 + $0x18d8] sm:$0xff] %v1745_v27  ;;  %v1751_v30 = vld [vmem:[%s11014_s23 + $0x30f0] sm:$0xff] }
 0x1a1   : > { %1748 = vst [vmem:[%s11019_s24 + $0x18e0] sm:$0xff] %v1747_v28  ;;  %1750 = vst [vmem:[%s11019_s24 + $0x18e8] sm:$0xff] %v1749_v29  ;;  %v1753_v31 = vld [vmem:[%s11014_s23 + $0x30f8] sm:$0xff]  ;;  %v1755_v32 = vld [vmem:[%s11014_s23 + $0x3100] sm:$0xff] }
 0x1a2   : > { %1752 = vst [vmem:[%s11019_s24 + $0x18f0] sm:$0xff] %v1751_v30  ;;  %1754 = vst [vmem:[%s11019_s24 + $0x18f8] sm:$0xff] %v1753_v31  ;;  %v1757_v33 = vld [vmem:[%s11014_s23 + $0x3108] sm:$0xff]  ;;  %v1759_v34 = vld [vmem:[%s11014_s23 + $0x3110] sm:$0xff] }
 0x1a3   : > { %1756 = vst [vmem:[%s11019_s24 + $0x1900] sm:$0xff] %v1755_v32  ;;  %v1761_v35 = vld [vmem:[%s11014_s23 + $0x3118] sm:$0xff]  ;;  %1758 = vst [vmem:[%s11019_s24 + $0x1908] sm:$0xff] %v1757_v33  ;;  %v1763_v36 = vld [vmem:[%s11014_s23 + $0x3120] sm:$0xff] }
 0x1a4   : > { %1760 = vst [vmem:[%s11019_s24 + $0x1910] sm:$0xff] %v1759_v34  ;;  %1762 = vst [vmem:[%s11019_s24 + $0x1918] sm:$0xff] %v1761_v35  ;;  %v1765_v37 = vld [vmem:[%s11014_s23 + $0x3128] sm:$0xff]  ;;  %v1767_v38 = vld [vmem:[%s11014_s23 + $0x3130] sm:$0xff] }
 0x1a5   : > { %1764 = vst [vmem:[%s11019_s24 + $0x1920] sm:$0xff] %v1763_v36  ;;  %1766 = vst [vmem:[%s11019_s24 + $0x1928] sm:$0xff] %v1765_v37  ;;  %v1769_v39 = vld [vmem:[%s11014_s23 + $0x3138] sm:$0xff]  ;;  %v1771_v40 = vld [vmem:[%s11014_s23 + $0x3140] sm:$0xff] }
 0x1a6   : > { %1768 = vst [vmem:[%s11019_s24 + $0x1930] sm:$0xff] %v1767_v38  ;;  %v1773_v41 = vld [vmem:[%s11014_s23 + $0x3148] sm:$0xff]  ;;  %1770 = vst [vmem:[%s11019_s24 + $0x1938] sm:$0xff] %v1769_v39  ;;  %v1775_v42 = vld [vmem:[%s11014_s23 + $0x3150] sm:$0xff] }
 0x1a7   : > { %1772 = vst [vmem:[%s11019_s24 + $0x1940] sm:$0xff] %v1771_v40  ;;  %1774 = vst [vmem:[%s11019_s24 + $0x1948] sm:$0xff] %v1773_v41  ;;  %v1777_v43 = vld [vmem:[%s11014_s23 + $0x3158] sm:$0xff]  ;;  %v1779_v44 = vld [vmem:[%s11014_s23 + $0x3160] sm:$0xff] }
 0x1a8   : > { %1776 = vst [vmem:[%s11019_s24 + $0x1950] sm:$0xff] %v1775_v42  ;;  %1778 = vst [vmem:[%s11019_s24 + $0x1958] sm:$0xff] %v1777_v43  ;;  %v1781_v45 = vld [vmem:[%s11014_s23 + $0x3168] sm:$0xff]  ;;  %v1783_v46 = vld [vmem:[%s11014_s23 + $0x3170] sm:$0xff] }
 0x1a9   : > { %1780 = vst [vmem:[%s11019_s24 + $0x1960] sm:$0xff] %v1779_v44  ;;  %v1785_v47 = vld [vmem:[%s11014_s23 + $0x3178] sm:$0xff]  ;;  %1782 = vst [vmem:[%s11019_s24 + $0x1968] sm:$0xff] %v1781_v45  ;;  %v1787_v48 = vld [vmem:[%s11014_s23 + $0x3180] sm:$0xff] }
 0x1aa   : > { %1784 = vst [vmem:[%s11019_s24 + $0x1970] sm:$0xff] %v1783_v46  ;;  %1786 = vst [vmem:[%s11019_s24 + $0x1978] sm:$0xff] %v1785_v47  ;;  %v1789_v49 = vld [vmem:[%s11014_s23 + $0x3188] sm:$0xff]  ;;  %v1791_v50 = vld [vmem:[%s11014_s23 + $0x3190] sm:$0xff] }
 0x1ab   : > { %1788 = vst [vmem:[%s11019_s24 + $0x1980] sm:$0xff] %v1787_v48  ;;  %1790 = vst [vmem:[%s11019_s24 + $0x1988] sm:$0xff] %v1789_v49  ;;  %v1793_v51 = vld [vmem:[%s11014_s23 + $0x3198] sm:$0xff]  ;;  %v1795_v52 = vld [vmem:[%s11014_s23 + $0x31a0] sm:$0xff] }
 0x1ac   : > { %1792 = vst [vmem:[%s11019_s24 + $0x1990] sm:$0xff] %v1791_v50  ;;  %v1797_v53 = vld [vmem:[%s11014_s23 + $0x31a8] sm:$0xff]  ;;  %1794 = vst [vmem:[%s11019_s24 + $0x1998] sm:$0xff] %v1793_v51  ;;  %v1799_v54 = vld [vmem:[%s11014_s23 + $0x31b0] sm:$0xff] }
 0x1ad   : > { %1796 = vst [vmem:[%s11019_s24 + $0x19a0] sm:$0xff] %v1795_v52  ;;  %1798 = vst [vmem:[%s11019_s24 + $0x19a8] sm:$0xff] %v1797_v53  ;;  %v1801_v55 = vld [vmem:[%s11014_s23 + $0x31b8] sm:$0xff]  ;;  %v1803_v56 = vld [vmem:[%s11014_s23 + $0x31c0] sm:$0xff] }
 0x1ae   : > { %1800 = vst [vmem:[%s11019_s24 + $0x19b0] sm:$0xff] %v1799_v54  ;;  %1802 = vst [vmem:[%s11019_s24 + $0x19b8] sm:$0xff] %v1801_v55  ;;  %v1805_v57 = vld [vmem:[%s11014_s23 + $0x31c8] sm:$0xff]  ;;  %v1807_v58 = vld [vmem:[%s11014_s23 + $0x31d0] sm:$0xff] }
 0x1af   : > { %1804 = vst [vmem:[%s11019_s24 + $0x19c0] sm:$0xff] %v1803_v56  ;;  %v1809_v59 = vld [vmem:[%s11014_s23 + $0x31d8] sm:$0xff]  ;;  %1806 = vst [vmem:[%s11019_s24 + $0x19c8] sm:$0xff] %v1805_v57  ;;  %v1811_v60 = vld [vmem:[%s11014_s23 + $0x31e0] sm:$0xff] }
 0x1b0   : > { %1808 = vst [vmem:[%s11019_s24 + $0x19d0] sm:$0xff] %v1807_v58  ;;  %1810 = vst [vmem:[%s11019_s24 + $0x19d8] sm:$0xff] %v1809_v59  ;;  %v1813_v61 = vld [vmem:[%s11014_s23 + $0x31e8] sm:$0xff]  ;;  %v1815_v62 = vld [vmem:[%s11014_s23 + $0x31f0] sm:$0xff] }
 0x1b1   : > { %1812 = vst [vmem:[%s11019_s24 + $0x19e0] sm:$0xff] %v1811_v60  ;;  %1814 = vst [vmem:[%s11019_s24 + $0x19e8] sm:$0xff] %v1813_v61  ;;  %v1817_v63 = vld [vmem:[%s11014_s23 + $0x31f8] sm:$0xff]  ;;  %v1819_v0 = vld [vmem:[%s11014_s23 + $0x3200] sm:$0xff] }
 0x1b2   : > { %1816 = vst [vmem:[%s11019_s24 + $0x19f0] sm:$0xff] %v1815_v62  ;;  %v1821_v1 = vld [vmem:[%s11014_s23 + $0x3208] sm:$0xff]  ;;  %1818 = vst [vmem:[%s11019_s24 + $0x19f8] sm:$0xff] %v1817_v63  ;;  %v1823_v2 = vld [vmem:[%s11014_s23 + $0x3210] sm:$0xff] }
 0x1b3   : > { %1820 = vst [vmem:[%s11019_s24 + $0x1a00] sm:$0xff] %v1819_v0  ;;  %1822 = vst [vmem:[%s11019_s24 + $0x1a08] sm:$0xff] %v1821_v1  ;;  %v1825_v3 = vld [vmem:[%s11014_s23 + $0x3218] sm:$0xff]  ;;  %v1827_v4 = vld [vmem:[%s11014_s23 + $0x3220] sm:$0xff] }
 0x1b4   : > { %1824 = vst [vmem:[%s11019_s24 + $0x1a10] sm:$0xff] %v1823_v2  ;;  %1826 = vst [vmem:[%s11019_s24 + $0x1a18] sm:$0xff] %v1825_v3  ;;  %v1829_v5 = vld [vmem:[%s11014_s23 + $0x3228] sm:$0xff]  ;;  %v1831_v6 = vld [vmem:[%s11014_s23 + $0x3230] sm:$0xff] }
 0x1b5   : > { %1828 = vst [vmem:[%s11019_s24 + $0x1a20] sm:$0xff] %v1827_v4  ;;  %v1833_v7 = vld [vmem:[%s11014_s23 + $0x3238] sm:$0xff]  ;;  %1830 = vst [vmem:[%s11019_s24 + $0x1a28] sm:$0xff] %v1829_v5  ;;  %v1835_v8 = vld [vmem:[%s11014_s23 + $0x3240] sm:$0xff] }
 0x1b6   : > { %1832 = vst [vmem:[%s11019_s24 + $0x1a30] sm:$0xff] %v1831_v6  ;;  %1834 = vst [vmem:[%s11019_s24 + $0x1a38] sm:$0xff] %v1833_v7  ;;  %v1837_v9 = vld [vmem:[%s11014_s23 + $0x3248] sm:$0xff]  ;;  %v1839_v10 = vld [vmem:[%s11014_s23 + $0x3250] sm:$0xff] }
 0x1b7   : > { %1836 = vst [vmem:[%s11019_s24 + $0x1a40] sm:$0xff] %v1835_v8  ;;  %1838 = vst [vmem:[%s11019_s24 + $0x1a48] sm:$0xff] %v1837_v9  ;;  %v1841_v11 = vld [vmem:[%s11014_s23 + $0x3258] sm:$0xff]  ;;  %v1843_v12 = vld [vmem:[%s11014_s23 + $0x3260] sm:$0xff] }
 0x1b8   : > { %1840 = vst [vmem:[%s11019_s24 + $0x1a50] sm:$0xff] %v1839_v10  ;;  %v1845_v13 = vld [vmem:[%s11014_s23 + $0x3268] sm:$0xff]  ;;  %1842 = vst [vmem:[%s11019_s24 + $0x1a58] sm:$0xff] %v1841_v11  ;;  %v1847_v14 = vld [vmem:[%s11014_s23 + $0x3270] sm:$0xff] }
 0x1b9   : > { %1844 = vst [vmem:[%s11019_s24 + $0x1a60] sm:$0xff] %v1843_v12  ;;  %1846 = vst [vmem:[%s11019_s24 + $0x1a68] sm:$0xff] %v1845_v13  ;;  %v1849_v15 = vld [vmem:[%s11014_s23 + $0x3278] sm:$0xff]  ;;  %v1851_v16 = vld [vmem:[%s11014_s23 + $0x3280] sm:$0xff] }
 0x1ba   : > { %1848 = vst [vmem:[%s11019_s24 + $0x1a70] sm:$0xff] %v1847_v14  ;;  %1850 = vst [vmem:[%s11019_s24 + $0x1a78] sm:$0xff] %v1849_v15  ;;  %v1853_v17 = vld [vmem:[%s11014_s23 + $0x3288] sm:$0xff]  ;;  %v1855_v18 = vld [vmem:[%s11014_s23 + $0x3290] sm:$0xff] }
 0x1bb   : > { %1852 = vst [vmem:[%s11019_s24 + $0x1a80] sm:$0xff] %v1851_v16  ;;  %v1857_v19 = vld [vmem:[%s11014_s23 + $0x3298] sm:$0xff]  ;;  %1854 = vst [vmem:[%s11019_s24 + $0x1a88] sm:$0xff] %v1853_v17  ;;  %v1859_v20 = vld [vmem:[%s11014_s23 + $0x32a0] sm:$0xff] }
 0x1bc   : > { %1856 = vst [vmem:[%s11019_s24 + $0x1a90] sm:$0xff] %v1855_v18  ;;  %1858 = vst [vmem:[%s11019_s24 + $0x1a98] sm:$0xff] %v1857_v19  ;;  %v1861_v21 = vld [vmem:[%s11014_s23 + $0x32a8] sm:$0xff]  ;;  %v1863_v22 = vld [vmem:[%s11014_s23 + $0x32b0] sm:$0xff] }
 0x1bd   : > { %1860 = vst [vmem:[%s11019_s24 + $0x1aa0] sm:$0xff] %v1859_v20  ;;  %1862 = vst [vmem:[%s11019_s24 + $0x1aa8] sm:$0xff] %v1861_v21  ;;  %v1865_v23 = vld [vmem:[%s11014_s23 + $0x32b8] sm:$0xff]  ;;  %v1867_v24 = vld [vmem:[%s11014_s23 + $0x32c0] sm:$0xff] }
 0x1be   : > { %1864 = vst [vmem:[%s11019_s24 + $0x1ab0] sm:$0xff] %v1863_v22  ;;  %v1869_v25 = vld [vmem:[%s11014_s23 + $0x32c8] sm:$0xff]  ;;  %1866 = vst [vmem:[%s11019_s24 + $0x1ab8] sm:$0xff] %v1865_v23  ;;  %v1871_v26 = vld [vmem:[%s11014_s23 + $0x32d0] sm:$0xff] }
 0x1bf   : > { %1868 = vst [vmem:[%s11019_s24 + $0x1ac0] sm:$0xff] %v1867_v24  ;;  %1870 = vst [vmem:[%s11019_s24 + $0x1ac8] sm:$0xff] %v1869_v25  ;;  %v1873_v27 = vld [vmem:[%s11014_s23 + $0x32d8] sm:$0xff]  ;;  %v1875_v28 = vld [vmem:[%s11014_s23 + $0x32e0] sm:$0xff] }
 0x1c0   : > { %1872 = vst [vmem:[%s11019_s24 + $0x1ad0] sm:$0xff] %v1871_v26  ;;  %1874 = vst [vmem:[%s11019_s24 + $0x1ad8] sm:$0xff] %v1873_v27  ;;  %v1877_v29 = vld [vmem:[%s11014_s23 + $0x32e8] sm:$0xff]  ;;  %v1879_v30 = vld [vmem:[%s11014_s23 + $0x32f0] sm:$0xff] }
 0x1c1   : > { %1876 = vst [vmem:[%s11019_s24 + $0x1ae0] sm:$0xff] %v1875_v28  ;;  %v1881_v31 = vld [vmem:[%s11014_s23 + $0x32f8] sm:$0xff]  ;;  %1878 = vst [vmem:[%s11019_s24 + $0x1ae8] sm:$0xff] %v1877_v29  ;;  %v1883_v32 = vld [vmem:[%s11014_s23 + $0x3300] sm:$0xff] }
 0x1c2   : > { %1880 = vst [vmem:[%s11019_s24 + $0x1af0] sm:$0xff] %v1879_v30  ;;  %1882 = vst [vmem:[%s11019_s24 + $0x1af8] sm:$0xff] %v1881_v31  ;;  %v1885_v33 = vld [vmem:[%s11014_s23 + $0x3308] sm:$0xff]  ;;  %v1887_v34 = vld [vmem:[%s11014_s23 + $0x3310] sm:$0xff] }
 0x1c3   : > { %1884 = vst [vmem:[%s11019_s24 + $0x1b00] sm:$0xff] %v1883_v32  ;;  %1886 = vst [vmem:[%s11019_s24 + $0x1b08] sm:$0xff] %v1885_v33  ;;  %v1889_v35 = vld [vmem:[%s11014_s23 + $0x3318] sm:$0xff]  ;;  %v1891_v36 = vld [vmem:[%s11014_s23 + $0x3320] sm:$0xff] }
 0x1c4   : > { %1888 = vst [vmem:[%s11019_s24 + $0x1b10] sm:$0xff] %v1887_v34  ;;  %v1893_v37 = vld [vmem:[%s11014_s23 + $0x3328] sm:$0xff]  ;;  %1890 = vst [vmem:[%s11019_s24 + $0x1b18] sm:$0xff] %v1889_v35  ;;  %v1895_v38 = vld [vmem:[%s11014_s23 + $0x3330] sm:$0xff] }
 0x1c5   : > { %1892 = vst [vmem:[%s11019_s24 + $0x1b20] sm:$0xff] %v1891_v36  ;;  %1894 = vst [vmem:[%s11019_s24 + $0x1b28] sm:$0xff] %v1893_v37  ;;  %v1897_v39 = vld [vmem:[%s11014_s23 + $0x3338] sm:$0xff]  ;;  %v1899_v40 = vld [vmem:[%s11014_s23 + $0x3340] sm:$0xff] }
 0x1c6   : > { %1896 = vst [vmem:[%s11019_s24 + $0x1b30] sm:$0xff] %v1895_v38  ;;  %1898 = vst [vmem:[%s11019_s24 + $0x1b38] sm:$0xff] %v1897_v39  ;;  %v1901_v41 = vld [vmem:[%s11014_s23 + $0x3348] sm:$0xff]  ;;  %v1903_v42 = vld [vmem:[%s11014_s23 + $0x3350] sm:$0xff] }
 0x1c7   : > { %1900 = vst [vmem:[%s11019_s24 + $0x1b40] sm:$0xff] %v1899_v40  ;;  %v1905_v43 = vld [vmem:[%s11014_s23 + $0x3358] sm:$0xff]  ;;  %1902 = vst [vmem:[%s11019_s24 + $0x1b48] sm:$0xff] %v1901_v41  ;;  %v1907_v44 = vld [vmem:[%s11014_s23 + $0x3360] sm:$0xff] }
 0x1c8   : > { %1904 = vst [vmem:[%s11019_s24 + $0x1b50] sm:$0xff] %v1903_v42  ;;  %1906 = vst [vmem:[%s11019_s24 + $0x1b58] sm:$0xff] %v1905_v43  ;;  %v1909_v45 = vld [vmem:[%s11014_s23 + $0x3368] sm:$0xff]  ;;  %v1911_v46 = vld [vmem:[%s11014_s23 + $0x3370] sm:$0xff] }
 0x1c9   : > { %1908 = vst [vmem:[%s11019_s24 + $0x1b60] sm:$0xff] %v1907_v44  ;;  %1910 = vst [vmem:[%s11019_s24 + $0x1b68] sm:$0xff] %v1909_v45  ;;  %v1913_v47 = vld [vmem:[%s11014_s23 + $0x3378] sm:$0xff]  ;;  %v1915_v48 = vld [vmem:[%s11014_s23 + $0x3380] sm:$0xff] }
 0x1ca   : > { %1912 = vst [vmem:[%s11019_s24 + $0x1b70] sm:$0xff] %v1911_v46  ;;  %v1917_v49 = vld [vmem:[%s11014_s23 + $0x3388] sm:$0xff]  ;;  %1914 = vst [vmem:[%s11019_s24 + $0x1b78] sm:$0xff] %v1913_v47  ;;  %v1919_v50 = vld [vmem:[%s11014_s23 + $0x3390] sm:$0xff] }
 0x1cb   : > { %1916 = vst [vmem:[%s11019_s24 + $0x1b80] sm:$0xff] %v1915_v48  ;;  %1918 = vst [vmem:[%s11019_s24 + $0x1b88] sm:$0xff] %v1917_v49  ;;  %v1921_v51 = vld [vmem:[%s11014_s23 + $0x3398] sm:$0xff]  ;;  %v1923_v52 = vld [vmem:[%s11014_s23 + $0x33a0] sm:$0xff] }
 0x1cc   : > { %1920 = vst [vmem:[%s11019_s24 + $0x1b90] sm:$0xff] %v1919_v50  ;;  %1922 = vst [vmem:[%s11019_s24 + $0x1b98] sm:$0xff] %v1921_v51  ;;  %v1925_v53 = vld [vmem:[%s11014_s23 + $0x33a8] sm:$0xff]  ;;  %v1927_v54 = vld [vmem:[%s11014_s23 + $0x33b0] sm:$0xff] }
 0x1cd   : > { %1924 = vst [vmem:[%s11019_s24 + $0x1ba0] sm:$0xff] %v1923_v52  ;;  %v1929_v55 = vld [vmem:[%s11014_s23 + $0x33b8] sm:$0xff]  ;;  %1926 = vst [vmem:[%s11019_s24 + $0x1ba8] sm:$0xff] %v1925_v53  ;;  %v1931_v56 = vld [vmem:[%s11014_s23 + $0x33c0] sm:$0xff] }
 0x1ce   : > { %1928 = vst [vmem:[%s11019_s24 + $0x1bb0] sm:$0xff] %v1927_v54  ;;  %1930 = vst [vmem:[%s11019_s24 + $0x1bb8] sm:$0xff] %v1929_v55  ;;  %v1933_v57 = vld [vmem:[%s11014_s23 + $0x33c8] sm:$0xff]  ;;  %v1935_v58 = vld [vmem:[%s11014_s23 + $0x33d0] sm:$0xff] }
 0x1cf   : > { %1932 = vst [vmem:[%s11019_s24 + $0x1bc0] sm:$0xff] %v1931_v56  ;;  %1934 = vst [vmem:[%s11019_s24 + $0x1bc8] sm:$0xff] %v1933_v57  ;;  %v1937_v59 = vld [vmem:[%s11014_s23 + $0x33d8] sm:$0xff]  ;;  %v1939_v60 = vld [vmem:[%s11014_s23 + $0x33e0] sm:$0xff] }
 0x1d0   : > { %1936 = vst [vmem:[%s11019_s24 + $0x1bd0] sm:$0xff] %v1935_v58  ;;  %v1941_v61 = vld [vmem:[%s11014_s23 + $0x33e8] sm:$0xff]  ;;  %1938 = vst [vmem:[%s11019_s24 + $0x1bd8] sm:$0xff] %v1937_v59  ;;  %v1943_v62 = vld [vmem:[%s11014_s23 + $0x33f0] sm:$0xff] }
 0x1d1   : > { %1940 = vst [vmem:[%s11019_s24 + $0x1be0] sm:$0xff] %v1939_v60  ;;  %1942 = vst [vmem:[%s11019_s24 + $0x1be8] sm:$0xff] %v1941_v61  ;;  %v1945_v63 = vld [vmem:[%s11014_s23 + $0x33f8] sm:$0xff]  ;;  %v1947_v0 = vld [vmem:[%s11014_s23 + $0x3400] sm:$0xff] }
 0x1d2   : > { %1944 = vst [vmem:[%s11019_s24 + $0x1bf0] sm:$0xff] %v1943_v62  ;;  %1946 = vst [vmem:[%s11019_s24 + $0x1bf8] sm:$0xff] %v1945_v63  ;;  %v1949_v1 = vld [vmem:[%s11014_s23 + $0x3408] sm:$0xff]  ;;  %v1951_v2 = vld [vmem:[%s11014_s23 + $0x3410] sm:$0xff] }
 0x1d3   : > { %1948 = vst [vmem:[%s11019_s24 + $0x1c00] sm:$0xff] %v1947_v0  ;;  %v1953_v3 = vld [vmem:[%s11014_s23 + $0x3418] sm:$0xff]  ;;  %1950 = vst [vmem:[%s11019_s24 + $0x1c08] sm:$0xff] %v1949_v1  ;;  %v1955_v4 = vld [vmem:[%s11014_s23 + $0x3420] sm:$0xff] }
 0x1d4   : > { %1952 = vst [vmem:[%s11019_s24 + $0x1c10] sm:$0xff] %v1951_v2  ;;  %1954 = vst [vmem:[%s11019_s24 + $0x1c18] sm:$0xff] %v1953_v3  ;;  %v1957_v5 = vld [vmem:[%s11014_s23 + $0x3428] sm:$0xff]  ;;  %v1959_v6 = vld [vmem:[%s11014_s23 + $0x3430] sm:$0xff] }
 0x1d5   : > { %1956 = vst [vmem:[%s11019_s24 + $0x1c20] sm:$0xff] %v1955_v4  ;;  %1958 = vst [vmem:[%s11019_s24 + $0x1c28] sm:$0xff] %v1957_v5  ;;  %v1961_v7 = vld [vmem:[%s11014_s23 + $0x3438] sm:$0xff]  ;;  %v1963_v8 = vld [vmem:[%s11014_s23 + $0x3440] sm:$0xff] }
 0x1d6   : > { %1960 = vst [vmem:[%s11019_s24 + $0x1c30] sm:$0xff] %v1959_v6  ;;  %v1965_v9 = vld [vmem:[%s11014_s23 + $0x3448] sm:$0xff]  ;;  %1962 = vst [vmem:[%s11019_s24 + $0x1c38] sm:$0xff] %v1961_v7  ;;  %v1967_v10 = vld [vmem:[%s11014_s23 + $0x3450] sm:$0xff] }
 0x1d7   : > { %1964 = vst [vmem:[%s11019_s24 + $0x1c40] sm:$0xff] %v1963_v8  ;;  %1966 = vst [vmem:[%s11019_s24 + $0x1c48] sm:$0xff] %v1965_v9  ;;  %v1969_v11 = vld [vmem:[%s11014_s23 + $0x3458] sm:$0xff]  ;;  %v1971_v12 = vld [vmem:[%s11014_s23 + $0x3460] sm:$0xff] }
 0x1d8   : > { %1968 = vst [vmem:[%s11019_s24 + $0x1c50] sm:$0xff] %v1967_v10  ;;  %1970 = vst [vmem:[%s11019_s24 + $0x1c58] sm:$0xff] %v1969_v11  ;;  %v1973_v13 = vld [vmem:[%s11014_s23 + $0x3468] sm:$0xff]  ;;  %v1975_v14 = vld [vmem:[%s11014_s23 + $0x3470] sm:$0xff] }
 0x1d9   : > { %1972 = vst [vmem:[%s11019_s24 + $0x1c60] sm:$0xff] %v1971_v12  ;;  %v1977_v15 = vld [vmem:[%s11014_s23 + $0x3478] sm:$0xff]  ;;  %1974 = vst [vmem:[%s11019_s24 + $0x1c68] sm:$0xff] %v1973_v13  ;;  %v1979_v16 = vld [vmem:[%s11014_s23 + $0x3480] sm:$0xff] }
 0x1da   : > { %1976 = vst [vmem:[%s11019_s24 + $0x1c70] sm:$0xff] %v1975_v14  ;;  %1978 = vst [vmem:[%s11019_s24 + $0x1c78] sm:$0xff] %v1977_v15  ;;  %v1981_v17 = vld [vmem:[%s11014_s23 + $0x3488] sm:$0xff]  ;;  %v1983_v18 = vld [vmem:[%s11014_s23 + $0x3490] sm:$0xff] }
 0x1db   : > { %1980 = vst [vmem:[%s11019_s24 + $0x1c80] sm:$0xff] %v1979_v16  ;;  %1982 = vst [vmem:[%s11019_s24 + $0x1c88] sm:$0xff] %v1981_v17  ;;  %v1985_v19 = vld [vmem:[%s11014_s23 + $0x3498] sm:$0xff]  ;;  %v1987_v20 = vld [vmem:[%s11014_s23 + $0x34a0] sm:$0xff] }
 0x1dc   : > { %1984 = vst [vmem:[%s11019_s24 + $0x1c90] sm:$0xff] %v1983_v18  ;;  %v1989_v21 = vld [vmem:[%s11014_s23 + $0x34a8] sm:$0xff]  ;;  %1986 = vst [vmem:[%s11019_s24 + $0x1c98] sm:$0xff] %v1985_v19  ;;  %v1991_v22 = vld [vmem:[%s11014_s23 + $0x34b0] sm:$0xff] }
 0x1dd   : > { %1988 = vst [vmem:[%s11019_s24 + $0x1ca0] sm:$0xff] %v1987_v20  ;;  %1990 = vst [vmem:[%s11019_s24 + $0x1ca8] sm:$0xff] %v1989_v21  ;;  %v1993_v23 = vld [vmem:[%s11014_s23 + $0x34b8] sm:$0xff]  ;;  %v1995_v24 = vld [vmem:[%s11014_s23 + $0x34c0] sm:$0xff] }
 0x1de   : > { %1992 = vst [vmem:[%s11019_s24 + $0x1cb0] sm:$0xff] %v1991_v22  ;;  %1994 = vst [vmem:[%s11019_s24 + $0x1cb8] sm:$0xff] %v1993_v23  ;;  %v1997_v25 = vld [vmem:[%s11014_s23 + $0x34c8] sm:$0xff]  ;;  %v1999_v26 = vld [vmem:[%s11014_s23 + $0x34d0] sm:$0xff] }
 0x1df   : > { %1996 = vst [vmem:[%s11019_s24 + $0x1cc0] sm:$0xff] %v1995_v24  ;;  %v2001_v27 = vld [vmem:[%s11014_s23 + $0x34d8] sm:$0xff]  ;;  %1998 = vst [vmem:[%s11019_s24 + $0x1cc8] sm:$0xff] %v1997_v25  ;;  %v2003_v28 = vld [vmem:[%s11014_s23 + $0x34e0] sm:$0xff] }
 0x1e0   : > { %2000 = vst [vmem:[%s11019_s24 + $0x1cd0] sm:$0xff] %v1999_v26  ;;  %2002 = vst [vmem:[%s11019_s24 + $0x1cd8] sm:$0xff] %v2001_v27  ;;  %v2005_v29 = vld [vmem:[%s11014_s23 + $0x34e8] sm:$0xff]  ;;  %v2007_v30 = vld [vmem:[%s11014_s23 + $0x34f0] sm:$0xff] }
 0x1e1   : > { %2004 = vst [vmem:[%s11019_s24 + $0x1ce0] sm:$0xff] %v2003_v28  ;;  %2006 = vst [vmem:[%s11019_s24 + $0x1ce8] sm:$0xff] %v2005_v29  ;;  %v2009_v31 = vld [vmem:[%s11014_s23 + $0x34f8] sm:$0xff]  ;;  %v2011_v32 = vld [vmem:[%s11014_s23 + $0x3500] sm:$0xff] }
 0x1e2   : > { %2008 = vst [vmem:[%s11019_s24 + $0x1cf0] sm:$0xff] %v2007_v30  ;;  %v2013_v33 = vld [vmem:[%s11014_s23 + $0x3508] sm:$0xff]  ;;  %2010 = vst [vmem:[%s11019_s24 + $0x1cf8] sm:$0xff] %v2009_v31  ;;  %v2015_v34 = vld [vmem:[%s11014_s23 + $0x3510] sm:$0xff] }
 0x1e3   : > { %2012 = vst [vmem:[%s11019_s24 + $0x1d00] sm:$0xff] %v2011_v32  ;;  %2014 = vst [vmem:[%s11019_s24 + $0x1d08] sm:$0xff] %v2013_v33  ;;  %v2017_v35 = vld [vmem:[%s11014_s23 + $0x3518] sm:$0xff]  ;;  %v2019_v36 = vld [vmem:[%s11014_s23 + $0x3520] sm:$0xff] }
 0x1e4   : > { %2016 = vst [vmem:[%s11019_s24 + $0x1d10] sm:$0xff] %v2015_v34  ;;  %2018 = vst [vmem:[%s11019_s24 + $0x1d18] sm:$0xff] %v2017_v35  ;;  %v2021_v37 = vld [vmem:[%s11014_s23 + $0x3528] sm:$0xff]  ;;  %v2023_v38 = vld [vmem:[%s11014_s23 + $0x3530] sm:$0xff] }
 0x1e5   : > { %2020 = vst [vmem:[%s11019_s24 + $0x1d20] sm:$0xff] %v2019_v36  ;;  %v2025_v39 = vld [vmem:[%s11014_s23 + $0x3538] sm:$0xff]  ;;  %2022 = vst [vmem:[%s11019_s24 + $0x1d28] sm:$0xff] %v2021_v37  ;;  %v2027_v40 = vld [vmem:[%s11014_s23 + $0x3540] sm:$0xff] }
 0x1e6   : > { %2024 = vst [vmem:[%s11019_s24 + $0x1d30] sm:$0xff] %v2023_v38  ;;  %2026 = vst [vmem:[%s11019_s24 + $0x1d38] sm:$0xff] %v2025_v39  ;;  %v2029_v41 = vld [vmem:[%s11014_s23 + $0x3548] sm:$0xff]  ;;  %v2031_v42 = vld [vmem:[%s11014_s23 + $0x3550] sm:$0xff] }
 0x1e7   : > { %2028 = vst [vmem:[%s11019_s24 + $0x1d40] sm:$0xff] %v2027_v40  ;;  %2030 = vst [vmem:[%s11019_s24 + $0x1d48] sm:$0xff] %v2029_v41  ;;  %v2033_v43 = vld [vmem:[%s11014_s23 + $0x3558] sm:$0xff]  ;;  %v2035_v44 = vld [vmem:[%s11014_s23 + $0x3560] sm:$0xff] }
 0x1e8   : > { %2032 = vst [vmem:[%s11019_s24 + $0x1d50] sm:$0xff] %v2031_v42  ;;  %v2037_v45 = vld [vmem:[%s11014_s23 + $0x3568] sm:$0xff]  ;;  %2034 = vst [vmem:[%s11019_s24 + $0x1d58] sm:$0xff] %v2033_v43  ;;  %v2039_v46 = vld [vmem:[%s11014_s23 + $0x3570] sm:$0xff] }
 0x1e9   : > { %2036 = vst [vmem:[%s11019_s24 + $0x1d60] sm:$0xff] %v2035_v44  ;;  %2038 = vst [vmem:[%s11019_s24 + $0x1d68] sm:$0xff] %v2037_v45  ;;  %v2041_v47 = vld [vmem:[%s11014_s23 + $0x3578] sm:$0xff]  ;;  %v2043_v48 = vld [vmem:[%s11014_s23 + $0x3580] sm:$0xff] }
 0x1ea   : > { %2040 = vst [vmem:[%s11019_s24 + $0x1d70] sm:$0xff] %v2039_v46  ;;  %2042 = vst [vmem:[%s11019_s24 + $0x1d78] sm:$0xff] %v2041_v47  ;;  %v2045_v49 = vld [vmem:[%s11014_s23 + $0x3588] sm:$0xff]  ;;  %v2047_v50 = vld [vmem:[%s11014_s23 + $0x3590] sm:$0xff] }
 0x1eb   : > { %2044 = vst [vmem:[%s11019_s24 + $0x1d80] sm:$0xff] %v2043_v48  ;;  %v2049_v51 = vld [vmem:[%s11014_s23 + $0x3598] sm:$0xff]  ;;  %2046 = vst [vmem:[%s11019_s24 + $0x1d88] sm:$0xff] %v2045_v49  ;;  %v2051_v52 = vld [vmem:[%s11014_s23 + $0x35a0] sm:$0xff] }
 0x1ec   : > { %2048 = vst [vmem:[%s11019_s24 + $0x1d90] sm:$0xff] %v2047_v50  ;;  %2050 = vst [vmem:[%s11019_s24 + $0x1d98] sm:$0xff] %v2049_v51  ;;  %v2053_v53 = vld [vmem:[%s11014_s23 + $0x35a8] sm:$0xff]  ;;  %v2055_v54 = vld [vmem:[%s11014_s23 + $0x35b0] sm:$0xff] }
 0x1ed   : > { %2052 = vst [vmem:[%s11019_s24 + $0x1da0] sm:$0xff] %v2051_v52  ;;  %2054 = vst [vmem:[%s11019_s24 + $0x1da8] sm:$0xff] %v2053_v53  ;;  %v2057_v55 = vld [vmem:[%s11014_s23 + $0x35b8] sm:$0xff]  ;;  %v2059_v56 = vld [vmem:[%s11014_s23 + $0x35c0] sm:$0xff] }
 0x1ee   : > { %2056 = vst [vmem:[%s11019_s24 + $0x1db0] sm:$0xff] %v2055_v54  ;;  %v2061_v57 = vld [vmem:[%s11014_s23 + $0x35c8] sm:$0xff]  ;;  %2058 = vst [vmem:[%s11019_s24 + $0x1db8] sm:$0xff] %v2057_v55  ;;  %v2063_v58 = vld [vmem:[%s11014_s23 + $0x35d0] sm:$0xff] }
 0x1ef   : > { %2060 = vst [vmem:[%s11019_s24 + $0x1dc0] sm:$0xff] %v2059_v56  ;;  %2062 = vst [vmem:[%s11019_s24 + $0x1dc8] sm:$0xff] %v2061_v57  ;;  %v2065_v59 = vld [vmem:[%s11014_s23 + $0x35d8] sm:$0xff]  ;;  %v2067_v60 = vld [vmem:[%s11014_s23 + $0x35e0] sm:$0xff] }
 0x1f0   : > { %2064 = vst [vmem:[%s11019_s24 + $0x1dd0] sm:$0xff] %v2063_v58  ;;  %2066 = vst [vmem:[%s11019_s24 + $0x1dd8] sm:$0xff] %v2065_v59  ;;  %v2069_v61 = vld [vmem:[%s11014_s23 + $0x35e8] sm:$0xff]  ;;  %v2071_v62 = vld [vmem:[%s11014_s23 + $0x35f0] sm:$0xff] }
 0x1f1   : > { %2068 = vst [vmem:[%s11019_s24 + $0x1de0] sm:$0xff] %v2067_v60  ;;  %v2073_v63 = vld [vmem:[%s11014_s23 + $0x35f8] sm:$0xff]  ;;  %2070 = vst [vmem:[%s11019_s24 + $0x1de8] sm:$0xff] %v2069_v61 }
 0x1f2   : > { %2072 = vst [vmem:[%s11019_s24 + $0x1df0] sm:$0xff] %v2071_v62  ;;  %2074 = vst [vmem:[%s11019_s24 + $0x1df8] sm:$0xff] %v2073_v63 }
 0x1f3 PF: > { %p10098_p6 = scmp.ge.s32.totalorder %s10953_s13, 1  ;;  %p2079_p7 = scmp.lt.s32.totalorder %s10953_s13, 3 }
 0x1f5   : > { %p2080_p8 = pnand %p10098_p6, %p2079_p7 }
 0x1f6   : > { %s2086_s25 = sand.u32 (!%p2080_p8), 1, %s10937_s9   ;;  %s2113_s26 = smul.u32 (!%p2080_p8), 192, %s10945_s11  ;;  %vm2130_vm0 = vcmask (!%p2080_p8), 326656  }
 0x1f7   : > { %2083 = sbr.rel (%p2080_p8) target bundleno = 1698 (0x6a2), region = 47  ;;  %p2122_p10 = scmp.lt.s32.totalorder (!%p2080_p8), %s10945_s11, 1 }
 0x1f8   : > { %s10873_s27 = smul.u32 (!%p2080_p8), 7680, %s2086_s25  ;;  %p2114_p9 = scmp.lt.s32.totalorder (!%p2080_p8), %s2113_s26, 383 }
 0x1fa   : > { %s12942_s28 = scalar_lea.vmem (!%p2080_p8), [#allocation3], %s10873_s27 }
 0x1fb   : > { %v2326_v0 = vld [vmem:[%s12942_s28 + $0x8] sm:$0xff] (!%p2080_p8)  ;;  %v2325_v2 = vld [vmem:[%s12942_s28] sm:$0xff] (!%p2080_p8)  ;;  %v2328_v5 = vld [vmem:[%s12942_s28 + $0x18] sm:$0xff] (!%p2080_p8) }
 0x1fc   : > { %v2518_v1 = vld [vmem:[%s12942_s28 + $0x608] sm:$0xff] (!%p2080_p8)  ;;  %v2517_v4 = vld [vmem:[%s12942_s28 + $0x600] sm:$0xff] (!%p2080_p8)  ;;  %v2520_v6 = vld [vmem:[%s12942_s28 + $0x618] sm:$0xff] (!%p2080_p8) }
 0x1fd   : > { %v10104_v3 = vpack.c.bf16 (!%p2080_p8), %v2518_v1, %v2326_v0  ;;  %v10106_v7 = vpack.c.bf16 (!%p2080_p8), %v2517_v4, %v2325_v2  ;;  %v10112_v8 = vpack.c.bf16 (!%p2080_p8), %v2520_v6, %v2328_v5  ;;  %v2327_v9 = vld [vmem:[%s12942_s28 + $0x10] sm:$0xff] (!%p2080_p8)  ;;  %v2710_v11 = vld [vmem:[%s12942_s28 + $0xc08] sm:$0xff] (!%p2080_p8)  ;;  %v2712_v15 = vld [vmem:[%s12942_s28 + $0xc18] sm:$0xff] (!%p2080_p8) }
 0x1fe   : > { %s14134_s26 = smov (!%p2114_p9, %s2113_s26), 383  ;;  %v2519_v10 = vld [vmem:[%s12942_s28 + $0x610] sm:$0xff]  ;;  %v2902_v13 = vld [vmem:[%s12942_s28 + $0x1208] sm:$0xff]  ;;  %v2904_v16 = vld [vmem:[%s12942_s28 + $0x1218] sm:$0xff]  ;;  %s14136_s11 = smov (!%p2122_p10, %s10945_s11), 1 }
 0x1ff   : > { %s10099_s29 = sshll.u32 %s14134_s26, 3  ;;  %10105 = vmatprep.subr.bf16.mxu0 %v10104_v3  ;;  %v10114_v12 = vpack.c.bf16 %v2519_v10, %v2327_v9  ;;  %10113 = vmatprep.subr.bf16.mxu1 %v10112_v8  ;;  %v10108_v14 = vpack.c.bf16 %v2902_v13, %v2710_v11  ;;  %v2709_v17 = vld [vmem:[%s12942_s28 + $0xc00] sm:$0xff]  ;;  %v10116_v19 = vpack.c.bf16 %v2904_v16, %v2712_v15  ;;  %v2711_v20 = vld [vmem:[%s12942_s28 + $0xc10] sm:$0xff]  ;;  %v3094_v26 = vld [vmem:[%s12942_s28 + $0x1808] sm:$0xff]  ;;  %s10100_s5 = sshll.u32 %s14136_s11, 3 }
 0x200   : > { %s12957_s4 = scalar_lea.vmem %s14124_s0, %s10099_s29  ;;  %10107 = vmatpush1.bf16.xpose.msra.mxu0 %v10106_v7  ;;  %v2901_v18 = vld [vmem:[%s12942_s28 + $0x1200] sm:$0xff]  ;;  %v2903_v21 = vld [vmem:[%s12942_s28 + $0x1210] sm:$0xff]  ;;  %v3096_v27 = vld [vmem:[%s12942_s28 + $0x1818] sm:$0xff]  ;;  %s2125_s8 = scalar_lea.vmem %s14126_s2, %s10100_s5 }
 0x201   : > { %10115 = vmatpush1.bf16.xpose.msra.mxu1 %v10114_v12  ;;  %10109 = vmatprep.subr.bf16.mxu0 %v10108_v14  ;;  %v2134_v22 = vld [vmem:[%s12957_s4 + $0x8] sm:$0xff]  ;;  %v2136_v23 = vld [vmem:[%s12957_s4 + $0x18] sm:$0xff]  ;;  %v10110_v24 = vpack.c.bf16 %v2901_v18, %v2709_v17  ;;  %v10118_v25 = vpack.c.bf16 %v2903_v21, %v2711_v20  ;;  %v2330_v28 = vld [vmem:[%s12942_s28 + $0x28] sm:$0xff] }
 0x202   : > { %10117 = vmatprep.subr.bf16.mxu1 %v10116_v19  ;;  %3349 = vmatprep.mubr.f32.mxu0 %v2134_v22  ;;  %v2522_v29 = vld [vmem:[%s12942_s28 + $0x628] sm:$0xff]  ;;  %v2332_v30 = vld [vmem:[%s12942_s28 + $0x38] sm:$0xff]  ;;  %v3093_v32 = vld [vmem:[%s12942_s28 + $0x1800] sm:$0xff] }
 0x203   : > { %3419 = vmatprep.mubr.f32.mxu1 %v2136_v23  ;;  %v2524_v31 = vld [vmem:[%s12942_s28 + $0x638] sm:$0xff]  ;;  %v3095_v33 = vld [vmem:[%s12942_s28 + $0x1810] sm:$0xff]  ;;  %v10120_v34 = vpack.c.bf16 %v2522_v29, %v2330_v28  ;;  %v2329_v35 = vld [vmem:[%s12942_s28 + $0x20] sm:$0xff] }
 0x204   : > { %v2521_v36 = vld [vmem:[%s12942_s28 + $0x620] sm:$0xff]  ;;  %v2331_v37 = vld [vmem:[%s12942_s28 + $0x30] sm:$0xff]  ;;  %v10128_v38 = vpack.c.bf16 %v2524_v31, %v2332_v30  ;;  %v2714_v40 = vld [vmem:[%s12942_s28 + $0xc28] sm:$0xff] }
 0x205   : > { %v2523_v39 = vld [vmem:[%s12942_s28 + $0x630] sm:$0xff]  ;;  %v2906_v41 = vld [vmem:[%s12942_s28 + $0x1228] sm:$0xff]  ;;  %v2716_v42 = vld [vmem:[%s12942_s28 + $0xc38] sm:$0xff]  ;;  %v10122_v45 = vpack.c.bf16 %v2521_v36, %v2329_v35 }
 0x206   : > { %v2908_v43 = vld [vmem:[%s12942_s28 + $0x1238] sm:$0xff]  ;;  %v2135_v46 = vld [vmem:[%s12957_s4 + $0x10] sm:$0xff]  ;;  %v10130_v47 = vpack.c.bf16 %v2523_v39, %v2331_v37  ;;  %v10124_v48 = vpack.c.bf16 %v2906_v41, %v2714_v40  ;;  %v2138_v50 = vld [vmem:[%s12957_s4 + $0x28] sm:$0xff] }
 0x207   : > { %v2133_v44 = vld [vmem:[%s12957_s4] sm:$0xff]  ;;  %v10132_v49 = vpack.c.bf16 %v2908_v43, %v2716_v42  ;;  %v2140_v51 = vld [vmem:[%s12957_s4 + $0x38] sm:$0xff]  ;;  %v2713_v52 = vld [vmem:[%s12942_s28 + $0xc20] sm:$0xff] }
 0x208   : > { %10111 = vmatpush1.bf16.xpose.msra.mxu0 %v10110_v24  ;;  %v2905_v53 = vld [vmem:[%s12942_s28 + $0x1220] sm:$0xff]  ;;  %v2715_v54 = vld [vmem:[%s12942_s28 + $0xc30] sm:$0xff]  ;;  %v3098_v58 = vld [vmem:[%s12942_s28 + $0x1828] sm:$0xff] }
 0x209   : > { %10119 = vmatpush1.bf16.xpose.msra.mxu1 %v10118_v25  ;;  %3293 = vmatprep.subr.mxu0 %v3094_v26  ;;  %v2907_v55 = vld [vmem:[%s12942_s28 + $0x1230] sm:$0xff]  ;;  %v10126_v56 = vpack.c.bf16 %v2905_v53, %v2713_v52  ;;  %v3100_v59 = vld [vmem:[%s12942_s28 + $0x1838] sm:$0xff]  ;;  %v2334_v60 = vld [vmem:[%s12942_s28 + $0x48] sm:$0xff] }
 0x20a   : > { %3363 = vmatprep.subr.mxu1 %v3096_v27  ;;  %v10134_v57 = vpack.c.bf16 %v2907_v55, %v2715_v54  ;;  %v2526_v61 = vld [vmem:[%s12942_s28 + $0x648] sm:$0xff]  ;;  %v2336_v62 = vld [vmem:[%s12942_s28 + $0x58] sm:$0xff]  ;;  %v3097_v0 = vld [vmem:[%s12942_s28 + $0x1820] sm:$0xff] }
 0x20b   : > { %v2528_v63 = vld [vmem:[%s12942_s28 + $0x658] sm:$0xff]  ;;  %v3099_v1 = vld [vmem:[%s12942_s28 + $0x1830] sm:$0xff]  ;;  %v10136_v2 = vpack.c.bf16 %v2526_v61, %v2334_v60  ;;  %v2333_v3 = vld [vmem:[%s12942_s28 + $0x40] sm:$0xff] }
 0x20c   : > { %v2525_v4 = vld [vmem:[%s12942_s28 + $0x640] sm:$0xff]  ;;  %v2335_v5 = vld [vmem:[%s12942_s28 + $0x50] sm:$0xff]  ;;  %v10144_v6 = vpack.c.bf16 %v2528_v63, %v2336_v62  ;;  %v2718_v8 = vld [vmem:[%s12942_s28 + $0xc48] sm:$0xff] }
 0x20d   : > { %v2527_v7 = vld [vmem:[%s12942_s28 + $0x650] sm:$0xff]  ;;  %v2910_v9 = vld [vmem:[%s12942_s28 + $0x1248] sm:$0xff]  ;;  %v2720_v10 = vld [vmem:[%s12942_s28 + $0xc58] sm:$0xff]  ;;  %v10138_v13 = vpack.c.bf16 %v2525_v4, %v2333_v3 }
 0x20e   : > { %v2912_v11 = vld [vmem:[%s12942_s28 + $0x1258] sm:$0xff]  ;;  %v2139_v14 = vld [vmem:[%s12957_s4 + $0x30] sm:$0xff]  ;;  %v10146_v15 = vpack.c.bf16 %v2527_v7, %v2335_v5  ;;  %v10140_v16 = vpack.c.bf16 %v2910_v9, %v2718_v8  ;;  %v2142_v18 = vld [vmem:[%s12957_s4 + $0x48] sm:$0xff] }
 0x20f   : > { %v2137_v12 = vld [vmem:[%s12957_s4 + $0x20] sm:$0xff]  ;;  %v10148_v17 = vpack.c.bf16 %v2912_v11, %v2720_v10  ;;  %v2144_v19 = vld [vmem:[%s12957_s4 + $0x58] sm:$0xff]  ;;  %v2717_v20 = vld [vmem:[%s12942_s28 + $0xc40] sm:$0xff] }
 0x210   : > { %3294 = vmatpush1.xpose.msra.mxu0 %v3093_v32  ;;  %v2909_v21 = vld [vmem:[%s12942_s28 + $0x1240] sm:$0xff]  ;;  %v2719_v22 = vld [vmem:[%s12942_s28 + $0xc50] sm:$0xff]  ;;  %v3102_v26 = vld [vmem:[%s12942_s28 + $0x1848] sm:$0xff] }
 0x211   : > { %3364 = vmatpush1.xpose.msra.mxu1 %v3095_v33  ;;  %10121 = vmatprep.subr.bf16.mxu0 %v10120_v34  ;;  %v2911_v23 = vld [vmem:[%s12942_s28 + $0x1250] sm:$0xff]  ;;  %v10142_v24 = vpack.c.bf16 %v2909_v21, %v2717_v20  ;;  %v3104_v27 = vld [vmem:[%s12942_s28 + $0x1858] sm:$0xff]  ;;  %v2338_v28 = vld [vmem:[%s12942_s28 + $0x68] sm:$0xff] }
 0x212   : > { %10129 = vmatprep.subr.bf16.mxu1 %v10128_v38  ;;  %v10150_v25 = vpack.c.bf16 %v2911_v23, %v2719_v22  ;;  %v2530_v29 = vld [vmem:[%s12942_s28 + $0x668] sm:$0xff]  ;;  %v2340_v30 = vld [vmem:[%s12942_s28 + $0x78] sm:$0xff]  ;;  %v3101_v32 = vld [vmem:[%s12942_s28 + $0x1840] sm:$0xff] }
 0x213   : > { %3350 = vmatmul.mubr.f32.vlgmr.msra.gmra.mrb[0].mxu0 %v2133_v44  ;;  %v2532_v31 = vld [vmem:[%s12942_s28 + $0x678] sm:$0xff]  ;;  %v3103_v33 = vld [vmem:[%s12942_s28 + $0x1850] sm:$0xff]  ;;  %v10152_v34 = vpack.c.bf16 %v2530_v29, %v2338_v28  ;;  %v2337_v35 = vld [vmem:[%s12942_s28 + $0x60] sm:$0xff] }
 0x214   : > { %3420 = vmatmul.mubr.f32.vlgmr.msra.gmra.mrb[0].mxu1 %v2135_v46  ;;  %10123 = vmatpush1.bf16.xpose.msra.mxu0 %v10122_v45  ;;  %v2529_v36 = vld [vmem:[%s12942_s28 + $0x660] sm:$0xff]  ;;  %v2339_v37 = vld [vmem:[%s12942_s28 + $0x70] sm:$0xff]  ;;  %v10160_v38 = vpack.c.bf16 %v2532_v31, %v2340_v30  ;;  %v2722_v40 = vld [vmem:[%s12942_s28 + $0xc68] sm:$0xff] }
 0x215   : > { %10131 = vmatpush1.bf16.xpose.msra.mxu1 %v10130_v47  ;;  %10125 = vmatprep.subr.bf16.mxu0 %v10124_v48  ;;  %v2531_v39 = vld [vmem:[%s12942_s28 + $0x670] sm:$0xff]  ;;  %v2914_v41 = vld [vmem:[%s12942_s28 + $0x1268] sm:$0xff]  ;;  %v2724_v42 = vld [vmem:[%s12942_s28 + $0xc78] sm:$0xff]  ;;  %v10154_v45 = vpack.c.bf16 %v2529_v36, %v2337_v35 }
 0x216   : > { %10133 = vmatprep.subr.bf16.mxu1 %v10132_v49  ;;  %3489 = vmatprep.mubr.f32.mxu0 %v2138_v50  ;;  %v2916_v43 = vld [vmem:[%s12942_s28 + $0x1278] sm:$0xff]  ;;  %v2143_v46 = vld [vmem:[%s12957_s4 + $0x50] sm:$0xff]  ;;  %v10162_v47 = vpack.c.bf16 %v2531_v39, %v2339_v37  ;;  %v10156_v48 = vpack.c.bf16 %v2914_v41, %v2722_v40  ;;  %v2146_v50 = vld [vmem:[%s12957_s4 + $0x68] sm:$0xff] }
 0x217   : > { %3559 = vmatprep.mubr.f32.mxu1 %v2140_v51  ;;  %v2141_v44 = vld [vmem:[%s12957_s4 + $0x40] sm:$0xff]  ;;  %v10164_v49 = vpack.c.bf16 %v2916_v43, %v2724_v42  ;;  %v2148_v51 = vld [vmem:[%s12957_s4 + $0x78] sm:$0xff]  ;;  %v2721_v52 = vld [vmem:[%s12942_s28 + $0xc60] sm:$0xff] }
 0x218   : > { %v2913_v53 = vld [vmem:[%s12942_s28 + $0x1260] sm:$0xff]  ;;  %v2723_v54 = vld [vmem:[%s12942_s28 + $0xc70] sm:$0xff]  ;;  %v2342_v60 = vld [vmem:[%s12942_s28 + $0x88] sm:$0xff] }
 0x219   : > { %v2915_v55 = vld [vmem:[%s12942_s28 + $0x1270] sm:$0xff]  ;;  %v2534_v61 = vld [vmem:[%s12942_s28 + $0x688] sm:$0xff]  ;;  %v2344_v62 = vld [vmem:[%s12942_s28 + $0x98] sm:$0xff] }
 0x21a   : > { %v2536_v63 = vld [vmem:[%s12942_s28 + $0x698] sm:$0xff]  ;;  %v2341_v3 = vld [vmem:[%s12942_s28 + $0x80] sm:$0xff]  ;;  %v2343_v5 = vld [vmem:[%s12942_s28 + $0x90] sm:$0xff] }
 0x21b   : > { %v2533_v4 = vld [vmem:[%s12942_s28 + $0x680] sm:$0xff]  ;;  %v2535_v7 = vld [vmem:[%s12942_s28 + $0x690] sm:$0xff]  ;;  %v2726_v8 = vld [vmem:[%s12942_s28 + $0xc88] sm:$0xff] }
 0x21c   : > { %10127 = vmatpush1.bf16.xpose.msra.mxu0 %v10126_v56  ;;  %v10158_v56 = vpack.c.bf16 %v2913_v53, %v2721_v52  ;;  %v2918_v9 = vld [vmem:[%s12942_s28 + $0x1288] sm:$0xff]  ;;  %v2728_v10 = vld [vmem:[%s12942_s28 + $0xc98] sm:$0xff]  ;;  %v2725_v20 = vld [vmem:[%s12942_s28 + $0xc80] sm:$0xff] }
 0x21d   : > { %10135 = vmatpush1.bf16.xpose.msra.mxu1 %v10134_v57  ;;  %3433 = vmatprep.subr.mxu0 %v3098_v58  ;;  %v10166_v57 = vpack.c.bf16 %v2915_v55, %v2723_v54  ;;  %v3106_v58 = vld [vmem:[%s12942_s28 + $0x1868] sm:$0xff]  ;;  %v2920_v11 = vld [vmem:[%s12942_s28 + $0x1298] sm:$0xff]  ;;  %v2917_v21 = vld [vmem:[%s12942_s28 + $0x1280] sm:$0xff] }
 0x21e   : > { %3503 = vmatprep.subr.mxu1 %v3100_v59  ;;  %v3108_v59 = vld [vmem:[%s12942_s28 + $0x1878] sm:$0xff]  ;;  %v2727_v22 = vld [vmem:[%s12942_s28 + $0xc90] sm:$0xff]  ;;  %v2346_v28 = vld [vmem:[%s12942_s28 + $0xa8] sm:$0xff] }
 0x21f   : > { %v2919_v23 = vld [vmem:[%s12942_s28 + $0x1290] sm:$0xff]  ;;  %v2538_v29 = vld [vmem:[%s12942_s28 + $0x6a8] sm:$0xff]  ;;  %v2348_v30 = vld [vmem:[%s12942_s28 + $0xb8] sm:$0xff] }
 0x220   : > { %v2540_v31 = vld [vmem:[%s12942_s28 + $0x6b8] sm:$0xff]  ;;  %v2345_v35 = vld [vmem:[%s12942_s28 + $0xa0] sm:$0xff]  ;;  %v2347_v37 = vld [vmem:[%s12942_s28 + $0xb0] sm:$0xff] }
 0x221   : > { %v2537_v36 = vld [vmem:[%s12942_s28 + $0x6a0] sm:$0xff]  ;;  %v2539_v39 = vld [vmem:[%s12942_s28 + $0x6b0] sm:$0xff]  ;;  %v2730_v40 = vld [vmem:[%s12942_s28 + $0xca8] sm:$0xff] }
 0x222   : > { %v2922_v41 = vld [vmem:[%s12942_s28 + $0x12a8] sm:$0xff]  ;;  %v2732_v42 = vld [vmem:[%s12942_s28 + $0xcb8] sm:$0xff]  ;;  %v2729_v52 = vld [vmem:[%s12942_s28 + $0xca0] sm:$0xff] }
 0x223   : > { %v2924_v43 = vld [vmem:[%s12942_s28 + $0x12b8] sm:$0xff]  ;;  %v2921_v53 = vld [vmem:[%s12942_s28 + $0x12a0] sm:$0xff]  ;;  %v2731_v54 = vld [vmem:[%s12942_s28 + $0xcb0] sm:$0xff] }
 0x224   : > { %3434 = vmatpush1.xpose.msra.mxu0 %v3097_v0  ;;  %v3105_v0 = vld [vmem:[%s12942_s28 + $0x1860] sm:$0xff]  ;;  %v2923_v55 = vld [vmem:[%s12942_s28 + $0x12b0] sm:$0xff] }
 0x225   : > { %3504 = vmatpush1.xpose.msra.mxu1 %v3099_v1  ;;  %10137 = vmatprep.subr.bf16.mxu0 %v10136_v2  ;;  %v3107_v1 = vld [vmem:[%s12942_s28 + $0x1870] sm:$0xff]  ;;  %v10168_v2 = vpack.c.bf16 %v2534_v61, %v2342_v60  ;;  %v2350_v60 = vld [vmem:[%s12942_s28 + $0xc8] sm:$0xff] }
 0x226   : > { %10145 = vmatprep.subr.bf16.mxu1 %v10144_v6  ;;  %v10176_v6 = vpack.c.bf16 %v2536_v63, %v2344_v62  ;;  %v2542_v61 = vld [vmem:[%s12942_s28 + $0x6c8] sm:$0xff]  ;;  %v2352_v62 = vld [vmem:[%s12942_s28 + $0xd8] sm:$0xff] }
 0x227   : > { %3490 = vmatmul.mubr.f32.vlgmr.msra.gmra.mrb[2].mxu0 %v2137_v12  ;;  %v2145_v12 = vld [vmem:[%s12957_s4 + $0x60] sm:$0xff] }
 0x228   : > { %10139 = vmatpush1.bf16.xpose.msra.mxu0 %v10138_v13  ;;  %3560 = vmatmul.mubr.f32.vlgmr.msra.gmra.mrb[2].mxu1 %v2139_v14  ;;  %v10170_v13 = vpack.c.bf16 %v2533_v4, %v2341_v3  ;;  %v2147_v14 = vld [vmem:[%s12957_s4 + $0x70] sm:$0xff]  ;;  %v2544_v63 = vld [vmem:[%s12942_s28 + $0x6d8] sm:$0xff]  ;;  %v2349_v3 = vld [vmem:[%s12942_s28 + $0xc0] sm:$0xff] }
 0x229   : > { %10147 = vmatpush1.bf16.xpose.msra.mxu1 %v10146_v15  ;;  %10141 = vmatprep.subr.bf16.mxu0 %v10140_v16  ;;  %v10178_v15 = vpack.c.bf16 %v2535_v7, %v2343_v5  ;;  %v10172_v16 = vpack.c.bf16 %v2918_v9, %v2726_v8  ;;  %v2541_v4 = vld [vmem:[%s12942_s28 + $0x6c0] sm:$0xff]  ;;  %v2351_v5 = vld [vmem:[%s12942_s28 + $0xd0] sm:$0xff]  ;;  %v2734_v8 = vld [vmem:[%s12942_s28 + $0xcc8] sm:$0xff] }
 0x22a   : > { %10149 = vmatprep.subr.bf16.mxu1 %v10148_v17  ;;  %3629 = vmatprep.mubr.f32.mxu0 %v2142_v18  ;;  %v10180_v17 = vpack.c.bf16 %v2920_v11, %v2728_v10  ;;  %v2150_v18 = vld [vmem:[%s12957_s4 + $0x88] sm:$0xff]  ;;  %v2543_v7 = vld [vmem:[%s12942_s28 + $0x6d0] sm:$0xff]  ;;  %v2926_v9 = vld [vmem:[%s12942_s28 + $0x12c8] sm:$0xff] }
 0x22b   : > { %3699 = vmatprep.mubr.f32.mxu1 %v2144_v19  ;;  %v2152_v19 = vld [vmem:[%s12957_s4 + $0x98] sm:$0xff]  ;;  %v2736_v10 = vld [vmem:[%s12942_s28 + $0xcd8] sm:$0xff] }
 0x22c   : > { %v2928_v11 = vld [vmem:[%s12942_s28 + $0x12d8] sm:$0xff] }
 0x230   : > { %10143 = vmatpush1.bf16.xpose.msra.mxu0 %v10142_v24  ;;  %v10174_v24 = vpack.c.bf16 %v2917_v21, %v2725_v20  ;;  %v2733_v20 = vld [vmem:[%s12942_s28 + $0xcc0] sm:$0xff] }
 0x231   : > { %10151 = vmatpush1.bf16.xpose.msra.mxu1 %v10150_v25  ;;  %3573 = vmatprep.subr.mxu0 %v3102_v26  ;;  %v10182_v25 = vpack.c.bf16 %v2919_v23, %v2727_v22  ;;  %v3110_v26 = vld [vmem:[%s12942_s28 + $0x1888] sm:$0xff]  ;;  %v2925_v21 = vld [vmem:[%s12942_s28 + $0x12c0] sm:$0xff]  ;;  %v2735_v22 = vld [vmem:[%s12942_s28 + $0xcd0] sm:$0xff] }
 0x232   : > { %3643 = vmatprep.subr.mxu1 %v3104_v27  ;;  %v3112_v27 = vld [vmem:[%s12942_s28 + $0x1898] sm:$0xff]  ;;  %v2927_v23 = vld [vmem:[%s12942_s28 + $0x12d0] sm:$0xff] }
 0x238   : > { %3574 = vmatpush1.xpose.msra.mxu0 %v3101_v32  ;;  %v3109_v32 = vld [vmem:[%s12942_s28 + $0x1880] sm:$0xff] }
 0x239   : > { %3644 = vmatpush1.xpose.msra.mxu1 %v3103_v33  ;;  %10153 = vmatprep.subr.bf16.mxu0 %v10152_v34  ;;  %v3111_v33 = vld [vmem:[%s12942_s28 + $0x1890] sm:$0xff]  ;;  %v10184_v34 = vpack.c.bf16 %v2538_v29, %v2346_v28  ;;  %v2354_v28 = vld [vmem:[%s12942_s28 + $0xe8] sm:$0xff] }
 0x23a   : > { %10161 = vmatprep.subr.bf16.mxu1 %v10160_v38  ;;  %v10192_v38 = vpack.c.bf16 %v2540_v31, %v2348_v30  ;;  %v2546_v29 = vld [vmem:[%s12942_s28 + $0x6e8] sm:$0xff]  ;;  %v2356_v30 = vld [vmem:[%s12942_s28 + $0xf8] sm:$0xff] }
 0x23b   : > { %3630 = vmatmul.mubr.f32.vlgmr.msra.gmra.mrb[4].mxu0 %v2141_v44  ;;  %v2149_v44 = vld [vmem:[%s12957_s4 + $0x80] sm:$0xff] }
 0x23c   : > { %10155 = vmatpush1.bf16.xpose.msra.mxu0 %v10154_v45  ;;  %3700 = vmatmul.mubr.f32.vlgmr.msra.gmra.mrb[4].mxu1 %v2143_v46  ;;  %v10186_v45 = vpack.c.bf16 %v2537_v36, %v2345_v35  ;;  %v2151_v46 = vld [vmem:[%s12957_s4 + $0x90] sm:$0xff]  ;;  %v2548_v31 = vld [vmem:[%s12942_s28 + $0x6f8] sm:$0xff]  ;;  %v2353_v35 = vld [vmem:[%s12942_s28 + $0xe0] sm:$0xff] }
 0x23d   : > { %10163 = vmatpush1.bf16.xpose.msra.mxu1 %v10162_v47  ;;  %10157 = vmatprep.subr.bf16.mxu0 %v10156_v48  ;;  %v10194_v47 = vpack.c.bf16 %v2539_v39, %v2347_v37  ;;  %v10188_v48 = vpack.c.bf16 %v2922_v41, %v2730_v40  ;;  %v2545_v36 = vld [vmem:[%s12942_s28 + $0x6e0] sm:$0xff]  ;;  %v2355_v37 = vld [vmem:[%s12942_s28 + $0xf0] sm:$0xff]  ;;  %v2738_v40 = vld [vmem:[%s12942_s28 + $0xce8] sm:$0xff] }
 0x23e   : > { %10165 = vmatprep.subr.bf16.mxu1 %v10164_v49  ;;  %3769 = vmatprep.mubr.f32.mxu0 %v2146_v50  ;;  %v10196_v49 = vpack.c.bf16 %v2924_v43, %v2732_v42  ;;  %v2154_v50 = vld [vmem:[%s12957_s4 + $0xa8] sm:$0xff]  ;;  %v2547_v39 = vld [vmem:[%s12942_s28 + $0x6f0] sm:$0xff]  ;;  %v2930_v41 = vld [vmem:[%s12942_s28 + $0x12e8] sm:$0xff] }
 0x23f   : > { %3839 = vmatprep.mubr.f32.mxu1 %v2148_v51  ;;  %v2156_v51 = vld [vmem:[%s12957_s4 + $0xb8] sm:$0xff]  ;;  %v2740_v42 = vld [vmem:[%s12942_s28 + $0xcf8] sm:$0xff] }
 0x240   : > { %v2932_v43 = vld [vmem:[%s12942_s28 + $0x12f8] sm:$0xff] }
 0x244   : > { %10159 = vmatpush1.bf16.xpose.msra.mxu0 %v10158_v56  ;;  %v10190_v56 = vpack.c.bf16 %v2921_v53, %v2729_v52  ;;  %v2737_v52 = vld [vmem:[%s12942_s28 + $0xce0] sm:$0xff] }
 0x245   : > { %10167 = vmatpush1.bf16.xpose.msra.mxu1 %v10166_v57  ;;  %3713 = vmatprep.subr.mxu0 %v3106_v58  ;;  %v10198_v57 = vpack.c.bf16 %v2923_v55, %v2731_v54  ;;  %v3114_v58 = vld [vmem:[%s12942_s28 + $0x18a8] sm:$0xff]  ;;  %v2929_v53 = vld [vmem:[%s12942_s28 + $0x12e0] sm:$0xff]  ;;  %v2739_v54 = vld [vmem:[%s12942_s28 + $0xcf0] sm:$0xff] }
 0x246   : > { %3783 = vmatprep.subr.mxu1 %v3108_v59  ;;  %v3116_v59 = vld [vmem:[%s12942_s28 + $0x18b8] sm:$0xff]  ;;  %v2931_v55 = vld [vmem:[%s12942_s28 + $0x12f0] sm:$0xff] }
 0x24c   : > { %3714 = vmatpush1.xpose.msra.mxu0 %v3105_v0  ;;  %v3113_v0 = vld [vmem:[%s12942_s28 + $0x18a0] sm:$0xff] }
 0x24d   : > { %3784 = vmatpush1.xpose.msra.mxu1 %v3107_v1  ;;  %10169 = vmatprep.subr.bf16.mxu0 %v10168_v2  ;;  %v3115_v1 = vld [vmem:[%s12942_s28 + $0x18b0] sm:$0xff]  ;;  %v10200_v2 = vpack.c.bf16 %v2542_v61, %v2350_v60  ;;  %v2358_v60 = vld [vmem:[%s12942_s28 + $0x108] sm:$0xff] }
 0x24e   : > { %10177 = vmatprep.subr.bf16.mxu1 %v10176_v6  ;;  %v10208_v6 = vpack.c.bf16 %v2544_v63, %v2352_v62  ;;  %v2550_v61 = vld [vmem:[%s12942_s28 + $0x708] sm:$0xff]  ;;  %v2360_v62 = vld [vmem:[%s12942_s28 + $0x118] sm:$0xff] }
 0x24f   : > { %3770 = vmatmul.mubr.f32.vlgmr.msra.gmra.mrb[6].mxu0 %v2145_v12  ;;  %v2153_v12 = vld [vmem:[%s12957_s4 + $0xa0] sm:$0xff] }
 0x250   : > { %10171 = vmatpush1.bf16.xpose.msra.mxu0 %v10170_v13  ;;  %3840 = vmatmul.mubr.f32.vlgmr.msra.gmra.mrb[6].mxu1 %v2147_v14  ;;  %v10202_v13 = vpack.c.bf16 %v2541_v4, %v2349_v3  ;;  %v2155_v14 = vld [vmem:[%s12957_s4 + $0xb0] sm:$0xff]  ;;  %v2552_v63 = vld [vmem:[%s12942_s28 + $0x718] sm:$0xff]  ;;  %v2357_v3 = vld [vmem:[%s12942_s28 + $0x100] sm:$0xff] }
 0x251   : > { %10179 = vmatpush1.bf16.xpose.msra.mxu1 %v10178_v15  ;;  %10173 = vmatprep.subr.bf16.mxu0 %v10172_v16  ;;  %v10210_v15 = vpack.c.bf16 %v2543_v7, %v2351_v5  ;;  %v10204_v16 = vpack.c.bf16 %v2926_v9, %v2734_v8  ;;  %v2549_v4 = vld [vmem:[%s12942_s28 + $0x700] sm:$0xff]  ;;  %v2359_v5 = vld [vmem:[%s12942_s28 + $0x110] sm:$0xff]  ;;  %v2742_v8 = vld [vmem:[%s12942_s28 + $0xd08] sm:$0xff] }
 0x252   : > { %10181 = vmatprep.subr.bf16.mxu1 %v10180_v17  ;;  %3909 = vmatprep.mubr.f32.mxu0 %v2150_v18  ;;  %v10212_v17 = vpack.c.bf16 %v2928_v11, %v2736_v10  ;;  %v2158_v18 = vld [vmem:[%s12957_s4 + $0xc8] sm:$0xff]  ;;  %v2551_v7 = vld [vmem:[%s12942_s28 + $0x710] sm:$0xff]  ;;  %v2934_v9 = vld [vmem:[%s12942_s28 + $0x1308] sm:$0xff] }
 0x253   : > { %3979 = vmatprep.mubr.f32.mxu1 %v2152_v19  ;;  %v2160_v19 = vld [vmem:[%s12957_s4 + $0xd8] sm:$0xff]  ;;  %v2744_v10 = vld [vmem:[%s12942_s28 + $0xd18] sm:$0xff] }
 0x254   : > { %v2936_v11 = vld [vmem:[%s12942_s28 + $0x1318] sm:$0xff] }
 0x258   : > { %10175 = vmatpush1.bf16.xpose.msra.mxu0 %v10174_v24  ;;  %v10206_v24 = vpack.c.bf16 %v2925_v21, %v2733_v20  ;;  %v2741_v20 = vld [vmem:[%s12942_s28 + $0xd00] sm:$0xff] }
 0x259   : > { %10183 = vmatpush1.bf16.xpose.msra.mxu1 %v10182_v25  ;;  %3853 = vmatprep.subr.mxu0 %v3110_v26  ;;  %v10214_v25 = vpack.c.bf16 %v2927_v23, %v2735_v22  ;;  %v3118_v26 = vld [vmem:[%s12942_s28 + $0x18c8] sm:$0xff]  ;;  %v2933_v21 = vld [vmem:[%s12942_s28 + $0x1300] sm:$0xff]  ;;  %v2743_v22 = vld [vmem:[%s12942_s28 + $0xd10] sm:$0xff] }
 0x25a   : > { %3923 = vmatprep.subr.mxu1 %v3112_v27  ;;  %v3120_v27 = vld [vmem:[%s12942_s28 + $0x18d8] sm:$0xff]  ;;  %v2935_v23 = vld [vmem:[%s12942_s28 + $0x1310] sm:$0xff] }
 0x260   : > { %3854 = vmatpush1.xpose.msra.mxu0 %v3109_v32  ;;  %v3117_v32 = vld [vmem:[%s12942_s28 + $0x18c0] sm:$0xff] }
 0x261   : > { %3924 = vmatpush1.xpose.msra.mxu1 %v3111_v33  ;;  %10185 = vmatprep.subr.bf16.mxu0 %v10184_v34  ;;  %v3119_v33 = vld [vmem:[%s12942_s28 + $0x18d0] sm:$0xff]  ;;  %v10216_v34 = vpack.c.bf16 %v2546_v29, %v2354_v28  ;;  %v2362_v28 = vld [vmem:[%s12942_s28 + $0x128] sm:$0xff] }
 0x262   : > { %10193 = vmatprep.subr.bf16.mxu1 %v10192_v38  ;;  %v10224_v38 = vpack.c.bf16 %v2548_v31, %v2356_v30  ;;  %v2554_v29 = vld [vmem:[%s12942_s28 + $0x728] sm:$0xff]  ;;  %v2364_v30 = vld [vmem:[%s12942_s28 + $0x138] sm:$0xff] }
 0x263   : > { %3910 = vmatmul.mubr.f32.vlgmr.msra.gmra.mrb[8].mxu0 %v2149_v44  ;;  %v2157_v44 = vld [vmem:[%s12957_s4 + $0xc0] sm:$0xff] }
 0x264   : > { %10187 = vmatpush1.bf16.xpose.msra.mxu0 %v10186_v45  ;;  %3980 = vmatmul.mubr.f32.vlgmr.msra.gmra.mrb[8].mxu1 %v2151_v46  ;;  %v10218_v45 = vpack.c.bf16 %v2545_v36, %v2353_v35  ;;  %v2159_v46 = vld [vmem:[%s12957_s4 + $0xd0] sm:$0xff]  ;;  %v2556_v31 = vld [vmem:[%s12942_s28 + $0x738] sm:$0xff]  ;;  %v2361_v35 = vld [vmem:[%s12942_s28 + $0x120] sm:$0xff] }
 0x265   : > { %10195 = vmatpush1.bf16.xpose.msra.mxu1 %v10194_v47  ;;  %10189 = vmatprep.subr.bf16.mxu0 %v10188_v48  ;;  %v10226_v47 = vpack.c.bf16 %v2547_v39, %v2355_v37  ;;  %v10220_v48 = vpack.c.bf16 %v2930_v41, %v2738_v40  ;;  %v2553_v36 = vld [vmem:[%s12942_s28 + $0x720] sm:$0xff]  ;;  %v2363_v37 = vld [vmem:[%s12942_s28 + $0x130] sm:$0xff]  ;;  %v2746_v40 = vld [vmem:[%s12942_s28 + $0xd28] sm:$0xff] }
 0x266   : > { %10197 = vmatprep.subr.bf16.mxu1 %v10196_v49  ;;  %4049 = vmatprep.mubr.f32.mxu0 %v2154_v50  ;;  %v10228_v49 = vpack.c.bf16 %v2932_v43, %v2740_v42  ;;  %v2162_v50 = vld [vmem:[%s12957_s4 + $0xe8] sm:$0xff]  ;;  %v2555_v39 = vld [vmem:[%s12942_s28 + $0x730] sm:$0xff]  ;;  %v2938_v41 = vld [vmem:[%s12942_s28 + $0x1328] sm:$0xff] }
 0x267   : > { %4119 = vmatprep.mubr.f32.mxu1 %v2156_v51  ;;  %v2164_v51 = vld [vmem:[%s12957_s4 + $0xf8] sm:$0xff]  ;;  %v2748_v42 = vld [vmem:[%s12942_s28 + $0xd38] sm:$0xff] }
 0x268   : > { %v2940_v43 = vld [vmem:[%s12942_s28 + $0x1338] sm:$0xff] }
 0x26c   : > { %10191 = vmatpush1.bf16.xpose.msra.mxu0 %v10190_v56  ;;  %v10222_v56 = vpack.c.bf16 %v2929_v53, %v2737_v52  ;;  %v2745_v52 = vld [vmem:[%s12942_s28 + $0xd20] sm:$0xff] }
 0x26d   : > { %10199 = vmatpush1.bf16.xpose.msra.mxu1 %v10198_v57  ;;  %3993 = vmatprep.subr.mxu0 %v3114_v58  ;;  %v10230_v57 = vpack.c.bf16 %v2931_v55, %v2739_v54  ;;  %v3122_v58 = vld [vmem:[%s12942_s28 + $0x18e8] sm:$0xff]  ;;  %v2937_v53 = vld [vmem:[%s12942_s28 + $0x1320] sm:$0xff]  ;;  %v2747_v54 = vld [vmem:[%s12942_s28 + $0xd30] sm:$0xff] }
 0x26e   : > { %4063 = vmatprep.subr.mxu1 %v3116_v59  ;;  %v3124_v59 = vld [vmem:[%s12942_s28 + $0x18f8] sm:$0xff]  ;;  %v2939_v55 = vld [vmem:[%s12942_s28 + $0x1330] sm:$0xff] }
 0x274   : > { %3994 = vmatpush1.xpose.msra.mxu0 %v3113_v0  ;;  %v3121_v0 = vld [vmem:[%s12942_s28 + $0x18e0] sm:$0xff] }
 0x275   : > { %4064 = vmatpush1.xpose.msra.mxu1 %v3115_v1  ;;  %10201 = vmatprep.subr.bf16.mxu0 %v10200_v2  ;;  %v3123_v1 = vld [vmem:[%s12942_s28 + $0x18f0] sm:$0xff]  ;;  %v10232_v2 = vpack.c.bf16 %v2550_v61, %v2358_v60  ;;  %v2366_v60 = vld [vmem:[%s12942_s28 + $0x148] sm:$0xff] }
 0x276   : > { %10209 = vmatprep.subr.bf16.mxu1 %v10208_v6  ;;  %v10240_v6 = vpack.c.bf16 %v2552_v63, %v2360_v62  ;;  %v2558_v61 = vld [vmem:[%s12942_s28 + $0x748] sm:$0xff]  ;;  %v2368_v62 = vld [vmem:[%s12942_s28 + $0x158] sm:$0xff] }
 0x277   : > { %4050 = vmatmul.mubr.f32.vlgmr.msra.gmra.mrb[10].mxu0 %v2153_v12  ;;  %v2161_v12 = vld [vmem:[%s12957_s4 + $0xe0] sm:$0xff] }
 0x278   : > { %10203 = vmatpush1.bf16.xpose.msra.mxu0 %v10202_v13  ;;  %4120 = vmatmul.mubr.f32.vlgmr.msra.gmra.mrb[10].mxu1 %v2155_v14  ;;  %v10234_v13 = vpack.c.bf16 %v2549_v4, %v2357_v3  ;;  %v2163_v14 = vld [vmem:[%s12957_s4 + $0xf0] sm:$0xff]  ;;  %v2560_v63 = vld [vmem:[%s12942_s28 + $0x758] sm:$0xff]  ;;  %v2365_v3 = vld [vmem:[%s12942_s28 + $0x140] sm:$0xff] }
 0x279   : > { %10211 = vmatpush1.bf16.xpose.msra.mxu1 %v10210_v15  ;;  %10205 = vmatprep.subr.bf16.mxu0 %v10204_v16  ;;  %v10242_v15 = vpack.c.bf16 %v2551_v7, %v2359_v5  ;;  %v10236_v16 = vpack.c.bf16 %v2934_v9, %v2742_v8  ;;  %v2557_v4 = vld [vmem:[%s12942_s28 + $0x740] sm:$0xff]  ;;  %v2367_v5 = vld [vmem:[%s12942_s28 + $0x150] sm:$0xff]  ;;  %v2750_v8 = vld [vmem:[%s12942_s28 + $0xd48] sm:$0xff] }
 0x27a   : > { %10213 = vmatprep.subr.bf16.mxu1 %v10212_v17  ;;  %4189 = vmatprep.mubr.f32.mxu0 %v2158_v18  ;;  %v10244_v17 = vpack.c.bf16 %v2936_v11, %v2744_v10  ;;  %v2166_v18 = vld [vmem:[%s12957_s4 + $0x108] sm:$0xff]  ;;  %v2559_v7 = vld [vmem:[%s12942_s28 + $0x750] sm:$0xff]  ;;  %v2942_v9 = vld [vmem:[%s12942_s28 + $0x1348] sm:$0xff] }
 0x27b   : > { %4259 = vmatprep.mubr.f32.mxu1 %v2160_v19  ;;  %v2168_v19 = vld [vmem:[%s12957_s4 + $0x118] sm:$0xff]  ;;  %v2752_v10 = vld [vmem:[%s12942_s28 + $0xd58] sm:$0xff] }
 0x27c   : > { %v2944_v11 = vld [vmem:[%s12942_s28 + $0x1358] sm:$0xff] }
 0x280   : > { %10207 = vmatpush1.bf16.xpose.msra.mxu0 %v10206_v24  ;;  %v10238_v24 = vpack.c.bf16 %v2933_v21, %v2741_v20  ;;  %v2749_v20 = vld [vmem:[%s12942_s28 + $0xd40] sm:$0xff] }
 0x281   : > { %10215 = vmatpush1.bf16.xpose.msra.mxu1 %v10214_v25  ;;  %4133 = vmatprep.subr.mxu0 %v3118_v26  ;;  %v10246_v25 = vpack.c.bf16 %v2935_v23, %v2743_v22  ;;  %v3126_v26 = vld [vmem:[%s12942_s28 + $0x1908] sm:$0xff]  ;;  %v2941_v21 = vld [vmem:[%s12942_s28 + $0x1340] sm:$0xff]  ;;  %v2751_v22 = vld [vmem:[%s12942_s28 + $0xd50] sm:$0xff] }
 0x282   : > { %4203 = vmatprep.subr.mxu1 %v3120_v27  ;;  %v3128_v27 = vld [vmem:[%s12942_s28 + $0x1918] sm:$0xff]  ;;  %v2943_v23 = vld [vmem:[%s12942_s28 + $0x1350] sm:$0xff] }
 0x288   : > { %4134 = vmatpush1.xpose.msra.mxu0 %v3117_v32  ;;  %v3125_v32 = vld [vmem:[%s12942_s28 + $0x1900] sm:$0xff] }
 0x289   : > { %4204 = vmatpush1.xpose.msra.mxu1 %v3119_v33  ;;  %10217 = vmatprep.subr.bf16.mxu0 %v10216_v34  ;;  %v3127_v33 = vld [vmem:[%s12942_s28 + $0x1910] sm:$0xff]  ;;  %v10248_v34 = vpack.c.bf16 %v2554_v29, %v2362_v28  ;;  %v2370_v28 = vld [vmem:[%s12942_s28 + $0x168] sm:$0xff] }
 0x28a   : > { %10225 = vmatprep.subr.bf16.mxu1 %v10224_v38  ;;  %v10256_v38 = vpack.c.bf16 %v2556_v31, %v2364_v30  ;;  %v2562_v29 = vld [vmem:[%s12942_s28 + $0x768] sm:$0xff]  ;;  %v2372_v30 = vld [vmem:[%s12942_s28 + $0x178] sm:$0xff] }
 0x28b   : > { %4190 = vmatmul.mubr.f32.vlgmr.msra.gmra.mrb[12].mxu0 %v2157_v44  ;;  %v2165_v44 = vld [vmem:[%s12957_s4 + $0x100] sm:$0xff] }
 0x28c   : > { %10219 = vmatpush1.bf16.xpose.msra.mxu0 %v10218_v45  ;;  %4260 = vmatmul.mubr.f32.vlgmr.msra.gmra.mrb[12].mxu1 %v2159_v46  ;;  %v10250_v45 = vpack.c.bf16 %v2553_v36, %v2361_v35  ;;  %v2167_v46 = vld [vmem:[%s12957_s4 + $0x110] sm:$0xff]  ;;  %v2564_v31 = vld [vmem:[%s12942_s28 + $0x778] sm:$0xff]  ;;  %v2369_v35 = vld [vmem:[%s12942_s28 + $0x160] sm:$0xff] }
 0x28d   : > { %10227 = vmatpush1.bf16.xpose.msra.mxu1 %v10226_v47  ;;  %10221 = vmatprep.subr.bf16.mxu0 %v10220_v48  ;;  %v10258_v47 = vpack.c.bf16 %v2555_v39, %v2363_v37  ;;  %v10252_v48 = vpack.c.bf16 %v2938_v41, %v2746_v40  ;;  %v2561_v36 = vld [vmem:[%s12942_s28 + $0x760] sm:$0xff]  ;;  %v2371_v37 = vld [vmem:[%s12942_s28 + $0x170] sm:$0xff]  ;;  %v2754_v40 = vld [vmem:[%s12942_s28 + $0xd68] sm:$0xff] }
 0x28e   : > { %10229 = vmatprep.subr.bf16.mxu1 %v10228_v49  ;;  %4329 = vmatprep.mubr.f32.mxu0 %v2162_v50  ;;  %v10260_v49 = vpack.c.bf16 %v2940_v43, %v2748_v42  ;;  %v2170_v50 = vld [vmem:[%s12957_s4 + $0x128] sm:$0xff]  ;;  %v2563_v39 = vld [vmem:[%s12942_s28 + $0x770] sm:$0xff]  ;;  %v2946_v41 = vld [vmem:[%s12942_s28 + $0x1368] sm:$0xff] }
 0x28f   : > { %4399 = vmatprep.mubr.f32.mxu1 %v2164_v51  ;;  %v2172_v51 = vld [vmem:[%s12957_s4 + $0x138] sm:$0xff]  ;;  %v2756_v42 = vld [vmem:[%s12942_s28 + $0xd78] sm:$0xff] }
 0x290   : > { %v2948_v43 = vld [vmem:[%s12942_s28 + $0x1378] sm:$0xff] }
 0x294   : > { %10223 = vmatpush1.bf16.xpose.msra.mxu0 %v10222_v56  ;;  %v10254_v56 = vpack.c.bf16 %v2937_v53, %v2745_v52  ;;  %v2753_v52 = vld [vmem:[%s12942_s28 + $0xd60] sm:$0xff] }
 0x295   : > { %10231 = vmatpush1.bf16.xpose.msra.mxu1 %v10230_v57  ;;  %4273 = vmatprep.subr.mxu0 %v3122_v58  ;;  %v10262_v57 = vpack.c.bf16 %v2939_v55, %v2747_v54  ;;  %v3130_v58 = vld [vmem:[%s12942_s28 + $0x1928] sm:$0xff]  ;;  %v2945_v53 = vld [vmem:[%s12942_s28 + $0x1360] sm:$0xff]  ;;  %v2755_v54 = vld [vmem:[%s12942_s28 + $0xd70] sm:$0xff] }
 0x296   : > { %4343 = vmatprep.subr.mxu1 %v3124_v59  ;;  %v3132_v59 = vld [vmem:[%s12942_s28 + $0x1938] sm:$0xff]  ;;  %v2947_v55 = vld [vmem:[%s12942_s28 + $0x1370] sm:$0xff] }
 0x29c   : > { %4274 = vmatpush1.xpose.msra.mxu0 %v3121_v0  ;;  %v3129_v0 = vld [vmem:[%s12942_s28 + $0x1920] sm:$0xff] }
 0x29d   : > { %4344 = vmatpush1.xpose.msra.mxu1 %v3123_v1  ;;  %10233 = vmatprep.subr.bf16.mxu0 %v10232_v2  ;;  %v3131_v1 = vld [vmem:[%s12942_s28 + $0x1930] sm:$0xff]  ;;  %v10264_v2 = vpack.c.bf16 %v2558_v61, %v2366_v60  ;;  %v2374_v61 = vld [vmem:[%s12942_s28 + $0x188] sm:$0xff] }
 0x29e   : > { %10241 = vmatprep.subr.bf16.mxu1 %v10240_v6  ;;  %v10272_v6 = vpack.c.bf16 %v2560_v63, %v2368_v62  ;;  %v2566_v62 = vld [vmem:[%s12942_s28 + $0x788] sm:$0xff] }
 0x29f   : > { %4330 = vmatmul.mubr.f32.vlgmr.msra.gmra.mrb[14].mxu0 %v2161_v12  ;;  %v2169_v12 = vld [vmem:[%s12957_s4 + $0x120] sm:$0xff] }
 0x2a0   : > { %10235 = vmatpush1.bf16.xpose.msra.mxu0 %v10234_v13  ;;  %4400 = vmatmul.mubr.f32.vlgmr.msra.gmra.mrb[14].mxu1 %v2163_v14  ;;  %v10266_v13 = vpack.c.bf16 %v2557_v4, %v2365_v3  ;;  %v2171_v14 = vld [vmem:[%s12957_s4 + $0x130] sm:$0xff] }
 0x2a1   : > { %10243 = vmatpush1.bf16.xpose.msra.mxu1 %v10242_v15  ;;  %10237 = vmatprep.subr.bf16.mxu0 %v10236_v16  ;;  %v10274_v15 = vpack.c.bf16 %v2559_v7, %v2367_v5  ;;  %v10268_v16 = vpack.c.bf16 %v2942_v9, %v2750_v8  ;;  %v3137_v5 = vld [vmem:[%s12942_s28 + $0x1960] sm:$0xff]  ;;  %v10296_v7 = vpack.c.bf16 %v2566_v62, %v2374_v61  ;;  %v2188_v62 = vld [vmem:[%s12957_s4 + $0x1b8] sm:$0xff] }
 0x2a2   : > { %10245 = vmatprep.subr.bf16.mxu1 %v10244_v17  ;;  %4469 = vmatprep.mubr.f32.mxu0 %v2166_v18  ;;  %v10276_v17 = vpack.c.bf16 %v2944_v11, %v2752_v10  ;;  %v2174_v18 = vld [vmem:[%s12957_s4 + $0x148] sm:$0xff]  ;;  %v2375_v10 = vld [vmem:[%s12942_s28 + $0x190] sm:$0xff] }
 0x2a3   : > { %4539 = vmatprep.mubr.f32.mxu1 %v2168_v19  ;;  %v2176_v19 = vld [vmem:[%s12957_s4 + $0x158] sm:$0xff]  ;;  %v2373_v8 = vld [vmem:[%s12942_s28 + $0x180] sm:$0xff] }
 0x2a4   : > { %v2565_v9 = vld [vmem:[%s12942_s28 + $0x780] sm:$0xff] }
 0x2a5   : > { %v2186_v61 = vld [vmem:[%s12957_s4 + $0x1a8] sm:$0xff] }
 0x2a8   : > { %10239 = vmatpush1.bf16.xpose.msra.mxu0 %v10238_v24  ;;  %v10270_v24 = vpack.c.bf16 %v2941_v21, %v2749_v20 }
 0x2a9   : > { %10247 = vmatpush1.bf16.xpose.msra.mxu1 %v10246_v25  ;;  %4413 = vmatprep.subr.mxu0 %v3126_v26  ;;  %v10278_v25 = vpack.c.bf16 %v2943_v23, %v2751_v22  ;;  %v3134_v26 = vld [vmem:[%s12942_s28 + $0x1948] sm:$0xff]  ;;  %v2182_v23 = vld [vmem:[%s12957_s4 + $0x188] sm:$0xff] }
 0x2aa   : > { %4483 = vmatprep.subr.mxu1 %v3128_v27  ;;  %v3136_v27 = vld [vmem:[%s12942_s28 + $0x1958] sm:$0xff] }
 0x2b0   : > { %4414 = vmatpush1.xpose.msra.mxu0 %v3125_v32  ;;  %v3133_v32 = vld [vmem:[%s12942_s28 + $0x1940] sm:$0xff] }
 0x2b1   : > { %4484 = vmatpush1.xpose.msra.mxu1 %v3127_v33  ;;  %10249 = vmatprep.subr.bf16.mxu0 %v10248_v34  ;;  %v3135_v33 = vld [vmem:[%s12942_s28 + $0x1950] sm:$0xff]  ;;  %v10280_v34 = vpack.c.bf16 %v2562_v29, %v2370_v28 }
 0x2b2   : > { %10257 = vmatprep.subr.bf16.mxu1 %v10256_v38  ;;  %v10288_v38 = vpack.c.bf16 %v2564_v31, %v2372_v30  ;;  %v2951_v28 = vld [vmem:[%s12942_s28 + $0x1390] sm:$0xff]  ;;  %v3142_v31 = vld [vmem:[%s12942_s28 + $0x1988] sm:$0xff] }
 0x2b3   : > { %4470 = vmatmul.mubr.f32.vlgmr.msra.gmra.mrb[16].mxu0 %v2165_v44  ;;  %v2173_v44 = vld [vmem:[%s12957_s4 + $0x140] sm:$0xff] }
 0x2b4   : > { %10251 = vmatpush1.bf16.xpose.msra.mxu0 %v10250_v45  ;;  %4540 = vmatmul.mubr.f32.vlgmr.msra.gmra.mrb[16].mxu1 %v2167_v46  ;;  %v10282_v45 = vpack.c.bf16 %v2561_v36, %v2369_v35  ;;  %v2175_v46 = vld [vmem:[%s12957_s4 + $0x150] sm:$0xff] }
 0x2b5   : > { %10259 = vmatpush1.bf16.xpose.msra.mxu1 %v10258_v47  ;;  %10253 = vmatprep.subr.bf16.mxu0 %v10252_v48  ;;  %v10290_v47 = vpack.c.bf16 %v2563_v39, %v2371_v37  ;;  %v10284_v48 = vpack.c.bf16 %v2946_v41, %v2754_v40  ;;  %v2570_v35 = vld [vmem:[%s12942_s28 + $0x7a8] sm:$0xff]  ;;  %v2380_v39 = vld [vmem:[%s12942_s28 + $0x1b8] sm:$0xff] }
 0x2b6   : > { %10261 = vmatprep.subr.bf16.mxu1 %v10260_v49  ;;  %4609 = vmatprep.mubr.f32.mxu0 %v2170_v50  ;;  %v10292_v49 = vpack.c.bf16 %v2948_v43, %v2756_v42  ;;  %v2178_v50 = vld [vmem:[%s12957_s4 + $0x168] sm:$0xff]  ;;  %v2572_v40 = vld [vmem:[%s12942_s28 + $0x7b8] sm:$0xff]  ;;  %v3143_v43 = vld [vmem:[%s12942_s28 + $0x1990] sm:$0xff] }
 0x2b7   : > { %4679 = vmatprep.mubr.f32.mxu1 %v2172_v51  ;;  %v2180_v51 = vld [vmem:[%s12957_s4 + $0x178] sm:$0xff]  ;;  %v3141_v42 = vld [vmem:[%s12942_s28 + $0x1980] sm:$0xff] }
 0x2bc   : > { %10255 = vmatpush1.bf16.xpose.msra.mxu0 %v10254_v56  ;;  %v10286_v56 = vpack.c.bf16 %v2945_v53, %v2753_v52  ;;  %v2954_v52 = vld [vmem:[%s12942_s28 + $0x13a8] sm:$0xff]  ;;  %v2764_v53 = vld [vmem:[%s12942_s28 + $0xdb8] sm:$0xff] }
 0x2bd   : > { %10263 = vmatpush1.bf16.xpose.msra.mxu1 %v10262_v57  ;;  %4553 = vmatprep.subr.mxu0 %v3130_v58  ;;  %v10294_v57 = vpack.c.bf16 %v2947_v55, %v2755_v54  ;;  %v3138_v58 = vld [vmem:[%s12942_s28 + $0x1968] sm:$0xff]  ;;  %v2956_v54 = vld [vmem:[%s12942_s28 + $0x13b8] sm:$0xff] }
 0x2be   : > { %4623 = vmatprep.subr.mxu1 %v3132_v59  ;;  %v3140_v59 = vld [vmem:[%s12942_s28 + $0x1978] sm:$0xff] }
 0x2bf   : > { %v2181_v55 = vld [vmem:[%s12957_s4 + $0x180] sm:$0xff] }
 0x2c4   : > { %4554 = vmatpush1.xpose.msra.mxu0 %v3129_v0 }
 0x2c5   : > { %4624 = vmatpush1.xpose.msra.mxu1 %v3131_v1  ;;  %10265 = vmatprep.subr.bf16.mxu0 %v10264_v2  ;;  %v2376_v1 = vld [vmem:[%s12942_s28 + $0x198] sm:$0xff] }
 0x2c6   : > { %10273 = vmatprep.subr.bf16.mxu1 %v10272_v6  ;;  %v2568_v2 = vld [vmem:[%s12942_s28 + $0x798] sm:$0xff]  ;;  %v3139_v6 = vld [vmem:[%s12942_s28 + $0x1970] sm:$0xff] }
 0x2c7   : > { %4610 = vmatmul.mubr.f32.vlgmr.msra.gmra.mrb[18].mxu0 %v2169_v12  ;;  %v10304_v11 = vpack.c.bf16 %v2568_v2, %v2376_v1  ;;  %v2567_v12 = vld [vmem:[%s12942_s28 + $0x790] sm:$0xff] }
 0x2c8   : > { %10267 = vmatpush1.bf16.xpose.msra.mxu0 %v10266_v13  ;;  %4680 = vmatmul.mubr.f32.vlgmr.msra.gmra.mrb[18].mxu1 %v2171_v14  ;;  %v2758_v13 = vld [vmem:[%s12942_s28 + $0xd88] sm:$0xff]  ;;  %v10306_v20 = vpack.c.bf16 %v2567_v12, %v2375_v10  ;;  %v2763_v1 = vld [vmem:[%s12942_s28 + $0xdb0] sm:$0xff] }
 0x2c9   : > { %10275 = vmatpush1.bf16.xpose.msra.mxu1 %v10274_v15  ;;  %10269 = vmatprep.subr.bf16.mxu0 %v10268_v16  ;;  %v2950_v14 = vld [vmem:[%s12942_s28 + $0x1388] sm:$0xff]  ;;  %v2760_v15 = vld [vmem:[%s12942_s28 + $0xd98] sm:$0xff]  ;;  %v2955_v2 = vld [vmem:[%s12942_s28 + $0x13b0] sm:$0xff] }
 0x2ca   : > { %10277 = vmatprep.subr.bf16.mxu1 %v10276_v17  ;;  %4749 = vmatprep.mubr.f32.mxu0 %v2174_v18  ;;  %v2952_v16 = vld [vmem:[%s12942_s28 + $0x1398] sm:$0xff]  ;;  %v10298_v18 = vpack.c.bf16 %v2565_v9, %v2373_v8  ;;  %v10300_v21 = vpack.c.bf16 %v2950_v14, %v2758_v13  ;;  %v2382_v8 = vld [vmem:[%s12942_s28 + $0x1c8] sm:$0xff] }
 0x2cb   : > { %4819 = vmatprep.mubr.f32.mxu1 %v2176_v19  ;;  %v2177_v17 = vld [vmem:[%s12957_s4 + $0x160] sm:$0xff]  ;;  %v2179_v19 = vld [vmem:[%s12957_s4 + $0x170] sm:$0xff]  ;;  %v10308_v22 = vpack.c.bf16 %v2952_v16, %v2760_v15  ;;  %v3145_v16 = vld [vmem:[%s12942_s28 + $0x19a0] sm:$0xff] }
 0x2cc   : > { %v2574_v9 = vld [vmem:[%s12942_s28 + $0x7c8] sm:$0xff]  ;;  %v2384_v13 = vld [vmem:[%s12942_s28 + $0x1d8] sm:$0xff] }
 0x2cd   : > { %v2576_v14 = vld [vmem:[%s12942_s28 + $0x7d8] sm:$0xff] }
 0x2d0   : > { %10271 = vmatpush1.bf16.xpose.msra.mxu0 %v10270_v24  ;;  %v2184_v24 = vld [vmem:[%s12957_s4 + $0x198] sm:$0xff] }
 0x2d1   : > { %10279 = vmatpush1.bf16.xpose.msra.mxu1 %v10278_v25  ;;  %4693 = vmatprep.subr.mxu0 %v3134_v26  ;;  %v2757_v25 = vld [vmem:[%s12942_s28 + $0xd80] sm:$0xff] }
 0x2d2   : > { %4763 = vmatprep.subr.mxu1 %v3136_v27  ;;  %v2949_v26 = vld [vmem:[%s12942_s28 + $0x1380] sm:$0xff]  ;;  %v2759_v27 = vld [vmem:[%s12942_s28 + $0xd90] sm:$0xff] }
 0x2d3   : > { %v10302_v29 = vpack.c.bf16 %v2949_v26, %v2757_v25  ;;  %v10310_v30 = vpack.c.bf16 %v2951_v28, %v2759_v27  ;;  %v2766_v25 = vld [vmem:[%s12942_s28 + $0xdc8] sm:$0xff]  ;;  %v2768_v27 = vld [vmem:[%s12942_s28 + $0xdd8] sm:$0xff] }
 0x2d4   : > { %v2958_v26 = vld [vmem:[%s12942_s28 + $0x13c8] sm:$0xff]  ;;  %v2960_v28 = vld [vmem:[%s12942_s28 + $0x13d8] sm:$0xff] }
 0x2d8   : > { %4694 = vmatpush1.xpose.msra.mxu0 %v3133_v32  ;;  %v3144_v32 = vld [vmem:[%s12942_s28 + $0x1998] sm:$0xff] }
 0x2d9   : > { %4764 = vmatpush1.xpose.msra.mxu1 %v3135_v33  ;;  %10281 = vmatprep.subr.bf16.mxu0 %v10280_v34  ;;  %v2378_v34 = vld [vmem:[%s12942_s28 + $0x1a8] sm:$0xff] }
 0x2da   : > { %10289 = vmatprep.subr.bf16.mxu1 %v10288_v38 }
 0x2db   : > { %4750 = vmatmul.mubr.f32.vlgmr.msra.gmra.mrb[20].mxu0 %v2173_v44 }
 0x2dc   : > { %10283 = vmatpush1.bf16.xpose.msra.mxu0 %v10282_v45  ;;  %4820 = vmatmul.mubr.f32.vlgmr.msra.gmra.mrb[20].mxu1 %v2175_v46  ;;  %v10312_v45 = vpack.c.bf16 %v2570_v35, %v2378_v34  ;;  %v2377_v46 = vld [vmem:[%s12942_s28 + $0x1a0] sm:$0xff]  ;;  %v10340_v34 = vpack.c.bf16 %v2960_v28, %v2768_v27 }
 0x2dd   : > { %10291 = vmatpush1.bf16.xpose.msra.mxu1 %v10290_v47  ;;  %10285 = vmatprep.subr.bf16.mxu0 %v10284_v48  ;;  %v2569_v47 = vld [vmem:[%s12942_s28 + $0x7a0] sm:$0xff]  ;;  %v2379_v48 = vld [vmem:[%s12942_s28 + $0x1b0] sm:$0xff] }
 0x2de   : > { %10293 = vmatprep.subr.bf16.mxu1 %v10292_v49  ;;  %4889 = vmatprep.mubr.f32.mxu0 %v2178_v50  ;;  %v10320_v49 = vpack.c.bf16 %v2572_v40, %v2380_v39  ;;  %v2571_v50 = vld [vmem:[%s12942_s28 + $0x7b0] sm:$0xff]  ;;  %v2190_v35 = vld [vmem:[%s12957_s4 + $0x1c8] sm:$0xff] }
 0x2df   : > { %4959 = vmatprep.mubr.f32.mxu1 %v2180_v51  ;;  %v2762_v51 = vld [vmem:[%s12942_s28 + $0xda8] sm:$0xff]  ;;  %v2767_v39 = vld [vmem:[%s12942_s28 + $0xdd0] sm:$0xff]  ;;  %v3153_v28 = vld [vmem:[%s12942_s28 + $0x19e0] sm:$0xff] }
 0x2e0   : > { %v2959_v40 = vld [vmem:[%s12942_s28 + $0x13d0] sm:$0xff] }
 0x2e4   : > { %10287 = vmatpush1.bf16.xpose.msra.mxu0 %v10286_v56  ;;  %v10314_v56 = vpack.c.bf16 %v2569_v47, %v2377_v46  ;;  %v2386_v46 = vld [vmem:[%s12942_s28 + $0x1e8] sm:$0xff] }
 0x2e5   : > { %10295 = vmatpush1.bf16.xpose.msra.mxu1 %v10294_v57  ;;  %4833 = vmatprep.subr.mxu0 %v3138_v58  ;;  %v2183_v57 = vld [vmem:[%s12957_s4 + $0x190] sm:$0xff]  ;;  %v10322_v58 = vpack.c.bf16 %v2571_v50, %v2379_v48 }
 0x2e6   : > { %v3351_v60 = vpop.f32.mrb[0].mxu0  ;;  %4903 = vmatprep.subr.mxu1 %v3140_v59  ;;  %v10316_v59 = vpack.c.bf16 %v2954_v52, %v2762_v51  ;;  %v2578_v47 = vld [vmem:[%s12942_s28 + $0x7e8] sm:$0xff]  ;;  %v2388_v51 = vld [vmem:[%s12942_s28 + $0x1f8] sm:$0xff] }
 0x2e7   : > { %v3353_v63 = vpop.f32.mrb[1].mxu0  ;;  %v3421_v0 = vpop.f32.mrb[0].mxu1  ;;  %v2580_v52 = vld [vmem:[%s12942_s28 + $0x7f8] sm:$0xff] }
 0x2e8   : > { %v3422_v3 = vadd.f32 %v3421_v0, %v3351_v60  ;;  %v3423_v4 = vpop.f32.mrb[1].mxu1  ;;  %v10324_v60 = vpack.c.bf16 %v2956_v54, %v2764_v53  ;;  %v2761_v63 = vld [vmem:[%s12942_s28 + $0xda0] sm:$0xff] }
 0x2e9   : > { %v2953_v0 = vld [vmem:[%s12942_s28 + $0x13a0] sm:$0xff]  ;;  %v10326_v4 = vpack.c.bf16 %v2955_v2, %v2763_v1  ;;  %v2772_v1 = vld [vmem:[%s12942_s28 + $0xdf8] sm:$0xff] }
 0x2ea   : > { %v3149_v54 = vld [vmem:[%s12942_s28 + $0x19c0] sm:$0xff]  ;;  %v2964_v2 = vld [vmem:[%s12942_s28 + $0x13f8] sm:$0xff] }
 0x2ec   : > { %4834 = vmatpush1.xpose.msra.mxu0 %v3137_v5  ;;  %v3146_v5 = vld [vmem:[%s12942_s28 + $0x19a8] sm:$0xff] }
 0x2ed   : > { %4904 = vmatpush1.xpose.msra.mxu1 %v3139_v6  ;;  %10297 = vmatprep.subr.bf16.mxu0 %v10296_v7  ;;  %v3148_v6 = vld [vmem:[%s12942_s28 + $0x19b8] sm:$0xff] }
 0x2ee   : > { %10305 = vmatprep.subr.bf16.mxu1 %v10304_v11 }
 0x2ef   : > { %4890 = vmatmul.mubr.f32.vlgmr.msra.gmra.mrb[22].mxu0 %v2177_v17  ;;  %v3147_v17 = vld [vmem:[%s12942_s28 + $0x19b0] sm:$0xff] }
 0x2f0   : > { %10299 = vmatpush1.bf16.xpose.msra.mxu0 %v10298_v18  ;;  %4960 = vmatmul.mubr.f32.vlgmr.msra.gmra.mrb[22].mxu1 %v2179_v19  ;;  %v10328_v19 = vpack.c.bf16 %v2574_v9, %v2382_v8  ;;  %v10356_v8 = vpack.c.bf16 %v2964_v2, %v2772_v1  ;;  %v2194_v9 = vld [vmem:[%s12957_s4 + $0x1e8] sm:$0xff] }
 0x2f1   : > { %10307 = vmatpush1.bf16.xpose.msra.mxu1 %v10306_v20  ;;  %10301 = vmatprep.subr.bf16.mxu0 %v10300_v21  ;;  %v2381_v20 = vld [vmem:[%s12942_s28 + $0x1c0] sm:$0xff] }
 0x2f2   : > { %10309 = vmatprep.subr.bf16.mxu1 %v10308_v22  ;;  %5029 = vmatprep.mubr.f32.mxu0 %v2182_v23  ;;  %v2573_v21 = vld [vmem:[%s12942_s28 + $0x7c0] sm:$0xff]  ;;  %v2383_v22 = vld [vmem:[%s12942_s28 + $0x1d0] sm:$0xff]  ;;  %v10336_v23 = vpack.c.bf16 %v2576_v14, %v2384_v13 }
 0x2f3   : > { %5099 = vmatprep.mubr.f32.mxu1 %v2184_v24  ;;  %v2575_v24 = vld [vmem:[%s12942_s28 + $0x7d0] sm:$0xff]  ;;  %v3157_v2 = vld [vmem:[%s12942_s28 + $0x1a00] sm:$0xff] }
 0x2f4   : > { %v2771_v13 = vld [vmem:[%s12942_s28 + $0xdf0] sm:$0xff] }
 0x2f5   : > { %v2963_v14 = vld [vmem:[%s12942_s28 + $0x13f0] sm:$0xff] }
 0x2f8   : > { %10303 = vmatpush1.bf16.xpose.msra.mxu0 %v10302_v29  ;;  %v2185_v29 = vld [vmem:[%s12957_s4 + $0x1a0] sm:$0xff] }
 0x2f9   : > { %10311 = vmatpush1.bf16.xpose.msra.mxu1 %v10310_v30  ;;  %4973 = vmatprep.subr.mxu0 %v3142_v31  ;;  %v10330_v30 = vpack.c.bf16 %v2573_v21, %v2381_v20  ;;  %v2187_v31 = vld [vmem:[%s12957_s4 + $0x1b0] sm:$0xff] }
 0x2fa   : > { %v3491_v33 = vpop.f32.mrb[2].mxu0  ;;  %5043 = vmatprep.subr.mxu1 %v3144_v32  ;;  %v10338_v32 = vpack.c.bf16 %v2575_v24, %v2383_v22  ;;  %v2390_v20 = vld [vmem:[%s12942_s28 + $0x208] sm:$0xff] }
 0x2fb   : > { %v3492_v36 = vadd.f32 %v3491_v33, %v3422_v3  ;;  %v3493_v37 = vpop.f32.mrb[3].mxu0  ;;  %v3561_v38 = vpop.f32.mrb[2].mxu1  ;;  %v10318_v3 = vpack.c.bf16 %v2953_v0, %v2761_v63  ;;  %v10332_v33 = vpack.c.bf16 %v2958_v26, %v2766_v25  ;;  %v2770_v63 = vld [vmem:[%s12942_s28 + $0xde8] sm:$0xff]  ;;  %v2392_v25 = vld [vmem:[%s12942_s28 + $0x218] sm:$0xff] }
 0x2fc   : > { %v3563_v41 = vpop.f32.mrb[3].mxu1  ;;  %v2765_v37 = vld [vmem:[%s12942_s28 + $0xdc0] sm:$0xff]  ;;  %v2962_v0 = vld [vmem:[%s12942_s28 + $0x13e8] sm:$0xff]  ;;  %v2584_v26 = vld [vmem:[%s12942_s28 + $0x818] sm:$0xff] }
 0x2fd   : > { %v3562_v44 = vadd.f32 %v3561_v38, %v3492_v36  ;;  %v2192_v36 = vld [vmem:[%s12957_s4 + $0x1d8] sm:$0xff]  ;;  %v2957_v38 = vld [vmem:[%s12942_s28 + $0x13c0] sm:$0xff]  ;;  %v2582_v21 = vld [vmem:[%s12942_s28 + $0x808] sm:$0xff] }
 0x2fe   : > { %v10334_v41 = vpack.c.bf16 %v2957_v38, %v2765_v37  ;;  %v2774_v37 = vld [vmem:[%s12942_s28 + $0xe08] sm:$0xff] }
 0x2ff   : > { %v2966_v38 = vld [vmem:[%s12942_s28 + $0x1408] sm:$0xff] }
 0x300   : > { %4974 = vmatpush1.xpose.msra.mxu0 %v3141_v42  ;;  %v10342_v42 = vpack.c.bf16 %v2959_v40, %v2767_v39  ;;  %v2776_v39 = vld [vmem:[%s12942_s28 + $0xe18] sm:$0xff] }
 0x301   : > { %5044 = vmatpush1.xpose.msra.mxu1 %v3143_v43  ;;  %10313 = vmatprep.subr.bf16.mxu0 %v10312_v45  ;;  %v3150_v43 = vld [vmem:[%s12942_s28 + $0x19c8] sm:$0xff]  ;;  %v2968_v40 = vld [vmem:[%s12942_s28 + $0x1418] sm:$0xff] }
 0x302   : > { %10321 = vmatprep.subr.bf16.mxu1 %v10320_v49 }
 0x303   : > { %5030 = vmatmul.mubr.f32.vlgmr.msra.gmra.mrb[24].mxu0 %v2181_v55  ;;  %v3151_v55 = vld [vmem:[%s12942_s28 + $0x19d0] sm:$0xff] }
 0x304   : > { %10315 = vmatpush1.bf16.xpose.msra.mxu0 %v10314_v56  ;;  %5100 = vmatmul.mubr.f32.vlgmr.msra.gmra.mrb[24].mxu1 %v2183_v57  ;;  %v10344_v57 = vpack.c.bf16 %v2578_v47, %v2386_v46  ;;  %v10372_v46 = vpack.c.bf16 %v2968_v40, %v2776_v39  ;;  %v2198_v47 = vld [vmem:[%s12957_s4 + $0x208] sm:$0xff] }
 0x305   : > { %10323 = vmatpush1.bf16.xpose.msra.mxu1 %v10322_v58  ;;  %10317 = vmatprep.subr.bf16.mxu0 %v10316_v59  ;;  %v2385_v58 = vld [vmem:[%s12942_s28 + $0x1e0] sm:$0xff] }
 0x306   : > { %10325 = vmatprep.subr.bf16.mxu1 %v10324_v60  ;;  %5169 = vmatprep.mubr.f32.mxu0 %v2186_v61  ;;  %v2577_v59 = vld [vmem:[%s12942_s28 + $0x7e0] sm:$0xff]  ;;  %v2387_v60 = vld [vmem:[%s12942_s28 + $0x1f0] sm:$0xff]  ;;  %v10352_v61 = vpack.c.bf16 %v2580_v52, %v2388_v51 }
 0x307   : > { %5239 = vmatprep.mubr.f32.mxu1 %v2188_v62  ;;  %v2579_v62 = vld [vmem:[%s12942_s28 + $0x7f0] sm:$0xff]  ;;  %v3161_v40 = vld [vmem:[%s12942_s28 + $0x1a20] sm:$0xff] }
 0x308   : > { %v2775_v51 = vld [vmem:[%s12942_s28 + $0xe10] sm:$0xff] }
 0x309   : > { %v2967_v52 = vld [vmem:[%s12942_s28 + $0x1410] sm:$0xff] }
 0x30c   : > { %10319 = vmatpush1.bf16.xpose.msra.mxu0 %v10318_v3  ;;  %v2189_v3 = vld [vmem:[%s12957_s4 + $0x1c0] sm:$0xff] }
 0x30d   : > { %10327 = vmatpush1.bf16.xpose.msra.mxu1 %v10326_v4  ;;  %5113 = vmatprep.subr.mxu0 %v3146_v5  ;;  %v10346_v4 = vpack.c.bf16 %v2577_v59, %v2385_v58  ;;  %v2191_v5 = vld [vmem:[%s12957_s4 + $0x1d0] sm:$0xff] }
 0x30e   : > { %v3631_v7 = vpop.f32.mrb[4].mxu0  ;;  %5183 = vmatprep.subr.mxu1 %v3148_v6  ;;  %v10354_v6 = vpack.c.bf16 %v2579_v62, %v2387_v60  ;;  %v2394_v58 = vld [vmem:[%s12942_s28 + $0x228] sm:$0xff] }
 0x30f   : > { %v3632_v10 = vadd.f32 %v3631_v7, %v3562_v44  ;;  %v3633_v11 = vpop.f32.mrb[5].mxu0  ;;  %v3701_v12 = vpop.f32.mrb[4].mxu1  ;;  %v3152_v44 = vld [vmem:[%s12942_s28 + $0x19d8] sm:$0xff]  ;;  %v10348_v7 = vpack.c.bf16 %v2962_v0, %v2770_v63  ;;  %v2586_v59 = vld [vmem:[%s12942_s28 + $0x828] sm:$0xff] }
 0x310   : > { %v3703_v15 = vpop.f32.mrb[5].mxu1  ;;  %v2769_v11 = vld [vmem:[%s12942_s28 + $0xde0] sm:$0xff]  ;;  %v2396_v63 = vld [vmem:[%s12942_s28 + $0x238] sm:$0xff] }
 0x311   : > { %v3702_v18 = vadd.f32 %v3701_v12, %v3632_v10  ;;  %v2196_v10 = vld [vmem:[%s12957_s4 + $0x1f8] sm:$0xff]  ;;  %v2961_v12 = vld [vmem:[%s12942_s28 + $0x13e0] sm:$0xff]  ;;  %v2588_v0 = vld [vmem:[%s12942_s28 + $0x838] sm:$0xff] }
 0x312   : > { %v10350_v15 = vpack.c.bf16 %v2961_v12, %v2769_v11  ;;  %v2778_v11 = vld [vmem:[%s12942_s28 + $0xe28] sm:$0xff] }
 0x313   : > { %v2970_v12 = vld [vmem:[%s12942_s28 + $0x1428] sm:$0xff] }
 0x314   : > { %5114 = vmatpush1.xpose.msra.mxu0 %v3145_v16  ;;  %v10358_v16 = vpack.c.bf16 %v2963_v14, %v2771_v13  ;;  %v2780_v13 = vld [vmem:[%s12942_s28 + $0xe38] sm:$0xff] }
 0x315   : > { %5184 = vmatpush1.xpose.msra.mxu1 %v3147_v17  ;;  %10329 = vmatprep.subr.bf16.mxu0 %v10328_v19  ;;  %v3154_v17 = vld [vmem:[%s12942_s28 + $0x19e8] sm:$0xff]  ;;  %v2972_v14 = vld [vmem:[%s12942_s28 + $0x1438] sm:$0xff] }
 0x316   : > { %10337 = vmatprep.subr.bf16.mxu1 %v10336_v23 }
 0x317   : > { %5170 = vmatmul.mubr.f32.vlgmr.msra.gmra.mrb[26].mxu0 %v2185_v29  ;;  %v3155_v29 = vld [vmem:[%s12942_s28 + $0x19f0] sm:$0xff] }
 0x318   : > { %10331 = vmatpush1.bf16.xpose.msra.mxu0 %v10330_v30  ;;  %5240 = vmatmul.mubr.f32.vlgmr.msra.gmra.mrb[26].mxu1 %v2187_v31  ;;  %v10360_v31 = vpack.c.bf16 %v2582_v21, %v2390_v20  ;;  %v10388_v20 = vpack.c.bf16 %v2972_v14, %v2780_v13  ;;  %v2202_v21 = vld [vmem:[%s12957_s4 + $0x228] sm:$0xff] }
 0x319   : > { %10339 = vmatpush1.bf16.xpose.msra.mxu1 %v10338_v32  ;;  %10333 = vmatprep.subr.bf16.mxu0 %v10332_v33  ;;  %v2389_v32 = vld [vmem:[%s12942_s28 + $0x200] sm:$0xff] }
 0x31a   : > { %10341 = vmatprep.subr.bf16.mxu1 %v10340_v34  ;;  %5309 = vmatprep.mubr.f32.mxu0 %v2190_v35  ;;  %v2581_v33 = vld [vmem:[%s12942_s28 + $0x800] sm:$0xff]  ;;  %v2391_v34 = vld [vmem:[%s12942_s28 + $0x210] sm:$0xff]  ;;  %v10368_v35 = vpack.c.bf16 %v2584_v26, %v2392_v25 }
 0x31b   : > { %5379 = vmatprep.mubr.f32.mxu1 %v2192_v36  ;;  %v2583_v36 = vld [vmem:[%s12942_s28 + $0x810] sm:$0xff]  ;;  %v3165_v14 = vld [vmem:[%s12942_s28 + $0x1a40] sm:$0xff] }
 0x31c   : > { %v2779_v25 = vld [vmem:[%s12942_s28 + $0xe30] sm:$0xff] }
 0x31d   : > { %v2971_v26 = vld [vmem:[%s12942_s28 + $0x1430] sm:$0xff] }
 0x320   : > { %10335 = vmatpush1.bf16.xpose.msra.mxu0 %v10334_v41  ;;  %v2193_v41 = vld [vmem:[%s12957_s4 + $0x1e0] sm:$0xff] }
 0x321   : > { %10343 = vmatpush1.bf16.xpose.msra.mxu1 %v10342_v42  ;;  %5253 = vmatprep.subr.mxu0 %v3150_v43  ;;  %v10362_v42 = vpack.c.bf16 %v2581_v33, %v2389_v32  ;;  %v2195_v43 = vld [vmem:[%s12957_s4 + $0x1f0] sm:$0xff] }
 0x322   : > { %v3771_v45 = vpop.f32.mrb[6].mxu0  ;;  %5323 = vmatprep.subr.mxu1 %v3152_v44  ;;  %v10370_v44 = vpack.c.bf16 %v2583_v36, %v2391_v34  ;;  %v2398_v32 = vld [vmem:[%s12942_s28 + $0x248] sm:$0xff] }
 0x323   : > { %v3772_v48 = vadd.f32 %v3771_v45, %v3702_v18  ;;  %v3773_v49 = vpop.f32.mrb[7].mxu0  ;;  %v3841_v50 = vpop.f32.mrb[6].mxu1  ;;  %v3156_v18 = vld [vmem:[%s12942_s28 + $0x19f8] sm:$0xff]  ;;  %v10364_v45 = vpack.c.bf16 %v2966_v38, %v2774_v37  ;;  %v2590_v33 = vld [vmem:[%s12942_s28 + $0x848] sm:$0xff] }
 0x324   : > { %v3843_v53 = vpop.f32.mrb[7].mxu1  ;;  %v2773_v49 = vld [vmem:[%s12942_s28 + $0xe00] sm:$0xff]  ;;  %v2400_v37 = vld [vmem:[%s12942_s28 + $0x258] sm:$0xff] }
 0x325   : > { %v3842_v56 = vadd.f32 %v3841_v50, %v3772_v48  ;;  %v2200_v48 = vld [vmem:[%s12957_s4 + $0x218] sm:$0xff]  ;;  %v2965_v50 = vld [vmem:[%s12942_s28 + $0x1400] sm:$0xff]  ;;  %v2592_v38 = vld [vmem:[%s12942_s28 + $0x858] sm:$0xff] }
 0x326   : > { %v10366_v53 = vpack.c.bf16 %v2965_v50, %v2773_v49  ;;  %v2782_v49 = vld [vmem:[%s12942_s28 + $0xe48] sm:$0xff] }
 0x327   : > { %v2974_v50 = vld [vmem:[%s12942_s28 + $0x1448] sm:$0xff] }
 0x328   : > { %5254 = vmatpush1.xpose.msra.mxu0 %v3149_v54  ;;  %v10374_v54 = vpack.c.bf16 %v2967_v52, %v2775_v51  ;;  %v2784_v51 = vld [vmem:[%s12942_s28 + $0xe58] sm:$0xff] }
 0x329   : > { %5324 = vmatpush1.xpose.msra.mxu1 %v3151_v55  ;;  %10345 = vmatprep.subr.bf16.mxu0 %v10344_v57  ;;  %v3158_v55 = vld [vmem:[%s12942_s28 + $0x1a08] sm:$0xff]  ;;  %v2976_v52 = vld [vmem:[%s12942_s28 + $0x1458] sm:$0xff] }
 0x32a   : > { %10353 = vmatprep.subr.bf16.mxu1 %v10352_v61 }
 0x32b   : > { %5310 = vmatmul.mubr.f32.vlgmr.msra.gmra.mrb[28].mxu0 %v2189_v3  ;;  %v3159_v3 = vld [vmem:[%s12942_s28 + $0x1a10] sm:$0xff] }
 0x32c   : > { %10347 = vmatpush1.bf16.xpose.msra.mxu0 %v10346_v4  ;;  %5380 = vmatmul.mubr.f32.vlgmr.msra.gmra.mrb[28].mxu1 %v2191_v5  ;;  %v10376_v5 = vpack.c.bf16 %v2586_v59, %v2394_v58  ;;  %v10404_v58 = vpack.c.bf16 %v2976_v52, %v2784_v51  ;;  %v2206_v59 = vld [vmem:[%s12957_s4 + $0x248] sm:$0xff] }
 0x32d   : > { %10355 = vmatpush1.bf16.xpose.msra.mxu1 %v10354_v6  ;;  %10349 = vmatprep.subr.bf16.mxu0 %v10348_v7  ;;  %v2393_v6 = vld [vmem:[%s12942_s28 + $0x220] sm:$0xff] }
 0x32e   : > { %10357 = vmatprep.subr.bf16.mxu1 %v10356_v8  ;;  %5449 = vmatprep.mubr.f32.mxu0 %v2194_v9  ;;  %v2585_v7 = vld [vmem:[%s12942_s28 + $0x820] sm:$0xff]  ;;  %v2395_v8 = vld [vmem:[%s12942_s28 + $0x230] sm:$0xff]  ;;  %v10384_v9 = vpack.c.bf16 %v2588_v0, %v2396_v63 }
 0x32f   : > { %5519 = vmatprep.mubr.f32.mxu1 %v2196_v10  ;;  %v2587_v10 = vld [vmem:[%s12942_s28 + $0x830] sm:$0xff]  ;;  %v3169_v52 = vld [vmem:[%s12942_s28 + $0x1a60] sm:$0xff] }
 0x330   : > { %v2783_v63 = vld [vmem:[%s12942_s28 + $0xe50] sm:$0xff] }
 0x331   : > { %v2975_v0 = vld [vmem:[%s12942_s28 + $0x1450] sm:$0xff] }
 0x334   : > { %10351 = vmatpush1.bf16.xpose.msra.mxu0 %v10350_v15  ;;  %v2197_v15 = vld [vmem:[%s12957_s4 + $0x200] sm:$0xff] }
 0x335   : > { %10359 = vmatpush1.bf16.xpose.msra.mxu1 %v10358_v16  ;;  %5393 = vmatprep.subr.mxu0 %v3154_v17  ;;  %v10378_v16 = vpack.c.bf16 %v2585_v7, %v2393_v6  ;;  %v2199_v17 = vld [vmem:[%s12957_s4 + $0x210] sm:$0xff] }
 0x336   : > { %v3911_v19 = vpop.f32.mrb[8].mxu0  ;;  %5463 = vmatprep.subr.mxu1 %v3156_v18  ;;  %v10386_v18 = vpack.c.bf16 %v2587_v10, %v2395_v8  ;;  %v2402_v6 = vld [vmem:[%s12942_s28 + $0x268] sm:$0xff] }
 0x337   : > { %v3912_v22 = vadd.f32 %v3911_v19, %v3842_v56  ;;  %v3913_v23 = vpop.f32.mrb[9].mxu0  ;;  %v3981_v24 = vpop.f32.mrb[8].mxu1  ;;  %v3160_v56 = vld [vmem:[%s12942_s28 + $0x1a18] sm:$0xff]  ;;  %v10380_v19 = vpack.c.bf16 %v2970_v12, %v2778_v11  ;;  %v2594_v7 = vld [vmem:[%s12942_s28 + $0x868] sm:$0xff] }
 0x338   : > { %v3983_v27 = vpop.f32.mrb[9].mxu1  ;;  %v2777_v23 = vld [vmem:[%s12942_s28 + $0xe20] sm:$0xff]  ;;  %v2404_v11 = vld [vmem:[%s12942_s28 + $0x278] sm:$0xff] }
 0x339   : > { %v3982_v30 = vadd.f32 %v3981_v24, %v3912_v22  ;;  %v2204_v22 = vld [vmem:[%s12957_s4 + $0x238] sm:$0xff]  ;;  %v2969_v24 = vld [vmem:[%s12942_s28 + $0x1420] sm:$0xff]  ;;  %v2596_v12 = vld [vmem:[%s12942_s28 + $0x878] sm:$0xff] }
 0x33a   : > { %v10382_v27 = vpack.c.bf16 %v2969_v24, %v2777_v23  ;;  %v2786_v23 = vld [vmem:[%s12942_s28 + $0xe68] sm:$0xff] }
 0x33b   : > { %v2978_v24 = vld [vmem:[%s12942_s28 + $0x1468] sm:$0xff] }
 0x33c   : > { %5394 = vmatpush1.xpose.msra.mxu0 %v3153_v28  ;;  %v10390_v28 = vpack.c.bf16 %v2971_v26, %v2779_v25  ;;  %v2788_v25 = vld [vmem:[%s12942_s28 + $0xe78] sm:$0xff] }
 0x33d   : > { %5464 = vmatpush1.xpose.msra.mxu1 %v3155_v29  ;;  %10361 = vmatprep.subr.bf16.mxu0 %v10360_v31  ;;  %v3162_v29 = vld [vmem:[%s12942_s28 + $0x1a28] sm:$0xff]  ;;  %v2980_v26 = vld [vmem:[%s12942_s28 + $0x1478] sm:$0xff] }
 0x33e   : > { %10369 = vmatprep.subr.bf16.mxu1 %v10368_v35 }
 0x33f   : > { %5450 = vmatmul.mubr.f32.vlgmr.msra.gmra.mrb[30].mxu0 %v2193_v41  ;;  %v3163_v41 = vld [vmem:[%s12942_s28 + $0x1a30] sm:$0xff] }
 0x340   : > { %10363 = vmatpush1.bf16.xpose.msra.mxu0 %v10362_v42  ;;  %5520 = vmatmul.mubr.f32.vlgmr.msra.gmra.mrb[30].mxu1 %v2195_v43  ;;  %v10392_v43 = vpack.c.bf16 %v2590_v33, %v2398_v32  ;;  %v10420_v32 = vpack.c.bf16 %v2980_v26, %v2788_v25  ;;  %v2210_v33 = vld [vmem:[%s12957_s4 + $0x268] sm:$0xff] }
 0x341   : > { %10371 = vmatpush1.bf16.xpose.msra.mxu1 %v10370_v44  ;;  %10365 = vmatprep.subr.bf16.mxu0 %v10364_v45  ;;  %v2397_v44 = vld [vmem:[%s12942_s28 + $0x240] sm:$0xff] }
 0x342   : > { %10373 = vmatprep.subr.bf16.mxu1 %v10372_v46  ;;  %5589 = vmatprep.mubr.f32.mxu0 %v2198_v47  ;;  %v2589_v45 = vld [vmem:[%s12942_s28 + $0x840] sm:$0xff]  ;;  %v2399_v46 = vld [vmem:[%s12942_s28 + $0x250] sm:$0xff]  ;;  %v10400_v47 = vpack.c.bf16 %v2592_v38, %v2400_v37 }
 0x343   : > { %5659 = vmatprep.mubr.f32.mxu1 %v2200_v48  ;;  %v2591_v48 = vld [vmem:[%s12942_s28 + $0x850] sm:$0xff]  ;;  %v3173_v26 = vld [vmem:[%s12942_s28 + $0x1a80] sm:$0xff] }
 0x344   : > { %v2787_v37 = vld [vmem:[%s12942_s28 + $0xe70] sm:$0xff] }
 0x345   : > { %v2979_v38 = vld [vmem:[%s12942_s28 + $0x1470] sm:$0xff] }
 0x348   : > { %10367 = vmatpush1.bf16.xpose.msra.mxu0 %v10366_v53  ;;  %v2201_v53 = vld [vmem:[%s12957_s4 + $0x220] sm:$0xff] }
 0x349   : > { %10375 = vmatpush1.bf16.xpose.msra.mxu1 %v10374_v54  ;;  %5533 = vmatprep.subr.mxu0 %v3158_v55  ;;  %v10394_v54 = vpack.c.bf16 %v2589_v45, %v2397_v44  ;;  %v2203_v55 = vld [vmem:[%s12957_s4 + $0x230] sm:$0xff] }
 0x34a   : > { %v4051_v57 = vpop.f32.mrb[10].mxu0  ;;  %5603 = vmatprep.subr.mxu1 %v3160_v56  ;;  %v10402_v56 = vpack.c.bf16 %v2591_v48, %v2399_v46  ;;  %v2406_v44 = vld [vmem:[%s12942_s28 + $0x288] sm:$0xff] }
 0x34b   : > { %v4052_v60 = vadd.f32 %v4051_v57, %v3982_v30  ;;  %v4053_v61 = vpop.f32.mrb[11].mxu0  ;;  %v4121_v62 = vpop.f32.mrb[10].mxu1  ;;  %v3164_v30 = vld [vmem:[%s12942_s28 + $0x1a38] sm:$0xff]  ;;  %v10396_v57 = vpack.c.bf16 %v2974_v50, %v2782_v49  ;;  %v2598_v45 = vld [vmem:[%s12942_s28 + $0x888] sm:$0xff] }
 0x34c   : > { %v4123_v1 = vpop.f32.mrb[11].mxu1  ;;  %v2781_v61 = vld [vmem:[%s12942_s28 + $0xe40] sm:$0xff]  ;;  %v2408_v49 = vld [vmem:[%s12942_s28 + $0x298] sm:$0xff] }
 0x34d   : > { %v4122_v4 = vadd.f32 %v4121_v62, %v4052_v60  ;;  %v2208_v60 = vld [vmem:[%s12957_s4 + $0x258] sm:$0xff]  ;;  %v2973_v62 = vld [vmem:[%s12942_s28 + $0x1440] sm:$0xff]  ;;  %v2600_v50 = vld [vmem:[%s12942_s28 + $0x898] sm:$0xff] }
 0x34e   : > { %v10398_v1 = vpack.c.bf16 %v2973_v62, %v2781_v61  ;;  %v2790_v61 = vld [vmem:[%s12942_s28 + $0xe88] sm:$0xff] }
 0x34f   : > { %v2982_v62 = vld [vmem:[%s12942_s28 + $0x1488] sm:$0xff] }
 0x350   : > { %5534 = vmatpush1.xpose.msra.mxu0 %v3157_v2  ;;  %v10406_v2 = vpack.c.bf16 %v2975_v0, %v2783_v63  ;;  %v2792_v63 = vld [vmem:[%s12942_s28 + $0xe98] sm:$0xff] }
 0x351   : > { %5604 = vmatpush1.xpose.msra.mxu1 %v3159_v3  ;;  %10377 = vmatprep.subr.bf16.mxu0 %v10376_v5  ;;  %v3166_v3 = vld [vmem:[%s12942_s28 + $0x1a48] sm:$0xff]  ;;  %v2984_v0 = vld [vmem:[%s12942_s28 + $0x1498] sm:$0xff] }
 0x352   : > { %10385 = vmatprep.subr.bf16.mxu1 %v10384_v9 }
 0x353   : > { %5590 = vmatmul.mubr.f32.vlgmr.msra.gmra.mrb[32].mxu0 %v2197_v15  ;;  %v3167_v15 = vld [vmem:[%s12942_s28 + $0x1a50] sm:$0xff] }
 0x354   : > { %10379 = vmatpush1.bf16.xpose.msra.mxu0 %v10378_v16  ;;  %5660 = vmatmul.mubr.f32.vlgmr.msra.gmra.mrb[32].mxu1 %v2199_v17  ;;  %v10408_v17 = vpack.c.bf16 %v2594_v7, %v2402_v6  ;;  %v10436_v6 = vpack.c.bf16 %v2984_v0, %v2792_v63  ;;  %v2214_v7 = vld [vmem:[%s12957_s4 + $0x288] sm:$0xff] }
 0x355   : > { %10387 = vmatpush1.bf16.xpose.msra.mxu1 %v10386_v18  ;;  %10381 = vmatprep.subr.bf16.mxu0 %v10380_v19  ;;  %v2401_v18 = vld [vmem:[%s12942_s28 + $0x260] sm:$0xff] }
 0x356   : > { %10389 = vmatprep.subr.bf16.mxu1 %v10388_v20  ;;  %5729 = vmatprep.mubr.f32.mxu0 %v2202_v21  ;;  %v2593_v19 = vld [vmem:[%s12942_s28 + $0x860] sm:$0xff]  ;;  %v2403_v20 = vld [vmem:[%s12942_s28 + $0x270] sm:$0xff]  ;;  %v10416_v21 = vpack.c.bf16 %v2596_v12, %v2404_v11 }
 0x357   : > { %5799 = vmatprep.mubr.f32.mxu1 %v2204_v22  ;;  %v2595_v22 = vld [vmem:[%s12942_s28 + $0x870] sm:$0xff]  ;;  %v3177_v0 = vld [vmem:[%s12942_s28 + $0x1aa0] sm:$0xff] }
 0x358   : > { %v2791_v11 = vld [vmem:[%s12942_s28 + $0xe90] sm:$0xff] }
 0x359   : > { %v2983_v12 = vld [vmem:[%s12942_s28 + $0x1490] sm:$0xff] }
 0x35c   : > { %10383 = vmatpush1.bf16.xpose.msra.mxu0 %v10382_v27  ;;  %v2205_v27 = vld [vmem:[%s12957_s4 + $0x240] sm:$0xff] }
 0x35d   : > { %10391 = vmatpush1.bf16.xpose.msra.mxu1 %v10390_v28  ;;  %5673 = vmatprep.subr.mxu0 %v3162_v29  ;;  %v10410_v28 = vpack.c.bf16 %v2593_v19, %v2401_v18  ;;  %v2207_v29 = vld [vmem:[%s12957_s4 + $0x250] sm:$0xff] }
 0x35e   : > { %v4191_v31 = vpop.f32.mrb[12].mxu0  ;;  %5743 = vmatprep.subr.mxu1 %v3164_v30  ;;  %v10418_v30 = vpack.c.bf16 %v2595_v22, %v2403_v20  ;;  %v2410_v18 = vld [vmem:[%s12942_s28 + $0x2a8] sm:$0xff] }
 0x35f   : > { %v4192_v34 = vadd.f32 %v4191_v31, %v4122_v4  ;;  %v4193_v35 = vpop.f32.mrb[13].mxu0  ;;  %v4261_v36 = vpop.f32.mrb[12].mxu1  ;;  %v3168_v4 = vld [vmem:[%s12942_s28 + $0x1a58] sm:$0xff]  ;;  %v10412_v31 = vpack.c.bf16 %v2978_v24, %v2786_v23  ;;  %v2602_v19 = vld [vmem:[%s12942_s28 + $0x8a8] sm:$0xff] }
 0x360   : > { %v4263_v39 = vpop.f32.mrb[13].mxu1  ;;  %v2785_v35 = vld [vmem:[%s12942_s28 + $0xe60] sm:$0xff]  ;;  %v2412_v23 = vld [vmem:[%s12942_s28 + $0x2b8] sm:$0xff] }
 0x361   : > { %v4262_v42 = vadd.f32 %v4261_v36, %v4192_v34  ;;  %v2212_v34 = vld [vmem:[%s12957_s4 + $0x278] sm:$0xff]  ;;  %v2977_v36 = vld [vmem:[%s12942_s28 + $0x1460] sm:$0xff]  ;;  %v2604_v24 = vld [vmem:[%s12942_s28 + $0x8b8] sm:$0xff] }
 0x362   : > { %v10414_v39 = vpack.c.bf16 %v2977_v36, %v2785_v35  ;;  %v2794_v35 = vld [vmem:[%s12942_s28 + $0xea8] sm:$0xff] }
 0x363   : > { %v2986_v36 = vld [vmem:[%s12942_s28 + $0x14a8] sm:$0xff] }
 0x364   : > { %5674 = vmatpush1.xpose.msra.mxu0 %v3161_v40  ;;  %v10422_v40 = vpack.c.bf16 %v2979_v38, %v2787_v37  ;;  %v2796_v37 = vld [vmem:[%s12942_s28 + $0xeb8] sm:$0xff] }
 0x365   : > { %5744 = vmatpush1.xpose.msra.mxu1 %v3163_v41  ;;  %10393 = vmatprep.subr.bf16.mxu0 %v10392_v43  ;;  %v3170_v41 = vld [vmem:[%s12942_s28 + $0x1a68] sm:$0xff]  ;;  %v2988_v38 = vld [vmem:[%s12942_s28 + $0x14b8] sm:$0xff] }
 0x366   : > { %10401 = vmatprep.subr.bf16.mxu1 %v10400_v47 }
 0x367   : > { %5730 = vmatmul.mubr.f32.vlgmr.msra.gmra.mrb[34].mxu0 %v2201_v53  ;;  %v3171_v53 = vld [vmem:[%s12942_s28 + $0x1a70] sm:$0xff] }
 0x368   : > { %10395 = vmatpush1.bf16.xpose.msra.mxu0 %v10394_v54  ;;  %5800 = vmatmul.mubr.f32.vlgmr.msra.gmra.mrb[34].mxu1 %v2203_v55  ;;  %v10424_v55 = vpack.c.bf16 %v2598_v45, %v2406_v44  ;;  %v10452_v44 = vpack.c.bf16 %v2988_v38, %v2796_v37  ;;  %v2218_v45 = vld [vmem:[%s12957_s4 + $0x2a8] sm:$0xff] }
 0x369   : > { %10403 = vmatpush1.bf16.xpose.msra.mxu1 %v10402_v56  ;;  %10397 = vmatprep.subr.bf16.mxu0 %v10396_v57  ;;  %v2405_v56 = vld [vmem:[%s12942_s28 + $0x280] sm:$0xff] }
 0x36a   : > { %10405 = vmatprep.subr.bf16.mxu1 %v10404_v58  ;;  %5869 = vmatprep.mubr.f32.mxu0 %v2206_v59  ;;  %v2597_v57 = vld [vmem:[%s12942_s28 + $0x880] sm:$0xff]  ;;  %v2407_v58 = vld [vmem:[%s12942_s28 + $0x290] sm:$0xff]  ;;  %v10432_v59 = vpack.c.bf16 %v2600_v50, %v2408_v49 }
 0x36b   : > { %5939 = vmatprep.mubr.f32.mxu1 %v2208_v60  ;;  %v2599_v60 = vld [vmem:[%s12942_s28 + $0x890] sm:$0xff]  ;;  %v3181_v38 = vld [vmem:[%s12942_s28 + $0x1ac0] sm:$0xff] }
 0x36c   : > { %v2795_v49 = vld [vmem:[%s12942_s28 + $0xeb0] sm:$0xff] }
 0x36d   : > { %v2987_v50 = vld [vmem:[%s12942_s28 + $0x14b0] sm:$0xff] }
 0x370   : > { %10399 = vmatpush1.bf16.xpose.msra.mxu0 %v10398_v1  ;;  %v2209_v1 = vld [vmem:[%s12957_s4 + $0x260] sm:$0xff] }
 0x371   : > { %10407 = vmatpush1.bf16.xpose.msra.mxu1 %v10406_v2  ;;  %5813 = vmatprep.subr.mxu0 %v3166_v3  ;;  %v10426_v2 = vpack.c.bf16 %v2597_v57, %v2405_v56  ;;  %v2211_v3 = vld [vmem:[%s12957_s4 + $0x270] sm:$0xff] }
 0x372   : > { %v4331_v5 = vpop.f32.mrb[14].mxu0  ;;  %5883 = vmatprep.subr.mxu1 %v3168_v4  ;;  %v10434_v4 = vpack.c.bf16 %v2599_v60, %v2407_v58  ;;  %v2414_v56 = vld [vmem:[%s12942_s28 + $0x2c8] sm:$0xff] }
 0x373   : > { %v4332_v8 = vadd.f32 %v4331_v5, %v4262_v42  ;;  %v4333_v9 = vpop.f32.mrb[15].mxu0  ;;  %v4401_v10 = vpop.f32.mrb[14].mxu1  ;;  %v3172_v42 = vld [vmem:[%s12942_s28 + $0x1a78] sm:$0xff]  ;;  %v10428_v5 = vpack.c.bf16 %v2982_v62, %v2790_v61  ;;  %v2606_v57 = vld [vmem:[%s12942_s28 + $0x8c8] sm:$0xff] }
 0x374   : > { %v4403_v13 = vpop.f32.mrb[15].mxu1  ;;  %v2789_v9 = vld [vmem:[%s12942_s28 + $0xe80] sm:$0xff]  ;;  %v2416_v61 = vld [vmem:[%s12942_s28 + $0x2d8] sm:$0xff] }
 0x375   : > { %v4402_v16 = vadd.f32 %v4401_v10, %v4332_v8  ;;  %v2216_v8 = vld [vmem:[%s12957_s4 + $0x298] sm:$0xff]  ;;  %v2981_v10 = vld [vmem:[%s12942_s28 + $0x1480] sm:$0xff]  ;;  %v2608_v62 = vld [vmem:[%s12942_s28 + $0x8d8] sm:$0xff] }
 0x376   : > { %v10430_v13 = vpack.c.bf16 %v2981_v10, %v2789_v9  ;;  %v2798_v9 = vld [vmem:[%s12942_s28 + $0xec8] sm:$0xff] }
 0x377   : > { %v2990_v10 = vld [vmem:[%s12942_s28 + $0x14c8] sm:$0xff] }
 0x378   : > { %5814 = vmatpush1.xpose.msra.mxu0 %v3165_v14  ;;  %v10438_v14 = vpack.c.bf16 %v2983_v12, %v2791_v11  ;;  %v2800_v11 = vld [vmem:[%s12942_s28 + $0xed8] sm:$0xff] }
 0x379   : > { %5884 = vmatpush1.xpose.msra.mxu1 %v3167_v15  ;;  %10409 = vmatprep.subr.bf16.mxu0 %v10408_v17  ;;  %v3174_v15 = vld [vmem:[%s12942_s28 + $0x1a88] sm:$0xff]  ;;  %v2992_v12 = vld [vmem:[%s12942_s28 + $0x14d8] sm:$0xff] }
 0x37a   : > { %10417 = vmatprep.subr.bf16.mxu1 %v10416_v21 }
 0x37b   : > { %5870 = vmatmul.mubr.f32.vlgmr.msra.gmra.mrb[36].mxu0 %v2205_v27  ;;  %v3175_v27 = vld [vmem:[%s12942_s28 + $0x1a90] sm:$0xff] }
 0x37c   : > { %10411 = vmatpush1.bf16.xpose.msra.mxu0 %v10410_v28  ;;  %5940 = vmatmul.mubr.f32.vlgmr.msra.gmra.mrb[36].mxu1 %v2207_v29  ;;  %v10440_v29 = vpack.c.bf16 %v2602_v19, %v2410_v18  ;;  %v10468_v18 = vpack.c.bf16 %v2992_v12, %v2800_v11  ;;  %v2222_v19 = vld [vmem:[%s12957_s4 + $0x2c8] sm:$0xff] }
 0x37d   : > { %10419 = vmatpush1.bf16.xpose.msra.mxu1 %v10418_v30  ;;  %10413 = vmatprep.subr.bf16.mxu0 %v10412_v31  ;;  %v2409_v30 = vld [vmem:[%s12942_s28 + $0x2a0] sm:$0xff] }
 0x37e   : > { %10421 = vmatprep.subr.bf16.mxu1 %v10420_v32  ;;  %6009 = vmatprep.mubr.f32.mxu0 %v2210_v33  ;;  %v2601_v31 = vld [vmem:[%s12942_s28 + $0x8a0] sm:$0xff]  ;;  %v2411_v32 = vld [vmem:[%s12942_s28 + $0x2b0] sm:$0xff]  ;;  %v10448_v33 = vpack.c.bf16 %v2604_v24, %v2412_v23 }
 0x37f   : > { %6079 = vmatprep.mubr.f32.mxu1 %v2212_v34  ;;  %v2603_v34 = vld [vmem:[%s12942_s28 + $0x8b0] sm:$0xff]  ;;  %v3185_v12 = vld [vmem:[%s12942_s28 + $0x1ae0] sm:$0xff] }
 0x380   : > { %v2799_v23 = vld [vmem:[%s12942_s28 + $0xed0] sm:$0xff] }
 0x381   : > { %v2991_v24 = vld [vmem:[%s12942_s28 + $0x14d0] sm:$0xff] }
 0x384   : > { %10415 = vmatpush1.bf16.xpose.msra.mxu0 %v10414_v39  ;;  %v2213_v39 = vld [vmem:[%s12957_s4 + $0x280] sm:$0xff] }
 0x385   : > { %10423 = vmatpush1.bf16.xpose.msra.mxu1 %v10422_v40  ;;  %5953 = vmatprep.subr.mxu0 %v3170_v41  ;;  %v10442_v40 = vpack.c.bf16 %v2601_v31, %v2409_v30  ;;  %v2215_v41 = vld [vmem:[%s12957_s4 + $0x290] sm:$0xff] }
 0x386   : > { %v4471_v43 = vpop.f32.mrb[16].mxu0  ;;  %6023 = vmatprep.subr.mxu1 %v3172_v42  ;;  %v10450_v42 = vpack.c.bf16 %v2603_v34, %v2411_v32  ;;  %v2418_v30 = vld [vmem:[%s12942_s28 + $0x2e8] sm:$0xff] }
 0x387   : > { %v4472_v46 = vadd.f32 %v4471_v43, %v4402_v16  ;;  %v4473_v47 = vpop.f32.mrb[17].mxu0  ;;  %v4541_v48 = vpop.f32.mrb[16].mxu1  ;;  %v3176_v16 = vld [vmem:[%s12942_s28 + $0x1a98] sm:$0xff]  ;;  %v10444_v43 = vpack.c.bf16 %v2986_v36, %v2794_v35  ;;  %v2610_v31 = vld [vmem:[%s12942_s28 + $0x8e8] sm:$0xff] }
 0x388   : > { %v4543_v51 = vpop.f32.mrb[17].mxu1  ;;  %v2793_v47 = vld [vmem:[%s12942_s28 + $0xea0] sm:$0xff]  ;;  %v2420_v35 = vld [vmem:[%s12942_s28 + $0x2f8] sm:$0xff] }
 0x389   : > { %v4542_v54 = vadd.f32 %v4541_v48, %v4472_v46  ;;  %v2220_v46 = vld [vmem:[%s12957_s4 + $0x2b8] sm:$0xff]  ;;  %v2985_v48 = vld [vmem:[%s12942_s28 + $0x14a0] sm:$0xff]  ;;  %v2612_v36 = vld [vmem:[%s12942_s28 + $0x8f8] sm:$0xff] }
 0x38a   : > { %v10446_v51 = vpack.c.bf16 %v2985_v48, %v2793_v47  ;;  %v2802_v47 = vld [vmem:[%s12942_s28 + $0xee8] sm:$0xff] }
 0x38b   : > { %v2994_v48 = vld [vmem:[%s12942_s28 + $0x14e8] sm:$0xff] }
 0x38c   : > { %5954 = vmatpush1.xpose.msra.mxu0 %v3169_v52  ;;  %v10454_v52 = vpack.c.bf16 %v2987_v50, %v2795_v49  ;;  %v2804_v49 = vld [vmem:[%s12942_s28 + $0xef8] sm:$0xff] }
 0x38d   : > { %6024 = vmatpush1.xpose.msra.mxu1 %v3171_v53  ;;  %10425 = vmatprep.subr.bf16.mxu0 %v10424_v55  ;;  %v3178_v53 = vld [vmem:[%s12942_s28 + $0x1aa8] sm:$0xff]  ;;  %v2996_v50 = vld [vmem:[%s12942_s28 + $0x14f8] sm:$0xff] }
 0x38e   : > { %10433 = vmatprep.subr.bf16.mxu1 %v10432_v59 }
 0x38f   : > { %6010 = vmatmul.mubr.f32.vlgmr.msra.gmra.mrb[38].mxu0 %v2209_v1  ;;  %v3179_v1 = vld [vmem:[%s12942_s28 + $0x1ab0] sm:$0xff] }
 0x390   : > { %10427 = vmatpush1.bf16.xpose.msra.mxu0 %v10426_v2  ;;  %6080 = vmatmul.mubr.f32.vlgmr.msra.gmra.mrb[38].mxu1 %v2211_v3  ;;  %v10456_v3 = vpack.c.bf16 %v2606_v57, %v2414_v56  ;;  %v10484_v56 = vpack.c.bf16 %v2996_v50, %v2804_v49  ;;  %v2226_v57 = vld [vmem:[%s12957_s4 + $0x2e8] sm:$0xff] }
 0x391   : > { %10435 = vmatpush1.bf16.xpose.msra.mxu1 %v10434_v4  ;;  %10429 = vmatprep.subr.bf16.mxu0 %v10428_v5  ;;  %v2413_v4 = vld [vmem:[%s12942_s28 + $0x2c0] sm:$0xff] }
 0x392   : > { %10437 = vmatprep.subr.bf16.mxu1 %v10436_v6  ;;  %6149 = vmatprep.mubr.f32.mxu0 %v2214_v7  ;;  %v2605_v5 = vld [vmem:[%s12942_s28 + $0x8c0] sm:$0xff]  ;;  %v2415_v6 = vld [vmem:[%s12942_s28 + $0x2d0] sm:$0xff]  ;;  %v10464_v7 = vpack.c.bf16 %v2608_v62, %v2416_v61 }
 0x393   : > { %6219 = vmatprep.mubr.f32.mxu1 %v2216_v8  ;;  %v2607_v8 = vld [vmem:[%s12942_s28 + $0x8d0] sm:$0xff]  ;;  %v3189_v50 = vld [vmem:[%s12942_s28 + $0x1b00] sm:$0xff] }
 0x394   : > { %v2803_v61 = vld [vmem:[%s12942_s28 + $0xef0] sm:$0xff] }
 0x395   : > { %v2995_v62 = vld [vmem:[%s12942_s28 + $0x14f0] sm:$0xff] }
 0x398   : > { %10431 = vmatpush1.bf16.xpose.msra.mxu0 %v10430_v13  ;;  %v2217_v13 = vld [vmem:[%s12957_s4 + $0x2a0] sm:$0xff] }
 0x399   : > { %10439 = vmatpush1.bf16.xpose.msra.mxu1 %v10438_v14  ;;  %6093 = vmatprep.subr.mxu0 %v3174_v15  ;;  %v10458_v14 = vpack.c.bf16 %v2605_v5, %v2413_v4  ;;  %v2219_v15 = vld [vmem:[%s12957_s4 + $0x2b0] sm:$0xff] }
 0x39a   : > { %v4611_v17 = vpop.f32.mrb[18].mxu0  ;;  %6163 = vmatprep.subr.mxu1 %v3176_v16  ;;  %v10466_v16 = vpack.c.bf16 %v2607_v8, %v2415_v6  ;;  %v2422_v4 = vld [vmem:[%s12942_s28 + $0x308] sm:$0xff] }
 0x39b   : > { %v4612_v20 = vadd.f32 %v4611_v17, %v4542_v54  ;;  %v4613_v21 = vpop.f32.mrb[19].mxu0  ;;  %v4681_v22 = vpop.f32.mrb[18].mxu1  ;;  %v3180_v54 = vld [vmem:[%s12942_s28 + $0x1ab8] sm:$0xff]  ;;  %v10460_v17 = vpack.c.bf16 %v2990_v10, %v2798_v9  ;;  %v2614_v5 = vld [vmem:[%s12942_s28 + $0x908] sm:$0xff] }
 0x39c   : > { %v4683_v25 = vpop.f32.mrb[19].mxu1  ;;  %v2797_v21 = vld [vmem:[%s12942_s28 + $0xec0] sm:$0xff]  ;;  %v2424_v9 = vld [vmem:[%s12942_s28 + $0x318] sm:$0xff] }
 0x39d   : > { %v4682_v28 = vadd.f32 %v4681_v22, %v4612_v20  ;;  %v2224_v20 = vld [vmem:[%s12957_s4 + $0x2d8] sm:$0xff]  ;;  %v2989_v22 = vld [vmem:[%s12942_s28 + $0x14c0] sm:$0xff]  ;;  %v2616_v10 = vld [vmem:[%s12942_s28 + $0x918] sm:$0xff] }
 0x39e   : > { %v10462_v25 = vpack.c.bf16 %v2989_v22, %v2797_v21  ;;  %v2806_v21 = vld [vmem:[%s12942_s28 + $0xf08] sm:$0xff] }
 0x39f   : > { %v2998_v22 = vld [vmem:[%s12942_s28 + $0x1508] sm:$0xff] }
 0x3a0   : > { %6094 = vmatpush1.xpose.msra.mxu0 %v3173_v26  ;;  %v10470_v26 = vpack.c.bf16 %v2991_v24, %v2799_v23  ;;  %v2808_v23 = vld [vmem:[%s12942_s28 + $0xf18] sm:$0xff] }
 0x3a1   : > { %6164 = vmatpush1.xpose.msra.mxu1 %v3175_v27  ;;  %10441 = vmatprep.subr.bf16.mxu0 %v10440_v29  ;;  %v3182_v27 = vld [vmem:[%s12942_s28 + $0x1ac8] sm:$0xff]  ;;  %v3000_v24 = vld [vmem:[%s12942_s28 + $0x1518] sm:$0xff] }
 0x3a2   : > { %10449 = vmatprep.subr.bf16.mxu1 %v10448_v33 }
 0x3a3   : > { %6150 = vmatmul.mubr.f32.vlgmr.msra.gmra.mrb[40].mxu0 %v2213_v39  ;;  %v3183_v39 = vld [vmem:[%s12942_s28 + $0x1ad0] sm:$0xff] }
 0x3a4   : > { %10443 = vmatpush1.bf16.xpose.msra.mxu0 %v10442_v40  ;;  %6220 = vmatmul.mubr.f32.vlgmr.msra.gmra.mrb[40].mxu1 %v2215_v41  ;;  %v10472_v41 = vpack.c.bf16 %v2610_v31, %v2418_v30  ;;  %v10500_v30 = vpack.c.bf16 %v3000_v24, %v2808_v23  ;;  %v2230_v31 = vld [vmem:[%s12957_s4 + $0x308] sm:$0xff] }
 0x3a5   : > { %10451 = vmatpush1.bf16.xpose.msra.mxu1 %v10450_v42  ;;  %10445 = vmatprep.subr.bf16.mxu0 %v10444_v43  ;;  %v2417_v42 = vld [vmem:[%s12942_s28 + $0x2e0] sm:$0xff] }
 0x3a6   : > { %10453 = vmatprep.subr.bf16.mxu1 %v10452_v44  ;;  %6289 = vmatprep.mubr.f32.mxu0 %v2218_v45  ;;  %v2609_v43 = vld [vmem:[%s12942_s28 + $0x8e0] sm:$0xff]  ;;  %v2419_v44 = vld [vmem:[%s12942_s28 + $0x2f0] sm:$0xff]  ;;  %v10480_v45 = vpack.c.bf16 %v2612_v36, %v2420_v35 }
 0x3a7   : > { %6359 = vmatprep.mubr.f32.mxu1 %v2220_v46  ;;  %v2611_v46 = vld [vmem:[%s12942_s28 + $0x8f0] sm:$0xff]  ;;  %v3193_v24 = vld [vmem:[%s12942_s28 + $0x1b20] sm:$0xff] }
 0x3a8   : > { %v2807_v35 = vld [vmem:[%s12942_s28 + $0xf10] sm:$0xff] }
 0x3a9   : > { %v2999_v36 = vld [vmem:[%s12942_s28 + $0x1510] sm:$0xff] }
 0x3ac   : > { %10447 = vmatpush1.bf16.xpose.msra.mxu0 %v10446_v51  ;;  %v2221_v51 = vld [vmem:[%s12957_s4 + $0x2c0] sm:$0xff] }
 0x3ad   : > { %10455 = vmatpush1.bf16.xpose.msra.mxu1 %v10454_v52  ;;  %6233 = vmatprep.subr.mxu0 %v3178_v53  ;;  %v10474_v52 = vpack.c.bf16 %v2609_v43, %v2417_v42  ;;  %v2223_v53 = vld [vmem:[%s12957_s4 + $0x2d0] sm:$0xff] }
 0x3ae   : > { %v4751_v55 = vpop.f32.mrb[20].mxu0  ;;  %6303 = vmatprep.subr.mxu1 %v3180_v54  ;;  %v10482_v54 = vpack.c.bf16 %v2611_v46, %v2419_v44  ;;  %v2426_v42 = vld [vmem:[%s12942_s28 + $0x328] sm:$0xff] }
 0x3af   : > { %v4752_v58 = vadd.f32 %v4751_v55, %v4682_v28  ;;  %v4753_v59 = vpop.f32.mrb[21].mxu0  ;;  %v4821_v60 = vpop.f32.mrb[20].mxu1  ;;  %v3184_v28 = vld [vmem:[%s12942_s28 + $0x1ad8] sm:$0xff]  ;;  %v10476_v55 = vpack.c.bf16 %v2994_v48, %v2802_v47  ;;  %v2618_v43 = vld [vmem:[%s12942_s28 + $0x928] sm:$0xff] }
 0x3b0   : > { %v4823_v63 = vpop.f32.mrb[21].mxu1  ;;  %v2801_v59 = vld [vmem:[%s12942_s28 + $0xee0] sm:$0xff]  ;;  %v2428_v47 = vld [vmem:[%s12942_s28 + $0x338] sm:$0xff] }
 0x3b1   : > { %v4822_v2 = vadd.f32 %v4821_v60, %v4752_v58  ;;  %v2228_v58 = vld [vmem:[%s12957_s4 + $0x2f8] sm:$0xff]  ;;  %v2993_v60 = vld [vmem:[%s12942_s28 + $0x14e0] sm:$0xff]  ;;  %v2620_v48 = vld [vmem:[%s12942_s28 + $0x938] sm:$0xff] }
 0x3b2   : > { %v10478_v63 = vpack.c.bf16 %v2993_v60, %v2801_v59  ;;  %v2810_v59 = vld [vmem:[%s12942_s28 + $0xf28] sm:$0xff] }
 0x3b3   : > { %v3002_v60 = vld [vmem:[%s12942_s28 + $0x1528] sm:$0xff] }
 0x3b4   : > { %6234 = vmatpush1.xpose.msra.mxu0 %v3177_v0  ;;  %v10486_v0 = vpack.c.bf16 %v2995_v62, %v2803_v61  ;;  %v2812_v61 = vld [vmem:[%s12942_s28 + $0xf38] sm:$0xff] }
 0x3b5   : > { %6304 = vmatpush1.xpose.msra.mxu1 %v3179_v1  ;;  %10457 = vmatprep.subr.bf16.mxu0 %v10456_v3  ;;  %v3186_v1 = vld [vmem:[%s12942_s28 + $0x1ae8] sm:$0xff]  ;;  %v3004_v62 = vld [vmem:[%s12942_s28 + $0x1538] sm:$0xff] }
 0x3b6   : > { %10465 = vmatprep.subr.bf16.mxu1 %v10464_v7 }
 0x3b7   : > { %6290 = vmatmul.mubr.f32.vlgmr.msra.gmra.mrb[42].mxu0 %v2217_v13  ;;  %v3187_v13 = vld [vmem:[%s12942_s28 + $0x1af0] sm:$0xff] }
 0x3b8   : > { %10459 = vmatpush1.bf16.xpose.msra.mxu0 %v10458_v14  ;;  %6360 = vmatmul.mubr.f32.vlgmr.msra.gmra.mrb[42].mxu1 %v2219_v15  ;;  %v10488_v15 = vpack.c.bf16 %v2614_v5, %v2422_v4  ;;  %v10516_v4 = vpack.c.bf16 %v3004_v62, %v2812_v61  ;;  %v2234_v5 = vld [vmem:[%s12957_s4 + $0x328] sm:$0xff] }
 0x3b9   : > { %10467 = vmatpush1.bf16.xpose.msra.mxu1 %v10466_v16  ;;  %10461 = vmatprep.subr.bf16.mxu0 %v10460_v17  ;;  %v2421_v16 = vld [vmem:[%s12942_s28 + $0x300] sm:$0xff] }
 0x3ba   : > { %10469 = vmatprep.subr.bf16.mxu1 %v10468_v18  ;;  %6429 = vmatprep.mubr.f32.mxu0 %v2222_v19  ;;  %v2613_v17 = vld [vmem:[%s12942_s28 + $0x900] sm:$0xff]  ;;  %v2423_v18 = vld [vmem:[%s12942_s28 + $0x310] sm:$0xff]  ;;  %v10496_v19 = vpack.c.bf16 %v2616_v10, %v2424_v9 }
 0x3bb   : > { %6499 = vmatprep.mubr.f32.mxu1 %v2224_v20  ;;  %v2615_v20 = vld [vmem:[%s12942_s28 + $0x910] sm:$0xff]  ;;  %v3197_v62 = vld [vmem:[%s12942_s28 + $0x1b40] sm:$0xff] }
 0x3bc   : > { %v2811_v9 = vld [vmem:[%s12942_s28 + $0xf30] sm:$0xff] }
 0x3bd   : > { %v3003_v10 = vld [vmem:[%s12942_s28 + $0x1530] sm:$0xff] }
 0x3c0   : > { %10463 = vmatpush1.bf16.xpose.msra.mxu0 %v10462_v25  ;;  %v2225_v25 = vld [vmem:[%s12957_s4 + $0x2e0] sm:$0xff] }
 0x3c1   : > { %10471 = vmatpush1.bf16.xpose.msra.mxu1 %v10470_v26  ;;  %6373 = vmatprep.subr.mxu0 %v3182_v27  ;;  %v10490_v26 = vpack.c.bf16 %v2613_v17, %v2421_v16  ;;  %v2227_v27 = vld [vmem:[%s12957_s4 + $0x2f0] sm:$0xff] }
 0x3c2   : > { %v4891_v29 = vpop.f32.mrb[22].mxu0  ;;  %6443 = vmatprep.subr.mxu1 %v3184_v28  ;;  %v10498_v28 = vpack.c.bf16 %v2615_v20, %v2423_v18  ;;  %v2430_v16 = vld [vmem:[%s12942_s28 + $0x348] sm:$0xff] }
 0x3c3   : > { %v4892_v32 = vadd.f32 %v4891_v29, %v4822_v2  ;;  %v4893_v33 = vpop.f32.mrb[23].mxu0  ;;  %v4961_v34 = vpop.f32.mrb[22].mxu1  ;;  %v3188_v2 = vld [vmem:[%s12942_s28 + $0x1af8] sm:$0xff]  ;;  %v10492_v29 = vpack.c.bf16 %v2998_v22, %v2806_v21  ;;  %v2622_v17 = vld [vmem:[%s12942_s28 + $0x948] sm:$0xff] }
 0x3c4   : > { %v4963_v37 = vpop.f32.mrb[23].mxu1  ;;  %v2805_v33 = vld [vmem:[%s12942_s28 + $0xf00] sm:$0xff]  ;;  %v2432_v21 = vld [vmem:[%s12942_s28 + $0x358] sm:$0xff] }
 0x3c5   : > { %v4962_v40 = vadd.f32 %v4961_v34, %v4892_v32  ;;  %v2232_v32 = vld [vmem:[%s12957_s4 + $0x318] sm:$0xff]  ;;  %v2997_v34 = vld [vmem:[%s12942_s28 + $0x1500] sm:$0xff]  ;;  %v2624_v22 = vld [vmem:[%s12942_s28 + $0x958] sm:$0xff] }
 0x3c6   : > { %v10494_v37 = vpack.c.bf16 %v2997_v34, %v2805_v33  ;;  %v2814_v33 = vld [vmem:[%s12942_s28 + $0xf48] sm:$0xff] }
 0x3c7   : > { %v3006_v34 = vld [vmem:[%s12942_s28 + $0x1548] sm:$0xff] }
 0x3c8   : > { %6374 = vmatpush1.xpose.msra.mxu0 %v3181_v38  ;;  %v10502_v38 = vpack.c.bf16 %v2999_v36, %v2807_v35  ;;  %v2816_v35 = vld [vmem:[%s12942_s28 + $0xf58] sm:$0xff] }
 0x3c9   : > { %6444 = vmatpush1.xpose.msra.mxu1 %v3183_v39  ;;  %10473 = vmatprep.subr.bf16.mxu0 %v10472_v41  ;;  %v3190_v39 = vld [vmem:[%s12942_s28 + $0x1b08] sm:$0xff]  ;;  %v3008_v36 = vld [vmem:[%s12942_s28 + $0x1558] sm:$0xff] }
 0x3ca   : > { %10481 = vmatprep.subr.bf16.mxu1 %v10480_v45 }
 0x3cb   : > { %6430 = vmatmul.mubr.f32.vlgmr.msra.gmra.mrb[44].mxu0 %v2221_v51  ;;  %v3191_v51 = vld [vmem:[%s12942_s28 + $0x1b10] sm:$0xff] }
 0x3cc   : > { %10475 = vmatpush1.bf16.xpose.msra.mxu0 %v10474_v52  ;;  %6500 = vmatmul.mubr.f32.vlgmr.msra.gmra.mrb[44].mxu1 %v2223_v53  ;;  %v10504_v53 = vpack.c.bf16 %v2618_v43, %v2426_v42  ;;  %v10532_v42 = vpack.c.bf16 %v3008_v36, %v2816_v35  ;;  %v2238_v43 = vld [vmem:[%s12957_s4 + $0x348] sm:$0xff] }
 0x3cd   : > { %10483 = vmatpush1.bf16.xpose.msra.mxu1 %v10482_v54  ;;  %10477 = vmatprep.subr.bf16.mxu0 %v10476_v55  ;;  %v2425_v54 = vld [vmem:[%s12942_s28 + $0x320] sm:$0xff] }
 0x3ce   : > { %10485 = vmatprep.subr.bf16.mxu1 %v10484_v56  ;;  %6569 = vmatprep.mubr.f32.mxu0 %v2226_v57  ;;  %v2617_v55 = vld [vmem:[%s12942_s28 + $0x920] sm:$0xff]  ;;  %v2427_v56 = vld [vmem:[%s12942_s28 + $0x330] sm:$0xff]  ;;  %v10512_v57 = vpack.c.bf16 %v2620_v48, %v2428_v47 }
 0x3cf   : > { %6639 = vmatprep.mubr.f32.mxu1 %v2228_v58  ;;  %v2619_v58 = vld [vmem:[%s12942_s28 + $0x930] sm:$0xff]  ;;  %v3201_v36 = vld [vmem:[%s12942_s28 + $0x1b60] sm:$0xff] }
 0x3d0   : > { %v2815_v47 = vld [vmem:[%s12942_s28 + $0xf50] sm:$0xff] }
 0x3d1   : > { %v3007_v48 = vld [vmem:[%s12942_s28 + $0x1550] sm:$0xff] }
 0x3d4   : > { %10479 = vmatpush1.bf16.xpose.msra.mxu0 %v10478_v63  ;;  %v2229_v63 = vld [vmem:[%s12957_s4 + $0x300] sm:$0xff] }
 0x3d5   : > { %10487 = vmatpush1.bf16.xpose.msra.mxu1 %v10486_v0  ;;  %6513 = vmatprep.subr.mxu0 %v3186_v1  ;;  %v10506_v0 = vpack.c.bf16 %v2617_v55, %v2425_v54  ;;  %v2231_v1 = vld [vmem:[%s12957_s4 + $0x310] sm:$0xff] }
 0x3d6   : > { %v5031_v3 = vpop.f32.mrb[24].mxu0  ;;  %6583 = vmatprep.subr.mxu1 %v3188_v2  ;;  %v10514_v2 = vpack.c.bf16 %v2619_v58, %v2427_v56  ;;  %v2434_v54 = vld [vmem:[%s12942_s28 + $0x368] sm:$0xff] }
 0x3d7   : > { %v5032_v6 = vadd.f32 %v5031_v3, %v4962_v40  ;;  %v5033_v7 = vpop.f32.mrb[25].mxu0  ;;  %v5101_v8 = vpop.f32.mrb[24].mxu1  ;;  %v3192_v40 = vld [vmem:[%s12942_s28 + $0x1b18] sm:$0xff]  ;;  %v10508_v3 = vpack.c.bf16 %v3002_v60, %v2810_v59  ;;  %v2626_v55 = vld [vmem:[%s12942_s28 + $0x968] sm:$0xff] }
 0x3d8   : > { %v5103_v11 = vpop.f32.mrb[25].mxu1  ;;  %v2809_v7 = vld [vmem:[%s12942_s28 + $0xf20] sm:$0xff]  ;;  %v2436_v59 = vld [vmem:[%s12942_s28 + $0x378] sm:$0xff] }
 0x3d9   : > { %v5102_v14 = vadd.f32 %v5101_v8, %v5032_v6  ;;  %v2236_v6 = vld [vmem:[%s12957_s4 + $0x338] sm:$0xff]  ;;  %v3001_v8 = vld [vmem:[%s12942_s28 + $0x1520] sm:$0xff]  ;;  %v2628_v60 = vld [vmem:[%s12942_s28 + $0x978] sm:$0xff] }
 0x3da   : > { %v10510_v11 = vpack.c.bf16 %v3001_v8, %v2809_v7  ;;  %v2818_v7 = vld [vmem:[%s12942_s28 + $0xf68] sm:$0xff] }
 0x3db   : > { %v3010_v8 = vld [vmem:[%s12942_s28 + $0x1568] sm:$0xff] }
 0x3dc   : > { %6514 = vmatpush1.xpose.msra.mxu0 %v3185_v12  ;;  %v10518_v12 = vpack.c.bf16 %v3003_v10, %v2811_v9  ;;  %v2820_v9 = vld [vmem:[%s12942_s28 + $0xf78] sm:$0xff] }
 0x3dd   : > { %6584 = vmatpush1.xpose.msra.mxu1 %v3187_v13  ;;  %10489 = vmatprep.subr.bf16.mxu0 %v10488_v15  ;;  %v3194_v13 = vld [vmem:[%s12942_s28 + $0x1b28] sm:$0xff]  ;;  %v3012_v10 = vld [vmem:[%s12942_s28 + $0x1578] sm:$0xff] }
 0x3de   : > { %10497 = vmatprep.subr.bf16.mxu1 %v10496_v19 }
 0x3df   : > { %6570 = vmatmul.mubr.f32.vlgmr.msra.gmra.mrb[46].mxu0 %v2225_v25  ;;  %v3195_v25 = vld [vmem:[%s12942_s28 + $0x1b30] sm:$0xff] }
 0x3e0   : > { %10491 = vmatpush1.bf16.xpose.msra.mxu0 %v10490_v26  ;;  %6640 = vmatmul.mubr.f32.vlgmr.msra.gmra.mrb[46].mxu1 %v2227_v27  ;;  %v10520_v27 = vpack.c.bf16 %v2622_v17, %v2430_v16  ;;  %v10548_v16 = vpack.c.bf16 %v3012_v10, %v2820_v9  ;;  %v2242_v17 = vld [vmem:[%s12957_s4 + $0x368] sm:$0xff] }
 0x3e1   : > { %10499 = vmatpush1.bf16.xpose.msra.mxu1 %v10498_v28  ;;  %10493 = vmatprep.subr.bf16.mxu0 %v10492_v29  ;;  %v2429_v28 = vld [vmem:[%s12942_s28 + $0x340] sm:$0xff] }
 0x3e2   : > { %10501 = vmatprep.subr.bf16.mxu1 %v10500_v30  ;;  %6709 = vmatprep.mubr.f32.mxu0 %v2230_v31  ;;  %v2621_v29 = vld [vmem:[%s12942_s28 + $0x940] sm:$0xff]  ;;  %v2431_v30 = vld [vmem:[%s12942_s28 + $0x350] sm:$0xff]  ;;  %v10528_v31 = vpack.c.bf16 %v2624_v22, %v2432_v21 }
 0x3e3   : > { %6779 = vmatprep.mubr.f32.mxu1 %v2232_v32  ;;  %v2623_v32 = vld [vmem:[%s12942_s28 + $0x950] sm:$0xff]  ;;  %v3205_v10 = vld [vmem:[%s12942_s28 + $0x1b80] sm:$0xff] }
 0x3e4   : > { %v2819_v21 = vld [vmem:[%s12942_s28 + $0xf70] sm:$0xff] }
 0x3e5   : > { %v3011_v22 = vld [vmem:[%s12942_s28 + $0x1570] sm:$0xff] }
 0x3e8   : > { %10495 = vmatpush1.bf16.xpose.msra.mxu0 %v10494_v37  ;;  %v2233_v37 = vld [vmem:[%s12957_s4 + $0x320] sm:$0xff] }
 0x3e9   : > { %10503 = vmatpush1.bf16.xpose.msra.mxu1 %v10502_v38  ;;  %6653 = vmatprep.subr.mxu0 %v3190_v39  ;;  %v10522_v38 = vpack.c.bf16 %v2621_v29, %v2429_v28  ;;  %v2235_v39 = vld [vmem:[%s12957_s4 + $0x330] sm:$0xff] }
 0x3ea   : > { %v5171_v41 = vpop.f32.mrb[26].mxu0  ;;  %6723 = vmatprep.subr.mxu1 %v3192_v40  ;;  %v10530_v40 = vpack.c.bf16 %v2623_v32, %v2431_v30  ;;  %v2438_v28 = vld [vmem:[%s12942_s28 + $0x388] sm:$0xff] }
 0x3eb   : > { %v5172_v44 = vadd.f32 %v5171_v41, %v5102_v14  ;;  %v5173_v45 = vpop.f32.mrb[27].mxu0  ;;  %v5241_v46 = vpop.f32.mrb[26].mxu1  ;;  %v3196_v14 = vld [vmem:[%s12942_s28 + $0x1b38] sm:$0xff]  ;;  %v10524_v41 = vpack.c.bf16 %v3006_v34, %v2814_v33  ;;  %v2630_v29 = vld [vmem:[%s12942_s28 + $0x988] sm:$0xff] }
 0x3ec   : > { %v5243_v49 = vpop.f32.mrb[27].mxu1  ;;  %v2813_v45 = vld [vmem:[%s12942_s28 + $0xf40] sm:$0xff]  ;;  %v2440_v33 = vld [vmem:[%s12942_s28 + $0x398] sm:$0xff] }
 0x3ed   : > { %v5242_v52 = vadd.f32 %v5241_v46, %v5172_v44  ;;  %v2240_v44 = vld [vmem:[%s12957_s4 + $0x358] sm:$0xff]  ;;  %v3005_v46 = vld [vmem:[%s12942_s28 + $0x1540] sm:$0xff]  ;;  %v2632_v34 = vld [vmem:[%s12942_s28 + $0x998] sm:$0xff] }
 0x3ee   : > { %v10526_v49 = vpack.c.bf16 %v3005_v46, %v2813_v45  ;;  %v2822_v45 = vld [vmem:[%s12942_s28 + $0xf88] sm:$0xff] }
 0x3ef   : > { %v3014_v46 = vld [vmem:[%s12942_s28 + $0x1588] sm:$0xff] }
 0x3f0   : > { %6654 = vmatpush1.xpose.msra.mxu0 %v3189_v50  ;;  %v10534_v50 = vpack.c.bf16 %v3007_v48, %v2815_v47  ;;  %v2824_v47 = vld [vmem:[%s12942_s28 + $0xf98] sm:$0xff] }
 0x3f1   : > { %6724 = vmatpush1.xpose.msra.mxu1 %v3191_v51  ;;  %10505 = vmatprep.subr.bf16.mxu0 %v10504_v53  ;;  %v3198_v51 = vld [vmem:[%s12942_s28 + $0x1b48] sm:$0xff]  ;;  %v3016_v48 = vld [vmem:[%s12942_s28 + $0x1598] sm:$0xff] }
 0x3f2   : > { %10513 = vmatprep.subr.bf16.mxu1 %v10512_v57 }
 0x3f3   : > { %6710 = vmatmul.mubr.f32.vlgmr.msra.gmra.mrb[48].mxu0 %v2229_v63  ;;  %v3199_v63 = vld [vmem:[%s12942_s28 + $0x1b50] sm:$0xff] }
 0x3f4   : > { %10507 = vmatpush1.bf16.xpose.msra.mxu0 %v10506_v0  ;;  %6780 = vmatmul.mubr.f32.vlgmr.msra.gmra.mrb[48].mxu1 %v2231_v1  ;;  %v10536_v1 = vpack.c.bf16 %v2626_v55, %v2434_v54  ;;  %v10564_v54 = vpack.c.bf16 %v3016_v48, %v2824_v47  ;;  %v2246_v55 = vld [vmem:[%s12957_s4 + $0x388] sm:$0xff] }
 0x3f5   : > { %10515 = vmatpush1.bf16.xpose.msra.mxu1 %v10514_v2  ;;  %10509 = vmatprep.subr.bf16.mxu0 %v10508_v3  ;;  %v2433_v2 = vld [vmem:[%s12942_s28 + $0x360] sm:$0xff] }
 0x3f6   : > { %10517 = vmatprep.subr.bf16.mxu1 %v10516_v4  ;;  %6849 = vmatprep.mubr.f32.mxu0 %v2234_v5  ;;  %v2625_v3 = vld [vmem:[%s12942_s28 + $0x960] sm:$0xff]  ;;  %v2435_v4 = vld [vmem:[%s12942_s28 + $0x370] sm:$0xff]  ;;  %v10544_v5 = vpack.c.bf16 %v2628_v60, %v2436_v59 }
 0x3f7   : > { %6919 = vmatprep.mubr.f32.mxu1 %v2236_v6  ;;  %v2627_v6 = vld [vmem:[%s12942_s28 + $0x970] sm:$0xff]  ;;  %v3209_v48 = vld [vmem:[%s12942_s28 + $0x1ba0] sm:$0xff] }
 0x3f8   : > { %v2823_v59 = vld [vmem:[%s12942_s28 + $0xf90] sm:$0xff] }
 0x3f9   : > { %v3015_v60 = vld [vmem:[%s12942_s28 + $0x1590] sm:$0xff] }
 0x3fc   : > { %10511 = vmatpush1.bf16.xpose.msra.mxu0 %v10510_v11  ;;  %v2237_v11 = vld [vmem:[%s12957_s4 + $0x340] sm:$0xff] }
 0x3fd   : > { %10519 = vmatpush1.bf16.xpose.msra.mxu1 %v10518_v12  ;;  %6793 = vmatprep.subr.mxu0 %v3194_v13  ;;  %v10538_v12 = vpack.c.bf16 %v2625_v3, %v2433_v2  ;;  %v2239_v13 = vld [vmem:[%s12957_s4 + $0x350] sm:$0xff] }
 0x3fe   : > { %v5311_v15 = vpop.f32.mrb[28].mxu0  ;;  %6863 = vmatprep.subr.mxu1 %v3196_v14  ;;  %v10546_v14 = vpack.c.bf16 %v2627_v6, %v2435_v4  ;;  %v2442_v2 = vld [vmem:[%s12942_s28 + $0x3a8] sm:$0xff] }
 0x3ff   : > { %v5312_v18 = vadd.f32 %v5311_v15, %v5242_v52  ;;  %v5313_v19 = vpop.f32.mrb[29].mxu0  ;;  %v5381_v20 = vpop.f32.mrb[28].mxu1  ;;  %v3200_v52 = vld [vmem:[%s12942_s28 + $0x1b58] sm:$0xff]  ;;  %v10540_v15 = vpack.c.bf16 %v3010_v8, %v2818_v7  ;;  %v2634_v3 = vld [vmem:[%s12942_s28 + $0x9a8] sm:$0xff] }
 0x400   : > { %v5383_v23 = vpop.f32.mrb[29].mxu1  ;;  %v2817_v19 = vld [vmem:[%s12942_s28 + $0xf60] sm:$0xff]  ;;  %v2444_v7 = vld [vmem:[%s12942_s28 + $0x3b8] sm:$0xff] }
 0x401   : > { %v5382_v26 = vadd.f32 %v5381_v20, %v5312_v18  ;;  %v2244_v18 = vld [vmem:[%s12957_s4 + $0x378] sm:$0xff]  ;;  %v3009_v20 = vld [vmem:[%s12942_s28 + $0x1560] sm:$0xff]  ;;  %v2636_v8 = vld [vmem:[%s12942_s28 + $0x9b8] sm:$0xff] }
 0x402   : > { %v10542_v23 = vpack.c.bf16 %v3009_v20, %v2817_v19  ;;  %v2826_v19 = vld [vmem:[%s12942_s28 + $0xfa8] sm:$0xff] }
 0x403   : > { %v3018_v20 = vld [vmem:[%s12942_s28 + $0x15a8] sm:$0xff] }
 0x404   : > { %6794 = vmatpush1.xpose.msra.mxu0 %v3193_v24  ;;  %v10550_v24 = vpack.c.bf16 %v3011_v22, %v2819_v21  ;;  %v2828_v21 = vld [vmem:[%s12942_s28 + $0xfb8] sm:$0xff] }
 0x405   : > { %6864 = vmatpush1.xpose.msra.mxu1 %v3195_v25  ;;  %10521 = vmatprep.subr.bf16.mxu0 %v10520_v27  ;;  %v3202_v25 = vld [vmem:[%s12942_s28 + $0x1b68] sm:$0xff]  ;;  %v3020_v22 = vld [vmem:[%s12942_s28 + $0x15b8] sm:$0xff] }
 0x406   : > { %10529 = vmatprep.subr.bf16.mxu1 %v10528_v31 }
 0x407   : > { %6850 = vmatmul.mubr.f32.vlgmr.msra.gmra.mrb[50].mxu0 %v2233_v37  ;;  %v3203_v37 = vld [vmem:[%s12942_s28 + $0x1b70] sm:$0xff] }
 0x408   : > { %10523 = vmatpush1.bf16.xpose.msra.mxu0 %v10522_v38  ;;  %6920 = vmatmul.mubr.f32.vlgmr.msra.gmra.mrb[50].mxu1 %v2235_v39  ;;  %v10552_v39 = vpack.c.bf16 %v2630_v29, %v2438_v28  ;;  %v10580_v28 = vpack.c.bf16 %v3020_v22, %v2828_v21  ;;  %v2250_v29 = vld [vmem:[%s12957_s4 + $0x3a8] sm:$0xff] }
 0x409   : > { %10531 = vmatpush1.bf16.xpose.msra.mxu1 %v10530_v40  ;;  %10525 = vmatprep.subr.bf16.mxu0 %v10524_v41  ;;  %v2437_v40 = vld [vmem:[%s12942_s28 + $0x380] sm:$0xff] }
 0x40a   : > { %10533 = vmatprep.subr.bf16.mxu1 %v10532_v42  ;;  %6989 = vmatprep.mubr.f32.mxu0 %v2238_v43  ;;  %v2629_v41 = vld [vmem:[%s12942_s28 + $0x980] sm:$0xff]  ;;  %v2439_v42 = vld [vmem:[%s12942_s28 + $0x390] sm:$0xff]  ;;  %v10560_v43 = vpack.c.bf16 %v2632_v34, %v2440_v33 }
 0x40b   : > { %7059 = vmatprep.mubr.f32.mxu1 %v2240_v44  ;;  %v2631_v44 = vld [vmem:[%s12942_s28 + $0x990] sm:$0xff]  ;;  %v3213_v22 = vld [vmem:[%s12942_s28 + $0x1bc0] sm:$0xff] }
 0x40c   : > { %v2827_v33 = vld [vmem:[%s12942_s28 + $0xfb0] sm:$0xff] }
 0x40d   : > { %v3019_v34 = vld [vmem:[%s12942_s28 + $0x15b0] sm:$0xff] }
 0x410   : > { %10527 = vmatpush1.bf16.xpose.msra.mxu0 %v10526_v49  ;;  %v2241_v49 = vld [vmem:[%s12957_s4 + $0x360] sm:$0xff] }
 0x411   : > { %10535 = vmatpush1.bf16.xpose.msra.mxu1 %v10534_v50  ;;  %6933 = vmatprep.subr.mxu0 %v3198_v51  ;;  %v10554_v50 = vpack.c.bf16 %v2629_v41, %v2437_v40  ;;  %v2243_v51 = vld [vmem:[%s12957_s4 + $0x370] sm:$0xff] }
 0x412   : > { %v5451_v53 = vpop.f32.mrb[30].mxu0  ;;  %7003 = vmatprep.subr.mxu1 %v3200_v52  ;;  %v10562_v52 = vpack.c.bf16 %v2631_v44, %v2439_v42  ;;  %v2446_v40 = vld [vmem:[%s12942_s28 + $0x3c8] sm:$0xff] }
 0x413   : > { %v5452_v56 = vadd.f32 %v5451_v53, %v5382_v26  ;;  %v5453_v57 = vpop.f32.mrb[31].mxu0  ;;  %v5521_v58 = vpop.f32.mrb[30].mxu1  ;;  %v3204_v26 = vld [vmem:[%s12942_s28 + $0x1b78] sm:$0xff]  ;;  %v10556_v53 = vpack.c.bf16 %v3014_v46, %v2822_v45  ;;  %v2638_v41 = vld [vmem:[%s12942_s28 + $0x9c8] sm:$0xff] }
 0x414   : > { %v5523_v61 = vpop.f32.mrb[31].mxu1  ;;  %v2821_v57 = vld [vmem:[%s12942_s28 + $0xf80] sm:$0xff]  ;;  %v2448_v45 = vld [vmem:[%s12942_s28 + $0x3d8] sm:$0xff] }
 0x415   : > { %v5522_v0 = vadd.f32 %v5521_v58, %v5452_v56  ;;  %v2248_v56 = vld [vmem:[%s12957_s4 + $0x398] sm:$0xff]  ;;  %v3013_v58 = vld [vmem:[%s12942_s28 + $0x1580] sm:$0xff]  ;;  %v2640_v46 = vld [vmem:[%s12942_s28 + $0x9d8] sm:$0xff] }
 0x416   : > { %v10558_v61 = vpack.c.bf16 %v3013_v58, %v2821_v57  ;;  %v2830_v57 = vld [vmem:[%s12942_s28 + $0xfc8] sm:$0xff] }
 0x417   : > { %v3022_v58 = vld [vmem:[%s12942_s28 + $0x15c8] sm:$0xff] }
 0x418   : > { %6934 = vmatpush1.xpose.msra.mxu0 %v3197_v62  ;;  %v10566_v62 = vpack.c.bf16 %v3015_v60, %v2823_v59  ;;  %v2832_v59 = vld [vmem:[%s12942_s28 + $0xfd8] sm:$0xff] }
 0x419   : > { %7004 = vmatpush1.xpose.msra.mxu1 %v3199_v63  ;;  %10537 = vmatprep.subr.bf16.mxu0 %v10536_v1  ;;  %v3206_v63 = vld [vmem:[%s12942_s28 + $0x1b88] sm:$0xff]  ;;  %v3024_v60 = vld [vmem:[%s12942_s28 + $0x15d8] sm:$0xff] }
 0x41a   : > { %10545 = vmatprep.subr.bf16.mxu1 %v10544_v5 }
 0x41b   : > { %6990 = vmatmul.mubr.f32.vlgmr.msra.gmra.mrb[52].mxu0 %v2237_v11  ;;  %v3207_v11 = vld [vmem:[%s12942_s28 + $0x1b90] sm:$0xff] }
 0x41c   : > { %10539 = vmatpush1.bf16.xpose.msra.mxu0 %v10538_v12  ;;  %7060 = vmatmul.mubr.f32.vlgmr.msra.gmra.mrb[52].mxu1 %v2239_v13  ;;  %v10568_v13 = vpack.c.bf16 %v2634_v3, %v2442_v2  ;;  %v10596_v2 = vpack.c.bf16 %v3024_v60, %v2832_v59  ;;  %v2254_v3 = vld [vmem:[%s12957_s4 + $0x3c8] sm:$0xff] }
 0x41d   : > { %10547 = vmatpush1.bf16.xpose.msra.mxu1 %v10546_v14  ;;  %10541 = vmatprep.subr.bf16.mxu0 %v10540_v15  ;;  %v2441_v14 = vld [vmem:[%s12942_s28 + $0x3a0] sm:$0xff] }
 0x41e   : > { %10549 = vmatprep.subr.bf16.mxu1 %v10548_v16  ;;  %7129 = vmatprep.mubr.f32.mxu0 %v2242_v17  ;;  %v2633_v15 = vld [vmem:[%s12942_s28 + $0x9a0] sm:$0xff]  ;;  %v2443_v16 = vld [vmem:[%s12942_s28 + $0x3b0] sm:$0xff]  ;;  %v10576_v17 = vpack.c.bf16 %v2636_v8, %v2444_v7 }
 0x41f   : > { %7199 = vmatprep.mubr.f32.mxu1 %v2244_v18  ;;  %v2635_v18 = vld [vmem:[%s12942_s28 + $0x9b0] sm:$0xff]  ;;  %v3217_v60 = vld [vmem:[%s12942_s28 + $0x1be0] sm:$0xff] }
 0x420   : > { %v2831_v7 = vld [vmem:[%s12942_s28 + $0xfd0] sm:$0xff] }
 0x421   : > { %v3023_v8 = vld [vmem:[%s12942_s28 + $0x15d0] sm:$0xff] }
 0x424   : > { %10543 = vmatpush1.bf16.xpose.msra.mxu0 %v10542_v23  ;;  %v2245_v23 = vld [vmem:[%s12957_s4 + $0x380] sm:$0xff] }
 0x425   : > { %10551 = vmatpush1.bf16.xpose.msra.mxu1 %v10550_v24  ;;  %7073 = vmatprep.subr.mxu0 %v3202_v25  ;;  %v10570_v24 = vpack.c.bf16 %v2633_v15, %v2441_v14  ;;  %v2247_v25 = vld [vmem:[%s12957_s4 + $0x390] sm:$0xff] }
 0x426   : > { %v5591_v27 = vpop.f32.mrb[32].mxu0  ;;  %7143 = vmatprep.subr.mxu1 %v3204_v26  ;;  %v10578_v26 = vpack.c.bf16 %v2635_v18, %v2443_v16  ;;  %v2450_v14 = vld [vmem:[%s12942_s28 + $0x3e8] sm:$0xff] }
 0x427   : > { %v5592_v30 = vadd.f32 %v5591_v27, %v5522_v0  ;;  %v5593_v31 = vpop.f32.mrb[33].mxu0  ;;  %v5661_v32 = vpop.f32.mrb[32].mxu1  ;;  %v3208_v0 = vld [vmem:[%s12942_s28 + $0x1b98] sm:$0xff]  ;;  %v10572_v27 = vpack.c.bf16 %v3018_v20, %v2826_v19  ;;  %v2642_v15 = vld [vmem:[%s12942_s28 + $0x9e8] sm:$0xff] }
 0x428   : > { %v5663_v35 = vpop.f32.mrb[33].mxu1  ;;  %v2825_v31 = vld [vmem:[%s12942_s28 + $0xfa0] sm:$0xff]  ;;  %v2452_v19 = vld [vmem:[%s12942_s28 + $0x3f8] sm:$0xff] }
 0x429   : > { %v5662_v38 = vadd.f32 %v5661_v32, %v5592_v30  ;;  %v2252_v30 = vld [vmem:[%s12957_s4 + $0x3b8] sm:$0xff]  ;;  %v3017_v32 = vld [vmem:[%s12942_s28 + $0x15a0] sm:$0xff]  ;;  %v2644_v20 = vld [vmem:[%s12942_s28 + $0x9f8] sm:$0xff] }
 0x42a   : > { %v10574_v35 = vpack.c.bf16 %v3017_v32, %v2825_v31  ;;  %v2834_v31 = vld [vmem:[%s12942_s28 + $0xfe8] sm:$0xff] }
 0x42b   : > { %v3026_v32 = vld [vmem:[%s12942_s28 + $0x15e8] sm:$0xff] }
 0x42c   : > { %7074 = vmatpush1.xpose.msra.mxu0 %v3201_v36  ;;  %v10582_v36 = vpack.c.bf16 %v3019_v34, %v2827_v33  ;;  %v2836_v33 = vld [vmem:[%s12942_s28 + $0xff8] sm:$0xff] }
 0x42d   : > { %7144 = vmatpush1.xpose.msra.mxu1 %v3203_v37  ;;  %10553 = vmatprep.subr.bf16.mxu0 %v10552_v39  ;;  %v3210_v37 = vld [vmem:[%s12942_s28 + $0x1ba8] sm:$0xff]  ;;  %v3028_v34 = vld [vmem:[%s12942_s28 + $0x15f8] sm:$0xff] }
 0x42e   : > { %10561 = vmatprep.subr.bf16.mxu1 %v10560_v43 }
 0x42f   : > { %7130 = vmatmul.mubr.f32.vlgmr.msra.gmra.mrb[54].mxu0 %v2241_v49  ;;  %v3211_v49 = vld [vmem:[%s12942_s28 + $0x1bb0] sm:$0xff] }
 0x430   : > { %10555 = vmatpush1.bf16.xpose.msra.mxu0 %v10554_v50  ;;  %7200 = vmatmul.mubr.f32.vlgmr.msra.gmra.mrb[54].mxu1 %v2243_v51  ;;  %v10584_v51 = vpack.c.bf16 %v2638_v41, %v2446_v40  ;;  %v10612_v40 = vpack.c.bf16 %v3028_v34, %v2836_v33  ;;  %v2258_v41 = vld [vmem:[%s12957_s4 + $0x3e8] sm:$0xff] }
 0x431   : > { %10563 = vmatpush1.bf16.xpose.msra.mxu1 %v10562_v52  ;;  %10557 = vmatprep.subr.bf16.mxu0 %v10556_v53  ;;  %v2445_v52 = vld [vmem:[%s12942_s28 + $0x3c0] sm:$0xff] }
 0x432   : > { %10565 = vmatprep.subr.bf16.mxu1 %v10564_v54  ;;  %7269 = vmatprep.mubr.f32.mxu0 %v2246_v55  ;;  %v2637_v53 = vld [vmem:[%s12942_s28 + $0x9c0] sm:$0xff]  ;;  %v2447_v54 = vld [vmem:[%s12942_s28 + $0x3d0] sm:$0xff]  ;;  %v10592_v55 = vpack.c.bf16 %v2640_v46, %v2448_v45 }
 0x433   : > { %7339 = vmatprep.mubr.f32.mxu1 %v2248_v56  ;;  %v2639_v56 = vld [vmem:[%s12942_s28 + $0x9d0] sm:$0xff]  ;;  %v3221_v34 = vld [vmem:[%s12942_s28 + $0x1c00] sm:$0xff] }
 0x434   : > { %v2835_v45 = vld [vmem:[%s12942_s28 + $0xff0] sm:$0xff] }
 0x435   : > { %v3027_v46 = vld [vmem:[%s12942_s28 + $0x15f0] sm:$0xff] }
 0x438   : > { %10559 = vmatpush1.bf16.xpose.msra.mxu0 %v10558_v61  ;;  %v2249_v61 = vld [vmem:[%s12957_s4 + $0x3a0] sm:$0xff] }
 0x439   : > { %10567 = vmatpush1.bf16.xpose.msra.mxu1 %v10566_v62  ;;  %7213 = vmatprep.subr.mxu0 %v3206_v63  ;;  %v10586_v62 = vpack.c.bf16 %v2637_v53, %v2445_v52  ;;  %v2251_v63 = vld [vmem:[%s12957_s4 + $0x3b0] sm:$0xff] }
 0x43a   : > { %v5731_v1 = vpop.f32.mrb[34].mxu0  ;;  %7283 = vmatprep.subr.mxu1 %v3208_v0  ;;  %v10594_v0 = vpack.c.bf16 %v2639_v56, %v2447_v54  ;;  %v2454_v52 = vld [vmem:[%s12942_s28 + $0x408] sm:$0xff] }
 0x43b   : > { %v5732_v4 = vadd.f32 %v5731_v1, %v5662_v38  ;;  %v5733_v5 = vpop.f32.mrb[35].mxu0  ;;  %v5801_v6 = vpop.f32.mrb[34].mxu1  ;;  %v3212_v38 = vld [vmem:[%s12942_s28 + $0x1bb8] sm:$0xff]  ;;  %v10588_v1 = vpack.c.bf16 %v3022_v58, %v2830_v57  ;;  %v2646_v53 = vld [vmem:[%s12942_s28 + $0xa08] sm:$0xff] }
 0x43c   : > { %v5803_v9 = vpop.f32.mrb[35].mxu1  ;;  %v2829_v5 = vld [vmem:[%s12942_s28 + $0xfc0] sm:$0xff]  ;;  %v2456_v57 = vld [vmem:[%s12942_s28 + $0x418] sm:$0xff] }
 0x43d   : > { %v5802_v12 = vadd.f32 %v5801_v6, %v5732_v4  ;;  %v2256_v4 = vld [vmem:[%s12957_s4 + $0x3d8] sm:$0xff]  ;;  %v3021_v6 = vld [vmem:[%s12942_s28 + $0x15c0] sm:$0xff]  ;;  %v2648_v58 = vld [vmem:[%s12942_s28 + $0xa18] sm:$0xff] }
 0x43e   : > { %v10590_v9 = vpack.c.bf16 %v3021_v6, %v2829_v5  ;;  %v2838_v5 = vld [vmem:[%s12942_s28 + $0x1008] sm:$0xff] }
 0x43f   : > { %v3030_v6 = vld [vmem:[%s12942_s28 + $0x1608] sm:$0xff] }
 0x440   : > { %7214 = vmatpush1.xpose.msra.mxu0 %v3205_v10  ;;  %v10598_v10 = vpack.c.bf16 %v3023_v8, %v2831_v7  ;;  %v2840_v7 = vld [vmem:[%s12942_s28 + $0x1018] sm:$0xff] }
 0x441   : > { %7284 = vmatpush1.xpose.msra.mxu1 %v3207_v11  ;;  %10569 = vmatprep.subr.bf16.mxu0 %v10568_v13  ;;  %v3214_v11 = vld [vmem:[%s12942_s28 + $0x1bc8] sm:$0xff]  ;;  %v3032_v8 = vld [vmem:[%s12942_s28 + $0x1618] sm:$0xff] }
 0x442   : > { %10577 = vmatprep.subr.bf16.mxu1 %v10576_v17 }
 0x443   : > { %7270 = vmatmul.mubr.f32.vlgmr.msra.gmra.mrb[56].mxu0 %v2245_v23  ;;  %v3215_v23 = vld [vmem:[%s12942_s28 + $0x1bd0] sm:$0xff] }
 0x444   : > { %10571 = vmatpush1.bf16.xpose.msra.mxu0 %v10570_v24  ;;  %7340 = vmatmul.mubr.f32.vlgmr.msra.gmra.mrb[56].mxu1 %v2247_v25  ;;  %v10600_v25 = vpack.c.bf16 %v2642_v15, %v2450_v14  ;;  %v10628_v14 = vpack.c.bf16 %v3032_v8, %v2840_v7  ;;  %v2262_v15 = vld [vmem:[%s12957_s4 + $0x408] sm:$0xff] }
 0x445   : > { %10579 = vmatpush1.bf16.xpose.msra.mxu1 %v10578_v26  ;;  %10573 = vmatprep.subr.bf16.mxu0 %v10572_v27  ;;  %v2449_v26 = vld [vmem:[%s12942_s28 + $0x3e0] sm:$0xff] }
 0x446   : > { %10581 = vmatprep.subr.bf16.mxu1 %v10580_v28  ;;  %7409 = vmatprep.mubr.f32.mxu0 %v2250_v29  ;;  %v2641_v27 = vld [vmem:[%s12942_s28 + $0x9e0] sm:$0xff]  ;;  %v2451_v28 = vld [vmem:[%s12942_s28 + $0x3f0] sm:$0xff]  ;;  %v10608_v29 = vpack.c.bf16 %v2644_v20, %v2452_v19 }
 0x447   : > { %7479 = vmatprep.mubr.f32.mxu1 %v2252_v30  ;;  %v2643_v30 = vld [vmem:[%s12942_s28 + $0x9f0] sm:$0xff]  ;;  %v3225_v8 = vld [vmem:[%s12942_s28 + $0x1c20] sm:$0xff] }
 0x448   : > { %v2839_v19 = vld [vmem:[%s12942_s28 + $0x1010] sm:$0xff] }
 0x449   : > { %v3031_v20 = vld [vmem:[%s12942_s28 + $0x1610] sm:$0xff] }
 0x44c   : > { %10575 = vmatpush1.bf16.xpose.msra.mxu0 %v10574_v35  ;;  %v2253_v35 = vld [vmem:[%s12957_s4 + $0x3c0] sm:$0xff] }
 0x44d   : > { %10583 = vmatpush1.bf16.xpose.msra.mxu1 %v10582_v36  ;;  %7353 = vmatprep.subr.mxu0 %v3210_v37  ;;  %v10602_v36 = vpack.c.bf16 %v2641_v27, %v2449_v26  ;;  %v2255_v37 = vld [vmem:[%s12957_s4 + $0x3d0] sm:$0xff] }
 0x44e   : > { %v5871_v39 = vpop.f32.mrb[36].mxu0  ;;  %7423 = vmatprep.subr.mxu1 %v3212_v38  ;;  %v10610_v38 = vpack.c.bf16 %v2643_v30, %v2451_v28  ;;  %v2458_v26 = vld [vmem:[%s12942_s28 + $0x428] sm:$0xff] }
 0x44f   : > { %v5872_v42 = vadd.f32 %v5871_v39, %v5802_v12  ;;  %v5873_v43 = vpop.f32.mrb[37].mxu0  ;;  %v5941_v44 = vpop.f32.mrb[36].mxu1  ;;  %v3216_v12 = vld [vmem:[%s12942_s28 + $0x1bd8] sm:$0xff]  ;;  %v10604_v39 = vpack.c.bf16 %v3026_v32, %v2834_v31  ;;  %v2650_v27 = vld [vmem:[%s12942_s28 + $0xa28] sm:$0xff] }
 0x450   : > { %v5943_v47 = vpop.f32.mrb[37].mxu1  ;;  %v2833_v43 = vld [vmem:[%s12942_s28 + $0xfe0] sm:$0xff]  ;;  %v2460_v31 = vld [vmem:[%s12942_s28 + $0x438] sm:$0xff] }
 0x451   : > { %v5942_v50 = vadd.f32 %v5941_v44, %v5872_v42  ;;  %v2260_v42 = vld [vmem:[%s12957_s4 + $0x3f8] sm:$0xff]  ;;  %v3025_v44 = vld [vmem:[%s12942_s28 + $0x15e0] sm:$0xff]  ;;  %v2652_v32 = vld [vmem:[%s12942_s28 + $0xa38] sm:$0xff] }
 0x452   : > { %v10606_v47 = vpack.c.bf16 %v3025_v44, %v2833_v43  ;;  %v2842_v43 = vld [vmem:[%s12942_s28 + $0x1028] sm:$0xff] }
 0x453   : > { %v3034_v44 = vld [vmem:[%s12942_s28 + $0x1628] sm:$0xff] }
 0x454   : > { %7354 = vmatpush1.xpose.msra.mxu0 %v3209_v48  ;;  %v10614_v48 = vpack.c.bf16 %v3027_v46, %v2835_v45  ;;  %v2844_v45 = vld [vmem:[%s12942_s28 + $0x1038] sm:$0xff] }
 0x455   : > { %7424 = vmatpush1.xpose.msra.mxu1 %v3211_v49  ;;  %10585 = vmatprep.subr.bf16.mxu0 %v10584_v51  ;;  %v3218_v49 = vld [vmem:[%s12942_s28 + $0x1be8] sm:$0xff]  ;;  %v3036_v46 = vld [vmem:[%s12942_s28 + $0x1638] sm:$0xff] }
 0x456   : > { %10593 = vmatprep.subr.bf16.mxu1 %v10592_v55 }
 0x457   : > { %7410 = vmatmul.mubr.f32.vlgmr.msra.gmra.mrb[58].mxu0 %v2249_v61  ;;  %v3219_v61 = vld [vmem:[%s12942_s28 + $0x1bf0] sm:$0xff] }
 0x458   : > { %10587 = vmatpush1.bf16.xpose.msra.mxu0 %v10586_v62  ;;  %7480 = vmatmul.mubr.f32.vlgmr.msra.gmra.mrb[58].mxu1 %v2251_v63  ;;  %v10616_v63 = vpack.c.bf16 %v2646_v53, %v2454_v52  ;;  %v10644_v52 = vpack.c.bf16 %v3036_v46, %v2844_v45  ;;  %v2266_v53 = vld [vmem:[%s12957_s4 + $0x428] sm:$0xff] }
 0x459   : > { %10595 = vmatpush1.bf16.xpose.msra.mxu1 %v10594_v0  ;;  %10589 = vmatprep.subr.bf16.mxu0 %v10588_v1  ;;  %v2453_v0 = vld [vmem:[%s12942_s28 + $0x400] sm:$0xff] }
 0x45a   : > { %10597 = vmatprep.subr.bf16.mxu1 %v10596_v2  ;;  %7549 = vmatprep.mubr.f32.mxu0 %v2254_v3  ;;  %v2645_v1 = vld [vmem:[%s12942_s28 + $0xa00] sm:$0xff]  ;;  %v2455_v2 = vld [vmem:[%s12942_s28 + $0x410] sm:$0xff]  ;;  %v10624_v3 = vpack.c.bf16 %v2648_v58, %v2456_v57 }
 0x45b   : > { %7619 = vmatprep.mubr.f32.mxu1 %v2256_v4  ;;  %v2647_v4 = vld [vmem:[%s12942_s28 + $0xa10] sm:$0xff]  ;;  %v3229_v46 = vld [vmem:[%s12942_s28 + $0x1c40] sm:$0xff] }
 0x45c   : > { %v2843_v57 = vld [vmem:[%s12942_s28 + $0x1030] sm:$0xff] }
 0x45d   : > { %v3035_v58 = vld [vmem:[%s12942_s28 + $0x1630] sm:$0xff] }
 0x460   : > { %10591 = vmatpush1.bf16.xpose.msra.mxu0 %v10590_v9  ;;  %v2257_v9 = vld [vmem:[%s12957_s4 + $0x3e0] sm:$0xff] }
 0x461   : > { %10599 = vmatpush1.bf16.xpose.msra.mxu1 %v10598_v10  ;;  %7493 = vmatprep.subr.mxu0 %v3214_v11  ;;  %v10618_v10 = vpack.c.bf16 %v2645_v1, %v2453_v0  ;;  %v2259_v11 = vld [vmem:[%s12957_s4 + $0x3f0] sm:$0xff] }
 0x462   : > { %v6011_v13 = vpop.f32.mrb[38].mxu0  ;;  %7563 = vmatprep.subr.mxu1 %v3216_v12  ;;  %v10626_v12 = vpack.c.bf16 %v2647_v4, %v2455_v2  ;;  %v2462_v0 = vld [vmem:[%s12942_s28 + $0x448] sm:$0xff] }
 0x463   : > { %v6012_v16 = vadd.f32 %v6011_v13, %v5942_v50  ;;  %v6013_v17 = vpop.f32.mrb[39].mxu0  ;;  %v6081_v18 = vpop.f32.mrb[38].mxu1  ;;  %v3220_v50 = vld [vmem:[%s12942_s28 + $0x1bf8] sm:$0xff]  ;;  %v10620_v13 = vpack.c.bf16 %v3030_v6, %v2838_v5  ;;  %v2654_v1 = vld [vmem:[%s12942_s28 + $0xa48] sm:$0xff] }
 0x464   : > { %v6083_v21 = vpop.f32.mrb[39].mxu1  ;;  %v2837_v17 = vld [vmem:[%s12942_s28 + $0x1000] sm:$0xff]  ;;  %v2464_v5 = vld [vmem:[%s12942_s28 + $0x458] sm:$0xff] }
 0x465   : > { %v6082_v24 = vadd.f32 %v6081_v18, %v6012_v16  ;;  %v2264_v16 = vld [vmem:[%s12957_s4 + $0x418] sm:$0xff]  ;;  %v3029_v18 = vld [vmem:[%s12942_s28 + $0x1600] sm:$0xff]  ;;  %v2656_v6 = vld [vmem:[%s12942_s28 + $0xa58] sm:$0xff] }
 0x466   : > { %v10622_v21 = vpack.c.bf16 %v3029_v18, %v2837_v17  ;;  %v2846_v17 = vld [vmem:[%s12942_s28 + $0x1048] sm:$0xff] }
 0x467   : > { %v3038_v18 = vld [vmem:[%s12942_s28 + $0x1648] sm:$0xff] }
 0x468   : > { %7494 = vmatpush1.xpose.msra.mxu0 %v3213_v22  ;;  %v10630_v22 = vpack.c.bf16 %v3031_v20, %v2839_v19  ;;  %v2848_v19 = vld [vmem:[%s12942_s28 + $0x1058] sm:$0xff] }
 0x469   : > { %7564 = vmatpush1.xpose.msra.mxu1 %v3215_v23  ;;  %10601 = vmatprep.subr.bf16.mxu0 %v10600_v25  ;;  %v3222_v23 = vld [vmem:[%s12942_s28 + $0x1c08] sm:$0xff]  ;;  %v3040_v20 = vld [vmem:[%s12942_s28 + $0x1658] sm:$0xff] }
 0x46a   : > { %10609 = vmatprep.subr.bf16.mxu1 %v10608_v29 }
 0x46b   : > { %7550 = vmatmul.mubr.f32.vlgmr.msra.gmra.mrb[60].mxu0 %v2253_v35  ;;  %v3223_v35 = vld [vmem:[%s12942_s28 + $0x1c10] sm:$0xff] }
 0x46c   : > { %10603 = vmatpush1.bf16.xpose.msra.mxu0 %v10602_v36  ;;  %7620 = vmatmul.mubr.f32.vlgmr.msra.gmra.mrb[60].mxu1 %v2255_v37  ;;  %v10632_v37 = vpack.c.bf16 %v2650_v27, %v2458_v26  ;;  %v10660_v26 = vpack.c.bf16 %v3040_v20, %v2848_v19  ;;  %v2270_v27 = vld [vmem:[%s12957_s4 + $0x448] sm:$0xff] }
 0x46d   : > { %10611 = vmatpush1.bf16.xpose.msra.mxu1 %v10610_v38  ;;  %10605 = vmatprep.subr.bf16.mxu0 %v10604_v39  ;;  %v2457_v38 = vld [vmem:[%s12942_s28 + $0x420] sm:$0xff] }
 0x46e   : > { %10613 = vmatprep.subr.bf16.mxu1 %v10612_v40  ;;  %7689 = vmatprep.mubr.f32.mxu0 %v2258_v41  ;;  %v2649_v39 = vld [vmem:[%s12942_s28 + $0xa20] sm:$0xff]  ;;  %v2459_v40 = vld [vmem:[%s12942_s28 + $0x430] sm:$0xff]  ;;  %v10640_v41 = vpack.c.bf16 %v2652_v32, %v2460_v31 }
 0x46f   : > { %7759 = vmatprep.mubr.f32.mxu1 %v2260_v42  ;;  %v2651_v42 = vld [vmem:[%s12942_s28 + $0xa30] sm:$0xff]  ;;  %v3233_v20 = vld [vmem:[%s12942_s28 + $0x1c60] sm:$0xff] }
 0x470   : > { %v2847_v31 = vld [vmem:[%s12942_s28 + $0x1050] sm:$0xff] }
 0x471   : > { %v3039_v32 = vld [vmem:[%s12942_s28 + $0x1650] sm:$0xff] }
 0x474   : > { %10607 = vmatpush1.bf16.xpose.msra.mxu0 %v10606_v47  ;;  %v2261_v47 = vld [vmem:[%s12957_s4 + $0x400] sm:$0xff] }
 0x475   : > { %10615 = vmatpush1.bf16.xpose.msra.mxu1 %v10614_v48  ;;  %7633 = vmatprep.subr.mxu0 %v3218_v49  ;;  %v10634_v48 = vpack.c.bf16 %v2649_v39, %v2457_v38  ;;  %v2263_v49 = vld [vmem:[%s12957_s4 + $0x410] sm:$0xff] }
 0x476   : > { %v6151_v51 = vpop.f32.mrb[40].mxu0  ;;  %7703 = vmatprep.subr.mxu1 %v3220_v50  ;;  %v10642_v50 = vpack.c.bf16 %v2651_v42, %v2459_v40  ;;  %v2466_v38 = vld [vmem:[%s12942_s28 + $0x468] sm:$0xff] }
 0x477   : > { %v6152_v54 = vadd.f32 %v6151_v51, %v6082_v24  ;;  %v6153_v55 = vpop.f32.mrb[41].mxu0  ;;  %v6221_v56 = vpop.f32.mrb[40].mxu1  ;;  %v3224_v24 = vld [vmem:[%s12942_s28 + $0x1c18] sm:$0xff]  ;;  %v10636_v51 = vpack.c.bf16 %v3034_v44, %v2842_v43  ;;  %v2658_v39 = vld [vmem:[%s12942_s28 + $0xa68] sm:$0xff] }
 0x478   : > { %v6223_v59 = vpop.f32.mrb[41].mxu1  ;;  %v2841_v55 = vld [vmem:[%s12942_s28 + $0x1020] sm:$0xff]  ;;  %v2468_v43 = vld [vmem:[%s12942_s28 + $0x478] sm:$0xff] }
 0x479   : > { %v6222_v62 = vadd.f32 %v6221_v56, %v6152_v54  ;;  %v2268_v54 = vld [vmem:[%s12957_s4 + $0x438] sm:$0xff]  ;;  %v3033_v56 = vld [vmem:[%s12942_s28 + $0x1620] sm:$0xff]  ;;  %v2660_v44 = vld [vmem:[%s12942_s28 + $0xa78] sm:$0xff] }
 0x47a   : > { %v10638_v59 = vpack.c.bf16 %v3033_v56, %v2841_v55  ;;  %v2850_v55 = vld [vmem:[%s12942_s28 + $0x1068] sm:$0xff] }
 0x47b   : > { %v3042_v56 = vld [vmem:[%s12942_s28 + $0x1668] sm:$0xff] }
 0x47c   : > { %7634 = vmatpush1.xpose.msra.mxu0 %v3217_v60  ;;  %v10646_v60 = vpack.c.bf16 %v3035_v58, %v2843_v57  ;;  %v2852_v57 = vld [vmem:[%s12942_s28 + $0x1078] sm:$0xff] }
 0x47d   : > { %7704 = vmatpush1.xpose.msra.mxu1 %v3219_v61  ;;  %10617 = vmatprep.subr.bf16.mxu0 %v10616_v63  ;;  %v3226_v61 = vld [vmem:[%s12942_s28 + $0x1c28] sm:$0xff]  ;;  %v3044_v58 = vld [vmem:[%s12942_s28 + $0x1678] sm:$0xff] }
 0x47e   : > { %10625 = vmatprep.subr.bf16.mxu1 %v10624_v3 }
 0x47f   : > { %7690 = vmatmul.mubr.f32.vlgmr.msra.gmra.mrb[62].mxu0 %v2257_v9  ;;  %v3227_v9 = vld [vmem:[%s12942_s28 + $0x1c30] sm:$0xff] }
 0x480   : > { %10619 = vmatpush1.bf16.xpose.msra.mxu0 %v10618_v10  ;;  %7760 = vmatmul.mubr.f32.vlgmr.msra.gmra.mrb[62].mxu1 %v2259_v11  ;;  %v10648_v11 = vpack.c.bf16 %v2654_v1, %v2462_v0  ;;  %v10676_v0 = vpack.c.bf16 %v3044_v58, %v2852_v57  ;;  %v2274_v1 = vld [vmem:[%s12957_s4 + $0x468] sm:$0xff] }
 0x481   : > { %10627 = vmatpush1.bf16.xpose.msra.mxu1 %v10626_v12  ;;  %10621 = vmatprep.subr.bf16.mxu0 %v10620_v13  ;;  %v2461_v12 = vld [vmem:[%s12942_s28 + $0x440] sm:$0xff] }
 0x482   : > { %10629 = vmatprep.subr.bf16.mxu1 %v10628_v14  ;;  %7829 = vmatprep.mubr.f32.mxu0 %v2262_v15  ;;  %v2653_v13 = vld [vmem:[%s12942_s28 + $0xa40] sm:$0xff]  ;;  %v2463_v14 = vld [vmem:[%s12942_s28 + $0x450] sm:$0xff]  ;;  %v10656_v15 = vpack.c.bf16 %v2656_v6, %v2464_v5 }
 0x483   : > { %7899 = vmatprep.mubr.f32.mxu1 %v2264_v16  ;;  %v2655_v16 = vld [vmem:[%s12942_s28 + $0xa50] sm:$0xff]  ;;  %v3237_v58 = vld [vmem:[%s12942_s28 + $0x1c80] sm:$0xff] }
 0x484   : > { %v2851_v5 = vld [vmem:[%s12942_s28 + $0x1070] sm:$0xff] }
 0x485   : > { %v3043_v6 = vld [vmem:[%s12942_s28 + $0x1670] sm:$0xff] }
 0x488   : > { %10623 = vmatpush1.bf16.xpose.msra.mxu0 %v10622_v21  ;;  %v2265_v21 = vld [vmem:[%s12957_s4 + $0x420] sm:$0xff] }
 0x489   : > { %10631 = vmatpush1.bf16.xpose.msra.mxu1 %v10630_v22  ;;  %7773 = vmatprep.subr.mxu0 %v3222_v23  ;;  %v10650_v22 = vpack.c.bf16 %v2653_v13, %v2461_v12  ;;  %v2267_v23 = vld [vmem:[%s12957_s4 + $0x430] sm:$0xff] }
 0x48a   : > { %v6291_v25 = vpop.f32.mrb[42].mxu0  ;;  %7843 = vmatprep.subr.mxu1 %v3224_v24  ;;  %v10658_v24 = vpack.c.bf16 %v2655_v16, %v2463_v14  ;;  %v2470_v12 = vld [vmem:[%s12942_s28 + $0x488] sm:$0xff] }
 0x48b   : > { %v6292_v28 = vadd.f32 %v6291_v25, %v6222_v62  ;;  %v6293_v29 = vpop.f32.mrb[43].mxu0  ;;  %v6361_v30 = vpop.f32.mrb[42].mxu1  ;;  %v3228_v62 = vld [vmem:[%s12942_s28 + $0x1c38] sm:$0xff]  ;;  %v10652_v25 = vpack.c.bf16 %v3038_v18, %v2846_v17  ;;  %v2662_v13 = vld [vmem:[%s12942_s28 + $0xa88] sm:$0xff] }
 0x48c   : > { %v6363_v33 = vpop.f32.mrb[43].mxu1  ;;  %v2845_v29 = vld [vmem:[%s12942_s28 + $0x1040] sm:$0xff]  ;;  %v2472_v17 = vld [vmem:[%s12942_s28 + $0x498] sm:$0xff] }
 0x48d   : > { %v6362_v36 = vadd.f32 %v6361_v30, %v6292_v28  ;;  %v2272_v28 = vld [vmem:[%s12957_s4 + $0x458] sm:$0xff]  ;;  %v3037_v30 = vld [vmem:[%s12942_s28 + $0x1640] sm:$0xff]  ;;  %v2664_v18 = vld [vmem:[%s12942_s28 + $0xa98] sm:$0xff] }
 0x48e   : > { %v10654_v33 = vpack.c.bf16 %v3037_v30, %v2845_v29  ;;  %v2854_v29 = vld [vmem:[%s12942_s28 + $0x1088] sm:$0xff] }
 0x48f   : > { %v3046_v30 = vld [vmem:[%s12942_s28 + $0x1688] sm:$0xff] }
 0x490   : > { %7774 = vmatpush1.xpose.msra.mxu0 %v3221_v34  ;;  %v10662_v34 = vpack.c.bf16 %v3039_v32, %v2847_v31  ;;  %v2856_v31 = vld [vmem:[%s12942_s28 + $0x1098] sm:$0xff] }
 0x491   : > { %7844 = vmatpush1.xpose.msra.mxu1 %v3223_v35  ;;  %10633 = vmatprep.subr.bf16.mxu0 %v10632_v37  ;;  %v3230_v35 = vld [vmem:[%s12942_s28 + $0x1c48] sm:$0xff]  ;;  %v3048_v32 = vld [vmem:[%s12942_s28 + $0x1698] sm:$0xff] }
 0x492   : > { %10641 = vmatprep.subr.bf16.mxu1 %v10640_v41 }
 0x493   : > { %7830 = vmatmul.mubr.f32.vlgmr.msra.gmra.mrb[64].mxu0 %v2261_v47  ;;  %v3231_v47 = vld [vmem:[%s12942_s28 + $0x1c50] sm:$0xff] }
 0x494   : > { %10635 = vmatpush1.bf16.xpose.msra.mxu0 %v10634_v48  ;;  %7900 = vmatmul.mubr.f32.vlgmr.msra.gmra.mrb[64].mxu1 %v2263_v49  ;;  %v10664_v49 = vpack.c.bf16 %v2658_v39, %v2466_v38  ;;  %v10692_v38 = vpack.c.bf16 %v3048_v32, %v2856_v31  ;;  %v2278_v39 = vld [vmem:[%s12957_s4 + $0x488] sm:$0xff] }
 0x495   : > { %10643 = vmatpush1.bf16.xpose.msra.mxu1 %v10642_v50  ;;  %10637 = vmatprep.subr.bf16.mxu0 %v10636_v51  ;;  %v2465_v50 = vld [vmem:[%s12942_s28 + $0x460] sm:$0xff] }
 0x496   : > { %10645 = vmatprep.subr.bf16.mxu1 %v10644_v52  ;;  %7969 = vmatprep.mubr.f32.mxu0 %v2266_v53  ;;  %v2657_v51 = vld [vmem:[%s12942_s28 + $0xa60] sm:$0xff]  ;;  %v2467_v52 = vld [vmem:[%s12942_s28 + $0x470] sm:$0xff]  ;;  %v10672_v53 = vpack.c.bf16 %v2660_v44, %v2468_v43 }
 0x497   : > { %8039 = vmatprep.mubr.f32.mxu1 %v2268_v54  ;;  %v2659_v54 = vld [vmem:[%s12942_s28 + $0xa70] sm:$0xff]  ;;  %v3241_v32 = vld [vmem:[%s12942_s28 + $0x1ca0] sm:$0xff] }
 0x498   : > { %v2855_v43 = vld [vmem:[%s12942_s28 + $0x1090] sm:$0xff] }
 0x499   : > { %v3047_v44 = vld [vmem:[%s12942_s28 + $0x1690] sm:$0xff] }
 0x49c   : > { %10639 = vmatpush1.bf16.xpose.msra.mxu0 %v10638_v59  ;;  %v2269_v59 = vld [vmem:[%s12957_s4 + $0x440] sm:$0xff] }
 0x49d   : > { %10647 = vmatpush1.bf16.xpose.msra.mxu1 %v10646_v60  ;;  %7913 = vmatprep.subr.mxu0 %v3226_v61  ;;  %v10666_v60 = vpack.c.bf16 %v2657_v51, %v2465_v50  ;;  %v2271_v61 = vld [vmem:[%s12957_s4 + $0x450] sm:$0xff] }
 0x49e   : > { %v6431_v63 = vpop.f32.mrb[44].mxu0  ;;  %7983 = vmatprep.subr.mxu1 %v3228_v62  ;;  %v10674_v62 = vpack.c.bf16 %v2659_v54, %v2467_v52  ;;  %v2474_v50 = vld [vmem:[%s12942_s28 + $0x4a8] sm:$0xff] }
 0x49f   : > { %v6432_v2 = vadd.f32 %v6431_v63, %v6362_v36  ;;  %v6433_v3 = vpop.f32.mrb[45].mxu0  ;;  %v6501_v4 = vpop.f32.mrb[44].mxu1  ;;  %v3232_v36 = vld [vmem:[%s12942_s28 + $0x1c58] sm:$0xff]  ;;  %v10668_v63 = vpack.c.bf16 %v3042_v56, %v2850_v55  ;;  %v2666_v51 = vld [vmem:[%s12942_s28 + $0xaa8] sm:$0xff] }
 0x4a0   : > { %v6503_v7 = vpop.f32.mrb[45].mxu1  ;;  %v2849_v3 = vld [vmem:[%s12942_s28 + $0x1060] sm:$0xff]  ;;  %v2476_v55 = vld [vmem:[%s12942_s28 + $0x4b8] sm:$0xff] }
 0x4a1   : > { %v6502_v10 = vadd.f32 %v6501_v4, %v6432_v2  ;;  %v2276_v2 = vld [vmem:[%s12957_s4 + $0x478] sm:$0xff]  ;;  %v3041_v4 = vld [vmem:[%s12942_s28 + $0x1660] sm:$0xff]  ;;  %v2668_v56 = vld [vmem:[%s12942_s28 + $0xab8] sm:$0xff] }
 0x4a2   : > { %v10670_v7 = vpack.c.bf16 %v3041_v4, %v2849_v3  ;;  %v2858_v3 = vld [vmem:[%s12942_s28 + $0x10a8] sm:$0xff] }
 0x4a3   : > { %v3050_v4 = vld [vmem:[%s12942_s28 + $0x16a8] sm:$0xff] }
 0x4a4   : > { %7914 = vmatpush1.xpose.msra.mxu0 %v3225_v8  ;;  %v10678_v8 = vpack.c.bf16 %v3043_v6, %v2851_v5  ;;  %v2860_v5 = vld [vmem:[%s12942_s28 + $0x10b8] sm:$0xff] }
 0x4a5   : > { %7984 = vmatpush1.xpose.msra.mxu1 %v3227_v9  ;;  %10649 = vmatprep.subr.bf16.mxu0 %v10648_v11  ;;  %v3234_v9 = vld [vmem:[%s12942_s28 + $0x1c68] sm:$0xff]  ;;  %v3052_v6 = vld [vmem:[%s12942_s28 + $0x16b8] sm:$0xff] }
 0x4a6   : > { %10657 = vmatprep.subr.bf16.mxu1 %v10656_v15 }
 0x4a7   : > { %7970 = vmatmul.mubr.f32.vlgmr.msra.gmra.mrb[66].mxu0 %v2265_v21  ;;  %v3235_v21 = vld [vmem:[%s12942_s28 + $0x1c70] sm:$0xff] }
 0x4a8   : > { %10651 = vmatpush1.bf16.xpose.msra.mxu0 %v10650_v22  ;;  %8040 = vmatmul.mubr.f32.vlgmr.msra.gmra.mrb[66].mxu1 %v2267_v23  ;;  %v10680_v23 = vpack.c.bf16 %v2662_v13, %v2470_v12  ;;  %v10708_v12 = vpack.c.bf16 %v3052_v6, %v2860_v5  ;;  %v2282_v13 = vld [vmem:[%s12957_s4 + $0x4a8] sm:$0xff] }
 0x4a9   : > { %10659 = vmatpush1.bf16.xpose.msra.mxu1 %v10658_v24  ;;  %10653 = vmatprep.subr.bf16.mxu0 %v10652_v25  ;;  %v2469_v24 = vld [vmem:[%s12942_s28 + $0x480] sm:$0xff] }
 0x4aa   : > { %10661 = vmatprep.subr.bf16.mxu1 %v10660_v26  ;;  %8109 = vmatprep.mubr.f32.mxu0 %v2270_v27  ;;  %v2661_v25 = vld [vmem:[%s12942_s28 + $0xa80] sm:$0xff]  ;;  %v2471_v26 = vld [vmem:[%s12942_s28 + $0x490] sm:$0xff]  ;;  %v10688_v27 = vpack.c.bf16 %v2664_v18, %v2472_v17 }
 0x4ab   : > { %8179 = vmatprep.mubr.f32.mxu1 %v2272_v28  ;;  %v2663_v28 = vld [vmem:[%s12942_s28 + $0xa90] sm:$0xff]  ;;  %v3245_v6 = vld [vmem:[%s12942_s28 + $0x1cc0] sm:$0xff] }
 0x4ac   : > { %v2859_v17 = vld [vmem:[%s12942_s28 + $0x10b0] sm:$0xff] }
 0x4ad   : > { %v3051_v18 = vld [vmem:[%s12942_s28 + $0x16b0] sm:$0xff] }
 0x4b0   : > { %10655 = vmatpush1.bf16.xpose.msra.mxu0 %v10654_v33  ;;  %v2273_v33 = vld [vmem:[%s12957_s4 + $0x460] sm:$0xff] }
 0x4b1   : > { %10663 = vmatpush1.bf16.xpose.msra.mxu1 %v10662_v34  ;;  %8053 = vmatprep.subr.mxu0 %v3230_v35  ;;  %v10682_v34 = vpack.c.bf16 %v2661_v25, %v2469_v24  ;;  %v2275_v35 = vld [vmem:[%s12957_s4 + $0x470] sm:$0xff] }
 0x4b2   : > { %v6571_v37 = vpop.f32.mrb[46].mxu0  ;;  %8123 = vmatprep.subr.mxu1 %v3232_v36  ;;  %v10690_v36 = vpack.c.bf16 %v2663_v28, %v2471_v26  ;;  %v2478_v24 = vld [vmem:[%s12942_s28 + $0x4c8] sm:$0xff] }
 0x4b3   : > { %v6572_v40 = vadd.f32 %v6571_v37, %v6502_v10  ;;  %v6573_v41 = vpop.f32.mrb[47].mxu0  ;;  %v6641_v42 = vpop.f32.mrb[46].mxu1  ;;  %v3236_v10 = vld [vmem:[%s12942_s28 + $0x1c78] sm:$0xff]  ;;  %v10684_v37 = vpack.c.bf16 %v3046_v30, %v2854_v29  ;;  %v2670_v25 = vld [vmem:[%s12942_s28 + $0xac8] sm:$0xff] }
 0x4b4   : > { %v6643_v45 = vpop.f32.mrb[47].mxu1  ;;  %v2853_v41 = vld [vmem:[%s12942_s28 + $0x1080] sm:$0xff]  ;;  %v2480_v29 = vld [vmem:[%s12942_s28 + $0x4d8] sm:$0xff] }
 0x4b5   : > { %v6642_v48 = vadd.f32 %v6641_v42, %v6572_v40  ;;  %v2280_v40 = vld [vmem:[%s12957_s4 + $0x498] sm:$0xff]  ;;  %v3045_v42 = vld [vmem:[%s12942_s28 + $0x1680] sm:$0xff]  ;;  %v2672_v30 = vld [vmem:[%s12942_s28 + $0xad8] sm:$0xff] }
 0x4b6   : > { %v10686_v45 = vpack.c.bf16 %v3045_v42, %v2853_v41  ;;  %v2862_v41 = vld [vmem:[%s12942_s28 + $0x10c8] sm:$0xff] }
 0x4b7   : > { %v3054_v42 = vld [vmem:[%s12942_s28 + $0x16c8] sm:$0xff] }
 0x4b8   : > { %8054 = vmatpush1.xpose.msra.mxu0 %v3229_v46  ;;  %v10694_v46 = vpack.c.bf16 %v3047_v44, %v2855_v43  ;;  %v2864_v43 = vld [vmem:[%s12942_s28 + $0x10d8] sm:$0xff] }
 0x4b9   : > { %8124 = vmatpush1.xpose.msra.mxu1 %v3231_v47  ;;  %10665 = vmatprep.subr.bf16.mxu0 %v10664_v49  ;;  %v3238_v47 = vld [vmem:[%s12942_s28 + $0x1c88] sm:$0xff]  ;;  %v3056_v44 = vld [vmem:[%s12942_s28 + $0x16d8] sm:$0xff] }
 0x4ba   : > { %10673 = vmatprep.subr.bf16.mxu1 %v10672_v53 }
 0x4bb   : > { %8110 = vmatmul.mubr.f32.vlgmr.msra.gmra.mrb[68].mxu0 %v2269_v59  ;;  %v3239_v59 = vld [vmem:[%s12942_s28 + $0x1c90] sm:$0xff] }
 0x4bc   : > { %10667 = vmatpush1.bf16.xpose.msra.mxu0 %v10666_v60  ;;  %8180 = vmatmul.mubr.f32.vlgmr.msra.gmra.mrb[68].mxu1 %v2271_v61  ;;  %v10696_v61 = vpack.c.bf16 %v2666_v51, %v2474_v50  ;;  %v10724_v50 = vpack.c.bf16 %v3056_v44, %v2864_v43  ;;  %v2286_v51 = vld [vmem:[%s12957_s4 + $0x4c8] sm:$0xff] }
 0x4bd   : > { %10675 = vmatpush1.bf16.xpose.msra.mxu1 %v10674_v62  ;;  %10669 = vmatprep.subr.bf16.mxu0 %v10668_v63  ;;  %v2473_v62 = vld [vmem:[%s12942_s28 + $0x4a0] sm:$0xff] }
 0x4be   : > { %10677 = vmatprep.subr.bf16.mxu1 %v10676_v0  ;;  %8249 = vmatprep.mubr.f32.mxu0 %v2274_v1  ;;  %v2665_v63 = vld [vmem:[%s12942_s28 + $0xaa0] sm:$0xff]  ;;  %v2475_v0 = vld [vmem:[%s12942_s28 + $0x4b0] sm:$0xff]  ;;  %v10704_v1 = vpack.c.bf16 %v2668_v56, %v2476_v55 }
 0x4bf   : > { %8319 = vmatprep.mubr.f32.mxu1 %v2276_v2  ;;  %v2667_v2 = vld [vmem:[%s12942_s28 + $0xab0] sm:$0xff]  ;;  %v3249_v44 = vld [vmem:[%s12942_s28 + $0x1ce0] sm:$0xff] }
 0x4c0   : > { %v2863_v55 = vld [vmem:[%s12942_s28 + $0x10d0] sm:$0xff] }
 0x4c1   : > { %v3055_v56 = vld [vmem:[%s12942_s28 + $0x16d0] sm:$0xff] }
 0x4c4   : > { %10671 = vmatpush1.bf16.xpose.msra.mxu0 %v10670_v7  ;;  %v2277_v7 = vld [vmem:[%s12957_s4 + $0x480] sm:$0xff] }
 0x4c5   : > { %10679 = vmatpush1.bf16.xpose.msra.mxu1 %v10678_v8  ;;  %8193 = vmatprep.subr.mxu0 %v3234_v9  ;;  %v10698_v8 = vpack.c.bf16 %v2665_v63, %v2473_v62  ;;  %v2279_v9 = vld [vmem:[%s12957_s4 + $0x490] sm:$0xff] }
 0x4c6   : > { %v6711_v11 = vpop.f32.mrb[48].mxu0  ;;  %8263 = vmatprep.subr.mxu1 %v3236_v10  ;;  %v10706_v10 = vpack.c.bf16 %v2667_v2, %v2475_v0  ;;  %v2482_v62 = vld [vmem:[%s12942_s28 + $0x4e8] sm:$0xff] }
 0x4c7   : > { %v6712_v14 = vadd.f32 %v6711_v11, %v6642_v48  ;;  %v6713_v15 = vpop.f32.mrb[49].mxu0  ;;  %v6781_v16 = vpop.f32.mrb[48].mxu1  ;;  %v3240_v48 = vld [vmem:[%s12942_s28 + $0x1c98] sm:$0xff]  ;;  %v10700_v11 = vpack.c.bf16 %v3050_v4, %v2858_v3  ;;  %v2674_v63 = vld [vmem:[%s12942_s28 + $0xae8] sm:$0xff] }
 0x4c8   : > { %v6783_v19 = vpop.f32.mrb[49].mxu1  ;;  %v2857_v15 = vld [vmem:[%s12942_s28 + $0x10a0] sm:$0xff]  ;;  %v2484_v3 = vld [vmem:[%s12942_s28 + $0x4f8] sm:$0xff] }
 0x4c9   : > { %v6782_v22 = vadd.f32 %v6781_v16, %v6712_v14  ;;  %v2284_v14 = vld [vmem:[%s12957_s4 + $0x4b8] sm:$0xff]  ;;  %v3049_v16 = vld [vmem:[%s12942_s28 + $0x16a0] sm:$0xff]  ;;  %v2676_v4 = vld [vmem:[%s12942_s28 + $0xaf8] sm:$0xff] }
 0x4ca   : > { %v10702_v19 = vpack.c.bf16 %v3049_v16, %v2857_v15  ;;  %v2866_v15 = vld [vmem:[%s12942_s28 + $0x10e8] sm:$0xff] }
 0x4cb   : > { %v3058_v16 = vld [vmem:[%s12942_s28 + $0x16e8] sm:$0xff] }
 0x4cc   : > { %8194 = vmatpush1.xpose.msra.mxu0 %v3233_v20  ;;  %v10710_v20 = vpack.c.bf16 %v3051_v18, %v2859_v17  ;;  %v2868_v17 = vld [vmem:[%s12942_s28 + $0x10f8] sm:$0xff] }
 0x4cd   : > { %8264 = vmatpush1.xpose.msra.mxu1 %v3235_v21  ;;  %10681 = vmatprep.subr.bf16.mxu0 %v10680_v23  ;;  %v3242_v21 = vld [vmem:[%s12942_s28 + $0x1ca8] sm:$0xff]  ;;  %v3060_v18 = vld [vmem:[%s12942_s28 + $0x16f8] sm:$0xff] }
 0x4ce   : > { %10689 = vmatprep.subr.bf16.mxu1 %v10688_v27 }
 0x4cf   : > { %8250 = vmatmul.mubr.f32.vlgmr.msra.gmra.mrb[70].mxu0 %v2273_v33  ;;  %v3243_v33 = vld [vmem:[%s12942_s28 + $0x1cb0] sm:$0xff] }
 0x4d0   : > { %10683 = vmatpush1.bf16.xpose.msra.mxu0 %v10682_v34  ;;  %8320 = vmatmul.mubr.f32.vlgmr.msra.gmra.mrb[70].mxu1 %v2275_v35  ;;  %v10712_v35 = vpack.c.bf16 %v2670_v25, %v2478_v24  ;;  %v10740_v24 = vpack.c.bf16 %v3060_v18, %v2868_v17  ;;  %v2290_v25 = vld [vmem:[%s12957_s4 + $0x4e8] sm:$0xff] }
 0x4d1   : > { %10691 = vmatpush1.bf16.xpose.msra.mxu1 %v10690_v36  ;;  %10685 = vmatprep.subr.bf16.mxu0 %v10684_v37  ;;  %v2477_v36 = vld [vmem:[%s12942_s28 + $0x4c0] sm:$0xff] }
 0x4d2   : > { %10693 = vmatprep.subr.bf16.mxu1 %v10692_v38  ;;  %8389 = vmatprep.mubr.f32.mxu0 %v2278_v39  ;;  %v2669_v37 = vld [vmem:[%s12942_s28 + $0xac0] sm:$0xff]  ;;  %v2479_v38 = vld [vmem:[%s12942_s28 + $0x4d0] sm:$0xff]  ;;  %v10720_v39 = vpack.c.bf16 %v2672_v30, %v2480_v29 }
 0x4d3   : > { %8459 = vmatprep.mubr.f32.mxu1 %v2280_v40  ;;  %v2671_v40 = vld [vmem:[%s12942_s28 + $0xad0] sm:$0xff]  ;;  %v3253_v18 = vld [vmem:[%s12942_s28 + $0x1d00] sm:$0xff] }
 0x4d4   : > { %v2867_v29 = vld [vmem:[%s12942_s28 + $0x10f0] sm:$0xff] }
 0x4d5   : > { %v3059_v30 = vld [vmem:[%s12942_s28 + $0x16f0] sm:$0xff] }
 0x4d8   : > { %10687 = vmatpush1.bf16.xpose.msra.mxu0 %v10686_v45  ;;  %v2281_v45 = vld [vmem:[%s12957_s4 + $0x4a0] sm:$0xff] }
 0x4d9   : > { %10695 = vmatpush1.bf16.xpose.msra.mxu1 %v10694_v46  ;;  %8333 = vmatprep.subr.mxu0 %v3238_v47  ;;  %v10714_v46 = vpack.c.bf16 %v2669_v37, %v2477_v36  ;;  %v2283_v47 = vld [vmem:[%s12957_s4 + $0x4b0] sm:$0xff] }
 0x4da   : > { %v6851_v49 = vpop.f32.mrb[50].mxu0  ;;  %8403 = vmatprep.subr.mxu1 %v3240_v48  ;;  %v10722_v48 = vpack.c.bf16 %v2671_v40, %v2479_v38  ;;  %v2486_v36 = vld [vmem:[%s12942_s28 + $0x508] sm:$0xff] }
 0x4db   : > { %v6852_v52 = vadd.f32 %v6851_v49, %v6782_v22  ;;  %v6853_v53 = vpop.f32.mrb[51].mxu0  ;;  %v6921_v54 = vpop.f32.mrb[50].mxu1  ;;  %v3244_v22 = vld [vmem:[%s12942_s28 + $0x1cb8] sm:$0xff]  ;;  %v10716_v49 = vpack.c.bf16 %v3054_v42, %v2862_v41  ;;  %v2678_v37 = vld [vmem:[%s12942_s28 + $0xb08] sm:$0xff] }
 0x4dc   : > { %v6923_v57 = vpop.f32.mrb[51].mxu1  ;;  %v2861_v53 = vld [vmem:[%s12942_s28 + $0x10c0] sm:$0xff]  ;;  %v2488_v41 = vld [vmem:[%s12942_s28 + $0x518] sm:$0xff] }
 0x4dd   : > { %v6922_v60 = vadd.f32 %v6921_v54, %v6852_v52  ;;  %v2288_v52 = vld [vmem:[%s12957_s4 + $0x4d8] sm:$0xff]  ;;  %v3053_v54 = vld [vmem:[%s12942_s28 + $0x16c0] sm:$0xff]  ;;  %v2680_v42 = vld [vmem:[%s12942_s28 + $0xb18] sm:$0xff] }
 0x4de   : > { %v10718_v57 = vpack.c.bf16 %v3053_v54, %v2861_v53  ;;  %v2870_v53 = vld [vmem:[%s12942_s28 + $0x1108] sm:$0xff] }
 0x4df   : > { %v3062_v54 = vld [vmem:[%s12942_s28 + $0x1708] sm:$0xff] }
 0x4e0   : > { %8334 = vmatpush1.xpose.msra.mxu0 %v3237_v58  ;;  %v10726_v58 = vpack.c.bf16 %v3055_v56, %v2863_v55  ;;  %v2872_v55 = vld [vmem:[%s12942_s28 + $0x1118] sm:$0xff] }
 0x4e1   : > { %8404 = vmatpush1.xpose.msra.mxu1 %v3239_v59  ;;  %10697 = vmatprep.subr.bf16.mxu0 %v10696_v61  ;;  %v3246_v59 = vld [vmem:[%s12942_s28 + $0x1cc8] sm:$0xff]  ;;  %v3064_v56 = vld [vmem:[%s12942_s28 + $0x1718] sm:$0xff] }
 0x4e2   : > { %10705 = vmatprep.subr.bf16.mxu1 %v10704_v1 }
 0x4e3   : > { %8390 = vmatmul.mubr.f32.vlgmr.msra.gmra.mrb[72].mxu0 %v2277_v7  ;;  %v3247_v7 = vld [vmem:[%s12942_s28 + $0x1cd0] sm:$0xff] }
 0x4e4   : > { %10699 = vmatpush1.bf16.xpose.msra.mxu0 %v10698_v8  ;;  %8460 = vmatmul.mubr.f32.vlgmr.msra.gmra.mrb[72].mxu1 %v2279_v9  ;;  %v10728_v9 = vpack.c.bf16 %v2674_v63, %v2482_v62  ;;  %v10756_v62 = vpack.c.bf16 %v3064_v56, %v2872_v55  ;;  %v2294_v63 = vld [vmem:[%s12957_s4 + $0x508] sm:$0xff] }
 0x4e5   : > { %10707 = vmatpush1.bf16.xpose.msra.mxu1 %v10706_v10  ;;  %10701 = vmatprep.subr.bf16.mxu0 %v10700_v11  ;;  %v2481_v10 = vld [vmem:[%s12942_s28 + $0x4e0] sm:$0xff] }
 0x4e6   : > { %10709 = vmatprep.subr.bf16.mxu1 %v10708_v12  ;;  %8529 = vmatprep.mubr.f32.mxu0 %v2282_v13  ;;  %v2673_v11 = vld [vmem:[%s12942_s28 + $0xae0] sm:$0xff]  ;;  %v2483_v12 = vld [vmem:[%s12942_s28 + $0x4f0] sm:$0xff]  ;;  %v10736_v13 = vpack.c.bf16 %v2676_v4, %v2484_v3 }
 0x4e7   : > { %8599 = vmatprep.mubr.f32.mxu1 %v2284_v14  ;;  %v2675_v14 = vld [vmem:[%s12942_s28 + $0xaf0] sm:$0xff]  ;;  %v3257_v56 = vld [vmem:[%s12942_s28 + $0x1d20] sm:$0xff] }
 0x4e8   : > { %v2871_v3 = vld [vmem:[%s12942_s28 + $0x1110] sm:$0xff] }
 0x4e9   : > { %v3063_v4 = vld [vmem:[%s12942_s28 + $0x1710] sm:$0xff] }
 0x4ec   : > { %10703 = vmatpush1.bf16.xpose.msra.mxu0 %v10702_v19  ;;  %v2285_v19 = vld [vmem:[%s12957_s4 + $0x4c0] sm:$0xff] }
 0x4ed   : > { %10711 = vmatpush1.bf16.xpose.msra.mxu1 %v10710_v20  ;;  %8473 = vmatprep.subr.mxu0 %v3242_v21  ;;  %v10730_v20 = vpack.c.bf16 %v2673_v11, %v2481_v10  ;;  %v2287_v21 = vld [vmem:[%s12957_s4 + $0x4d0] sm:$0xff] }
 0x4ee   : > { %v6991_v23 = vpop.f32.mrb[52].mxu0  ;;  %8543 = vmatprep.subr.mxu1 %v3244_v22  ;;  %v10738_v22 = vpack.c.bf16 %v2675_v14, %v2483_v12  ;;  %v2490_v10 = vld [vmem:[%s12942_s28 + $0x528] sm:$0xff] }
 0x4ef   : > { %v6992_v26 = vadd.f32 %v6991_v23, %v6922_v60  ;;  %v6993_v27 = vpop.f32.mrb[53].mxu0  ;;  %v7061_v28 = vpop.f32.mrb[52].mxu1  ;;  %v3248_v60 = vld [vmem:[%s12942_s28 + $0x1cd8] sm:$0xff]  ;;  %v10732_v23 = vpack.c.bf16 %v3058_v16, %v2866_v15  ;;  %v2682_v11 = vld [vmem:[%s12942_s28 + $0xb28] sm:$0xff] }
 0x4f0   : > { %v7063_v31 = vpop.f32.mrb[53].mxu1  ;;  %v2865_v27 = vld [vmem:[%s12942_s28 + $0x10e0] sm:$0xff]  ;;  %v2492_v15 = vld [vmem:[%s12942_s28 + $0x538] sm:$0xff] }
 0x4f1   : > { %v7062_v34 = vadd.f32 %v7061_v28, %v6992_v26  ;;  %v2292_v26 = vld [vmem:[%s12957_s4 + $0x4f8] sm:$0xff]  ;;  %v3057_v28 = vld [vmem:[%s12942_s28 + $0x16e0] sm:$0xff]  ;;  %v2684_v16 = vld [vmem:[%s12942_s28 + $0xb38] sm:$0xff] }
 0x4f2   : > { %v10734_v31 = vpack.c.bf16 %v3057_v28, %v2865_v27  ;;  %v2874_v27 = vld [vmem:[%s12942_s28 + $0x1128] sm:$0xff] }
 0x4f3   : > { %v3066_v28 = vld [vmem:[%s12942_s28 + $0x1728] sm:$0xff] }
 0x4f4   : > { %8474 = vmatpush1.xpose.msra.mxu0 %v3241_v32  ;;  %v10742_v32 = vpack.c.bf16 %v3059_v30, %v2867_v29  ;;  %v2876_v29 = vld [vmem:[%s12942_s28 + $0x1138] sm:$0xff] }
 0x4f5   : > { %8544 = vmatpush1.xpose.msra.mxu1 %v3243_v33  ;;  %10713 = vmatprep.subr.bf16.mxu0 %v10712_v35  ;;  %v3250_v33 = vld [vmem:[%s12942_s28 + $0x1ce8] sm:$0xff]  ;;  %v3068_v30 = vld [vmem:[%s12942_s28 + $0x1738] sm:$0xff] }
 0x4f6   : > { %10721 = vmatprep.subr.bf16.mxu1 %v10720_v39 }
 0x4f7   : > { %8530 = vmatmul.mubr.f32.vlgmr.msra.gmra.mrb[74].mxu0 %v2281_v45  ;;  %v3251_v45 = vld [vmem:[%s12942_s28 + $0x1cf0] sm:$0xff] }
 0x4f8   : > { %10715 = vmatpush1.bf16.xpose.msra.mxu0 %v10714_v46  ;;  %8600 = vmatmul.mubr.f32.vlgmr.msra.gmra.mrb[74].mxu1 %v2283_v47  ;;  %v10744_v47 = vpack.c.bf16 %v2678_v37, %v2486_v36  ;;  %v10772_v36 = vpack.c.bf16 %v3068_v30, %v2876_v29  ;;  %v2298_v37 = vld [vmem:[%s12957_s4 + $0x528] sm:$0xff] }
 0x4f9   : > { %10723 = vmatpush1.bf16.xpose.msra.mxu1 %v10722_v48  ;;  %10717 = vmatprep.subr.bf16.mxu0 %v10716_v49  ;;  %v2485_v48 = vld [vmem:[%s12942_s28 + $0x500] sm:$0xff] }
 0x4fa   : > { %10725 = vmatprep.subr.bf16.mxu1 %v10724_v50  ;;  %8669 = vmatprep.mubr.f32.mxu0 %v2286_v51  ;;  %v2677_v49 = vld [vmem:[%s12942_s28 + $0xb00] sm:$0xff]  ;;  %v2487_v50 = vld [vmem:[%s12942_s28 + $0x510] sm:$0xff]  ;;  %v10752_v51 = vpack.c.bf16 %v2680_v42, %v2488_v41 }
 0x4fb   : > { %8739 = vmatprep.mubr.f32.mxu1 %v2288_v52  ;;  %v2679_v52 = vld [vmem:[%s12942_s28 + $0xb10] sm:$0xff]  ;;  %v3261_v30 = vld [vmem:[%s12942_s28 + $0x1d40] sm:$0xff] }
 0x4fc   : > { %v2875_v41 = vld [vmem:[%s12942_s28 + $0x1130] sm:$0xff] }
 0x4fd   : > { %v3067_v42 = vld [vmem:[%s12942_s28 + $0x1730] sm:$0xff] }
 0x500   : > { %10719 = vmatpush1.bf16.xpose.msra.mxu0 %v10718_v57  ;;  %v2289_v57 = vld [vmem:[%s12957_s4 + $0x4e0] sm:$0xff] }
 0x501   : > { %10727 = vmatpush1.bf16.xpose.msra.mxu1 %v10726_v58  ;;  %8613 = vmatprep.subr.mxu0 %v3246_v59  ;;  %v10746_v58 = vpack.c.bf16 %v2677_v49, %v2485_v48  ;;  %v2291_v59 = vld [vmem:[%s12957_s4 + $0x4f0] sm:$0xff] }
 0x502   : > { %v7131_v61 = vpop.f32.mrb[54].mxu0  ;;  %8683 = vmatprep.subr.mxu1 %v3248_v60  ;;  %v10754_v60 = vpack.c.bf16 %v2679_v52, %v2487_v50  ;;  %v2494_v48 = vld [vmem:[%s12942_s28 + $0x548] sm:$0xff] }
 0x503   : > { %v7132_v0 = vadd.f32 %v7131_v61, %v7062_v34  ;;  %v7133_v1 = vpop.f32.mrb[55].mxu0  ;;  %v7201_v2 = vpop.f32.mrb[54].mxu1  ;;  %v3252_v34 = vld [vmem:[%s12942_s28 + $0x1cf8] sm:$0xff]  ;;  %v10748_v61 = vpack.c.bf16 %v3062_v54, %v2870_v53  ;;  %v2686_v49 = vld [vmem:[%s12942_s28 + $0xb48] sm:$0xff] }
 0x504   : > { %v7203_v5 = vpop.f32.mrb[55].mxu1  ;;  %v2869_v1 = vld [vmem:[%s12942_s28 + $0x1100] sm:$0xff]  ;;  %v2496_v53 = vld [vmem:[%s12942_s28 + $0x558] sm:$0xff] }
 0x505   : > { %v7202_v8 = vadd.f32 %v7201_v2, %v7132_v0  ;;  %v2296_v0 = vld [vmem:[%s12957_s4 + $0x518] sm:$0xff]  ;;  %v3061_v2 = vld [vmem:[%s12942_s28 + $0x1700] sm:$0xff]  ;;  %v2688_v54 = vld [vmem:[%s12942_s28 + $0xb58] sm:$0xff] }
 0x506   : > { %v10750_v5 = vpack.c.bf16 %v3061_v2, %v2869_v1  ;;  %v2878_v1 = vld [vmem:[%s12942_s28 + $0x1148] sm:$0xff] }
 0x507   : > { %v3070_v2 = vld [vmem:[%s12942_s28 + $0x1748] sm:$0xff] }
 0x508   : > { %8614 = vmatpush1.xpose.msra.mxu0 %v3245_v6  ;;  %v10758_v6 = vpack.c.bf16 %v3063_v4, %v2871_v3  ;;  %v2880_v3 = vld [vmem:[%s12942_s28 + $0x1158] sm:$0xff] }
 0x509   : > { %8684 = vmatpush1.xpose.msra.mxu1 %v3247_v7  ;;  %10729 = vmatprep.subr.bf16.mxu0 %v10728_v9  ;;  %v3254_v7 = vld [vmem:[%s12942_s28 + $0x1d08] sm:$0xff]  ;;  %v3072_v4 = vld [vmem:[%s12942_s28 + $0x1758] sm:$0xff] }
 0x50a   : > { %10737 = vmatprep.subr.bf16.mxu1 %v10736_v13 }
 0x50b   : > { %8670 = vmatmul.mubr.f32.vlgmr.msra.gmra.mrb[76].mxu0 %v2285_v19  ;;  %v3255_v19 = vld [vmem:[%s12942_s28 + $0x1d10] sm:$0xff] }
 0x50c   : > { %10731 = vmatpush1.bf16.xpose.msra.mxu0 %v10730_v20  ;;  %8740 = vmatmul.mubr.f32.vlgmr.msra.gmra.mrb[76].mxu1 %v2287_v21  ;;  %v10760_v21 = vpack.c.bf16 %v2682_v11, %v2490_v10  ;;  %v10788_v10 = vpack.c.bf16 %v3072_v4, %v2880_v3  ;;  %v2302_v11 = vld [vmem:[%s12957_s4 + $0x548] sm:$0xff] }
 0x50d   : > { %10739 = vmatpush1.bf16.xpose.msra.mxu1 %v10738_v22  ;;  %10733 = vmatprep.subr.bf16.mxu0 %v10732_v23  ;;  %v2489_v22 = vld [vmem:[%s12942_s28 + $0x520] sm:$0xff] }
 0x50e   : > { %10741 = vmatprep.subr.bf16.mxu1 %v10740_v24  ;;  %8809 = vmatprep.mubr.f32.mxu0 %v2290_v25  ;;  %v2681_v23 = vld [vmem:[%s12942_s28 + $0xb20] sm:$0xff]  ;;  %v2491_v24 = vld [vmem:[%s12942_s28 + $0x530] sm:$0xff]  ;;  %v10768_v25 = vpack.c.bf16 %v2684_v16, %v2492_v15 }
 0x50f   : > { %8879 = vmatprep.mubr.f32.mxu1 %v2292_v26  ;;  %v2683_v26 = vld [vmem:[%s12942_s28 + $0xb30] sm:$0xff]  ;;  %v3265_v4 = vld [vmem:[%s12942_s28 + $0x1d60] sm:$0xff] }
 0x510   : > { %v2879_v15 = vld [vmem:[%s12942_s28 + $0x1150] sm:$0xff] }
 0x511   : > { %v3071_v16 = vld [vmem:[%s12942_s28 + $0x1750] sm:$0xff] }
 0x514   : > { %10735 = vmatpush1.bf16.xpose.msra.mxu0 %v10734_v31  ;;  %v2293_v31 = vld [vmem:[%s12957_s4 + $0x500] sm:$0xff] }
 0x515   : > { %10743 = vmatpush1.bf16.xpose.msra.mxu1 %v10742_v32  ;;  %8753 = vmatprep.subr.mxu0 %v3250_v33  ;;  %v10762_v32 = vpack.c.bf16 %v2681_v23, %v2489_v22  ;;  %v2295_v33 = vld [vmem:[%s12957_s4 + $0x510] sm:$0xff] }
 0x516   : > { %v7271_v35 = vpop.f32.mrb[56].mxu0  ;;  %8823 = vmatprep.subr.mxu1 %v3252_v34  ;;  %v10770_v34 = vpack.c.bf16 %v2683_v26, %v2491_v24  ;;  %v2498_v22 = vld [vmem:[%s12942_s28 + $0x568] sm:$0xff] }
 0x517   : > { %v7272_v38 = vadd.f32 %v7271_v35, %v7202_v8  ;;  %v7273_v39 = vpop.f32.mrb[57].mxu0  ;;  %v7341_v40 = vpop.f32.mrb[56].mxu1  ;;  %v3256_v8 = vld [vmem:[%s12942_s28 + $0x1d18] sm:$0xff]  ;;  %v10764_v35 = vpack.c.bf16 %v3066_v28, %v2874_v27  ;;  %v2690_v23 = vld [vmem:[%s12942_s28 + $0xb68] sm:$0xff] }
 0x518   : > { %v7343_v43 = vpop.f32.mrb[57].mxu1  ;;  %v2873_v39 = vld [vmem:[%s12942_s28 + $0x1120] sm:$0xff]  ;;  %v2500_v27 = vld [vmem:[%s12942_s28 + $0x578] sm:$0xff] }
 0x519   : > { %v7342_v46 = vadd.f32 %v7341_v40, %v7272_v38  ;;  %v2300_v38 = vld [vmem:[%s12957_s4 + $0x538] sm:$0xff]  ;;  %v3065_v40 = vld [vmem:[%s12942_s28 + $0x1720] sm:$0xff]  ;;  %v2692_v28 = vld [vmem:[%s12942_s28 + $0xb78] sm:$0xff] }
 0x51a   : > { %v10766_v43 = vpack.c.bf16 %v3065_v40, %v2873_v39  ;;  %v2882_v39 = vld [vmem:[%s12942_s28 + $0x1168] sm:$0xff] }
 0x51b   : > { %v3074_v40 = vld [vmem:[%s12942_s28 + $0x1768] sm:$0xff] }
 0x51c   : > { %8754 = vmatpush1.xpose.msra.mxu0 %v3249_v44  ;;  %v10774_v44 = vpack.c.bf16 %v3067_v42, %v2875_v41  ;;  %v2884_v41 = vld [vmem:[%s12942_s28 + $0x1178] sm:$0xff] }
 0x51d   : > { %8824 = vmatpush1.xpose.msra.mxu1 %v3251_v45  ;;  %10745 = vmatprep.subr.bf16.mxu0 %v10744_v47  ;;  %v3258_v45 = vld [vmem:[%s12942_s28 + $0x1d28] sm:$0xff]  ;;  %v3076_v42 = vld [vmem:[%s12942_s28 + $0x1778] sm:$0xff] }
 0x51e   : > { %10753 = vmatprep.subr.bf16.mxu1 %v10752_v51 }
 0x51f   : > { %8810 = vmatmul.mubr.f32.vlgmr.msra.gmra.mrb[78].mxu0 %v2289_v57  ;;  %v3259_v57 = vld [vmem:[%s12942_s28 + $0x1d30] sm:$0xff] }
 0x520   : > { %10747 = vmatpush1.bf16.xpose.msra.mxu0 %v10746_v58  ;;  %8880 = vmatmul.mubr.f32.vlgmr.msra.gmra.mrb[78].mxu1 %v2291_v59  ;;  %v10776_v59 = vpack.c.bf16 %v2686_v49, %v2494_v48  ;;  %v10804_v48 = vpack.c.bf16 %v3076_v42, %v2884_v41  ;;  %v2306_v49 = vld [vmem:[%s12957_s4 + $0x568] sm:$0xff] }
 0x521   : > { %10755 = vmatpush1.bf16.xpose.msra.mxu1 %v10754_v60  ;;  %10749 = vmatprep.subr.bf16.mxu0 %v10748_v61  ;;  %v2493_v60 = vld [vmem:[%s12942_s28 + $0x540] sm:$0xff] }
 0x522   : > { %10757 = vmatprep.subr.bf16.mxu1 %v10756_v62  ;;  %8949 = vmatprep.mubr.f32.mxu0 %v2294_v63  ;;  %v2685_v61 = vld [vmem:[%s12942_s28 + $0xb40] sm:$0xff]  ;;  %v2495_v62 = vld [vmem:[%s12942_s28 + $0x550] sm:$0xff]  ;;  %v10784_v63 = vpack.c.bf16 %v2688_v54, %v2496_v53 }
 0x523   : > { %9019 = vmatprep.mubr.f32.mxu1 %v2296_v0  ;;  %v2687_v0 = vld [vmem:[%s12942_s28 + $0xb50] sm:$0xff]  ;;  %v3269_v42 = vld [vmem:[%s12942_s28 + $0x1d80] sm:$0xff] }
 0x524   : > { %v2883_v53 = vld [vmem:[%s12942_s28 + $0x1170] sm:$0xff] }
 0x525   : > { %v3075_v54 = vld [vmem:[%s12942_s28 + $0x1770] sm:$0xff] }
 0x528   : > { %10751 = vmatpush1.bf16.xpose.msra.mxu0 %v10750_v5  ;;  %v2297_v5 = vld [vmem:[%s12957_s4 + $0x520] sm:$0xff] }
 0x529   : > { %10759 = vmatpush1.bf16.xpose.msra.mxu1 %v10758_v6  ;;  %8893 = vmatprep.subr.mxu0 %v3254_v7  ;;  %v10778_v6 = vpack.c.bf16 %v2685_v61, %v2493_v60  ;;  %v2299_v7 = vld [vmem:[%s12957_s4 + $0x530] sm:$0xff] }
 0x52a   : > { %v7411_v9 = vpop.f32.mrb[58].mxu0  ;;  %8963 = vmatprep.subr.mxu1 %v3256_v8  ;;  %v10786_v8 = vpack.c.bf16 %v2687_v0, %v2495_v62  ;;  %v2502_v60 = vld [vmem:[%s12942_s28 + $0x588] sm:$0xff] }
 0x52b   : > { %v7412_v12 = vadd.f32 %v7411_v9, %v7342_v46  ;;  %v7413_v13 = vpop.f32.mrb[59].mxu0  ;;  %v7481_v14 = vpop.f32.mrb[58].mxu1  ;;  %v3260_v46 = vld [vmem:[%s12942_s28 + $0x1d38] sm:$0xff]  ;;  %v10780_v9 = vpack.c.bf16 %v3070_v2, %v2878_v1  ;;  %v2694_v61 = vld [vmem:[%s12942_s28 + $0xb88] sm:$0xff] }
 0x52c   : > { %v7483_v17 = vpop.f32.mrb[59].mxu1  ;;  %v2877_v13 = vld [vmem:[%s12942_s28 + $0x1140] sm:$0xff]  ;;  %v2504_v1 = vld [vmem:[%s12942_s28 + $0x598] sm:$0xff] }
 0x52d   : > { %v7482_v20 = vadd.f32 %v7481_v14, %v7412_v12  ;;  %v2304_v12 = vld [vmem:[%s12957_s4 + $0x558] sm:$0xff]  ;;  %v3069_v14 = vld [vmem:[%s12942_s28 + $0x1740] sm:$0xff]  ;;  %v2696_v2 = vld [vmem:[%s12942_s28 + $0xb98] sm:$0xff] }
 0x52e   : > { %v10782_v17 = vpack.c.bf16 %v3069_v14, %v2877_v13  ;;  %v2886_v13 = vld [vmem:[%s12942_s28 + $0x1188] sm:$0xff] }
 0x52f   : > { %v3078_v14 = vld [vmem:[%s12942_s28 + $0x1788] sm:$0xff] }
 0x530   : > { %8894 = vmatpush1.xpose.msra.mxu0 %v3253_v18  ;;  %v10790_v18 = vpack.c.bf16 %v3071_v16, %v2879_v15  ;;  %v2888_v15 = vld [vmem:[%s12942_s28 + $0x1198] sm:$0xff] }
 0x531   : > { %8964 = vmatpush1.xpose.msra.mxu1 %v3255_v19  ;;  %10761 = vmatprep.subr.bf16.mxu0 %v10760_v21  ;;  %v3262_v19 = vld [vmem:[%s12942_s28 + $0x1d48] sm:$0xff]  ;;  %v3080_v16 = vld [vmem:[%s12942_s28 + $0x1798] sm:$0xff] }
 0x532   : > { %10769 = vmatprep.subr.bf16.mxu1 %v10768_v25 }
 0x533   : > { %8950 = vmatmul.mubr.f32.vlgmr.msra.gmra.mrb[80].mxu0 %v2293_v31  ;;  %v3263_v31 = vld [vmem:[%s12942_s28 + $0x1d50] sm:$0xff] }
 0x534   : > { %10763 = vmatpush1.bf16.xpose.msra.mxu0 %v10762_v32  ;;  %9020 = vmatmul.mubr.f32.vlgmr.msra.gmra.mrb[80].mxu1 %v2295_v33  ;;  %v10792_v33 = vpack.c.bf16 %v2690_v23, %v2498_v22  ;;  %v10820_v22 = vpack.c.bf16 %v3080_v16, %v2888_v15  ;;  %v2310_v23 = vld [vmem:[%s12957_s4 + $0x588] sm:$0xff] }
 0x535   : > { %10771 = vmatpush1.bf16.xpose.msra.mxu1 %v10770_v34  ;;  %10765 = vmatprep.subr.bf16.mxu0 %v10764_v35  ;;  %v2497_v34 = vld [vmem:[%s12942_s28 + $0x560] sm:$0xff] }
 0x536   : > { %10773 = vmatprep.subr.bf16.mxu1 %v10772_v36  ;;  %9089 = vmatprep.mubr.f32.mxu0 %v2298_v37  ;;  %v2689_v35 = vld [vmem:[%s12942_s28 + $0xb60] sm:$0xff]  ;;  %v2499_v36 = vld [vmem:[%s12942_s28 + $0x570] sm:$0xff]  ;;  %v10800_v37 = vpack.c.bf16 %v2692_v28, %v2500_v27 }
 0x537   : > { %9159 = vmatprep.mubr.f32.mxu1 %v2300_v38  ;;  %v2691_v38 = vld [vmem:[%s12942_s28 + $0xb70] sm:$0xff]  ;;  %v3273_v16 = vld [vmem:[%s12942_s28 + $0x1da0] sm:$0xff] }
 0x538   : > { %v2887_v27 = vld [vmem:[%s12942_s28 + $0x1190] sm:$0xff] }
 0x539   : > { %v3079_v28 = vld [vmem:[%s12942_s28 + $0x1790] sm:$0xff] }
 0x53c   : > { %10767 = vmatpush1.bf16.xpose.msra.mxu0 %v10766_v43  ;;  %v2301_v43 = vld [vmem:[%s12957_s4 + $0x540] sm:$0xff] }
 0x53d   : > { %10775 = vmatpush1.bf16.xpose.msra.mxu1 %v10774_v44  ;;  %9033 = vmatprep.subr.mxu0 %v3258_v45  ;;  %v10794_v44 = vpack.c.bf16 %v2689_v35, %v2497_v34  ;;  %v2303_v45 = vld [vmem:[%s12957_s4 + $0x550] sm:$0xff] }
 0x53e   : > { %v7551_v47 = vpop.f32.mrb[60].mxu0  ;;  %9103 = vmatprep.subr.mxu1 %v3260_v46  ;;  %v10802_v46 = vpack.c.bf16 %v2691_v38, %v2499_v36  ;;  %v2506_v34 = vld [vmem:[%s12942_s28 + $0x5a8] sm:$0xff] }
 0x53f   : > { %v7552_v50 = vadd.f32 %v7551_v47, %v7482_v20  ;;  %v7553_v51 = vpop.f32.mrb[61].mxu0  ;;  %v7621_v52 = vpop.f32.mrb[60].mxu1  ;;  %v3264_v20 = vld [vmem:[%s12942_s28 + $0x1d58] sm:$0xff]  ;;  %v10796_v47 = vpack.c.bf16 %v3074_v40, %v2882_v39  ;;  %v2698_v35 = vld [vmem:[%s12942_s28 + $0xba8] sm:$0xff] }
 0x540   : > { %v7623_v55 = vpop.f32.mrb[61].mxu1  ;;  %v2881_v51 = vld [vmem:[%s12942_s28 + $0x1160] sm:$0xff]  ;;  %v2508_v39 = vld [vmem:[%s12942_s28 + $0x5b8] sm:$0xff] }
 0x541   : > { %v7622_v58 = vadd.f32 %v7621_v52, %v7552_v50  ;;  %v2308_v50 = vld [vmem:[%s12957_s4 + $0x578] sm:$0xff]  ;;  %v3073_v52 = vld [vmem:[%s12942_s28 + $0x1760] sm:$0xff]  ;;  %v2700_v40 = vld [vmem:[%s12942_s28 + $0xbb8] sm:$0xff] }
 0x542   : > { %v10798_v55 = vpack.c.bf16 %v3073_v52, %v2881_v51  ;;  %v2890_v51 = vld [vmem:[%s12942_s28 + $0x11a8] sm:$0xff] }
 0x543   : > { %v3082_v52 = vld [vmem:[%s12942_s28 + $0x17a8] sm:$0xff] }
 0x544   : > { %9034 = vmatpush1.xpose.msra.mxu0 %v3257_v56  ;;  %v10806_v56 = vpack.c.bf16 %v3075_v54, %v2883_v53  ;;  %v2892_v53 = vld [vmem:[%s12942_s28 + $0x11b8] sm:$0xff] }
 0x545   : > { %9104 = vmatpush1.xpose.msra.mxu1 %v3259_v57  ;;  %10777 = vmatprep.subr.bf16.mxu0 %v10776_v59  ;;  %v3266_v57 = vld [vmem:[%s12942_s28 + $0x1d68] sm:$0xff]  ;;  %v3084_v54 = vld [vmem:[%s12942_s28 + $0x17b8] sm:$0xff] }
 0x546   : > { %10785 = vmatprep.subr.bf16.mxu1 %v10784_v63 }
 0x547   : > { %9090 = vmatmul.mubr.f32.vlgmr.msra.gmra.mrb[82].mxu0 %v2297_v5  ;;  %v3267_v5 = vld [vmem:[%s12942_s28 + $0x1d70] sm:$0xff] }
 0x548   : > { %10779 = vmatpush1.bf16.xpose.msra.mxu0 %v10778_v6  ;;  %9160 = vmatmul.mubr.f32.vlgmr.msra.gmra.mrb[82].mxu1 %v2299_v7  ;;  %v10808_v7 = vpack.c.bf16 %v2694_v61, %v2502_v60  ;;  %v10836_v60 = vpack.c.bf16 %v3084_v54, %v2892_v53  ;;  %v2314_v61 = vld [vmem:[%s12957_s4 + $0x5a8] sm:$0xff] }
 0x549   : > { %10787 = vmatpush1.bf16.xpose.msra.mxu1 %v10786_v8  ;;  %10781 = vmatprep.subr.bf16.mxu0 %v10780_v9  ;;  %v2501_v8 = vld [vmem:[%s12942_s28 + $0x580] sm:$0xff] }
 0x54a   : > { %10789 = vmatprep.subr.bf16.mxu1 %v10788_v10  ;;  %9229 = vmatprep.mubr.f32.mxu0 %v2302_v11  ;;  %v2693_v9 = vld [vmem:[%s12942_s28 + $0xb80] sm:$0xff]  ;;  %v2503_v10 = vld [vmem:[%s12942_s28 + $0x590] sm:$0xff]  ;;  %v10816_v11 = vpack.c.bf16 %v2696_v2, %v2504_v1 }
 0x54b   : > { %9299 = vmatprep.mubr.f32.mxu1 %v2304_v12  ;;  %v2695_v12 = vld [vmem:[%s12942_s28 + $0xb90] sm:$0xff]  ;;  %v3277_v54 = vld [vmem:[%s12942_s28 + $0x1dc0] sm:$0xff] }
 0x54c   : > { %v2891_v1 = vld [vmem:[%s12942_s28 + $0x11b0] sm:$0xff] }
 0x54d   : > { %v3083_v2 = vld [vmem:[%s12942_s28 + $0x17b0] sm:$0xff] }
 0x550   : > { %10783 = vmatpush1.bf16.xpose.msra.mxu0 %v10782_v17  ;;  %v2305_v17 = vld [vmem:[%s12957_s4 + $0x560] sm:$0xff] }
 0x551   : > { %10791 = vmatpush1.bf16.xpose.msra.mxu1 %v10790_v18  ;;  %9173 = vmatprep.subr.mxu0 %v3262_v19  ;;  %v10810_v18 = vpack.c.bf16 %v2693_v9, %v2501_v8  ;;  %v2307_v19 = vld [vmem:[%s12957_s4 + $0x570] sm:$0xff] }
 0x552   : > { %v7691_v21 = vpop.f32.mrb[62].mxu0  ;;  %9243 = vmatprep.subr.mxu1 %v3264_v20  ;;  %v10818_v20 = vpack.c.bf16 %v2695_v12, %v2503_v10  ;;  %v2510_v8 = vld [vmem:[%s12942_s28 + $0x5c8] sm:$0xff] }
 0x553   : > { %v7692_v24 = vadd.f32 %v7691_v21, %v7622_v58  ;;  %v7693_v25 = vpop.f32.mrb[63].mxu0  ;;  %v7761_v26 = vpop.f32.mrb[62].mxu1  ;;  %v3268_v58 = vld [vmem:[%s12942_s28 + $0x1d78] sm:$0xff]  ;;  %v10812_v21 = vpack.c.bf16 %v3078_v14, %v2886_v13  ;;  %v2702_v9 = vld [vmem:[%s12942_s28 + $0xbc8] sm:$0xff] }
 0x554   : > { %v7763_v29 = vpop.f32.mrb[63].mxu1  ;;  %v2885_v25 = vld [vmem:[%s12942_s28 + $0x1180] sm:$0xff]  ;;  %v2512_v13 = vld [vmem:[%s12942_s28 + $0x5d8] sm:$0xff] }
 0x555   : > { %v7762_v32 = vadd.f32 %v7761_v26, %v7692_v24  ;;  %v2312_v24 = vld [vmem:[%s12957_s4 + $0x598] sm:$0xff]  ;;  %v3077_v26 = vld [vmem:[%s12942_s28 + $0x1780] sm:$0xff]  ;;  %v2704_v14 = vld [vmem:[%s12942_s28 + $0xbd8] sm:$0xff] }
 0x556   : > { %v10814_v29 = vpack.c.bf16 %v3077_v26, %v2885_v25  ;;  %v2894_v25 = vld [vmem:[%s12942_s28 + $0x11c8] sm:$0xff] }
 0x557   : > { %v3086_v26 = vld [vmem:[%s12942_s28 + $0x17c8] sm:$0xff] }
 0x558   : > { %9174 = vmatpush1.xpose.msra.mxu0 %v3261_v30  ;;  %v10822_v30 = vpack.c.bf16 %v3079_v28, %v2887_v27  ;;  %v2896_v27 = vld [vmem:[%s12942_s28 + $0x11d8] sm:$0xff] }
 0x559   : > { %9244 = vmatpush1.xpose.msra.mxu1 %v3263_v31  ;;  %10793 = vmatprep.subr.bf16.mxu0 %v10792_v33  ;;  %v3270_v31 = vld [vmem:[%s12942_s28 + $0x1d88] sm:$0xff]  ;;  %v3088_v28 = vld [vmem:[%s12942_s28 + $0x17d8] sm:$0xff] }
 0x55a   : > { %10801 = vmatprep.subr.bf16.mxu1 %v10800_v37 }
 0x55b   : > { %9230 = vmatmul.mubr.f32.vlgmr.msra.gmra.mrb[84].mxu0 %v2301_v43  ;;  %v3271_v43 = vld [vmem:[%s12942_s28 + $0x1d90] sm:$0xff] }
 0x55c   : > { %10795 = vmatpush1.bf16.xpose.msra.mxu0 %v10794_v44  ;;  %9300 = vmatmul.mubr.f32.vlgmr.msra.gmra.mrb[84].mxu1 %v2303_v45  ;;  %v10824_v45 = vpack.c.bf16 %v2698_v35, %v2506_v34  ;;  %v10852_v34 = vpack.c.bf16 %v3088_v28, %v2896_v27  ;;  %v2318_v35 = vld [vmem:[%s12957_s4 + $0x5c8] sm:$0xff]  ;;  %v2321_v27 = vld [vmem:[%s12957_s4 + $0x5e0] sm:$0xff]  ;;  %v2323_v28 = vld [vmem:[%s12957_s4 + $0x5f0] sm:$0xff] }
 0x55d   : > { %10803 = vmatpush1.bf16.xpose.msra.mxu1 %v10802_v46  ;;  %10797 = vmatprep.subr.bf16.mxu0 %v10796_v47  ;;  %v2505_v46 = vld [vmem:[%s12942_s28 + $0x5a0] sm:$0xff] }
 0x55e   : > { %10805 = vmatprep.subr.bf16.mxu1 %v10804_v48  ;;  %9369 = vmatprep.mubr.f32.mxu0 %v2306_v49  ;;  %v2697_v47 = vld [vmem:[%s12942_s28 + $0xba0] sm:$0xff]  ;;  %v2507_v48 = vld [vmem:[%s12942_s28 + $0x5b0] sm:$0xff]  ;;  %v10832_v49 = vpack.c.bf16 %v2700_v40, %v2508_v39 }
 0x55f   : > { %9439 = vmatprep.mubr.f32.mxu1 %v2308_v50  ;;  %v2699_v50 = vld [vmem:[%s12942_s28 + $0xbb0] sm:$0xff] }
 0x560   : > { %v2895_v39 = vld [vmem:[%s12942_s28 + $0x11d0] sm:$0xff] }
 0x561   : > { %v3087_v40 = vld [vmem:[%s12942_s28 + $0x17d0] sm:$0xff] }
 0x564   : > { %10799 = vmatpush1.bf16.xpose.msra.mxu0 %v10798_v55  ;;  %v2309_v55 = vld [vmem:[%s12957_s4 + $0x580] sm:$0xff] }
 0x565   : > { %10807 = vmatpush1.bf16.xpose.msra.mxu1 %v10806_v56  ;;  %9313 = vmatprep.subr.mxu0 %v3266_v57  ;;  %v10826_v56 = vpack.c.bf16 %v2697_v47, %v2505_v46  ;;  %v2311_v57 = vld [vmem:[%s12957_s4 + $0x590] sm:$0xff] }
 0x566   : > { %v7831_v59 = vpop.f32.mrb[64].mxu0  ;;  %9383 = vmatprep.subr.mxu1 %v3268_v58  ;;  %v10834_v58 = vpack.c.bf16 %v2699_v50, %v2507_v48  ;;  %v2514_v46 = vld [vmem:[%s12942_s28 + $0x5e8] sm:$0xff] }
 0x567   : > { %v7832_v62 = vadd.f32 %v7831_v59, %v7762_v32  ;;  %v7833_v63 = vpop.f32.mrb[65].mxu0  ;;  %v7901_v0 = vpop.f32.mrb[64].mxu1  ;;  %v3272_v32 = vld [vmem:[%s12942_s28 + $0x1d98] sm:$0xff]  ;;  %v10828_v59 = vpack.c.bf16 %v3082_v52, %v2890_v51  ;;  %v2706_v47 = vld [vmem:[%s12942_s28 + $0xbe8] sm:$0xff] }
 0x568   : > { %v7903_v3 = vpop.f32.mrb[65].mxu1  ;;  %v2889_v63 = vld [vmem:[%s12942_s28 + $0x11a0] sm:$0xff]  ;;  %v2516_v51 = vld [vmem:[%s12942_s28 + $0x5f8] sm:$0xff] }
 0x569   : > { %v7902_v6 = vadd.f32 %v7901_v0, %v7832_v62  ;;  %v2316_v62 = vld [vmem:[%s12957_s4 + $0x5b8] sm:$0xff]  ;;  %v3081_v0 = vld [vmem:[%s12942_s28 + $0x17a0] sm:$0xff]  ;;  %v2708_v52 = vld [vmem:[%s12942_s28 + $0xbf8] sm:$0xff] }
 0x56a   : > { %v10830_v3 = vpack.c.bf16 %v3081_v0, %v2889_v63  ;;  %v2898_v63 = vld [vmem:[%s12942_s28 + $0x11e8] sm:$0xff] }
 0x56b   : > { %v3090_v0 = vld [vmem:[%s12942_s28 + $0x17e8] sm:$0xff] }
 0x56c   : > { %9314 = vmatpush1.xpose.msra.mxu0 %v3265_v4  ;;  %v10838_v4 = vpack.c.bf16 %v3083_v2, %v2891_v1  ;;  %v2900_v1 = vld [vmem:[%s12942_s28 + $0x11f8] sm:$0xff] }
 0x56d   : > { %9384 = vmatpush1.xpose.msra.mxu1 %v3267_v5  ;;  %10809 = vmatprep.subr.bf16.mxu0 %v10808_v7  ;;  %v3274_v5 = vld [vmem:[%s12942_s28 + $0x1da8] sm:$0xff]  ;;  %v3092_v2 = vld [vmem:[%s12942_s28 + $0x17f8] sm:$0xff] }
 0x56e   : > { %10817 = vmatprep.subr.bf16.mxu1 %v10816_v11 }
 0x56f   : > { %9370 = vmatmul.mubr.f32.vlgmr.msra.gmra.mrb[86].mxu0 %v2305_v17  ;;  %v3275_v17 = vld [vmem:[%s12942_s28 + $0x1db0] sm:$0xff] }
 0x570   : > { %10811 = vmatpush1.bf16.xpose.msra.mxu0 %v10810_v18  ;;  %9440 = vmatmul.mubr.f32.vlgmr.msra.gmra.mrb[86].mxu1 %v2307_v19  ;;  %v10840_v19 = vpack.c.bf16 %v2702_v9, %v2510_v8  ;;  %v10868_v8 = vpack.c.bf16 %v3092_v2, %v2900_v1  ;;  %v2322_v9 = vld [vmem:[%s12957_s4 + $0x5e8] sm:$0xff] }
 0x571   : > { %10819 = vmatpush1.bf16.xpose.msra.mxu1 %v10818_v20  ;;  %10813 = vmatprep.subr.bf16.mxu0 %v10812_v21  ;;  %v2509_v20 = vld [vmem:[%s12942_s28 + $0x5c0] sm:$0xff] }
 0x572   : > { %10821 = vmatprep.subr.bf16.mxu1 %v10820_v22  ;;  %9509 = vmatprep.mubr.f32.mxu0 %v2310_v23  ;;  %v2701_v21 = vld [vmem:[%s12942_s28 + $0xbc0] sm:$0xff]  ;;  %v2511_v22 = vld [vmem:[%s12942_s28 + $0x5d0] sm:$0xff]  ;;  %v10848_v23 = vpack.c.bf16 %v2704_v14, %v2512_v13 }
 0x573   : > { %9579 = vmatprep.mubr.f32.mxu1 %v2312_v24  ;;  %v2703_v24 = vld [vmem:[%s12942_s28 + $0xbd0] sm:$0xff] }
 0x574   : > { %v2899_v13 = vld [vmem:[%s12942_s28 + $0x11f0] sm:$0xff] }
 0x575   : > { %v3091_v14 = vld [vmem:[%s12942_s28 + $0x17f0] sm:$0xff] }
 0x578   : > { %10815 = vmatpush1.bf16.xpose.msra.mxu0 %v10814_v29  ;;  %v2313_v29 = vld [vmem:[%s12957_s4 + $0x5a0] sm:$0xff] }
 0x579   : > { %10823 = vmatpush1.bf16.xpose.msra.mxu1 %v10822_v30  ;;  %9453 = vmatprep.subr.mxu0 %v3270_v31  ;;  %v10842_v30 = vpack.c.bf16 %v2701_v21, %v2509_v20  ;;  %v2315_v31 = vld [vmem:[%s12957_s4 + $0x5b0] sm:$0xff] }
 0x57a   : > { %v7971_v33 = vpop.f32.mrb[66].mxu0  ;;  %9523 = vmatprep.subr.mxu1 %v3272_v32  ;;  %v10850_v32 = vpack.c.bf16 %v2703_v24, %v2511_v22 }
 0x57b   : > { %v7972_v36 = vadd.f32 %v7971_v33, %v7902_v6  ;;  %v7973_v37 = vpop.f32.mrb[67].mxu0  ;;  %v8041_v38 = vpop.f32.mrb[66].mxu1  ;;  %v3276_v6 = vld [vmem:[%s12942_s28 + $0x1db8] sm:$0xff]  ;;  %v10844_v33 = vpack.c.bf16 %v3086_v26, %v2894_v25  ;;  %v3281_v25 = vld [vmem:[%s12942_s28 + $0x1de0] sm:$0xff]  ;;  %v3283_v26 = vld [vmem:[%s12942_s28 + $0x1df0] sm:$0xff] }
 0x57c   : > { %v8043_v41 = vpop.f32.mrb[67].mxu1  ;;  %v2893_v37 = vld [vmem:[%s12942_s28 + $0x11c0] sm:$0xff] }
 0x57d   : > { %v8042_v44 = vadd.f32 %v8041_v38, %v7972_v36  ;;  %v2320_v36 = vld [vmem:[%s12957_s4 + $0x5d8] sm:$0xff]  ;;  %v3085_v38 = vld [vmem:[%s12942_s28 + $0x17c0] sm:$0xff] }
 0x57e   : > { %v10846_v41 = vpack.c.bf16 %v3085_v38, %v2893_v37 }
 0x580   : > { %9454 = vmatpush1.xpose.msra.mxu0 %v3269_v42  ;;  %v10854_v42 = vpack.c.bf16 %v3087_v40, %v2895_v39 }
 0x581   : > { %9524 = vmatpush1.xpose.msra.mxu1 %v3271_v43  ;;  %10825 = vmatprep.subr.bf16.mxu0 %v10824_v45  ;;  %v3278_v43 = vld [vmem:[%s12942_s28 + $0x1dc8] sm:$0xff] }
 0x582   : > { %10833 = vmatprep.subr.bf16.mxu1 %v10832_v49 }
 0x583   : > { %9510 = vmatmul.mubr.f32.vlgmr.msra.gmra.mrb[88].mxu0 %v2309_v55  ;;  %v3279_v55 = vld [vmem:[%s12942_s28 + $0x1dd0] sm:$0xff] }
 0x584   : > { %10827 = vmatpush1.bf16.xpose.msra.mxu0 %v10826_v56  ;;  %9580 = vmatmul.mubr.f32.vlgmr.msra.gmra.mrb[88].mxu1 %v2311_v57  ;;  %v10856_v57 = vpack.c.bf16 %v2706_v47, %v2514_v46 }
 0x585   : > { %10835 = vmatpush1.bf16.xpose.msra.mxu1 %v10834_v58  ;;  %10829 = vmatprep.subr.bf16.mxu0 %v10828_v59  ;;  %v2513_v58 = vld [vmem:[%s12942_s28 + $0x5e0] sm:$0xff] }
 0x586   : > { %10837 = vmatprep.subr.bf16.mxu1 %v10836_v60  ;;  %9649 = vmatprep.mubr.f32.mxu0 %v2314_v61  ;;  %v2705_v59 = vld [vmem:[%s12942_s28 + $0xbe0] sm:$0xff]  ;;  %v2515_v60 = vld [vmem:[%s12942_s28 + $0x5f0] sm:$0xff]  ;;  %v10864_v61 = vpack.c.bf16 %v2708_v52, %v2516_v51 }
 0x587   : > { %9719 = vmatprep.mubr.f32.mxu1 %v2316_v62  ;;  %v2707_v62 = vld [vmem:[%s12942_s28 + $0xbf0] sm:$0xff] }
 0x58c   : > { %10831 = vmatpush1.bf16.xpose.msra.mxu0 %v10830_v3  ;;  %v2317_v3 = vld [vmem:[%s12957_s4 + $0x5c0] sm:$0xff] }
 0x58d   : > { %10839 = vmatpush1.bf16.xpose.msra.mxu1 %v10838_v4  ;;  %9593 = vmatprep.subr.mxu0 %v3274_v5  ;;  %v10858_v4 = vpack.c.bf16 %v2705_v59, %v2513_v58  ;;  %v2319_v5 = vld [vmem:[%s12957_s4 + $0x5d0] sm:$0xff] }
 0x58e   : > { %v8111_v7 = vpop.f32.mrb[68].mxu0  ;;  %9663 = vmatprep.subr.mxu1 %v3276_v6  ;;  %v10866_v6 = vpack.c.bf16 %v2707_v62, %v2515_v60 }
 0x58f   : > { %v8112_v10 = vadd.f32 %v8111_v7, %v8042_v44  ;;  %v8113_v11 = vpop.f32.mrb[69].mxu0  ;;  %v8181_v12 = vpop.f32.mrb[68].mxu1  ;;  %v3280_v44 = vld [vmem:[%s12942_s28 + $0x1dd8] sm:$0xff]  ;;  %v10860_v7 = vpack.c.bf16 %v3090_v0, %v2898_v63 }
 0x590   : > { %v8183_v15 = vpop.f32.mrb[69].mxu1  ;;  %v2897_v11 = vld [vmem:[%s12942_s28 + $0x11e0] sm:$0xff] }
 0x591   : > { %v8182_v18 = vadd.f32 %v8181_v12, %v8112_v10  ;;  %v2324_v10 = vld [vmem:[%s12957_s4 + $0x5f8] sm:$0xff]  ;;  %v3089_v12 = vld [vmem:[%s12942_s28 + $0x17e0] sm:$0xff] }
 0x592   : > { %v10862_v15 = vpack.c.bf16 %v3089_v12, %v2897_v11 }
 0x594   : > { %9594 = vmatpush1.xpose.msra.mxu0 %v3273_v16  ;;  %v10870_v16 = vpack.c.bf16 %v3091_v14, %v2899_v13 }
 0x595   : > { %9664 = vmatpush1.xpose.msra.mxu1 %v3275_v17  ;;  %10841 = vmatprep.subr.bf16.mxu0 %v10840_v19  ;;  %v3282_v17 = vld [vmem:[%s12942_s28 + $0x1de8] sm:$0xff] }
 0x596   : > { %10849 = vmatprep.subr.bf16.mxu1 %v10848_v23 }
 0x597   : > { %9650 = vmatmul.mubr.f32.vlgmr.msra.gmra.mrb[90].mxu0 %v2313_v29 }
 0x598   : > { %10843 = vmatpush1.bf16.xpose.msra.mxu0 %v10842_v30  ;;  %9720 = vmatmul.mubr.f32.vlgmr.msra.gmra.mrb[90].mxu1 %v2315_v31 }
 0x599   : > { %10851 = vmatpush1.bf16.xpose.msra.mxu1 %v10850_v32  ;;  %10845 = vmatprep.subr.bf16.mxu0 %v10844_v33 }
 0x59a   : > { %10853 = vmatprep.subr.bf16.mxu1 %v10852_v34  ;;  %9789 = vmatprep.mubr.f32.mxu0 %v2318_v35 }
 0x59b   : > { %9859 = vmatprep.mubr.f32.mxu1 %v2320_v36 }
 0x5a0   : > { %10847 = vmatpush1.bf16.xpose.msra.mxu0 %v10846_v41 }
 0x5a1   : > { %10855 = vmatpush1.bf16.xpose.msra.mxu1 %v10854_v42  ;;  %9733 = vmatprep.subr.mxu0 %v3278_v43 }
 0x5a2   : > { %v8251_v45 = vpop.f32.mrb[70].mxu0  ;;  %9803 = vmatprep.subr.mxu1 %v3280_v44 }
 0x5a3   : > { %v8252_v48 = vadd.f32 %v8251_v45, %v8182_v18  ;;  %v8253_v49 = vpop.f32.mrb[71].mxu0  ;;  %v8321_v50 = vpop.f32.mrb[70].mxu1  ;;  %v3284_v18 = vld [vmem:[%s12942_s28 + $0x1df8] sm:$0xff] }
 0x5a4   : > { %v8323_v53 = vpop.f32.mrb[71].mxu1 }
 0x5a5   : > { %v8322_v56 = vadd.f32 %v8321_v50, %v8252_v48  ;;  %v10955_v53 = vmov 0.0  }
 0x5a6   : > { %2131 = vst.msk [vmem:[#allocation2] sm:$0xff] %vm2130_vm0, %v10955_v53 }
 0x5a8   : > { %9734 = vmatpush1.xpose.msra.mxu0 %v3277_v54 }
 0x5a9   : > { %9804 = vmatpush1.xpose.msra.mxu1 %v3279_v55  ;;  %10857 = vmatprep.subr.bf16.mxu0 %v10856_v57 }
 0x5aa   : > { %10865 = vmatprep.subr.bf16.mxu1 %v10864_v61 }
 0x5ab   : > { %9790 = vmatmul.mubr.f32.vlgmr.msra.gmra.mrb[92].mxu0 %v2317_v3 }
 0x5ac   : > { %10859 = vmatpush1.bf16.xpose.msra.mxu0 %v10858_v4  ;;  %9860 = vmatmul.mubr.f32.vlgmr.msra.gmra.mrb[92].mxu1 %v2319_v5 }
 0x5ad   : > { %10867 = vmatpush1.bf16.xpose.msra.mxu1 %v10866_v6  ;;  %10861 = vmatprep.subr.bf16.mxu0 %v10860_v7 }
 0x5ae   : > { %10869 = vmatprep.subr.bf16.mxu1 %v10868_v8  ;;  %9929 = vmatprep.mubr.f32.mxu0 %v2322_v9 }
 0x5af   : > { %9999 = vmatprep.mubr.f32.mxu1 %v2324_v10 }
 0x5b4   : > { %10863 = vmatpush1.bf16.xpose.msra.mxu0 %v10862_v15 }
 0x5b5   : > { %10871 = vmatpush1.bf16.xpose.msra.mxu1 %v10870_v16  ;;  %9873 = vmatprep.subr.mxu0 %v3282_v17 }
 0x5b6   : > { %v8391_v19 = vpop.f32.mrb[72].mxu0  ;;  %9943 = vmatprep.subr.mxu1 %v3284_v18 }
 0x5b7   : > { %v8392_v20 = vadd.f32 %v8391_v19, %v8322_v56  ;;  %v8393_v21 = vpop.f32.mrb[73].mxu0  ;;  %v8461_v22 = vpop.f32.mrb[72].mxu1 }
 0x5b8   : > { %v8463_v23 = vpop.f32.mrb[73].mxu1 }
 0x5b9   : > { %v8462_v24 = vadd.f32 %v8461_v22, %v8392_v20 }
 0x5bc   : > { %9874 = vmatpush1.xpose.msra.mxu0 %v3281_v25 }
 0x5bd   : > { %9944 = vmatpush1.xpose.msra.mxu1 %v3283_v26 }
 0x5bf   : > { %9930 = vmatmul.mubr.f32.vlgmr.msra.gmra.mrb[94].mxu0 %v2321_v27 }
 0x5c0   : > { %10000 = vmatmul.mubr.f32.vlgmr.msra.gmra.mrb[94].mxu1 %v2323_v28 }
 0x5ca   : > { %v8531_v29 = vpop.f32.mrb[74].mxu0 }
 0x5cb   : > { %v8532_v30 = vadd.f32 %v8531_v29, %v8462_v24  ;;  %v8533_v31 = vpop.f32.mrb[75].mxu0  ;;  %v8601_v32 = vpop.f32.mrb[74].mxu1 }
 0x5cc   : > { %v8603_v33 = vpop.f32.mrb[75].mxu1 }
 0x5cd   : > { %v8602_v34 = vadd.f32 %v8601_v32, %v8532_v30  ;;  %v2132_v30 = vld [vmem:[#allocation2] sm:$0xff] }
 0x5de   : > { %v8671_v35 = vpop.f32.mrb[76].mxu0 }
 0x5df   : > { %v8672_v36 = vadd.f32 %v8671_v35, %v8602_v34  ;;  %v8673_v37 = vpop.f32.mrb[77].mxu0  ;;  %v8741_v38 = vpop.f32.mrb[76].mxu1 }
 0x5e0   : > { %v8743_v39 = vpop.f32.mrb[77].mxu1 }
 0x5e1   : > { %v8742_v40 = vadd.f32 %v8741_v38, %v8672_v36 }
 0x5f2   : > { %v8811_v41 = vpop.f32.mrb[78].mxu0 }
 0x5f3   : > { %v8812_v42 = vadd.f32 %v8811_v41, %v8742_v40  ;;  %v8813_v43 = vpop.f32.mrb[79].mxu0  ;;  %v8881_v44 = vpop.f32.mrb[78].mxu1 }
 0x5f4   : > { %v8883_v45 = vpop.f32.mrb[79].mxu1 }
 0x5f5   : > { %v8882_v46 = vadd.f32 %v8881_v44, %v8812_v42 }
 0x606   : > { %v8951_v47 = vpop.f32.mrb[80].mxu0 }
 0x607   : > { %v8952_v48 = vadd.f32 %v8951_v47, %v8882_v46  ;;  %v8953_v49 = vpop.f32.mrb[81].mxu0  ;;  %v9021_v50 = vpop.f32.mrb[80].mxu1 }
 0x608   : > { %v9023_v51 = vpop.f32.mrb[81].mxu1 }
 0x609   : > { %v9022_v52 = vadd.f32 %v9021_v50, %v8952_v48 }
 0x61a   : > { %v9091_v54 = vpop.f32.mrb[82].mxu0 }
 0x61b   : > { %v9092_v55 = vadd.f32 %v9091_v54, %v9022_v52  ;;  %v9093_v56 = vpop.f32.mrb[83].mxu0  ;;  %v9161_v57 = vpop.f32.mrb[82].mxu1 }
 0x61c   : > { %v9163_v58 = vpop.f32.mrb[83].mxu1 }
 0x61d   : > { %v9162_v59 = vadd.f32 %v9161_v57, %v9092_v55 }
 0x62e   : > { %v9231_v60 = vpop.f32.mrb[84].mxu0 }
 0x62f   : > { %v9232_v61 = vadd.f32 %v9231_v60, %v9162_v59  ;;  %v9233_v62 = vpop.f32.mrb[85].mxu0  ;;  %v9301_v63 = vpop.f32.mrb[84].mxu1 }
 0x630   : > { %v9303_v0 = vpop.f32.mrb[85].mxu1 }
 0x631   : > { %v9302_v1 = vadd.f32 %v9301_v63, %v9232_v61 }
 0x642   : > { %v9371_v2 = vpop.f32.mrb[86].mxu0 }
 0x643   : > { %v9372_v3 = vadd.f32 %v9371_v2, %v9302_v1  ;;  %v9373_v4 = vpop.f32.mrb[87].mxu0  ;;  %v9441_v5 = vpop.f32.mrb[86].mxu1 }
 0x644   : > { %v9443_v6 = vpop.f32.mrb[87].mxu1 }
 0x645   : > { %v9442_v7 = vadd.f32 %v9441_v5, %v9372_v3 }
 0x656   : > { %v9511_v8 = vpop.f32.mrb[88].mxu0 }
 0x657   : > { %v9512_v9 = vadd.f32 %v9511_v8, %v9442_v7  ;;  %v9513_v10 = vpop.f32.mrb[89].mxu0  ;;  %v9581_v11 = vpop.f32.mrb[88].mxu1 }
 0x658   : > { %v9583_v12 = vpop.f32.mrb[89].mxu1 }
 0x659   : > { %v9582_v13 = vadd.f32 %v9581_v11, %v9512_v9 }
 0x66a   : > { %v9651_v14 = vpop.f32.mrb[90].mxu0 }
 0x66b   : > { %v9652_v15 = vadd.f32 %v9651_v14, %v9582_v13  ;;  %v9653_v16 = vpop.f32.mrb[91].mxu0  ;;  %v9721_v17 = vpop.f32.mrb[90].mxu1 }
 0x66c   : > { %v9723_v18 = vpop.f32.mrb[91].mxu1 }
 0x66d   : > { %v9722_v19 = vadd.f32 %v9721_v17, %v9652_v15 }
 0x67e   : > { %v9791_v20 = vpop.f32.mrb[92].mxu0 }
 0x67f   : > { %v9792_v21 = vadd.f32 %v9791_v20, %v9722_v19  ;;  %v9793_v22 = vpop.f32.mrb[93].mxu0  ;;  %v9861_v23 = vpop.f32.mrb[92].mxu1 }
 0x680   : > { %v9863_v24 = vpop.f32.mrb[93].mxu1 }
 0x681   : > { %v9862_v25 = vadd.f32 %v9861_v23, %v9792_v21 }
 0x692   : > { %v9931_v26 = vpop.f32.mrb[94].mxu0 }
 0x693   : > { %v9932_v27 = vadd.f32 %v9931_v26, %v9862_v25  ;;  %v9933_v28 = vpop.f32.mrb[95].mxu0  ;;  %v10001_v29 = vpop.f32.mrb[94].mxu1 }
 0x694   : > { %v10003_v31 = vpop.f32.mrb[95].mxu1 }
 0x695   : > { %v10002_v32 = vadd.f32 %v10001_v29, %v9932_v27 }
 0x697   : > { %v10005_v33 = vadd.f32 %v10002_v32, %v2132_v30 }
 0x699   : > { %10007 = vst.msk [vmem:[#allocation2] sm:$0xff] %vm2130_vm0, %v10005_v33 }
 0x6a0   : > { %v10011_v34 = vld [vmem:[#allocation2] sm:$0xff] }
 0x6a1   : > { %10012 = vst.msk [vmem:[%s2125_s8] sm:$0xff] %vm2130_vm0, %v10011_v34 }
 0x6a2 PF: > { %s12_s13 = sadd.s32 1, %s10953_s13   ;;  %s14127_s9 = smov %s10941_s10 }
 0x6a3   : > { %p9_p11 = scmp.ge.s32.totalorder %s12_s13, 4   ;;  %s14128_s10 = smov %s11006_s17 }
 0x6a4   : > { %s14129_s11 = smov %s10949_s12  ;;  %s14130_s12 = smov %s14132_s14 }
 0x6a5   :  { %11 = sbr.rel (!%p9_p11) target bundleno = 3 (0x3), region = 97 }

</bundles_post_ra>
